<compile_context>
chip_gen: v7x
topology: tpu7x:2x2x1
jax: 0.10.0
libtpu: 0.0.40
codegen_flags: <defaults>
</compile_context>

<pallas_src>
import functools
import math

import jax
import jax.numpy as jnp
from jax import lax
from jax.experimental import pallas as pl
from jax.experimental.pallas import tpu as pltpu


# ---------------------------------------------------------------------------
# Configuration (inner_dim must equal in_channels: the PyTorch module feeds the
# proj_in output into a ToBEVConvolution built with in_channels).
# ---------------------------------------------------------------------------
B, X, Y, Z = 2, 8, 8, 4
IN_CHANNELS = 32
N_HEADS, D_HEAD = 4, 8
INNER = N_HEADS * D_HEAD            # 32 == IN_CHANNELS
CONTEXT_DIM = 16
DEPTH = 1
N_BEV_KERNELS = 128                 # ToBEVConvolution n_kernels (only z=0..Z-1 used)
NUM_GROUPS = 32
N_POINTS = B * X * Y * Z            # 512
M_BEV = X * Y                       # BEV tokens per batch (64)
P_BATCH = X * Y * Z                 # points per batch (256)


# ---------------------------------------------------------------------------
# In-kernel helpers (operate on register arrays)
# ---------------------------------------------------------------------------
def _ln(x, g, b, eps=1e-5):
    mu = jnp.mean(x, axis=-1, keepdims=True)
    var = jnp.mean((x - mu) ** 2, axis=-1, keepdims=True)
    return (x - mu) * lax.rsqrt(var + eps) * g + b


def _mha(q, k, v, heads, d_head):
    """All heads fused; q/k/v are (M, heads*d_head); returns merged (M, heads*d_head)."""
    scale = d_head ** (-0.5)
    outs = []
    for h in range(heads):                      # unrolled, static lane slices
        sl = slice(h * d_head, (h + 1) * d_head)
        qh, kh, vh = q[:, sl], k[:, sl], v[:, sl]
        sim = lax.dot_general(qh, kh, (((1,), (1,)), ((), ())),
                              preferred_element_type=jnp.float32) * scale
        m = jnp.max(sim, axis=-1, keepdims=True)
        p = jnp.exp(sim - m)
        inv = pl.reciprocal(jnp.sum(p, axis=-1, keepdims=True), approx=True)  # EUP slot
        outs.append(jnp.dot(p * inv, vh, preferred_element_type=jnp.float32))
    return jnp.concatenate(outs, axis=-1)


def _gelu_exact(g):
    # exact erf-based GELU, matching torch.nn.functional.gelu default
    return 0.5 * g * (1.0 + lax.erf(g * (1.0 / math.sqrt(2.0))))


# ---------------------------------------------------------------------------
# Kernel 1: GroupNorm + proj_in + ToBEVConvolution (per batch, z-major layout)
# ---------------------------------------------------------------------------
def _gn_proj_bev_kernel(x_ref, gn_ref, wproj_ref, wbev_ref, h_ref, bev_ref,
                        *, eps, nz, m):
    x = x_ref[0]                                            # (P, C), z-major
    # GroupNorm(32, C) with channels_per_group == 1 -> per-channel stats over points.
    # Two-pass variance (non-negative), avoids E[x^2]-E[x]^2 cancellation.
    mean = jnp.mean(x, axis=0, keepdims=True)               # (1, C)
    var = jnp.mean((x - mean) ** 2, axis=0, keepdims=True)  # (1, C)
    y = (x - mean) * lax.rsqrt(var + eps) * gn_ref[0:1] + gn_ref[1:2]
    # proj_in: 1x1x1 sparse conv == per-point linear (no bias)
    h = jnp.dot(y, wproj_ref[...], preferred_element_type=jnp.float32)  # (P, D)
    h_ref[0] = h
    # ToBEVConvolution (tensor stride 1, conv stride 1): kernel index == z coordinate;
    # coalescing over duplicate (b,x,y,0) == sum over z.  z-slices are contiguous
    # row blocks here, accumulated in registers (no output revisit / grid reduction).
    d = h.shape[1]
    acc = jnp.zeros((m, d), jnp.float32)
    for z in range(nz):
        acc = acc + jnp.dot(h[z * m:(z + 1) * m, :], wbev_ref[z],
                            preferred_element_type=jnp.float32)
    bev_ref[0] = acc


def gn_proj_bev(x_zm, gn, w_proj, w_bev, eps=1e-6):
    Bn, P, C = x_zm.shape
    D = w_proj.shape[1]
    Zn = w_bev.shape[0]
    M = P // Zn
    kern = functools.partial(_gn_proj_bev_kernel, eps=eps, nz=Zn, m=M)
    return pl.pallas_call(
        kern,
        out_shape=(jax.ShapeDtypeStruct((Bn, P, D), x_zm.dtype),
                   jax.ShapeDtypeStruct((Bn, M, D), x_zm.dtype)),
        grid=(Bn,),
        in_specs=[pl.BlockSpec((1, P, C), lambda b: (b, 0, 0)),
                  pl.BlockSpec((2, C), lambda b: (0, 0)),
                  pl.BlockSpec((C, D), lambda b: (0, 0)),
                  pl.BlockSpec((Zn, D, D), lambda b: (0, 0, 0))],
        out_specs=[pl.BlockSpec((1, P, D), lambda b: (b, 0, 0)),
                   pl.BlockSpec((1, M, D), lambda b: (b, 0, 0))],
        compiler_params=pltpu.CompilerParams(dimension_semantics=("parallel",)),
    )(x_zm, gn, w_proj, w_bev)


# ---------------------------------------------------------------------------
# Kernel 2: one fused BasicTransformerBlock per batch
# ---------------------------------------------------------------------------
def _transformer_block_kernel(x_ref, ln_ref, wqkv1_ref, wo1_ref, bo1_ref,
                              wqm2_ref, wkv2_ref, wo2_ref, bo2_ref,
                              w1_ref, b1_ref, w2_ref, b2_ref, o_ref,
                              *, heads, d_head, inner):
    x = x_ref[0]                                            # (M, D)
    ln = ln_ref[...]                                        # (6, D)

    # --- attn1: self-attention (context_i = normed features) ---
    f = _ln(x, ln[0:1], ln[1:2])
    qkv = jnp.dot(f, wqkv1_ref[...], preferred_element_type=jnp.float32)  # (M, 3*inner)
    q, k, v = qkv[:, :inner], qkv[:, inner:2 * inner], qkv[:, 2 * inner:]
    o = _mha(q, k, v, heads, d_head)
    x = jnp.dot(o, wo1_ref[...], preferred_element_type=jnp.float32) + bo1_ref[...] + x

    # --- attn2: context=None path -> context_i = self_attd_mapper(norm2(x)) ---
    f = _ln(x, ln[2:3], ln[3:4])
    qm = jnp.dot(f, wqm2_ref[...], preferred_element_type=jnp.float32)    # (M, inner+ctx)
    q, ctx = qm[:, :inner], qm[:, inner:]
    kv = jnp.dot(ctx, wkv2_ref[...], preferred_element_type=jnp.float32)  # (M, 2*inner)
    k, v = kv[:, :inner], kv[:, inner:]
    o = _mha(q, k, v, heads, d_head)
    x = jnp.dot(o, wo2_ref[...], preferred_element_type=jnp.float32) + bo2_ref[...] + x

    # --- FeedForward with GEGLU (dropout = 0); intermediate stays in VMEM ---
    f = _ln(x, ln[4:5], ln[5:6])
    h12 = jnp.dot(f, w1_ref[...], preferred_element_type=jnp.float32) + b1_ref[...]
    half = h12.shape[1] // 2
    g = h12[:, :half] * _gelu_exact(h12[:, half:])
    x = jnp.dot(g, w2_ref[...], preferred_element_type=jnp.float32) + b2_ref[...] + x

    o_ref[0] = x


def transformer_block(x_bev, bp, heads=N_HEADS, d_head=D_HEAD):
    Bn, M, D = x_bev.shape
    inner = heads * d_head
    kern = functools.partial(_transformer_block_kernel,
                             heads=heads, d_head=d_head, inner=inner)

    def full(arr):
        shp = arr.shape
        return pl.BlockSpec(shp, lambda b, _n=len(shp): (0,) * _n)

    return pl.pallas_call(
        kern,
        out_shape=jax.ShapeDtypeStruct((Bn, M, D), x_bev.dtype),
        grid=(Bn,),
        in_specs=[pl.BlockSpec((1, M, D), lambda b: (b, 0, 0)),
                  full(bp["ln"]), full(bp["wqkv1"]), full(bp["wo1"]), full(bp["bo1"]),
                  full(bp["wqm2"]), full(bp["wkv2"]), full(bp["wo2"]), full(bp["bo2"]),
                  full(bp["w1"]), full(bp["b1"]), full(bp["w2"]), full(bp["b2"])],
        out_specs=pl.BlockSpec((1, M, D), lambda b: (b, 0, 0)),
        compiler_params=pltpu.CompilerParams(dimension_semantics=("parallel",)),
    )(x_bev, bp["ln"], bp["wqkv1"], bp["wo1"], bp["bo1"], bp["wqm2"], bp["wkv2"],
      bp["wo2"], bp["bo2"], bp["w1"], bp["b1"], bp["w2"], bp["b2"])


# ---------------------------------------------------------------------------
# Kernel 3: bev2origin (broadcast over z) + proj_out + residual with x_in
# ---------------------------------------------------------------------------
def _bev_merge_out_kernel(h_ref, bev_ref, xin_ref, w_ref, o_ref, *, nz):
    h = h_ref[0]                                            # (P, D) z-major
    bev = bev_ref[0]                                        # (M, D)
    bev_full = jnp.concatenate([bev] * nz, axis=0)          # bev2origin: repeat over z
    y = jnp.dot(h + bev_full, w_ref[...], preferred_element_type=jnp.float32)
    o_ref[0] = y + xin_ref[0]


def bev_merge_proj_out(h_zm, x_bev, x_in_zm, w_out):
    Bn, P, D = h_zm.shape
    _, M, _ = x_bev.shape
    C = w_out.shape[1]
    nz = P // M
    kern = functools.partial(_bev_merge_out_kernel, nz=nz)
    return pl.pallas_call(
        kern,
        out_shape=jax.ShapeDtypeStruct((Bn, P, C), h_zm.dtype),
        grid=(Bn,),
        in_specs=[pl.BlockSpec((1, P, D), lambda b: (b, 0, 0)),
                  pl.BlockSpec((1, M, D), lambda b: (b, 0, 0)),
                  pl.BlockSpec((1, P, C), lambda b: (b, 0, 0)),
                  pl.BlockSpec((D, C), lambda b: (0, 0))],
        out_specs=pl.BlockSpec((1, P, C), lambda b: (b, 0, 0)),
        compiler_params=pltpu.CompilerParams(dimension_semantics=("parallel",)),
    )(h_zm, x_bev, x_in_zm, w_out)


# ---------------------------------------------------------------------------
# Parameters (deterministic synthetic init; shapes follow the module __init__)
# ---------------------------------------------------------------------------
def init_params(key):
    ks = iter(jax.random.split(key, 32))

    def uni(shape, scale):
        return jax.random.uniform(next(ks), shape, jnp.float32, -scale, scale)

    def attn_params(query_dim, context_dim, inner_dim, with_mapper):
        p = {
            "wq": uni((query_dim, inner_dim), 1.0 / math.sqrt(query_dim)),
            "wk": uni((context_dim, inner_dim), 1.0 / math.sqrt(context_dim)),
            "wv": uni((context_dim, inner_dim), 1.0 / math.sqrt(context_dim)),
            "wo": uni((inner_dim, query_dim), 1.0 / math.sqrt(inner_dim)),
            "bo": jnp.zeros((query_dim,), jnp.float32),
        }
        if with_mapper:
            p["w_map"] = uni((query_dim, context_dim), 1.0 / math.sqrt(query_dim))
        return p

    def block_params(dim):
        return {
            "ln1_g": jnp.ones((dim,), jnp.float32), "ln1_b": jnp.zeros((dim,), jnp.float32),
            "ln2_g": jnp.ones((dim,), jnp.float32), "ln2_b": jnp.zeros((dim,), jnp.float32),
            "ln3_g": jnp.ones((dim,), jnp.float32), "ln3_b": jnp.zeros((dim,), jnp.float32),
            "attn1": attn_params(dim, dim, INNER, with_mapper=False),
            "attn2": attn_params(dim, CONTEXT_DIM, INNER, with_mapper=True),
            "ff": {
                "w1": uni((dim, 8 * dim), 1.0 / math.sqrt(dim)),
                "b1": jnp.zeros((8 * dim,), jnp.float32),
                "w2": uni((4 * dim, dim), 1.0 / math.sqrt(4 * dim)),
                "b2": jnp.zeros((dim,), jnp.float32),
            },
        }

    return {
        "gn_gamma": jnp.ones((IN_CHANNELS,), jnp.float32),
        "gn_beta": jnp.zeros((IN_CHANNELS,), jnp.float32),
        "proj_in_w": uni((IN_CHANNELS, INNER), 1.0 / math.sqrt(IN_CHANNELS)),
        # ToBEVConvolution.reset_parameters: uniform(-1/sqrt(Cin), 1/sqrt(Cin))
        "bev_kernel": uni((N_BEV_KERNELS, IN_CHANNELS, IN_CHANNELS),
                          1.0 / math.sqrt(IN_CHANNELS)),
        "blocks": [block_params(INNER) for _ in range(DEPTH)],
        # zero_module(proj_out)
        "proj_out_w": jnp.zeros((INNER, IN_CHANNELS), jnp.float32),
    }


def fuse_params(params):
    """One-off weight packing: concat QKV/mapper weights (lane-dense matmul outputs),
    stack LN scale/bias, slice the z-indexed BEV kernels actually used."""
    def fuse_block(bp):
        return {
            "ln": jnp.stack([bp["ln1_g"], bp["ln1_b"], bp["ln2_g"], bp["ln2_b"],
                             bp["ln3_g"], bp["ln3_b"]]),                        # (6, D)
            "wqkv1": jnp.concatenate([bp["attn1"]["wq"], bp["attn1"]["wk"],
                                      bp["attn1"]["wv"]], axis=1),              # (D, 3D)
            "wo1": bp["attn1"]["wo"], "bo1": bp["attn1"]["bo"].reshape(1, -1),
            "wqm2": jnp.concatenate([bp["attn2"]["wq"], bp["attn2"]["w_map"]], axis=1),
            "wkv2": jnp.concatenate([bp["attn2"]["wk"], bp["attn2"]["wv"]], axis=1),
            "wo2": bp["attn2"]["wo"], "bo2": bp["attn2"]["bo"].reshape(1, -1),
            "w1": bp["ff"]["w1"], "b1": bp["ff"]["b1"].reshape(1, -1),
            "w2": bp["ff"]["w2"], "b2": bp["ff"]["b2"].reshape(1, -1),
        }
    return {
        "gn": jnp.stack([params["gn_gamma"], params["gn_beta"]]),               # (2, C)
        "proj_in_w": params["proj_in_w"],
        "w_bev": params["bev_kernel"][:Z],                                      # (Z, C, C)
        "blocks": [fuse_block(bp) for bp in params["blocks"]],
        "proj_out_w": params["proj_out_w"],
    }


# ---------------------------------------------------------------------------
# Forward pass
# ---------------------------------------------------------------------------
def spatial_transformer_forward(fp, feats, coords):
    """feats: [N, C] sparse features; coords: [N, 4] int32 (b, x, y, z)."""
    # coords unused: fully-occupied z-fastest grid assumed (see TODO at top).
    del coords
    C = feats.shape[1]
    assert NUM_GROUPS == C, "fast GroupNorm path requires channels_per_group == 1"

    # Reorder once to a per-batch z-major layout (b, z*M + m, c) so the per-z BEV
    # kernel slices are contiguous row blocks; cheap one-off XLA relayout.
    x_zm = feats.reshape(B, M_BEV, Z, C).transpose(0, 2, 1, 3).reshape(B, Z * M_BEV, C)

    # Kernel 1: GroupNorm + proj_in + ToBEVConvolution
    h_zm, x_bev = gn_proj_bev(x_zm, fp["gn"], fp["proj_in_w"], fp["w_bev"], eps=1e-6)

    # Kernel 2 (x depth): fused BasicTransformerBlock on BEV tokens
    for bp in fp["blocks"]:
        x_bev = transformer_block(x_bev, bp)

    # Kernel 3: bev2origin broadcast + proj_out (zero-init) + residual with x_in
    out_zm = bev_merge_proj_out(h_zm, x_bev, x_zm, fp["proj_out_w"])

    # Back to the original point order (z fastest)
    return out_zm.reshape(B, Z, M_BEV, C).transpose(0, 2, 1, 3).reshape(N_POINTS, C)


# ---------------------------------------------------------------------------
# Main
# ---------------------------------------------------------------------------
if __name__ == "__main__":
    assert INNER == IN_CHANNELS, "module wiring requires n_heads*d_head == in_channels"

    key = jax.random.PRNGKey(0)
    k_feat, k_param = jax.random.split(key)

    feats = jax.random.normal(k_feat, (N_POINTS, IN_CHANNELS), jnp.float32)
    bb, xx, yy, zz = jnp.meshgrid(jnp.arange(B), jnp.arange(X),
                                  jnp.arange(Y), jnp.arange(Z), indexing="ij")
    coords = jnp.stack([bb, xx, yy, zz], axis=-1).reshape(-1, 4).astype(jnp.int32)

    params = init_params(k_param)
    fp = fuse_params(params)

    fwd = jax.jit(spatial_transformer_forward)
    out = fwd(fp, feats, coords)
    out = jax.block_until_ready(out)
    assert out.shape == (N_POINTS, IN_CHANNELS) and out.dtype == jnp.float32
    print("KERNEL_OK")
</pallas_src>

<mosaic_0001>
module attributes {stable_mosaic.version = 11 : i64} {
  func.func @_gn_proj_bev_kernel(%arg0: i32, %arg1: memref<1x256x32xf32, #tpu.memory_space<vmem>>, %arg2: memref<2x32xf32, #tpu.memory_space<vmem>>, %arg3: memref<32x32xf32, #tpu.memory_space<vmem>>, %arg4: memref<4x32x32xf32, #tpu.memory_space<vmem>>, %arg5: memref<1x256x32xf32, #tpu.memory_space<vmem>>, %arg6: memref<1x64x32xf32, #tpu.memory_space<vmem>>) attributes {dimension_semantics = [#tpu.dimension_semantics<parallel>], iteration_bounds = array<i64: 2>, scalar_prefetch = 0 : i64, scratch_operands = 0 : i64, tpu.core_type = #tpu.core_type<tc>, window_params = [{transform_indices = @transform_0, window_bounds = array<i64: 1, 256, 32>}, {pipeline_mode = #tpu.pipeline_mode<synchronous>, transform_indices = @transform_1, window_bounds = array<i64: 2, 32>}, {pipeline_mode = #tpu.pipeline_mode<synchronous>, transform_indices = @transform_2, window_bounds = array<i64: 32, 32>}, {pipeline_mode = #tpu.pipeline_mode<synchronous>, transform_indices = @transform_3, window_bounds = array<i64: 4, 32, 32>}, {transform_indices = @transform_4, window_bounds = array<i64: 1, 256, 32>}, {transform_indices = @transform_5, window_bounds = array<i64: 1, 64, 32>}]} {
    %c0 = arith.constant 0 : index
    %c0_0 = arith.constant 0 : index
    %c0_1 = arith.constant 0 : index
    %0 = vector.load %arg1[%c0, %c0_0, %c0_1] : memref<1x256x32xf32, #tpu.memory_space<vmem>>, vector<1x256x32xf32>
    %1 = vector.shape_cast %0 : vector<1x256x32xf32> to vector<256x32xf32>
    %cst = arith.constant dense<0.000000e+00> : vector<32xf32>
    %2 = vector.multi_reduction <add>, %1, %cst [0] : vector<256x32xf32> to vector<32xf32>
    %3 = vector.shape_cast %2 : vector<32xf32> to vector<1x32xf32>
    %cst_2 = arith.constant 2.560000e+02 : f32
    %4 = vector.broadcast %cst_2 : f32 to vector<1x32xf32>
    %5 = arith.divf %3, %4 : vector<1x32xf32>
    %6 = vector.broadcast %5 : vector<1x32xf32> to vector<256x32xf32>
    %7 = arith.subf %1, %6 : vector<256x32xf32>
    %8 = arith.mulf %7, %7 : vector<256x32xf32>
    %cst_3 = arith.constant dense<0.000000e+00> : vector<32xf32>
    %9 = vector.multi_reduction <add>, %8, %cst_3 [0] : vector<256x32xf32> to vector<32xf32>
    %10 = vector.shape_cast %9 : vector<32xf32> to vector<1x32xf32>
    %cst_4 = arith.constant 2.560000e+02 : f32
    %11 = vector.broadcast %cst_4 : f32 to vector<1x32xf32>
    %12 = arith.divf %10, %11 : vector<1x32xf32>
    %13 = vector.broadcast %5 : vector<1x32xf32> to vector<256x32xf32>
    %14 = arith.subf %1, %13 : vector<256x32xf32>
    %cst_5 = arith.constant 9.99999997E-7 : f32
    %15 = vector.broadcast %cst_5 : f32 to vector<1x32xf32>
    %16 = arith.addf %12, %15 : vector<1x32xf32>
    %17 = math.rsqrt %16 : vector<1x32xf32>
    %18 = vector.broadcast %17 : vector<1x32xf32> to vector<256x32xf32>
    %19 = arith.mulf %14, %18 : vector<256x32xf32>
    %c0_6 = arith.constant 0 : index
    %c0_7 = arith.constant 0 : index
    %20 = vector.load %arg2[%c0_6, %c0_7] : memref<2x32xf32, #tpu.memory_space<vmem>>, vector<1x32xf32>
    %21 = vector.broadcast %20 : vector<1x32xf32> to vector<256x32xf32>
    %22 = arith.mulf %19, %21 : vector<256x32xf32>
    %c1 = arith.constant 1 : index
    %c0_8 = arith.constant 0 : index
    %23 = vector.load %arg2[%c1, %c0_8] : memref<2x32xf32, #tpu.memory_space<vmem>>, vector<1x32xf32>
    %24 = vector.broadcast %23 : vector<1x32xf32> to vector<256x32xf32>
    %25 = arith.addf %22, %24 : vector<256x32xf32>
    %c0_9 = arith.constant 0 : index
    %c0_10 = arith.constant 0 : index
    %26 = vector.load %arg3[%c0_9, %c0_10] : memref<32x32xf32, #tpu.memory_space<vmem>>, vector<32x32xf32>
    %cst_11 = arith.constant dense<0.000000e+00> : vector<256x32xf32>
    %27 = tpu.matmul %25, %26, %cst_11 {dimension_numbers = #tpu.dot_dimension_numbers<[1], [0], [0], [1], [0, 0, 1, 1], [], []>} : vector<256x32xf32>, vector<32x32xf32>, vector<256x32xf32> -> vector<256x32xf32>
    %c0_12 = arith.constant 0 : index
    %c0_13 = arith.constant 0 : index
    %c0_14 = arith.constant 0 : index
    %28 = vector.load %arg5[%c0_12, %c0_13, %c0_14] : memref<1x256x32xf32, #tpu.memory_space<vmem>>, vector<1x256x32xf32>
    %29 = vector.shape_cast %28 : vector<1x256x32xf32> to vector<256x32xf32>
    %30 = vector.shape_cast %27 : vector<256x32xf32> to vector<1x256x32xf32>
    tpu.vector_store %arg5[%c0_12, %c0_13, %c0_14], %30 {strides = array<i32>} : memref<1x256x32xf32, #tpu.memory_space<vmem>>, vector<1x256x32xf32>,
    %cst_15 = arith.constant 0.000000e+00 : f32
    %31 = vector.broadcast %cst_15 : f32 to vector<64x32xf32>
    %32 = vector.extract_strided_slice %27 {offsets = [0, 0], sizes = [64, 32], strides = [1, 1]} : vector<256x32xf32> to vector<64x32xf32>
    %c0_16 = arith.constant 0 : index
    %c0_17 = arith.constant 0 : index
    %c0_18 = arith.constant 0 : index
    %33 = vector.load %arg4[%c0_16, %c0_17, %c0_18] : memref<4x32x32xf32, #tpu.memory_space<vmem>>, vector<1x32x32xf32>
    %34 = vector.shape_cast %33 : vector<1x32x32xf32> to vector<32x32xf32>
    %cst_19 = arith.constant dense<0.000000e+00> : vector<64x32xf32>
    %35 = tpu.matmul %32, %34, %cst_19 {dimension_numbers = #tpu.dot_dimension_numbers<[1], [0], [0], [1], [0, 0, 1, 1], [], []>} : vector<64x32xf32>, vector<32x32xf32>, vector<64x32xf32> -> vector<64x32xf32>
    %36 = arith.addf %31, %35 : vector<64x32xf32>
    %37 = vector.extract_strided_slice %27 {offsets = [64, 0], sizes = [64, 32], strides = [1, 1]} : vector<256x32xf32> to vector<64x32xf32>
    %c1_20 = arith.constant 1 : index
    %c0_21 = arith.constant 0 : index
    %c0_22 = arith.constant 0 : index
    %38 = vector.load %arg4[%c1_20, %c0_21, %c0_22] : memref<4x32x32xf32, #tpu.memory_space<vmem>>, vector<1x32x32xf32>
    %39 = vector.shape_cast %38 : vector<1x32x32xf32> to vector<32x32xf32>
    %cst_23 = arith.constant dense<0.000000e+00> : vector<64x32xf32>
    %40 = tpu.matmul %37, %39, %cst_23 {dimension_numbers = #tpu.dot_dimension_numbers<[1], [0], [0], [1], [0, 0, 1, 1], [], []>} : vector<64x32xf32>, vector<32x32xf32>, vector<64x32xf32> -> vector<64x32xf32>
    %41 = arith.addf %36, %40 : vector<64x32xf32>
    %42 = vector.extract_strided_slice %27 {offsets = [128, 0], sizes = [64, 32], strides = [1, 1]} : vector<256x32xf32> to vector<64x32xf32>
    %c2 = arith.constant 2 : index
    %c0_24 = arith.constant 0 : index
    %c0_25 = arith.constant 0 : index
    %43 = vector.load %arg4[%c2, %c0_24, %c0_25] : memref<4x32x32xf32, #tpu.memory_space<vmem>>, vector<1x32x32xf32>
    %44 = vector.shape_cast %43 : vector<1x32x32xf32> to vector<32x32xf32>
    %cst_26 = arith.constant dense<0.000000e+00> : vector<64x32xf32>
    %45 = tpu.matmul %42, %44, %cst_26 {dimension_numbers = #tpu.dot_dimension_numbers<[1], [0], [0], [1], [0, 0, 1, 1], [], []>} : vector<64x32xf32>, vector<32x32xf32>, vector<64x32xf32> -> vector<64x32xf32>
    %46 = arith.addf %41, %45 : vector<64x32xf32>
    %47 = vector.extract_strided_slice %27 {offsets = [192, 0], sizes = [64, 32], strides = [1, 1]} : vector<256x32xf32> to vector<64x32xf32>
    %c3 = arith.constant 3 : index
    %c0_27 = arith.constant 0 : index
    %c0_28 = arith.constant 0 : index
    %48 = vector.load %arg4[%c3, %c0_27, %c0_28] : memref<4x32x32xf32, #tpu.memory_space<vmem>>, vector<1x32x32xf32>
    %49 = vector.shape_cast %48 : vector<1x32x32xf32> to vector<32x32xf32>
    %cst_29 = arith.constant dense<0.000000e+00> : vector<64x32xf32>
    %50 = tpu.matmul %47, %49, %cst_29 {dimension_numbers = #tpu.dot_dimension_numbers<[1], [0], [0], [1], [0, 0, 1, 1], [], []>} : vector<64x32xf32>, vector<32x32xf32>, vector<64x32xf32> -> vector<64x32xf32>
    %51 = arith.addf %46, %50 : vector<64x32xf32>
    %c0_30 = arith.constant 0 : index
    %c0_31 = arith.constant 0 : index
    %c0_32 = arith.constant 0 : index
    %52 = vector.load %arg6[%c0_30, %c0_31, %c0_32] : memref<1x64x32xf32, #tpu.memory_space<vmem>>, vector<1x64x32xf32>
    %53 = vector.shape_cast %52 : vector<1x64x32xf32> to vector<64x32xf32>
    %54 = vector.shape_cast %51 : vector<64x32xf32> to vector<1x64x32xf32>
    tpu.vector_store %arg6[%c0_30, %c0_31, %c0_32], %54 {strides = array<i32>} : memref<1x64x32xf32, #tpu.memory_space<vmem>>, vector<1x64x32xf32>,
    return
  }
  func.func @transform_0(%arg0: i32) -> (i32, i32, i32) {
    %c0_i32 = arith.constant 0 : i32
    %c0_i32_0 = arith.constant 0 : i32
    %c0_i32_1 = arith.constant 0 : i32
    return %arg0, %c0_i32, %c0_i32_0 : i32, i32, i32
  }
  func.func @transform_1(%arg0: i32) -> (i32, i32) {
    %c0_i32 = arith.constant 0 : i32
    %c0_i32_0 = arith.constant 0 : i32
    %c0_i32_1 = arith.constant 0 : i32
    return %c0_i32, %c0_i32_0 : i32, i32
  }
  func.func @transform_2(%arg0: i32) -> (i32, i32) {
    %c0_i32 = arith.constant 0 : i32
    %c0_i32_0 = arith.constant 0 : i32
    %c0_i32_1 = arith.constant 0 : i32
    return %c0_i32, %c0_i32_0 : i32, i32
  }
  func.func @transform_3(%arg0: i32) -> (i32, i32, i32) {
    %c0_i32 = arith.constant 0 : i32
    %c0_i32_0 = arith.constant 0 : i32
    %c0_i32_1 = arith.constant 0 : i32
    %c0_i32_2 = arith.constant 0 : i32
    return %c0_i32, %c0_i32_0, %c0_i32_1 : i32, i32, i32
  }
  func.func @transform_4(%arg0: i32) -> (i32, i32, i32) {
    %c0_i32 = arith.constant 0 : i32
    %c0_i32_0 = arith.constant 0 : i32
    %c0_i32_1 = arith.constant 0 : i32
    return %arg0, %c0_i32, %c0_i32_0 : i32, i32, i32
  }
  func.func @transform_5(%arg0: i32) -> (i32, i32, i32) {
    %c0_i32 = arith.constant 0 : i32
    %c0_i32_0 = arith.constant 0 : i32
    %c0_i32_1 = arith.constant 0 : i32
    return %arg0, %c0_i32, %c0_i32_0 : i32, i32, i32
  }
}

module attributes {stable_mosaic.version = 11 : i64} {
  func.func @_bev_merge_out_kernel(%arg0: i32, %arg1: memref<1x256x32xf32, #tpu.memory_space<vmem>>, %arg2: memref<1x64x32xf32, #tpu.memory_space<vmem>>, %arg3: memref<1x256x32xf32, #tpu.memory_space<vmem>>, %arg4: memref<32x32xf32, #tpu.memory_space<vmem>>, %arg5: memref<1x256x32xf32, #tpu.memory_space<vmem>>) attributes {dimension_semantics = [#tpu.dimension_semantics<parallel>], iteration_bounds = array<i64: 2>, scalar_prefetch = 0 : i64, scratch_operands = 0 : i64, tpu.core_type = #tpu.core_type<tc>, window_params = [{transform_indices = @transform_0, window_bounds = array<i64: 1, 256, 32>}, {transform_indices = @transform_1, window_bounds = array<i64: 1, 64, 32>}, {transform_indices = @transform_2, window_bounds = array<i64: 1, 256, 32>}, {pipeline_mode = #tpu.pipeline_mode<synchronous>, transform_indices = @transform_3, window_bounds = array<i64: 32, 32>}, {transform_indices = @transform_4, window_bounds = array<i64: 1, 256, 32>}]} {
    %c0 = arith.constant 0 : index
    %c0_0 = arith.constant 0 : index
    %c0_1 = arith.constant 0 : index
    %0 = vector.load %arg1[%c0, %c0_0, %c0_1] : memref<1x256x32xf32, #tpu.memory_space<vmem>>, vector<1x256x32xf32>
    %1 = vector.shape_cast %0 : vector<1x256x32xf32> to vector<256x32xf32>
    %c0_2 = arith.constant 0 : index
    %c0_3 = arith.constant 0 : index
    %c0_4 = arith.constant 0 : index
    %2 = vector.load %arg2[%c0_2, %c0_3, %c0_4] : memref<1x64x32xf32, #tpu.memory_space<vmem>>, vector<1x64x32xf32>
    %3 = vector.shape_cast %2 : vector<1x64x32xf32> to vector<64x32xf32>
    %4 = tpu.concatenate %3, %3, %3, %3 in 0 : vector<64x32xf32>, vector<64x32xf32>, vector<64x32xf32>, vector<64x32xf32> -> vector<256x32xf32>
    %5 = arith.addf %1, %4 : vector<256x32xf32>
    %c0_5 = arith.constant 0 : index
    %c0_6 = arith.constant 0 : index
    %6 = vector.load %arg4[%c0_5, %c0_6] : memref<32x32xf32, #tpu.memory_space<vmem>>, vector<32x32xf32>
    %cst = arith.constant dense<0.000000e+00> : vector<256x32xf32>
    %7 = tpu.matmul %5, %6, %cst {dimension_numbers = #tpu.dot_dimension_numbers<[1], [0], [0], [1], [0, 0, 1, 1], [], []>} : vector<256x32xf32>, vector<32x32xf32>, vector<256x32xf32> -> vector<256x32xf32>
    %c0_7 = arith.constant 0 : index
    %c0_8 = arith.constant 0 : index
    %c0_9 = arith.constant 0 : index
    %8 = vector.load %arg3[%c0_7, %c0_8, %c0_9] : memref<1x256x32xf32, #tpu.memory_space<vmem>>, vector<1x256x32xf32>
    %9 = vector.shape_cast %8 : vector<1x256x32xf32> to vector<256x32xf32>
    %10 = arith.addf %7, %9 : vector<256x32xf32>
    %c0_10 = arith.constant 0 : index
    %c0_11 = arith.constant 0 : index
    %c0_12 = arith.constant 0 : index
    %11 = vector.load %arg5[%c0_10, %c0_11, %c0_12] : memref<1x256x32xf32, #tpu.memory_space<vmem>>, vector<1x256x32xf32>
    %12 = vector.shape_cast %11 : vector<1x256x32xf32> to vector<256x32xf32>
    %13 = vector.shape_cast %10 : vector<256x32xf32> to vector<1x256x32xf32>
    tpu.vector_store %arg5[%c0_10, %c0_11, %c0_12], %13 {strides = array<i32>} : memref<1x256x32xf32, #tpu.memory_space<vmem>>, vector<1x256x32xf32>,
    return
  }
  func.func @transform_0(%arg0: i32) -> (i32, i32, i32) {
    %c0_i32 = arith.constant 0 : i32
    %c0_i32_0 = arith.constant 0 : i32
    %c0_i32_1 = arith.constant 0 : i32
    return %arg0, %c0_i32, %c0_i32_0 : i32, i32, i32
  }
  func.func @transform_1(%arg0: i32) -> (i32, i32, i32) {
    %c0_i32 = arith.constant 0 : i32
    %c0_i32_0 = arith.constant 0 : i32
    %c0_i32_1 = arith.constant 0 : i32
    return %arg0, %c0_i32, %c0_i32_0 : i32, i32, i32
  }
  func.func @transform_2(%arg0: i32) -> (i32, i32, i32) {
    %c0_i32 = arith.constant 0 : i32
    %c0_i32_0 = arith.constant 0 : i32
    %c0_i32_1 = arith.constant 0 : i32
    return %arg0, %c0_i32, %c0_i32_0 : i32, i32, i32
  }
  func.func @transform_3(%arg0: i32) -> (i32, i32) {
    %c0_i32 = arith.constant 0 : i32
    %c0_i32_0 = arith.constant 0 : i32
    %c0_i32_1 = arith.constant 0 : i32
    return %c0_i32, %c0_i32_0 : i32, i32
  }
  func.func @transform_4(%arg0: i32) -> (i32, i32, i32) {
    %c0_i32 = arith.constant 0 : i32
    %c0_i32_0 = arith.constant 0 : i32
    %c0_i32_1 = arith.constant 0 : i32
    return %arg0, %c0_i32, %c0_i32_0 : i32, i32, i32
  }
}

module attributes {stable_mosaic.version = 11 : i64} {
  func.func @_transformer_block_kernel(%arg0: i32, %arg1: memref<1x64x32xf32, #tpu.memory_space<vmem>>, %arg2: memref<6x32xf32, #tpu.memory_space<vmem>>, %arg3: memref<32x96xf32, #tpu.memory_space<vmem>>, %arg4: memref<32x32xf32, #tpu.memory_space<vmem>>, %arg5: memref<1x32xf32, #tpu.memory_space<vmem>>, %arg6: memref<32x48xf32, #tpu.memory_space<vmem>>, %arg7: memref<16x64xf32, #tpu.memory_space<vmem>>, %arg8: memref<32x32xf32, #tpu.memory_space<vmem>>, %arg9: memref<1x32xf32, #tpu.memory_space<vmem>>, %arg10: memref<32x256xf32, #tpu.memory_space<vmem>>, %arg11: memref<1x256xf32, #tpu.memory_space<vmem>>, %arg12: memref<128x32xf32, #tpu.memory_space<vmem>>, %arg13: memref<1x32xf32, #tpu.memory_space<vmem>>, %arg14: memref<1x64x32xf32, #tpu.memory_space<vmem>>) attributes {dimension_semantics = [#tpu.dimension_semantics<parallel>], iteration_bounds = array<i64: 2>, scalar_prefetch = 0 : i64, scratch_operands = 0 : i64, tpu.core_type = #tpu.core_type<tc>, window_params = [{transform_indices = @transform_0, window_bounds = array<i64: 1, 64, 32>}, {pipeline_mode = #tpu.pipeline_mode<synchronous>, transform_indices = @transform_1, window_bounds = array<i64: 6, 32>}, {pipeline_mode = #tpu.pipeline_mode<synchronous>, transform_indices = @transform_2, window_bounds = array<i64: 32, 96>}, {pipeline_mode = #tpu.pipeline_mode<synchronous>, transform_indices = @transform_3, window_bounds = array<i64: 32, 32>}, {pipeline_mode = #tpu.pipeline_mode<synchronous>, transform_indices = @transform_4, window_bounds = array<i64: 1, 32>}, {pipeline_mode = #tpu.pipeline_mode<synchronous>, transform_indices = @transform_5, window_bounds = array<i64: 32, 48>}, {pipeline_mode = #tpu.pipeline_mode<synchronous>, transform_indices = @transform_6, window_bounds = array<i64: 16, 64>}, {pipeline_mode = #tpu.pipeline_mode<synchronous>, transform_indices = @transform_7, window_bounds = array<i64: 32, 32>}, {pipeline_mode = #tpu.pipeline_mode<synchronous>, transform_indices = @transform_8, window_bounds = array<i64: 1, 32>}, {pipeline_mode = #tpu.pipeline_mode<synchronous>, transform_indices = @transform_9, window_bounds = array<i64: 32, 256>}, {pipeline_mode = #tpu.pipeline_mode<synchronous>, transform_indices = @transform_10, window_bounds = array<i64: 1, 256>}, {pipeline_mode = #tpu.pipeline_mode<synchronous>, transform_indices = @transform_11, window_bounds = array<i64: 128, 32>}, {pipeline_mode = #tpu.pipeline_mode<synchronous>, transform_indices = @transform_12, window_bounds = array<i64: 1, 32>}, {transform_indices = @transform_13, window_bounds = array<i64: 1, 64, 32>}]} {
    %c0 = arith.constant 0 : index
    %c0_0 = arith.constant 0 : index
    %c0_1 = arith.constant 0 : index
    %0 = vector.load %arg1[%c0, %c0_0, %c0_1] : memref<1x64x32xf32, #tpu.memory_space<vmem>>, vector<1x64x32xf32>
    %1 = vector.shape_cast %0 : vector<1x64x32xf32> to vector<64x32xf32>
    %c0_2 = arith.constant 0 : index
    %c0_3 = arith.constant 0 : index
    %2 = vector.load %arg2[%c0_2, %c0_3] : memref<6x32xf32, #tpu.memory_space<vmem>>, vector<6x32xf32>
    %3 = vector.extract_strided_slice %2 {offsets = [0, 0], sizes = [1, 32], strides = [1, 1]} : vector<6x32xf32> to vector<1x32xf32>
    %4 = vector.extract_strided_slice %2 {offsets = [1, 0], sizes = [1, 32], strides = [1, 1]} : vector<6x32xf32> to vector<1x32xf32>
    %cst = arith.constant dense<0.000000e+00> : vector<64xf32>
    %5 = vector.multi_reduction <add>, %1, %cst [1] : vector<64x32xf32> to vector<64xf32>
    %6 = vector.shape_cast %5 : vector<64xf32> to vector<64x1xf32>
    %cst_4 = arith.constant 3.200000e+01 : f32
    %7 = vector.broadcast %cst_4 : f32 to vector<64x1xf32>
    %8 = arith.divf %6, %7 : vector<64x1xf32>
    %9 = vector.broadcast %8 : vector<64x1xf32> to vector<64x32xf32>
    %10 = arith.subf %1, %9 : vector<64x32xf32>
    %11 = arith.mulf %10, %10 : vector<64x32xf32>
    %cst_5 = arith.constant dense<0.000000e+00> : vector<64xf32>
    %12 = vector.multi_reduction <add>, %11, %cst_5 [1] : vector<64x32xf32> to vector<64xf32>
    %13 = vector.shape_cast %12 : vector<64xf32> to vector<64x1xf32>
    %cst_6 = arith.constant 3.200000e+01 : f32
    %14 = vector.broadcast %cst_6 : f32 to vector<64x1xf32>
    %15 = arith.divf %13, %14 : vector<64x1xf32>
    %16 = vector.broadcast %8 : vector<64x1xf32> to vector<64x32xf32>
    %17 = arith.subf %1, %16 : vector<64x32xf32>
    %cst_7 = arith.constant 9.99999974E-6 : f32
    %18 = vector.broadcast %cst_7 : f32 to vector<64x1xf32>
    %19 = arith.addf %15, %18 : vector<64x1xf32>
    %20 = math.rsqrt %19 : vector<64x1xf32>
    %21 = vector.broadcast %20 : vector<64x1xf32> to vector<64x32xf32>
    %22 = arith.mulf %17, %21 : vector<64x32xf32>
    %23 = vector.broadcast %3 : vector<1x32xf32> to vector<64x32xf32>
    %24 = arith.mulf %22, %23 : vector<64x32xf32>
    %25 = vector.broadcast %4 : vector<1x32xf32> to vector<64x32xf32>
    %26 = arith.addf %24, %25 : vector<64x32xf32>
    %c0_8 = arith.constant 0 : index
    %c0_9 = arith.constant 0 : index
    %27 = vector.load %arg3[%c0_8, %c0_9] : memref<32x96xf32, #tpu.memory_space<vmem>>, vector<32x96xf32>
    %cst_10 = arith.constant dense<0.000000e+00> : vector<64x96xf32>
    %28 = tpu.matmul %26, %27, %cst_10 {dimension_numbers = #tpu.dot_dimension_numbers<[1], [0], [0], [1], [0, 0, 1, 1], [], []>} : vector<64x32xf32>, vector<32x96xf32>, vector<64x96xf32> -> vector<64x96xf32>
    %29 = vector.extract_strided_slice %28 {offsets = [0, 0], sizes = [64, 32], strides = [1, 1]} : vector<64x96xf32> to vector<64x32xf32>
    %30 = vector.extract_strided_slice %28 {offsets = [0, 32], sizes = [64, 32], strides = [1, 1]} : vector<64x96xf32> to vector<64x32xf32>
    %31 = vector.extract_strided_slice %28 {offsets = [0, 64], sizes = [64, 32], strides = [1, 1]} : vector<64x96xf32> to vector<64x32xf32>
    %32 = vector.extract_strided_slice %29 {offsets = [0, 0], sizes = [64, 8], strides = [1, 1]} : vector<64x32xf32> to vector<64x8xf32>
    %33 = vector.extract_strided_slice %30 {offsets = [0, 0], sizes = [64, 8], strides = [1, 1]} : vector<64x32xf32> to vector<64x8xf32>
    %34 = vector.extract_strided_slice %31 {offsets = [0, 0], sizes = [64, 8], strides = [1, 1]} : vector<64x32xf32> to vector<64x8xf32>
    %cst_11 = arith.constant dense<0.000000e+00> : vector<64x64xf32>
    %35 = tpu.matmul %32, %33, %cst_11 {dimension_numbers = #tpu.dot_dimension_numbers<[1], [1], [0], [0], [0, 0, 1, 0], [], []>} : vector<64x8xf32>, vector<64x8xf32>, vector<64x64xf32> -> vector<64x64xf32>
    %cst_12 = arith.constant 0.353553385 : f32
    %36 = vector.broadcast %cst_12 : f32 to vector<64x64xf32>
    %37 = arith.mulf %35, %36 : vector<64x64xf32>
    %cst_13 = arith.constant dense<0xFF800000> : vector<64xf32>
    %38 = vector.multi_reduction <maximumf>, %37, %cst_13 [1] : vector<64x64xf32> to vector<64xf32>
    %39 = vector.shape_cast %38 : vector<64xf32> to vector<64x1xf32>
    %40 = vector.broadcast %39 : vector<64x1xf32> to vector<64x64xf32>
    %41 = arith.subf %37, %40 : vector<64x64xf32>
    %42 = math.exp %41 : vector<64x64xf32>
    %cst_14 = arith.constant dense<0.000000e+00> : vector<64xf32>
    %43 = vector.multi_reduction <add>, %42, %cst_14 [1] : vector<64x64xf32> to vector<64xf32>
    %44 = vector.shape_cast %43 : vector<64xf32> to vector<64x1xf32>
    %45 = tpu.reciprocal %44 {approx = true} : vector<64x1xf32> -> vector<64x1xf32>
    %46 = vector.broadcast %45 : vector<64x1xf32> to vector<64x64xf32>
    %47 = arith.mulf %42, %46 : vector<64x64xf32>
    %cst_15 = arith.constant dense<0.000000e+00> : vector<64x8xf32>
    %48 = tpu.matmul %47, %34, %cst_15 {dimension_numbers = #tpu.dot_dimension_numbers<[1], [0], [0], [1], [0, 0, 1, 1], [], []>} : vector<64x64xf32>, vector<64x8xf32>, vector<64x8xf32> -> vector<64x8xf32>
    %49 = vector.extract_strided_slice %29 {offsets = [0, 8], sizes = [64, 8], strides = [1, 1]} : vector<64x32xf32> to vector<64x8xf32>
    %50 = vector.extract_strided_slice %30 {offsets = [0, 8], sizes = [64, 8], strides = [1, 1]} : vector<64x32xf32> to vector<64x8xf32>
    %51 = vector.extract_strided_slice %31 {offsets = [0, 8], sizes = [64, 8], strides = [1, 1]} : vector<64x32xf32> to vector<64x8xf32>
    %cst_16 = arith.constant dense<0.000000e+00> : vector<64x64xf32>
    %52 = tpu.matmul %49, %50, %cst_16 {dimension_numbers = #tpu.dot_dimension_numbers<[1], [1], [0], [0], [0, 0, 1, 0], [], []>} : vector<64x8xf32>, vector<64x8xf32>, vector<64x64xf32> -> vector<64x64xf32>
    %cst_17 = arith.constant 0.353553385 : f32
    %53 = vector.broadcast %cst_17 : f32 to vector<64x64xf32>
    %54 = arith.mulf %52, %53 : vector<64x64xf32>
    %cst_18 = arith.constant dense<0xFF800000> : vector<64xf32>
    %55 = vector.multi_reduction <maximumf>, %54, %cst_18 [1] : vector<64x64xf32> to vector<64xf32>
    %56 = vector.shape_cast %55 : vector<64xf32> to vector<64x1xf32>
    %57 = vector.broadcast %56 : vector<64x1xf32> to vector<64x64xf32>
    %58 = arith.subf %54, %57 : vector<64x64xf32>
    %59 = math.exp %58 : vector<64x64xf32>
    %cst_19 = arith.constant dense<0.000000e+00> : vector<64xf32>
    %60 = vector.multi_reduction <add>, %59, %cst_19 [1] : vector<64x64xf32> to vector<64xf32>
    %61 = vector.shape_cast %60 : vector<64xf32> to vector<64x1xf32>
    %62 = tpu.reciprocal %61 {approx = true} : vector<64x1xf32> -> vector<64x1xf32>
    %63 = vector.broadcast %62 : vector<64x1xf32> to vector<64x64xf32>
    %64 = arith.mulf %59, %63 : vector<64x64xf32>
    %cst_20 = arith.constant dense<0.000000e+00> : vector<64x8xf32>
    %65 = tpu.matmul %64, %51, %cst_20 {dimension_numbers = #tpu.dot_dimension_numbers<[1], [0], [0], [1], [0, 0, 1, 1], [], []>} : vector<64x64xf32>, vector<64x8xf32>, vector<64x8xf32> -> vector<64x8xf32>
    %66 = vector.extract_strided_slice %29 {offsets = [0, 16], sizes = [64, 8], strides = [1, 1]} : vector<64x32xf32> to vector<64x8xf32>
    %67 = vector.extract_strided_slice %30 {offsets = [0, 16], sizes = [64, 8], strides = [1, 1]} : vector<64x32xf32> to vector<64x8xf32>
    %68 = vector.extract_strided_slice %31 {offsets = [0, 16], sizes = [64, 8], strides = [1, 1]} : vector<64x32xf32> to vector<64x8xf32>
    %cst_21 = arith.constant dense<0.000000e+00> : vector<64x64xf32>
    %69 = tpu.matmul %66, %67, %cst_21 {dimension_numbers = #tpu.dot_dimension_numbers<[1], [1], [0], [0], [0, 0, 1, 0], [], []>} : vector<64x8xf32>, vector<64x8xf32>, vector<64x64xf32> -> vector<64x64xf32>
    %cst_22 = arith.constant 0.353553385 : f32
    %70 = vector.broadcast %cst_22 : f32 to vector<64x64xf32>
    %71 = arith.mulf %69, %70 : vector<64x64xf32>
    %cst_23 = arith.constant dense<0xFF800000> : vector<64xf32>
    %72 = vector.multi_reduction <maximumf>, %71, %cst_23 [1] : vector<64x64xf32> to vector<64xf32>
    %73 = vector.shape_cast %72 : vector<64xf32> to vector<64x1xf32>
    %74 = vector.broadcast %73 : vector<64x1xf32> to vector<64x64xf32>
    %75 = arith.subf %71, %74 : vector<64x64xf32>
    %76 = math.exp %75 : vector<64x64xf32>
    %cst_24 = arith.constant dense<0.000000e+00> : vector<64xf32>
    %77 = vector.multi_reduction <add>, %76, %cst_24 [1] : vector<64x64xf32> to vector<64xf32>
    %78 = vector.shape_cast %77 : vector<64xf32> to vector<64x1xf32>
    %79 = tpu.reciprocal %78 {approx = true} : vector<64x1xf32> -> vector<64x1xf32>
    %80 = vector.broadcast %79 : vector<64x1xf32> to vector<64x64xf32>
    %81 = arith.mulf %76, %80 : vector<64x64xf32>
    %cst_25 = arith.constant dense<0.000000e+00> : vector<64x8xf32>
    %82 = tpu.matmul %81, %68, %cst_25 {dimension_numbers = #tpu.dot_dimension_numbers<[1], [0], [0], [1], [0, 0, 1, 1], [], []>} : vector<64x64xf32>, vector<64x8xf32>, vector<64x8xf32> -> vector<64x8xf32>
    %83 = vector.extract_strided_slice %29 {offsets = [0, 24], sizes = [64, 8], strides = [1, 1]} : vector<64x32xf32> to vector<64x8xf32>
    %84 = vector.extract_strided_slice %30 {offsets = [0, 24], sizes = [64, 8], strides = [1, 1]} : vector<64x32xf32> to vector<64x8xf32>
    %85 = vector.extract_strided_slice %31 {offsets = [0, 24], sizes = [64, 8], strides = [1, 1]} : vector<64x32xf32> to vector<64x8xf32>
    %cst_26 = arith.constant dense<0.000000e+00> : vector<64x64xf32>
    %86 = tpu.matmul %83, %84, %cst_26 {dimension_numbers = #tpu.dot_dimension_numbers<[1], [1], [0], [0], [0, 0, 1, 0], [], []>} : vector<64x8xf32>, vector<64x8xf32>, vector<64x64xf32> -> vector<64x64xf32>
    %cst_27 = arith.constant 0.353553385 : f32
    %87 = vector.broadcast %cst_27 : f32 to vector<64x64xf32>
    %88 = arith.mulf %86, %87 : vector<64x64xf32>
    %cst_28 = arith.constant dense<0xFF800000> : vector<64xf32>
    %89 = vector.multi_reduction <maximumf>, %88, %cst_28 [1] : vector<64x64xf32> to vector<64xf32>
    %90 = vector.shape_cast %89 : vector<64xf32> to vector<64x1xf32>
    %91 = vector.broadcast %90 : vector<64x1xf32> to vector<64x64xf32>
    %92 = arith.subf %88, %91 : vector<64x64xf32>
    %93 = math.exp %92 : vector<64x64xf32>
    %cst_29 = arith.constant dense<0.000000e+00> : vector<64xf32>
    %94 = vector.multi_reduction <add>, %93, %cst_29 [1] : vector<64x64xf32> to vector<64xf32>
    %95 = vector.shape_cast %94 : vector<64xf32> to vector<64x1xf32>
    %96 = tpu.reciprocal %95 {approx = true} : vector<64x1xf32> -> vector<64x1xf32>
    %97 = vector.broadcast %96 : vector<64x1xf32> to vector<64x64xf32>
    %98 = arith.mulf %93, %97 : vector<64x64xf32>
    %cst_30 = arith.constant dense<0.000000e+00> : vector<64x8xf32>
    %99 = tpu.matmul %98, %85, %cst_30 {dimension_numbers = #tpu.dot_dimension_numbers<[1], [0], [0], [1], [0, 0, 1, 1], [], []>} : vector<64x64xf32>, vector<64x8xf32>, vector<64x8xf32> -> vector<64x8xf32>
    %100 = tpu.concatenate %48, %65, %82, %99 in 1 : vector<64x8xf32>, vector<64x8xf32>, vector<64x8xf32>, vector<64x8xf32> -> vector<64x32xf32>
    %c0_31 = arith.constant 0 : index
    %c0_32 = arith.constant 0 : index
    %101 = vector.load %arg4[%c0_31, %c0_32] : memref<32x32xf32, #tpu.memory_space<vmem>>, vector<32x32xf32>
    %cst_33 = arith.constant dense<0.000000e+00> : vector<64x32xf32>
    %102 = tpu.matmul %100, %101, %cst_33 {dimension_numbers = #tpu.dot_dimension_numbers<[1], [0], [0], [1], [0, 0, 1, 1], [], []>} : vector<64x32xf32>, vector<32x32xf32>, vector<64x32xf32> -> vector<64x32xf32>
    %c0_34 = arith.constant 0 : index
    %c0_35 = arith.constant 0 : index
    %103 = vector.load %arg5[%c0_34, %c0_35] : memref<1x32xf32, #tpu.memory_space<vmem>>, vector<1x32xf32>
    %104 = vector.broadcast %103 : vector<1x32xf32> to vector<64x32xf32>
    %105 = arith.addf %102, %104 : vector<64x32xf32>
    %106 = arith.addf %105, %1 : vector<64x32xf32>
    %107 = vector.extract_strided_slice %2 {offsets = [2, 0], sizes = [1, 32], strides = [1, 1]} : vector<6x32xf32> to vector<1x32xf32>
    %108 = vector.extract_strided_slice %2 {offsets = [3, 0], sizes = [1, 32], strides = [1, 1]} : vector<6x32xf32> to vector<1x32xf32>
    %cst_36 = arith.constant dense<0.000000e+00> : vector<64xf32>
    %109 = vector.multi_reduction <add>, %106, %cst_36 [1] : vector<64x32xf32> to vector<64xf32>
    %110 = vector.shape_cast %109 : vector<64xf32> to vector<64x1xf32>
    %cst_37 = arith.constant 3.200000e+01 : f32
    %111 = vector.broadcast %cst_37 : f32 to vector<64x1xf32>
    %112 = arith.divf %110, %111 : vector<64x1xf32>
    %113 = vector.broadcast %112 : vector<64x1xf32> to vector<64x32xf32>
    %114 = arith.subf %106, %113 : vector<64x32xf32>
    %115 = arith.mulf %114, %114 : vector<64x32xf32>
    %cst_38 = arith.constant dense<0.000000e+00> : vector<64xf32>
    %116 = vector.multi_reduction <add>, %115, %cst_38 [1] : vector<64x32xf32> to vector<64xf32>
    %117 = vector.shape_cast %116 : vector<64xf32> to vector<64x1xf32>
    %cst_39 = arith.constant 3.200000e+01 : f32
    %118 = vector.broadcast %cst_39 : f32 to vector<64x1xf32>
    %119 = arith.divf %117, %118 : vector<64x1xf32>
    %120 = vector.broadcast %112 : vector<64x1xf32> to vector<64x32xf32>
    %121 = arith.subf %106, %120 : vector<64x32xf32>
    %cst_40 = arith.constant 9.99999974E-6 : f32
    %122 = vector.broadcast %cst_40 : f32 to vector<64x1xf32>
    %123 = arith.addf %119, %122 : vector<64x1xf32>
    %124 = math.rsqrt %123 : vector<64x1xf32>
    %125 = vector.broadcast %124 : vector<64x1xf32> to vector<64x32xf32>
    %126 = arith.mulf %121, %125 : vector<64x32xf32>
    %127 = vector.broadcast %107 : vector<1x32xf32> to vector<64x32xf32>
    %128 = arith.mulf %126, %127 : vector<64x32xf32>
    %129 = vector.broadcast %108 : vector<1x32xf32> to vector<64x32xf32>
    %130 = arith.addf %128, %129 : vector<64x32xf32>
    %c0_41 = arith.constant 0 : index
    %c0_42 = arith.constant 0 : index
    %131 = vector.load %arg6[%c0_41, %c0_42] : memref<32x48xf32, #tpu.memory_space<vmem>>, vector<32x48xf32>
    %cst_43 = arith.constant dense<0.000000e+00> : vector<64x48xf32>
    %132 = tpu.matmul %130, %131, %cst_43 {dimension_numbers = #tpu.dot_dimension_numbers<[1], [0], [0], [1], [0, 0, 1, 1], [], []>} : vector<64x32xf32>, vector<32x48xf32>, vector<64x48xf32> -> vector<64x48xf32>
    %133 = vector.extract_strided_slice %132 {offsets = [0, 0], sizes = [64, 32], strides = [1, 1]} : vector<64x48xf32> to vector<64x32xf32>
    %134 = vector.extract_strided_slice %132 {offsets = [0, 32], sizes = [64, 16], strides = [1, 1]} : vector<64x48xf32> to vector<64x16xf32>
    %c0_44 = arith.constant 0 : index
    %c0_45 = arith.constant 0 : index
    %135 = vector.load %arg7[%c0_44, %c0_45] : memref<16x64xf32, #tpu.memory_space<vmem>>, vector<16x64xf32>
    %cst_46 = arith.constant dense<0.000000e+00> : vector<64x64xf32>
    %136 = tpu.matmul %134, %135, %cst_46 {dimension_numbers = #tpu.dot_dimension_numbers<[1], [0], [0], [1], [0, 0, 1, 1], [], []>} : vector<64x16xf32>, vector<16x64xf32>, vector<64x64xf32> -> vector<64x64xf32>
    %137 = vector.extract_strided_slice %136 {offsets = [0, 0], sizes = [64, 32], strides = [1, 1]} : vector<64x64xf32> to vector<64x32xf32>
    %138 = vector.extract_strided_slice %136 {offsets = [0, 32], sizes = [64, 32], strides = [1, 1]} : vector<64x64xf32> to vector<64x32xf32>
    %139 = vector.extract_strided_slice %133 {offsets = [0, 0], sizes = [64, 8], strides = [1, 1]} : vector<64x32xf32> to vector<64x8xf32>
    %140 = vector.extract_strided_slice %137 {offsets = [0, 0], sizes = [64, 8], strides = [1, 1]} : vector<64x32xf32> to vector<64x8xf32>
    %141 = vector.extract_strided_slice %138 {offsets = [0, 0], sizes = [64, 8], strides = [1, 1]} : vector<64x32xf32> to vector<64x8xf32>
    %cst_47 = arith.constant dense<0.000000e+00> : vector<64x64xf32>
    %142 = tpu.matmul %139, %140, %cst_47 {dimension_numbers = #tpu.dot_dimension_numbers<[1], [1], [0], [0], [0, 0, 1, 0], [], []>} : vector<64x8xf32>, vector<64x8xf32>, vector<64x64xf32> -> vector<64x64xf32>
    %cst_48 = arith.constant 0.353553385 : f32
    %143 = vector.broadcast %cst_48 : f32 to vector<64x64xf32>
    %144 = arith.mulf %142, %143 : vector<64x64xf32>
    %cst_49 = arith.constant dense<0xFF800000> : vector<64xf32>
    %145 = vector.multi_reduction <maximumf>, %144, %cst_49 [1] : vector<64x64xf32> to vector<64xf32>
    %146 = vector.shape_cast %145 : vector<64xf32> to vector<64x1xf32>
    %147 = vector.broadcast %146 : vector<64x1xf32> to vector<64x64xf32>
    %148 = arith.subf %144, %147 : vector<64x64xf32>
    %149 = math.exp %148 : vector<64x64xf32>
    %cst_50 = arith.constant dense<0.000000e+00> : vector<64xf32>
    %150 = vector.multi_reduction <add>, %149, %cst_50 [1] : vector<64x64xf32> to vector<64xf32>
    %151 = vector.shape_cast %150 : vector<64xf32> to vector<64x1xf32>
    %152 = tpu.reciprocal %151 {approx = true} : vector<64x1xf32> -> vector<64x1xf32>
    %153 = vector.broadcast %152 : vector<64x1xf32> to vector<64x64xf32>
    %154 = arith.mulf %149, %153 : vector<64x64xf32>
    %cst_51 = arith.constant dense<0.000000e+00> : vector<64x8xf32>
    %155 = tpu.matmul %154, %141, %cst_51 {dimension_numbers = #tpu.dot_dimension_numbers<[1], [0], [0], [1], [0, 0, 1, 1], [], []>} : vector<64x64xf32>, vector<64x8xf32>, vector<64x8xf32> -> vector<64x8xf32>
    %156 = vector.extract_strided_slice %133 {offsets = [0, 8], sizes = [64, 8], strides = [1, 1]} : vector<64x32xf32> to vector<64x8xf32>
    %157 = vector.extract_strided_slice %137 {offsets = [0, 8], sizes = [64, 8], strides = [1, 1]} : vector<64x32xf32> to vector<64x8xf32>
    %158 = vector.extract_strided_slice %138 {offsets = [0, 8], sizes = [64, 8], strides = [1, 1]} : vector<64x32xf32> to vector<64x8xf32>
    %cst_52 = arith.constant dense<0.000000e+00> : vector<64x64xf32>
    %159 = tpu.matmul %156, %157, %cst_52 {dimension_numbers = #tpu.dot_dimension_numbers<[1], [1], [0], [0], [0, 0, 1, 0], [], []>} : vector<64x8xf32>, vector<64x8xf32>, vector<64x64xf32> -> vector<64x64xf32>
    %cst_53 = arith.constant 0.353553385 : f32
    %160 = vector.broadcast %cst_53 : f32 to vector<64x64xf32>
    %161 = arith.mulf %159, %160 : vector<64x64xf32>
    %cst_54 = arith.constant dense<0xFF800000> : vector<64xf32>
    %162 = vector.multi_reduction <maximumf>, %161, %cst_54 [1] : vector<64x64xf32> to vector<64xf32>
    %163 = vector.shape_cast %162 : vector<64xf32> to vector<64x1xf32>
    %164 = vector.broadcast %163 : vector<64x1xf32> to vector<64x64xf32>
    %165 = arith.subf %161, %164 : vector<64x64xf32>
    %166 = math.exp %165 : vector<64x64xf32>
    %cst_55 = arith.constant dense<0.000000e+00> : vector<64xf32>
    %167 = vector.multi_reduction <add>, %166, %cst_55 [1] : vector<64x64xf32> to vector<64xf32>
    %168 = vector.shape_cast %167 : vector<64xf32> to vector<64x1xf32>
    %169 = tpu.reciprocal %168 {approx = true} : vector<64x1xf32> -> vector<64x1xf32>
    %170 = vector.broadcast %169 : vector<64x1xf32> to vector<64x64xf32>
    %171 = arith.mulf %166, %170 : vector<64x64xf32>
    %cst_56 = arith.constant dense<0.000000e+00> : vector<64x8xf32>
    %172 = tpu.matmul %171, %158, %cst_56 {dimension_numbers = #tpu.dot_dimension_numbers<[1], [0], [0], [1], [0, 0, 1, 1], [], []>} : vector<64x64xf32>, vector<64x8xf32>, vector<64x8xf32> -> vector<64x8xf32>
    %173 = vector.extract_strided_slice %133 {offsets = [0, 16], sizes = [64, 8], strides = [1, 1]} : vector<64x32xf32> to vector<64x8xf32>
    %174 = vector.extract_strided_slice %137 {offsets = [0, 16], sizes = [64, 8], strides = [1, 1]} : vector<64x32xf32> to vector<64x8xf32>
    %175 = vector.extract_strided_slice %138 {offsets = [0, 16], sizes = [64, 8], strides = [1, 1]} : vector<64x32xf32> to vector<64x8xf32>
    %cst_57 = arith.constant dense<0.000000e+00> : vector<64x64xf32>
    %176 = tpu.matmul %173, %174, %cst_57 {dimension_numbers = #tpu.dot_dimension_numbers<[1], [1], [0], [0], [0, 0, 1, 0], [], []>} : vector<64x8xf32>, vector<64x8xf32>, vector<64x64xf32> -> vector<64x64xf32>
    %cst_58 = arith.constant 0.353553385 : f32
    %177 = vector.broadcast %cst_58 : f32 to vector<64x64xf32>
    %178 = arith.mulf %176, %177 : vector<64x64xf32>
    %cst_59 = arith.constant dense<0xFF800000> : vector<64xf32>
    %179 = vector.multi_reduction <maximumf>, %178, %cst_59 [1] : vector<64x64xf32> to vector<64xf32>
    %180 = vector.shape_cast %179 : vector<64xf32> to vector<64x1xf32>
    %181 = vector.broadcast %180 : vector<64x1xf32> to vector<64x64xf32>
    %182 = arith.subf %178, %181 : vector<64x64xf32>
    %183 = math.exp %182 : vector<64x64xf32>
    %cst_60 = arith.constant dense<0.000000e+00> : vector<64xf32>
    %184 = vector.multi_reduction <add>, %183, %cst_60 [1] : vector<64x64xf32> to vector<64xf32>
    %185 = vector.shape_cast %184 : vector<64xf32> to vector<64x1xf32>
    %186 = tpu.reciprocal %185 {approx = true} : vector<64x1xf32> -> vector<64x1xf32>
    %187 = vector.broadcast %186 : vector<64x1xf32> to vector<64x64xf32>
    %188 = arith.mulf %183, %187 : vector<64x64xf32>
    %cst_61 = arith.constant dense<0.000000e+00> : vector<64x8xf32>
    %189 = tpu.matmul %188, %175, %cst_61 {dimension_numbers = #tpu.dot_dimension_numbers<[1], [0], [0], [1], [0, 0, 1, 1], [], []>} : vector<64x64xf32>, vector<64x8xf32>, vector<64x8xf32> -> vector<64x8xf32>
    %190 = vector.extract_strided_slice %133 {offsets = [0, 24], sizes = [64, 8], strides = [1, 1]} : vector<64x32xf32> to vector<64x8xf32>
    %191 = vector.extract_strided_slice %137 {offsets = [0, 24], sizes = [64, 8], strides = [1, 1]} : vector<64x32xf32> to vector<64x8xf32>
    %192 = vector.extract_strided_slice %138 {offsets = [0, 24], sizes = [64, 8], strides = [1, 1]} : vector<64x32xf32> to vector<64x8xf32>
    %cst_62 = arith.constant dense<0.000000e+00> : vector<64x64xf32>
    %193 = tpu.matmul %190, %191, %cst_62 {dimension_numbers = #tpu.dot_dimension_numbers<[1], [1], [0], [0], [0, 0, 1, 0], [], []>} : vector<64x8xf32>, vector<64x8xf32>, vector<64x64xf32> -> vector<64x64xf32>
    %cst_63 = arith.constant 0.353553385 : f32
    %194 = vector.broadcast %cst_63 : f32 to vector<64x64xf32>
    %195 = arith.mulf %193, %194 : vector<64x64xf32>
    %cst_64 = arith.constant dense<0xFF800000> : vector<64xf32>
    %196 = vector.multi_reduction <maximumf>, %195, %cst_64 [1] : vector<64x64xf32> to vector<64xf32>
    %197 = vector.shape_cast %196 : vector<64xf32> to vector<64x1xf32>
    %198 = vector.broadcast %197 : vector<64x1xf32> to vector<64x64xf32>
    %199 = arith.subf %195, %198 : vector<64x64xf32>
    %200 = math.exp %199 : vector<64x64xf32>
    %cst_65 = arith.constant dense<0.000000e+00> : vector<64xf32>
    %201 = vector.multi_reduction <add>, %200, %cst_65 [1] : vector<64x64xf32> to vector<64xf32>
    %202 = vector.shape_cast %201 : vector<64xf32> to vector<64x1xf32>
    %203 = tpu.reciprocal %202 {approx = true} : vector<64x1xf32> -> vector<64x1xf32>
    %204 = vector.broadcast %203 : vector<64x1xf32> to vector<64x64xf32>
    %205 = arith.mulf %200, %204 : vector<64x64xf32>
    %cst_66 = arith.constant dense<0.000000e+00> : vector<64x8xf32>
    %206 = tpu.matmul %205, %192, %cst_66 {dimension_numbers = #tpu.dot_dimension_numbers<[1], [0], [0], [1], [0, 0, 1, 1], [], []>} : vector<64x64xf32>, vector<64x8xf32>, vector<64x8xf32> -> vector<64x8xf32>
    %207 = tpu.concatenate %155, %172, %189, %206 in 1 : vector<64x8xf32>, vector<64x8xf32>, vector<64x8xf32>, vector<64x8xf32> -> vector<64x32xf32>
    %c0_67 = arith.constant 0 : index
    %c0_68 = arith.constant 0 : index
    %208 = vector.load %arg8[%c0_67, %c0_68] : memref<32x32xf32, #tpu.memory_space<vmem>>, vector<32x32xf32>
    %cst_69 = arith.constant dense<0.000000e+00> : vector<64x32xf32>
    %209 = tpu.matmul %207, %208, %cst_69 {dimension_numbers = #tpu.dot_dimension_numbers<[1], [0], [0], [1], [0, 0, 1, 1], [], []>} : vector<64x32xf32>, vector<32x32xf32>, vector<64x32xf32> -> vector<64x32xf32>
    %c0_70 = arith.constant 0 : index
    %c0_71 = arith.constant 0 : index
    %210 = vector.load %arg9[%c0_70, %c0_71] : memref<1x32xf32, #tpu.memory_space<vmem>>, vector<1x32xf32>
    %211 = vector.broadcast %210 : vector<1x32xf32> to vector<64x32xf32>
    %212 = arith.addf %209, %211 : vector<64x32xf32>
    %213 = arith.addf %212, %106 : vector<64x32xf32>
    %214 = vector.extract_strided_slice %2 {offsets = [4, 0], sizes = [1, 32], strides = [1, 1]} : vector<6x32xf32> to vector<1x32xf32>
    %215 = vector.extract_strided_slice %2 {offsets = [5, 0], sizes = [1, 32], strides = [1, 1]} : vector<6x32xf32> to vector<1x32xf32>
    %cst_72 = arith.constant dense<0.000000e+00> : vector<64xf32>
    %216 = vector.multi_reduction <add>, %213, %cst_72 [1] : vector<64x32xf32> to vector<64xf32>
    %217 = vector.shape_cast %216 : vector<64xf32> to vector<64x1xf32>
    %cst_73 = arith.constant 3.200000e+01 : f32
    %218 = vector.broadcast %cst_73 : f32 to vector<64x1xf32>
    %219 = arith.divf %217, %218 : vector<64x1xf32>
    %220 = vector.broadcast %219 : vector<64x1xf32> to vector<64x32xf32>
    %221 = arith.subf %213, %220 : vector<64x32xf32>
    %222 = arith.mulf %221, %221 : vector<64x32xf32>
    %cst_74 = arith.constant dense<0.000000e+00> : vector<64xf32>
    %223 = vector.multi_reduction <add>, %222, %cst_74 [1] : vector<64x32xf32> to vector<64xf32>
    %224 = vector.shape_cast %223 : vector<64xf32> to vector<64x1xf32>
    %cst_75 = arith.constant 3.200000e+01 : f32
    %225 = vector.broadcast %cst_75 : f32 to vector<64x1xf32>
    %226 = arith.divf %224, %225 : vector<64x1xf32>
    %227 = vector.broadcast %219 : vector<64x1xf32> to vector<64x32xf32>
    %228 = arith.subf %213, %227 : vector<64x32xf32>
    %cst_76 = arith.constant 9.99999974E-6 : f32
    %229 = vector.broadcast %cst_76 : f32 to vector<64x1xf32>
    %230 = arith.addf %226, %229 : vector<64x1xf32>
    %231 = math.rsqrt %230 : vector<64x1xf32>
    %232 = vector.broadcast %231 : vector<64x1xf32> to vector<64x32xf32>
    %233 = arith.mulf %228, %232 : vector<64x32xf32>
    %234 = vector.broadcast %214 : vector<1x32xf32> to vector<64x32xf32>
    %235 = arith.mulf %233, %234 : vector<64x32xf32>
    %236 = vector.broadcast %215 : vector<1x32xf32> to vector<64x32xf32>
    %237 = arith.addf %235, %236 : vector<64x32xf32>
    %c0_77 = arith.constant 0 : index
    %c0_78 = arith.constant 0 : index
    %238 = vector.load %arg10[%c0_77, %c0_78] : memref<32x256xf32, #tpu.memory_space<vmem>>, vector<32x256xf32>
    %cst_79 = arith.constant dense<0.000000e+00> : vector<64x256xf32>
    %239 = tpu.matmul %237, %238, %cst_79 {dimension_numbers = #tpu.dot_dimension_numbers<[1], [0], [0], [1], [0, 0, 1, 1], [], []>} : vector<64x32xf32>, vector<32x256xf32>, vector<64x256xf32> -> vector<64x256xf32>
    %c0_80 = arith.constant 0 : index
    %c0_81 = arith.constant 0 : index
    %240 = vector.load %arg11[%c0_80, %c0_81] : memref<1x256xf32, #tpu.memory_space<vmem>>, vector<1x256xf32>
    %241 = vector.broadcast %240 : vector<1x256xf32> to vector<64x256xf32>
    %242 = arith.addf %239, %241 : vector<64x256xf32>
    %243 = vector.extract_strided_slice %242 {offsets = [0, 0], sizes = [64, 128], strides = [1, 1]} : vector<64x256xf32> to vector<64x128xf32>
    %244 = vector.extract_strided_slice %242 {offsets = [0, 128], sizes = [64, 128], strides = [1, 1]} : vector<64x256xf32> to vector<64x128xf32>
    %cst_82 = arith.constant 5.000000e-01 : f32
    %245 = vector.broadcast %cst_82 : f32 to vector<64x128xf32>
    %246 = arith.mulf %245, %244 : vector<64x128xf32>
    %cst_83 = arith.constant 0.707106769 : f32
    %247 = vector.broadcast %cst_83 : f32 to vector<64x128xf32>
    %248 = arith.mulf %244, %247 : vector<64x128xf32>
    %249 = math.erf %248 : vector<64x128xf32>
    %cst_84 = arith.constant 1.000000e+00 : f32
    %250 = vector.broadcast %cst_84 : f32 to vector<64x128xf32>
    %251 = arith.addf %250, %249 : vector<64x128xf32>
    %252 = arith.mulf %246, %251 : vector<64x128xf32>
    %253 = arith.mulf %243, %252 : vector<64x128xf32>
    %c0_85 = arith.constant 0 : index
    %c0_86 = arith.constant 0 : index
    %254 = vector.load %arg12[%c0_85, %c0_86] : memref<128x32xf32, #tpu.memory_space<vmem>>, vector<128x32xf32>
    %cst_87 = arith.constant dense<0.000000e+00> : vector<64x32xf32>
    %255 = tpu.matmul %253, %254, %cst_87 {dimension_numbers = #tpu.dot_dimension_numbers<[1], [0], [0], [1], [0, 0, 1, 1], [], []>} : vector<64x128xf32>, vector<128x32xf32>, vector<64x32xf32> -> vector<64x32xf32>
    %c0_88 = arith.constant 0 : index
    %c0_89 = arith.constant 0 : index
    %256 = vector.load %arg13[%c0_88, %c0_89] : memref<1x32xf32, #tpu.memory_space<vmem>>, vector<1x32xf32>
    %257 = vector.broadcast %256 : vector<1x32xf32> to vector<64x32xf32>
    %258 = arith.addf %255, %257 : vector<64x32xf32>
    %259 = arith.addf %258, %213 : vector<64x32xf32>
    %c0_90 = arith.constant 0 : index
    %c0_91 = arith.constant 0 : index
    %c0_92 = arith.constant 0 : index
    %260 = vector.load %arg14[%c0_90, %c0_91, %c0_92] : memref<1x64x32xf32, #tpu.memory_space<vmem>>, vector<1x64x32xf32>
    %261 = vector.shape_cast %260 : vector<1x64x32xf32> to vector<64x32xf32>
    %262 = vector.shape_cast %259 : vector<64x32xf32> to vector<1x64x32xf32>
    tpu.vector_store %arg14[%c0_90, %c0_91, %c0_92], %262 {strides = array<i32>} : memref<1x64x32xf32, #tpu.memory_space<vmem>>, vector<1x64x32xf32>,
    return
  }
  func.func @transform_0(%arg0: i32) -> (i32, i32, i32) {
    %c0_i32 = arith.constant 0 : i32
    %c0_i32_0 = arith.constant 0 : i32
    %c0_i32_1 = arith.constant 0 : i32
    return %arg0, %c0_i32, %c0_i32_0 : i32, i32, i32
  }
  func.func @transform_1(%arg0: i32) -> (i32, i32) {
    %c0_i32 = arith.constant 0 : i32
    %c0_i32_0 = arith.constant 0 : i32
    %c0_i32_1 = arith.constant 0 : i32
    return %c0_i32, %c0_i32_0 : i32, i32
  }
  func.func @transform_2(%arg0: i32) -> (i32, i32) {
    %c0_i32 = arith.constant 0 : i32
    %c0_i32_0 = arith.constant 0 : i32
    %c0_i32_1 = arith.constant 0 : i32
    return %c0_i32, %c0_i32_0 : i32, i32
  }
  func.func @transform_3(%arg0: i32) -> (i32, i32) {
    %c0_i32 = arith.constant 0 : i32
    %c0_i32_0 = arith.constant 0 : i32
    %c0_i32_1 = arith.constant 0 : i32
    return %c0_i32, %c0_i32_0 : i32, i32
  }
  func.func @transform_4(%arg0: i32) -> (i32, i32) {
    %c0_i32 = arith.constant 0 : i32
    %c0_i32_0 = arith.constant 0 : i32
    %c0_i32_1 = arith.constant 0 : i32
    return %c0_i32, %c0_i32_0 : i32, i32
  }
  func.func @transform_5(%arg0: i32) -> (i32, i32) {
    %c0_i32 = arith.constant 0 : i32
    %c0_i32_0 = arith.constant 0 : i32
    %c0_i32_1 = arith.constant 0 : i32
    return %c0_i32, %c0_i32_0 : i32, i32
  }
  func.func @transform_6(%arg0: i32) -> (i32, i32) {
    %c0_i32 = arith.constant 0 : i32
    %c0_i32_0 = arith.constant 0 : i32
    %c0_i32_1 = arith.constant 0 : i32
    return %c0_i32, %c0_i32_0 : i32, i32
  }
  func.func @transform_7(%arg0: i32) -> (i32, i32) {
    %c0_i32 = arith.constant 0 : i32
    %c0_i32_0 = arith.constant 0 : i32
    %c0_i32_1 = arith.constant 0 : i32
    return %c0_i32, %c0_i32_0 : i32, i32
  }
  func.func @transform_8(%arg0: i32) -> (i32, i32) {
    %c0_i32 = arith.constant 0 : i32
    %c0_i32_0 = arith.constant 0 : i32
    %c0_i32_1 = arith.constant 0 : i32
    return %c0_i32, %c0_i32_0 : i32, i32
  }
  func.func @transform_9(%arg0: i32) -> (i32, i32) {
    %c0_i32 = arith.constant 0 : i32
    %c0_i32_0 = arith.constant 0 : i32
    %c0_i32_1 = arith.constant 0 : i32
    return %c0_i32, %c0_i32_0 : i32, i32
  }
  func.func @transform_10(%arg0: i32) -> (i32, i32) {
    %c0_i32 = arith.constant 0 : i32
    %c0_i32_0 = arith.constant 0 : i32
    %c0_i32_1 = arith.constant 0 : i32
    return %c0_i32, %c0_i32_0 : i32, i32
  }
  func.func @transform_11(%arg0: i32) -> (i32, i32) {
    %c0_i32 = arith.constant 0 : i32
    %c0_i32_0 = arith.constant 0 : i32
    %c0_i32_1 = arith.constant 0 : i32
    return %c0_i32, %c0_i32_0 : i32, i32
  }
  func.func @transform_12(%arg0: i32) -> (i32, i32) {
    %c0_i32 = arith.constant 0 : i32
    %c0_i32_0 = arith.constant 0 : i32
    %c0_i32_1 = arith.constant 0 : i32
    return %c0_i32, %c0_i32_0 : i32, i32
  }
  func.func @transform_13(%arg0: i32) -> (i32, i32, i32) {
    %c0_i32 = arith.constant 0 : i32
    %c0_i32_0 = arith.constant 0 : i32
    %c0_i32_1 = arith.constant 0 : i32
    return %arg0, %c0_i32, %c0_i32_0 : i32, i32, i32
  }
}

</mosaic_0001>

<bundles_post_ra>
// kernel: spatial_transformer_forward.5
= control target key start
LH: loop header
LB: loop body
LE: loop exit
PB: predicated region body
PF: predicated region fallthrough
CT: control target
= control target key end

     0   :  { %s975_s15 = smov 0   ;;  %s1191_s0 = inlined_call_operand.vmem [shape: f32[2,256,32], index: 0, kind: input, shape index: {}]   ;;  %s1192_s1 = inlined_call_operand.vmem [shape: f32[2,64,32], index: 1, kind: input, shape index: {}]   ;;  %s1193_s2 = inlined_call_operand.vmem [shape: f32[2,256,32], index: 2, kind: input, shape index: {}]   ;;  %s1194_s3 = inlined_call_operand.vmem [shape: f32[32,32], index: 3, kind: input, shape index: {}]   ;;  %s1195_s4 = inlined_call_operand.vmem [shape: f32[2,256,32], index: 4, kind: output, shape index: {}]  }
   0x1 LB: > { %s779_s16 = sadd.s32 4294967295, %s948_s15   ;;  %p783_p0 = scmp.ge.s32.totalorder %s948_s15, 1  ;;  %s948_s15 = sphi %s975_s15, %s14_s15  }
   0x2   : > { %p182_p1 = scmp.lt.s32.totalorder %s948_s15, 3 }
   0x4   : > { %p183_p2 = pnand %p783_p0, %p182_p1 }
   0x5   : > { %v310_v0 = vld [vmem:[%s1194_s3] sm:$0xff] (!%p183_p2)  ;;  %v311_v1 = vld [vmem:[%s1194_s3 + $0x8] sm:$0xff] (!%p183_p2)  ;;  %v312_v2 = vld [vmem:[%s1194_s3 + $0x10] sm:$0xff] (!%p183_p2)  ;;  %p218_p3 = scmp.lt.s32.totalorder (!%p183_p2), %s779_s16, 1  ;;  %vm346_vm0 = vcmask (!%p183_p2), 261120  }
   0x6   : > { %186 = sbr.rel (%p183_p2) target bundleno = 266 (0x10a), region = 36  ;;  %v922_v3 = vpack.c.bf16 (!%p183_p2), %v311_v1, %v310_v0  ;;  %v313_v4 = vld [vmem:[%s1194_s3 + $0x18] sm:$0xff] (!%p183_p2) }
   0x7   : > { %v926_v5 = vpack.c.bf16 (!%p183_p2), %v313_v4, %v312_v2 }
   0x8   : > { %923 = vmatprep.subr.bf16.mxu0 (!%p183_p2), %v922_v3  ;;  %930 = vmatprep.subr.bf16.mxu1 (!%p183_p2), %v922_v3 }
   0x9   : > { %925 = vmatpush3.bf16.msra.mxu0 (!%p183_p2), %v922_v3  ;;  %932 = vmatpush3.bf16.msra.mxu1 (!%p183_p2), %v922_v3 }
   0xa   : > { %927 = vmatprep.subr.bf16.mxu0 (!%p183_p2), %v926_v5  ;;  %931 = vmatprep.subr.bf16.mxu1 (!%p183_p2), %v926_v5 }
   0xd   : > { %s1197_s16 = smov (!%p218_p3, %s779_s16), 1  ;;  %929 = vmatpush3.bf16.msra.mxu0 %v926_v5  ;;  %933 = vmatpush3.bf16.msra.mxu1 %v926_v5 }
   0xe   : > { %s995_s25 = sshll.u32 %s1197_s16, 8  ;;  %s827_s26 = sshll.u32 %s1197_s16, 6 }
   0xf   : > { %s1001_s29 = scalar_lea.vmem %s1191_s0, %s995_s25  ;;  %s1006_s6 = scalar_lea.vmem %s1192_s1, %s827_s26 }
  0x10   : > { %v238_v6 = vld [vmem:[%s1001_s29] sm:$0xff]  ;;  %v239_v11 = vld [vmem:[%s1001_s29 + $0x8] sm:$0xff]  ;;  %v240_v16 = vld [vmem:[%s1001_s29 + $0x10] sm:$0xff]  ;;  %s1084_s9 = scalar_lea.vmem %s1193_s2, %s995_s25  ;;  %s1094_s12 = scalar_lea.vmem %s1195_s4, %s995_s25 }
  0x11   : > { %v270_v7 = vld [vmem:[%s1006_s6] sm:$0xff]  ;;  %v271_v12 = vld [vmem:[%s1006_s6 + $0x8] sm:$0xff]  ;;  %v272_v17 = vld [vmem:[%s1006_s6 + $0x10] sm:$0xff] }
  0x12   : > { %v254_v8 = vld [vmem:[%s1001_s29 + $0x80] sm:$0xff]  ;;  %v278_v9 = vadd.f32 %v270_v7, %v238_v6  ;;  %v255_v13 = vld [vmem:[%s1001_s29 + $0x88] sm:$0xff]  ;;  %v279_v14 = vadd.f32 %v271_v12, %v239_v11  ;;  %v256_v18 = vld [vmem:[%s1001_s29 + $0x90] sm:$0xff]  ;;  %v280_v19 = vadd.f32 %v272_v17, %v240_v16 }
  0x13   : > { %v294_v10 = vadd.f32 %v270_v7, %v254_v8  ;;  %v295_v15 = vadd.f32 %v271_v12, %v255_v13  ;;  %v296_v20 = vadd.f32 %v272_v17, %v256_v18  ;;  %v241_v21 = vld [vmem:[%s1001_s29 + $0x18] sm:$0xff]  ;;  %v242_v24 = vld [vmem:[%s1001_s29 + $0x20] sm:$0xff]  ;;  %v243_v31 = vld [vmem:[%s1001_s29 + $0x28] sm:$0xff] }
  0x14   : > { %874 = vmatprep.mubr.msk.f32.mxu0 %vm346_vm0, %v278_v9  ;;  %v273_v22 = vld [vmem:[%s1006_s6 + $0x18] sm:$0xff]  ;;  %v274_v25 = vld [vmem:[%s1006_s6 + $0x20] sm:$0xff]  ;;  %v275_v32 = vld [vmem:[%s1006_s6 + $0x28] sm:$0xff] }
  0x15   : > { %898 = vmatprep.mubr.msk.f32.mxu1 %vm346_vm0, %v294_v10  ;;  %v257_v23 = vld [vmem:[%s1001_s29 + $0x98] sm:$0xff]  ;;  %v258_v26 = vld [vmem:[%s1001_s29 + $0xa0] sm:$0xff]  ;;  %875 = vmatmul.mubr.msk.f32.vlgmr.msra.gmra.mrb[0].mxu0 %vm346_vm0, %v279_v14  ;;  %v281_v27 = vadd.f32 %v273_v22, %v241_v21  ;;  %v282_v29 = vadd.f32 %v274_v25, %v242_v24  ;;  %v259_v33 = vld [vmem:[%s1001_s29 + $0xa8] sm:$0xff]  ;;  %v283_v37 = vadd.f32 %v275_v32, %v243_v31 }
  0x16   : > { %899 = vmatmul.mubr.msk.f32.vlgmr.msra.gmra.mrb[0].mxu1 %vm346_vm0, %v295_v15  ;;  %v297_v28 = vadd.f32 %v273_v22, %v257_v23  ;;  %877 = vmatprep.mubr.msk.f32.mxu0 %vm346_vm0, %v280_v19  ;;  %v298_v30 = vadd.f32 %v274_v25, %v258_v26  ;;  %v244_v34 = vld [vmem:[%s1001_s29 + $0x30] sm:$0xff]  ;;  %v299_v38 = vadd.f32 %v275_v32, %v259_v33  ;;  %v245_v41 = vld [vmem:[%s1001_s29 + $0x38] sm:$0xff]  ;;  %v246_v44 = vld [vmem:[%s1001_s29 + $0x40] sm:$0xff] }
  0x17   : > { %901 = vmatprep.mubr.msk.f32.mxu1 %vm346_vm0, %v296_v20  ;;  %v276_v35 = vld [vmem:[%s1006_s6 + $0x30] sm:$0xff]  ;;  %v277_v42 = vld [vmem:[%s1006_s6 + $0x38] sm:$0xff]  ;;  %v262_v45 = vld [vmem:[%s1001_s29 + $0xc0] sm:$0xff]  ;;  %v286_v48 = vadd.f32 %v270_v7, %v246_v44 }
  0x18   : > { %v260_v36 = vld [vmem:[%s1001_s29 + $0xb0] sm:$0xff]  ;;  %v284_v39 = vadd.f32 %v276_v35, %v244_v34  ;;  %v261_v43 = vld [vmem:[%s1001_s29 + $0xb8] sm:$0xff]  ;;  %v285_v46 = vadd.f32 %v277_v42, %v245_v41  ;;  %v302_v49 = vadd.f32 %v270_v7, %v262_v45  ;;  %v247_v50 = vld [vmem:[%s1001_s29 + $0x48] sm:$0xff] }
  0x19   : > { %878 = vmatmul.mubr.msk.f32.gmra.mrb[2].mxu0 %vm346_vm0, %v281_v27  ;;  %v300_v40 = vadd.f32 %v276_v35, %v260_v36  ;;  %v301_v47 = vadd.f32 %v277_v42, %v261_v43  ;;  %v263_v51 = vld [vmem:[%s1001_s29 + $0xc8] sm:$0xff]  ;;  %v248_v52 = vld [vmem:[%s1001_s29 + $0x50] sm:$0xff]  ;;  %v287_v54 = vadd.f32 %v271_v12, %v247_v50  ;;  %v249_v58 = vld [vmem:[%s1001_s29 + $0x58] sm:$0xff] }
  0x1a   : > { %902 = vmatmul.mubr.msk.f32.gmra.mrb[2].mxu1 %vm346_vm0, %v297_v28  ;;  %880 = vmatprep.mubr.msk.f32.mxu0 %vm346_vm0, %v282_v29  ;;  %v264_v53 = vld [vmem:[%s1001_s29 + $0xd0] sm:$0xff]  ;;  %v303_v55 = vadd.f32 %v271_v12, %v263_v51  ;;  %v288_v56 = vadd.f32 %v272_v17, %v248_v52  ;;  %v265_v59 = vld [vmem:[%s1001_s29 + $0xd8] sm:$0xff]  ;;  %v250_v60 = vld [vmem:[%s1001_s29 + $0x60] sm:$0xff]  ;;  %v289_v62 = vadd.f32 %v273_v22, %v249_v58 }
  0x1b   : > { %904 = vmatprep.mubr.msk.f32.mxu1 %vm346_vm0, %v298_v30  ;;  %v304_v57 = vadd.f32 %v272_v17, %v264_v53  ;;  %v266_v61 = vld [vmem:[%s1001_s29 + $0xe0] sm:$0xff]  ;;  %v305_v63 = vadd.f32 %v273_v22, %v265_v59  ;;  %v290_v0 = vadd.f32 %v274_v25, %v250_v60  ;;  %v251_v2 = vld [vmem:[%s1001_s29 + $0x68] sm:$0xff]  ;;  %v252_v4 = vld [vmem:[%s1001_s29 + $0x70] sm:$0xff] }
  0x1c   : > { %v306_v1 = vadd.f32 %v274_v25, %v266_v61  ;;  %v267_v3 = vld [vmem:[%s1001_s29 + $0xe8] sm:$0xff]  ;;  %v268_v5 = vld [vmem:[%s1001_s29 + $0xf0] sm:$0xff]  ;;  %v291_v6 = vadd.f32 %v275_v32, %v251_v2  ;;  %v292_v8 = vadd.f32 %v276_v35, %v252_v4  ;;  %v253_v10 = vld [vmem:[%s1001_s29 + $0x78] sm:$0xff] }
  0x1d   : > { %881 = vmatmul.mubr.msk.f32.gmra.mrb[4].mxu0 %vm346_vm0, %v283_v37  ;;  %v307_v7 = vadd.f32 %v275_v32, %v267_v3  ;;  %v308_v9 = vadd.f32 %v276_v35, %v268_v5  ;;  %v269_v11 = vld [vmem:[%s1001_s29 + $0xf8] sm:$0xff]  ;;  %v293_v12 = vadd.f32 %v277_v42, %v253_v10  ;;  %v315_v14 = vld [vmem:[%s1084_s9 + $0x8] sm:$0xff]  ;;  %v314_v16 = vld [vmem:[%s1084_s9] sm:$0xff] }
  0x1e   : > { %905 = vmatmul.mubr.msk.f32.gmra.mrb[4].mxu1 %vm346_vm0, %v299_v38  ;;  %883 = vmatprep.mubr.msk.f32.mxu0 %vm346_vm0, %v284_v39  ;;  %v309_v13 = vadd.f32 %v277_v42, %v269_v11  ;;  %v331_v15 = vld [vmem:[%s1084_s9 + $0x88] sm:$0xff]  ;;  %v330_v17 = vld [vmem:[%s1084_s9 + $0x80] sm:$0xff]  ;;  %v317_v26 = vld [vmem:[%s1084_s9 + $0x18] sm:$0xff] }
  0x1f   : > { %907 = vmatprep.mubr.msk.f32.mxu1 %vm346_vm0, %v300_v40  ;;  %v333_v27 = vld [vmem:[%s1084_s9 + $0x98] sm:$0xff]  ;;  %v316_v28 = vld [vmem:[%s1084_s9 + $0x10] sm:$0xff]  ;;  %v319_v38 = vld [vmem:[%s1084_s9 + $0x28] sm:$0xff] }
  0x20   : > { %v332_v29 = vld [vmem:[%s1084_s9 + $0x90] sm:$0xff]  ;;  %v335_v39 = vld [vmem:[%s1084_s9 + $0xa8] sm:$0xff]  ;;  %v318_v40 = vld [vmem:[%s1084_s9 + $0x20] sm:$0xff] }
  0x21   : > { %884 = vmatmul.mubr.msk.f32.gmra.mrb[6].mxu0 %vm346_vm0, %v285_v46  ;;  %v334_v41 = vld [vmem:[%s1084_s9 + $0xa0] sm:$0xff]  ;;  %v321_v50 = vld [vmem:[%s1084_s9 + $0x38] sm:$0xff]  ;;  %v320_v52 = vld [vmem:[%s1084_s9 + $0x30] sm:$0xff] }
  0x22   : > { %908 = vmatmul.mubr.msk.f32.gmra.mrb[6].mxu1 %vm346_vm0, %v301_v47  ;;  %886 = vmatprep.mubr.msk.f32.mxu0 %vm346_vm0, %v286_v48  ;;  %v337_v51 = vld [vmem:[%s1084_s9 + $0xb8] sm:$0xff]  ;;  %v336_v53 = vld [vmem:[%s1084_s9 + $0xb0] sm:$0xff] }
  0x23   : > { %910 = vmatprep.mubr.msk.f32.mxu1 %vm346_vm0, %v302_v49  ;;  %v325_v10 = vld [vmem:[%s1084_s9 + $0x58] sm:$0xff] }
  0x24   : > { %v341_v11 = vld [vmem:[%s1084_s9 + $0xd8] sm:$0xff] }
  0x25   : > { %887 = vmatmul.mubr.msk.f32.gmra.mrb[8].mxu0 %vm346_vm0, %v287_v54 }
  0x26   : > { %911 = vmatmul.mubr.msk.f32.gmra.mrb[8].mxu1 %vm346_vm0, %v303_v55  ;;  %889 = vmatprep.mubr.msk.f32.mxu0 %vm346_vm0, %v288_v56 }
  0x27   : > { %913 = vmatprep.mubr.msk.f32.mxu1 %vm346_vm0, %v304_v57 }
  0x29   : > { %890 = vmatmul.mubr.msk.f32.gmra.mrb[10].mxu0 %vm346_vm0, %v289_v62  ;;  %v323_v62 = vld [vmem:[%s1084_s9 + $0x48] sm:$0xff] }
  0x2a   : > { %914 = vmatmul.mubr.msk.f32.gmra.mrb[10].mxu1 %vm346_vm0, %v305_v63  ;;  %892 = vmatprep.mubr.msk.f32.mxu0 %vm346_vm0, %v290_v0  ;;  %v339_v63 = vld [vmem:[%s1084_s9 + $0xc8] sm:$0xff]  ;;  %v322_v0 = vld [vmem:[%s1084_s9 + $0x40] sm:$0xff] }
  0x2b   : > { %916 = vmatprep.mubr.msk.f32.mxu1 %vm346_vm0, %v306_v1  ;;  %v338_v1 = vld [vmem:[%s1084_s9 + $0xc0] sm:$0xff] }
  0x2d   : > { %893 = vmatmul.mubr.msk.f32.gmra.mrb[12].mxu0 %vm346_vm0, %v291_v6 }
  0x2e   : > { %917 = vmatmul.mubr.msk.f32.gmra.mrb[12].mxu1 %vm346_vm0, %v307_v7  ;;  %895 = vmatprep.mubr.msk.f32.mxu0 %vm346_vm0, %v292_v8 }
  0x2f   : > { %919 = vmatprep.mubr.msk.f32.mxu1 %vm346_vm0, %v308_v9 }
  0x31   : > { %896 = vmatmul.mubr.msk.f32.gmra.mrb[14].mxu0 %vm346_vm0, %v293_v12  ;;  %v324_v12 = vld [vmem:[%s1084_s9 + $0x50] sm:$0xff] }
  0x32   : > { %920 = vmatmul.mubr.msk.f32.gmra.mrb[14].mxu1 %vm346_vm0, %v309_v13  ;;  %v340_v13 = vld [vmem:[%s1084_s9 + $0xd0] sm:$0xff] }
  0xe8   : > { %v876_v18 = vpop.f32.mrb[0].mxu0 }
  0xe9   : > { %v900_v19 = vpop.f32.mrb[0].mxu1  ;;  %v515_v20 = vadd.f32 %v876_v18, %v315_v14  ;;  %v509_v22 = vpop.f32.mrb[1].mxu0 }
  0xea   : > { %v595_v21 = vadd.f32 %v900_v19, %v331_v15  ;;  %v589_v23 = vpop.f32.mrb[1].mxu1  ;;  %v510_v24 = vadd.f32 %v509_v22, %v314_v16  ;;  %v327_v22 = vld [vmem:[%s1084_s9 + $0x68] sm:$0xff] }
  0xeb   : > { %v590_v25 = vadd.f32 %v589_v23, %v330_v17  ;;  %669 = vst.msk [vmem:[%s1094_s12 + $0x8] sm:$0xff] %vm346_vm0, %v515_v20  ;;  %v343_v23 = vld [vmem:[%s1084_s9 + $0xe8] sm:$0xff] }
  0xec   : > { %685 = vst.msk [vmem:[%s1094_s12 + $0x88] sm:$0xff] %vm346_vm0, %v595_v21  ;;  %668 = vst.msk [vmem:[%s1094_s12] sm:$0xff] %vm346_vm0, %v510_v24  ;;  %v879_v30 = vpop.f32.mrb[2].mxu0  ;;  %v326_v24 = vld [vmem:[%s1084_s9 + $0x60] sm:$0xff] }
  0xed   : > { %684 = vst.msk [vmem:[%s1094_s12 + $0x80] sm:$0xff] %vm346_vm0, %v590_v25  ;;  %v903_v31 = vpop.f32.mrb[2].mxu1  ;;  %v525_v32 = vadd.f32 %v879_v30, %v317_v26  ;;  %v519_v34 = vpop.f32.mrb[3].mxu0  ;;  %v342_v25 = vld [vmem:[%s1084_s9 + $0xe0] sm:$0xff] }
  0xee   : > { %v605_v33 = vadd.f32 %v903_v31, %v333_v27  ;;  %v599_v35 = vpop.f32.mrb[3].mxu1  ;;  %v520_v36 = vadd.f32 %v519_v34, %v316_v28  ;;  %v329_v34 = vld [vmem:[%s1084_s9 + $0x78] sm:$0xff] }
  0xef   : > { %v600_v37 = vadd.f32 %v599_v35, %v332_v29  ;;  %671 = vst.msk [vmem:[%s1094_s12 + $0x18] sm:$0xff] %vm346_vm0, %v525_v32  ;;  %v345_v35 = vld [vmem:[%s1084_s9 + $0xf8] sm:$0xff] }
  0xf0   : > { %687 = vst.msk [vmem:[%s1094_s12 + $0x98] sm:$0xff] %vm346_vm0, %v605_v33  ;;  %670 = vst.msk [vmem:[%s1094_s12 + $0x10] sm:$0xff] %vm346_vm0, %v520_v36  ;;  %v882_v42 = vpop.f32.mrb[4].mxu0  ;;  %v328_v36 = vld [vmem:[%s1084_s9 + $0x70] sm:$0xff] }
  0xf1   : > { %686 = vst.msk [vmem:[%s1094_s12 + $0x90] sm:$0xff] %vm346_vm0, %v600_v37  ;;  %v906_v43 = vpop.f32.mrb[4].mxu1  ;;  %v535_v44 = vadd.f32 %v882_v42, %v319_v38  ;;  %v529_v46 = vpop.f32.mrb[5].mxu0  ;;  %v344_v37 = vld [vmem:[%s1084_s9 + $0xf0] sm:$0xff] }
  0xf2   : > { %v615_v45 = vadd.f32 %v906_v43, %v335_v39  ;;  %v609_v47 = vpop.f32.mrb[5].mxu1  ;;  %v530_v48 = vadd.f32 %v529_v46, %v318_v40 }
  0xf3   : > { %v610_v49 = vadd.f32 %v609_v47, %v334_v41  ;;  %673 = vst.msk [vmem:[%s1094_s12 + $0x28] sm:$0xff] %vm346_vm0, %v535_v44 }
  0xf4   : > { %689 = vst.msk [vmem:[%s1094_s12 + $0xa8] sm:$0xff] %vm346_vm0, %v615_v45  ;;  %672 = vst.msk [vmem:[%s1094_s12 + $0x20] sm:$0xff] %vm346_vm0, %v530_v48  ;;  %v885_v54 = vpop.f32.mrb[6].mxu0 }
  0xf5   : > { %688 = vst.msk [vmem:[%s1094_s12 + $0xa0] sm:$0xff] %vm346_vm0, %v610_v49  ;;  %v909_v55 = vpop.f32.mrb[6].mxu1  ;;  %v545_v56 = vadd.f32 %v885_v54, %v321_v50  ;;  %v539_v58 = vpop.f32.mrb[7].mxu0 }
  0xf6   : > { %v625_v57 = vadd.f32 %v909_v55, %v337_v51  ;;  %v619_v59 = vpop.f32.mrb[7].mxu1  ;;  %v540_v60 = vadd.f32 %v539_v58, %v320_v52 }
  0xf7   : > { %v620_v61 = vadd.f32 %v619_v59, %v336_v53  ;;  %675 = vst.msk [vmem:[%s1094_s12 + $0x38] sm:$0xff] %vm346_vm0, %v545_v56 }
  0xf8   : > { %691 = vst.msk [vmem:[%s1094_s12 + $0xb8] sm:$0xff] %vm346_vm0, %v625_v57  ;;  %674 = vst.msk [vmem:[%s1094_s12 + $0x30] sm:$0xff] %vm346_vm0, %v540_v60  ;;  %v888_v2 = vpop.f32.mrb[8].mxu0 }
  0xf9   : > { %690 = vst.msk [vmem:[%s1094_s12 + $0xb0] sm:$0xff] %vm346_vm0, %v620_v61  ;;  %v912_v3 = vpop.f32.mrb[8].mxu1  ;;  %v555_v4 = vadd.f32 %v888_v2, %v323_v62  ;;  %v549_v6 = vpop.f32.mrb[9].mxu0 }
  0xfa   : > { %v635_v5 = vadd.f32 %v912_v3, %v339_v63  ;;  %v629_v7 = vpop.f32.mrb[9].mxu1  ;;  %v550_v8 = vadd.f32 %v549_v6, %v322_v0 }
  0xfb   : > { %v630_v9 = vadd.f32 %v629_v7, %v338_v1  ;;  %677 = vst.msk [vmem:[%s1094_s12 + $0x48] sm:$0xff] %vm346_vm0, %v555_v4 }
  0xfc   : > { %693 = vst.msk [vmem:[%s1094_s12 + $0xc8] sm:$0xff] %vm346_vm0, %v635_v5  ;;  %676 = vst.msk [vmem:[%s1094_s12 + $0x40] sm:$0xff] %vm346_vm0, %v550_v8  ;;  %v891_v14 = vpop.f32.mrb[10].mxu0 }
  0xfd   : > { %692 = vst.msk [vmem:[%s1094_s12 + $0xc0] sm:$0xff] %vm346_vm0, %v630_v9  ;;  %v915_v15 = vpop.f32.mrb[10].mxu1  ;;  %v565_v16 = vadd.f32 %v891_v14, %v325_v10  ;;  %v559_v18 = vpop.f32.mrb[11].mxu0 }
  0xfe   : > { %v645_v17 = vadd.f32 %v915_v15, %v341_v11  ;;  %v639_v19 = vpop.f32.mrb[11].mxu1  ;;  %v560_v20 = vadd.f32 %v559_v18, %v324_v12 }
  0xff   : > { %v640_v21 = vadd.f32 %v639_v19, %v340_v13  ;;  %679 = vst.msk [vmem:[%s1094_s12 + $0x58] sm:$0xff] %vm346_vm0, %v565_v16 }
 0x100   : > { %695 = vst.msk [vmem:[%s1094_s12 + $0xd8] sm:$0xff] %vm346_vm0, %v645_v17  ;;  %678 = vst.msk [vmem:[%s1094_s12 + $0x50] sm:$0xff] %vm346_vm0, %v560_v20  ;;  %v894_v26 = vpop.f32.mrb[12].mxu0 }
 0x101   : > { %694 = vst.msk [vmem:[%s1094_s12 + $0xd0] sm:$0xff] %vm346_vm0, %v640_v21  ;;  %v918_v27 = vpop.f32.mrb[12].mxu1  ;;  %v575_v28 = vadd.f32 %v894_v26, %v327_v22  ;;  %v569_v30 = vpop.f32.mrb[13].mxu0 }
 0x102   : > { %v655_v29 = vadd.f32 %v918_v27, %v343_v23  ;;  %v649_v31 = vpop.f32.mrb[13].mxu1  ;;  %v570_v32 = vadd.f32 %v569_v30, %v326_v24 }
 0x103   : > { %v650_v33 = vadd.f32 %v649_v31, %v342_v25  ;;  %681 = vst.msk [vmem:[%s1094_s12 + $0x68] sm:$0xff] %vm346_vm0, %v575_v28 }
 0x104   : > { %697 = vst.msk [vmem:[%s1094_s12 + $0xe8] sm:$0xff] %vm346_vm0, %v655_v29  ;;  %680 = vst.msk [vmem:[%s1094_s12 + $0x60] sm:$0xff] %vm346_vm0, %v570_v32  ;;  %v897_v38 = vpop.f32.mrb[14].mxu0 }
 0x105   : > { %696 = vst.msk [vmem:[%s1094_s12 + $0xe0] sm:$0xff] %vm346_vm0, %v650_v33  ;;  %v921_v39 = vpop.f32.mrb[14].mxu1  ;;  %v585_v40 = vadd.f32 %v897_v38, %v329_v34  ;;  %v579_v42 = vpop.f32.mrb[15].mxu0 }
 0x106   : > { %v665_v41 = vadd.f32 %v921_v39, %v345_v35  ;;  %v659_v43 = vpop.f32.mrb[15].mxu1  ;;  %v580_v44 = vadd.f32 %v579_v42, %v328_v36 }
 0x107   : > { %v660_v45 = vadd.f32 %v659_v43, %v344_v37  ;;  %683 = vst.msk [vmem:[%s1094_s12 + $0x78] sm:$0xff] %vm346_vm0, %v585_v40 }
 0x108   : > { %699 = vst.msk [vmem:[%s1094_s12 + $0xf8] sm:$0xff] %vm346_vm0, %v665_v41  ;;  %682 = vst.msk [vmem:[%s1094_s12 + $0x70] sm:$0xff] %vm346_vm0, %v580_v44 }
 0x109   : > { %698 = vst.msk [vmem:[%s1094_s12 + $0xf0] sm:$0xff] %vm346_vm0, %v660_v45 }
 0x10a PF: > { %s14_s15 = sadd.s32 1, %s948_s15  }
 0x10b   : > { %p11_p4 = scmp.ge.s32.totalorder %s14_s15, 4  }
 0x10d   :  { %13 = sbr.rel (!%p11_p4) target bundleno = 1 (0x1), region = 72 }

// kernel: spatial_transformer_forward.3
= control target key start
LH: loop header
LB: loop body
LE: loop exit
PB: predicated region body
PF: predicated region fallthrough
CT: control target
= control target key end

     0   :  { %s2014_s18 = smov 0   ;;  %s2784_s0 = inlined_call_operand.vmem [shape: f32[2,256,32], index: 0, kind: input, shape index: {}]   ;;  %s2785_s1 = inlined_call_operand.vmem [shape: f32[2,32], index: 1, kind: input, shape index: {}]   ;;  %s2786_s2 = inlined_call_operand.vmem [shape: f32[32,32], index: 2, kind: input, shape index: {}]   ;;  %s2787_s3 = inlined_call_operand.vmem [shape: f32[4,32,32], index: 3, kind: input, shape index: {}]   ;;  %s2788_s4 = inlined_call_operand.vmem [shape: f32[2,256,32], index: 4, kind: output, shape index: {0}]   ;;  %s2789_s5 = inlined_call_operand.vmem [shape: f32[2,64,32], index: 5, kind: output, shape index: {1}]  }
   0x1 LB: > { %s1588_s19 = sadd.s32 4294967295, %s1982_s18   ;;  %p1592_p0 = scmp.ge.s32.totalorder %s1982_s18, 1  ;;  %s1982_s18 = sphi %s2014_s18, %s16_s18  }
   0x2   : > { %p190_p1 = scmp.lt.s32.totalorder %s1982_s18, 3 }
   0x4   : > { %p191_p2 = pnand %p1592_p0, %p190_p1 }
   0x5   : > { %v584_v0 = vld [vmem:[%s2786_s2] sm:$0xff] (!%p191_p2)  ;;  %v585_v1 = vld [vmem:[%s2786_s2 + $0x8] sm:$0xff] (!%p191_p2)  ;;  %v586_v2 = vld [vmem:[%s2786_s2 + $0x10] sm:$0xff] (!%p191_p2)  ;;  %p223_p3 = scmp.lt.s32.totalorder (!%p191_p2), %s1588_s19, 1  ;;  %vm270_vm0 = vcmask (!%p191_p2), 261120  }
   0x6   : > { %194 = sbr.rel (%p191_p2) target bundleno = 699 (0x2bb), region = 36  ;;  %v1902_v3 = vpack.c.bf16 (!%p191_p2), %v585_v1, %v584_v0  ;;  %v587_v4 = vld [vmem:[%s2786_s2 + $0x18] sm:$0xff] (!%p191_p2) }
   0x7   : > { %v1906_v5 = vpack.c.bf16 (!%p191_p2), %v587_v4, %v586_v2 }
   0x8   : > { %1903 = vmatprep.subr.bf16.mxu0 (!%p191_p2), %v1902_v3 }
   0x9   : > { %1905 = vmatpush3.bf16.msra.mxu0 (!%p191_p2), %v1902_v3 }
   0xa   : > { %1907 = vmatprep.subr.bf16.mxu0 (!%p191_p2), %v1906_v5 }
   0xd   : > { %s2791_s19 = smov (!%p223_p3, %s1588_s19), 1  ;;  %1909 = vmatpush3.bf16.msra.mxu0 %v1906_v5 }
   0xe   : > { %s1679_s28 = sshll.u32 %s2791_s19, 8  ;;  %s1681_s25 = sshll.u32 %s2791_s19, 6 }
   0xf   : > { %s2042_s6 = scalar_lea.vmem %s2784_s0, %s1679_s28  ;;  %s2625_s27 = scalar_lea.vmem %s2788_s4, %s1679_s28 }
  0x10   : > { %v2045_v6 = vld [vmem:[%s2042_s6] sm:$0xff]  ;;  %v2048_v7 = vld [vmem:[%s2042_s6 + $0x8] sm:$0xff]  ;;  %v2051_v8 = vld [vmem:[%s2042_s6 + $0x10] sm:$0xff]  ;;  %s237_s28 = scalar_lea.vmem %s2789_s5, %s1681_s25 }
  0x11   : > { %v2054_v9 = vld [vmem:[%s2042_s6 + $0x18] sm:$0xff]  ;;  %v271_v10 = vsel %vm270_vm0, %v2045_v6, 0.0  ;;  %v272_v11 = vsel %vm270_vm0, %v2048_v7, 0.0  ;;  %v274_v12 = vsel %vm270_vm0, %v2051_v8, 0.0  ;;  %v2063_v13 = vld [vmem:[%s2042_s6 + $0x20] sm:$0xff]  ;;  %v2068_v16 = vld [vmem:[%s2042_s6 + $0x28] sm:$0xff] }
  0x12   : > { %v273_v14 = vadd.f32 %v272_v11, %v271_v10  ;;  %v276_v15 = vsel %vm270_vm0, %v2054_v9, 0.0  ;;  %v278_v18 = vsel %vm270_vm0, %v2063_v13, 0.0  ;;  %v2073_v19 = vld [vmem:[%s2042_s6 + $0x30] sm:$0xff]  ;;  %v280_v21 = vsel %vm270_vm0, %v2068_v16, 0.0  ;;  %v2078_v22 = vld [vmem:[%s2042_s6 + $0x38] sm:$0xff]  ;;  %v2083_v25 = vld [vmem:[%s2042_s6 + $0x40] sm:$0xff] }
  0x13   : > { %v282_v24 = vsel %vm270_vm0, %v2073_v19, 0.0  ;;  %v284_v27 = vsel %vm270_vm0, %v2078_v22, 0.0  ;;  %v2088_v28 = vld [vmem:[%s2042_s6 + $0x48] sm:$0xff]  ;;  %v286_v30 = vsel %vm270_vm0, %v2083_v25, 0.0  ;;  %v2093_v31 = vld [vmem:[%s2042_s6 + $0x50] sm:$0xff]  ;;  %v2098_v34 = vld [vmem:[%s2042_s6 + $0x58] sm:$0xff] }
  0x14   : > { %v275_v17 = vadd.f32 %v274_v12, %v273_v14  ;;  %v288_v33 = vsel %vm270_vm0, %v2088_v28, 0.0  ;;  %v290_v36 = vsel %vm270_vm0, %v2093_v31, 0.0  ;;  %v2103_v37 = vld [vmem:[%s2042_s6 + $0x60] sm:$0xff]  ;;  %v292_v39 = vsel %vm270_vm0, %v2098_v34, 0.0  ;;  %v2108_v40 = vld [vmem:[%s2042_s6 + $0x68] sm:$0xff]  ;;  %v2113_v43 = vld [vmem:[%s2042_s6 + $0x70] sm:$0xff] }
  0x15   : > { %v294_v42 = vsel %vm270_vm0, %v2103_v37, 0.0  ;;  %v296_v45 = vsel %vm270_vm0, %v2108_v40, 0.0  ;;  %v2118_v46 = vld [vmem:[%s2042_s6 + $0x78] sm:$0xff]  ;;  %v298_v48 = vsel %vm270_vm0, %v2113_v43, 0.0  ;;  %v2123_v49 = vld [vmem:[%s2042_s6 + $0x80] sm:$0xff]  ;;  %v2128_v52 = vld [vmem:[%s2042_s6 + $0x88] sm:$0xff] }
  0x16   : > { %v277_v20 = vadd.f32 %v276_v15, %v275_v17  ;;  %v300_v51 = vsel %vm270_vm0, %v2118_v46, 0.0  ;;  %v302_v54 = vsel %vm270_vm0, %v2123_v49, 0.0  ;;  %v2133_v55 = vld [vmem:[%s2042_s6 + $0x90] sm:$0xff]  ;;  %v304_v57 = vsel %vm270_vm0, %v2128_v52, 0.0  ;;  %v2138_v58 = vld [vmem:[%s2042_s6 + $0x98] sm:$0xff]  ;;  %v2143_v61 = vld [vmem:[%s2042_s6 + $0xa0] sm:$0xff] }
  0x17   : > { %v306_v60 = vsel %vm270_vm0, %v2133_v55, 0.0  ;;  %v308_v63 = vsel %vm270_vm0, %v2138_v58, 0.0  ;;  %v2148_v0 = vld [vmem:[%s2042_s6 + $0xa8] sm:$0xff]  ;;  %v310_v2 = vsel %vm270_vm0, %v2143_v61, 0.0  ;;  %v2153_v3 = vld [vmem:[%s2042_s6 + $0xb0] sm:$0xff]  ;;  %v2158_v10 = vld [vmem:[%s2042_s6 + $0xb8] sm:$0xff] }
  0x18   : > { %v279_v23 = vadd.f32 %v278_v18, %v277_v20  ;;  %v312_v5 = vsel %vm270_vm0, %v2148_v0, 0.0  ;;  %v314_v12 = vsel %vm270_vm0, %v2153_v3, 0.0  ;;  %v2163_v14 = vld [vmem:[%s2042_s6 + $0xc0] sm:$0xff]  ;;  %v316_v17 = vsel %vm270_vm0, %v2158_v10, 0.0  ;;  %v2168_v18 = vld [vmem:[%s2042_s6 + $0xc8] sm:$0xff] }
  0x1a   : > { %v281_v26 = vadd.f32 %v280_v21, %v279_v23  ;;  %v318_v21 = vsel %vm270_vm0, %v2163_v14, 0.0  ;;  %v2173_v23 = vld [vmem:[%s2042_s6 + $0xd0] sm:$0xff] }
  0x1c   : > { %v283_v29 = vadd.f32 %v282_v24, %v281_v26  ;;  %v320_v26 = vsel %vm270_vm0, %v2168_v18, 0.0 }
  0x1e   : > { %v285_v32 = vadd.f32 %v284_v27, %v283_v29  ;;  %v2178_v27 = vld [vmem:[%s2042_s6 + $0xd8] sm:$0xff] }
  0x20   : > { %v287_v35 = vadd.f32 %v286_v30, %v285_v32  ;;  %v322_v30 = vsel %vm270_vm0, %v2173_v23, 0.0  ;;  %v2183_v32 = vld [vmem:[%s2042_s6 + $0xe0] sm:$0xff] }
  0x22   : > { %v289_v38 = vadd.f32 %v288_v33, %v287_v35  ;;  %v324_v35 = vsel %vm270_vm0, %v2178_v27, 0.0 }
  0x24   : > { %v291_v41 = vadd.f32 %v290_v36, %v289_v38  ;;  %v2188_v36 = vld [vmem:[%s2042_s6 + $0xe8] sm:$0xff] }
  0x26   : > { %v293_v44 = vadd.f32 %v292_v39, %v291_v41  ;;  %v326_v39 = vsel %vm270_vm0, %v2183_v32, 0.0  ;;  %v2193_v41 = vld [vmem:[%s2042_s6 + $0xf0] sm:$0xff] }
  0x28   : > { %v295_v47 = vadd.f32 %v294_v42, %v293_v44  ;;  %v328_v44 = vsel %vm270_vm0, %v2188_v36, 0.0 }
  0x2a   : > { %v297_v50 = vadd.f32 %v296_v45, %v295_v47  ;;  %v2198_v45 = vld [vmem:[%s2042_s6 + $0xf8] sm:$0xff] }
  0x2c   : > { %v299_v53 = vadd.f32 %v298_v48, %v297_v50  ;;  %v330_v48 = vsel %vm270_vm0, %v2193_v41, 0.0 }
  0x2e   : > { %v301_v56 = vadd.f32 %v300_v51, %v299_v53  ;;  %v332_v51 = vsel %vm270_vm0, %v2198_v45, 0.0 }
  0x30   : > { %v303_v59 = vadd.f32 %v302_v54, %v301_v56 }
  0x32   : > { %v305_v62 = vadd.f32 %v304_v57, %v303_v59 }
  0x34   : > { %v307_v1 = vadd.f32 %v306_v60, %v305_v62 }
  0x36   : > { %v309_v4 = vadd.f32 %v308_v63, %v307_v1 }
  0x38   : > { %v311_v11 = vadd.f32 %v310_v2, %v309_v4 }
  0x3a   : > { %v313_v15 = vadd.f32 %v312_v5, %v311_v11 }
  0x3c   : > { %v315_v20 = vadd.f32 %v314_v12, %v313_v15 }
  0x3e   : > { %v317_v24 = vadd.f32 %v316_v17, %v315_v20 }
  0x40   : > { %v319_v29 = vadd.f32 %v318_v21, %v317_v24 }
  0x42   : > { %v321_v33 = vadd.f32 %v320_v26, %v319_v29 }
  0x44   : > { %v323_v38 = vadd.f32 %v322_v30, %v321_v33 }
  0x46   : > { %v325_v42 = vadd.f32 %v324_v35, %v323_v38 }
  0x48   : > { %v327_v47 = vadd.f32 %v326_v39, %v325_v42 }
  0x4a   : > { %v329_v50 = vadd.f32 %v328_v44, %v327_v47 }
  0x4c   : > { %v331_v53 = vadd.f32 %v330_v48, %v329_v50 }
  0x4e   : > { %v333_v54 = vadd.f32 %v332_v51, %v331_v53 }
  0x50   : > { %v334_v56 = vrot.slane %v333_v54, 4 }
  0x52   : > { %v335_v57 = vadd.f32 %v334_v56, %v333_v54 }
  0x54   : > { %v336_v59 = vrot.slane %v335_v57, 2 }
  0x56   : > { %v337_v60 = vadd.f32 %v336_v59, %v335_v57 }
  0x58   : > { %v338_v62 = vrot.slane %v337_v60, 1 }
  0x5a   : > { %v339_v63 = vadd.f32 %v338_v62, %v337_v60 }
  0x5c   : > { %v2204_v1 = vmul.f32 0.00390625, %v339_v63 }
  0x5e   : > { %v2208_v2 = vsub.f32 %v2045_v6, %v2204_v1  ;;  %v2212_v4 = vsub.f32 %v2048_v7, %v2204_v1  ;;  %v2216_v5 = vsub.f32 %v2051_v8, %v2204_v1  ;;  %v2220_v11 = vsub.f32 %v2054_v9, %v2204_v1 }
  0x5f   : > { %v2224_v12 = vsub.f32 %v2063_v13, %v2204_v1  ;;  %v2234_v8 = vsub.f32 %v2068_v16, %v2204_v1  ;;  %v2240_v13 = vsub.f32 %v2073_v19, %v2204_v1  ;;  %v2249_v16 = vsub.f32 %v2078_v22, %v2204_v1 }
  0x60   : > { %v374_v6 = vmul.f32 %v2208_v2, %v2208_v2  ;;  %v375_v15 = vmul.f32 %v2212_v4, %v2212_v4  ;;  %v376_v7 = vmul.f32 %v2216_v5, %v2216_v5  ;;  %v377_v9 = vmul.f32 %v2220_v11, %v2220_v11 }
  0x61   : > { %v378_v17 = vmul.f32 %v2224_v12, %v2224_v12  ;;  %v379_v29 = vmul.f32 %v2234_v8, %v2234_v8  ;;  %v2256_v33 = vsub.f32 %v2083_v25, %v2204_v1  ;;  %v380_v35 = vmul.f32 %v2240_v13, %v2240_v13 }
  0x62   : > { %v406_v20 = vsel %vm270_vm0, %v374_v6, 0.0  ;;  %v407_v21 = vsel %vm270_vm0, %v375_v15, 0.0  ;;  %v409_v24 = vsel %vm270_vm0, %v376_v7, 0.0  ;;  %v411_v19 = vsel %vm270_vm0, %v377_v9, 0.0 }
  0x63   : > { %v408_v26 = vadd.f32 %v407_v21, %v406_v20  ;;  %v413_v38 = vsel %vm270_vm0, %v378_v17, 0.0  ;;  %v2263_v22 = vsub.f32 %v2088_v28, %v2204_v1  ;;  %v381_v42 = vmul.f32 %v2249_v16, %v2249_v16 }
  0x64   : > { %v415_v44 = vsel %vm270_vm0, %v379_v29, 0.0  ;;  %v2270_v25 = vsub.f32 %v2093_v31, %v2204_v1  ;;  %v382_v48 = vmul.f32 %v2256_v33, %v2256_v33  ;;  %v417_v50 = vsel %vm270_vm0, %v380_v35, 0.0 }
  0x65   : > { %v410_v30 = vadd.f32 %v409_v24, %v408_v26  ;;  %v2277_v28 = vsub.f32 %v2098_v34, %v2204_v1  ;;  %v383_v53 = vmul.f32 %v2263_v22, %v2263_v22  ;;  %v419_v54 = vsel %vm270_vm0, %v381_v42, 0.0 }
  0x66   : > { %v2284_v31 = vsub.f32 %v2103_v37, %v2204_v1  ;;  %v384_v57 = vmul.f32 %v2270_v25, %v2270_v25  ;;  %v421_v59 = vsel %vm270_vm0, %v382_v48, 0.0  ;;  %v2291_v34 = vsub.f32 %v2108_v40, %v2204_v1 }
  0x67   : > { %v412_v39 = vadd.f32 %v411_v19, %v410_v30  ;;  %v385_v62 = vmul.f32 %v2277_v28, %v2277_v28  ;;  %v423_v63 = vsel %vm270_vm0, %v383_v53, 0.0  ;;  %v2298_v37 = vsub.f32 %v2113_v43, %v2204_v1 }
  0x68   : > { %v386_v15 = vmul.f32 %v2284_v31, %v2284_v31  ;;  %v425_v7 = vsel %vm270_vm0, %v384_v57, 0.0  ;;  %v2305_v40 = vsub.f32 %v2118_v46, %v2204_v1  ;;  %v387_v17 = vmul.f32 %v2291_v34, %v2291_v34 }
  0x69   : > { %v414_v47 = vadd.f32 %v413_v38, %v412_v39  ;;  %v427_v20 = vsel %vm270_vm0, %v385_v62, 0.0  ;;  %v2312_v43 = vsub.f32 %v2123_v49, %v2204_v1  ;;  %v388_v24 = vmul.f32 %v2298_v37, %v2298_v37 }
  0x6a   : > { %v429_v26 = vsel %vm270_vm0, %v386_v15, 0.0  ;;  %v2319_v46 = vsub.f32 %v2128_v52, %v2204_v1  ;;  %v389_v19 = vmul.f32 %v2305_v40, %v2305_v40  ;;  %v431_v30 = vsel %vm270_vm0, %v387_v17, 0.0 }
  0x6b   : > { %v416_v51 = vadd.f32 %v415_v44, %v414_v47  ;;  %v2326_v49 = vsub.f32 %v2133_v55, %v2204_v1  ;;  %v390_v38 = vmul.f32 %v2312_v43, %v2312_v43  ;;  %v433_v39 = vsel %vm270_vm0, %v388_v24, 0.0 }
  0x6c   : > { %v2333_v52 = vsub.f32 %v2138_v58, %v2204_v1  ;;  %v391_v44 = vmul.f32 %v2319_v46, %v2319_v46  ;;  %v435_v47 = vsel %vm270_vm0, %v389_v19, 0.0  ;;  %v2340_v55 = vsub.f32 %v2143_v61, %v2204_v1 }
  0x6d   : > { %v418_v56 = vadd.f32 %v417_v50, %v416_v51  ;;  %v392_v50 = vmul.f32 %v2326_v49, %v2326_v49  ;;  %v437_v51 = vsel %vm270_vm0, %v390_v38, 0.0  ;;  %v2347_v58 = vsub.f32 %v2148_v0, %v2204_v1 }
  0x6e   : > { %v2354_v61 = vsub.f32 %v2153_v3, %v2204_v1  ;;  %v2361_v0 = vsub.f32 %v2158_v10, %v2204_v1  ;;  %v2368_v3 = vsub.f32 %v2163_v14, %v2204_v1  ;;  %v2375_v10 = vsub.f32 %v2168_v18, %v2204_v1 }
  0x6f   : > { %v420_v60 = vadd.f32 %v419_v54, %v418_v56  ;;  %v393_v54 = vmul.f32 %v2333_v52, %v2333_v52  ;;  %v439_v56 = vsel %vm270_vm0, %v391_v44, 0.0  ;;  %v2382_v14 = vsub.f32 %v2173_v23, %v2204_v1 }
  0x70   : > { %v2389_v18 = vsub.f32 %v2178_v27, %v2204_v1  ;;  %v2396_v23 = vsub.f32 %v2183_v32, %v2204_v1  ;;  %v2403_v27 = vsub.f32 %v2188_v36, %v2204_v1  ;;  %v2410_v32 = vsub.f32 %v2193_v41, %v2204_v1 }
  0x71   : > { %v422_v6 = vadd.f32 %v421_v59, %v420_v60  ;;  %v394_v59 = vmul.f32 %v2340_v55, %v2340_v55  ;;  %v441_v60 = vsel %vm270_vm0, %v392_v50, 0.0  ;;  %v2417_v36 = vsub.f32 %v2198_v45, %v2204_v1 }
  0x72   : > { %v404_v41 = vmul.f32 %v2410_v32, %v2410_v32 }
  0x73   : > { %v424_v9 = vadd.f32 %v423_v63, %v422_v6  ;;  %v395_v63 = vmul.f32 %v2347_v58, %v2347_v58  ;;  %v443_v6 = vsel %vm270_vm0, %v393_v54, 0.0 }
  0x74   : > { %v465_v45 = vsel %vm270_vm0, %v404_v41, 0.0 }
  0x75   : > { %v426_v21 = vadd.f32 %v425_v7, %v424_v9  ;;  %v396_v7 = vmul.f32 %v2354_v61, %v2354_v61  ;;  %v445_v9 = vsel %vm270_vm0, %v394_v59, 0.0 }
  0x77   : > { %v428_v29 = vadd.f32 %v427_v20, %v426_v21  ;;  %v397_v20 = vmul.f32 %v2361_v0, %v2361_v0  ;;  %v447_v21 = vsel %vm270_vm0, %v395_v63, 0.0  ;;  %v405_v63 = vmul.f32 %v2417_v36, %v2417_v36 }
  0x79   : > { %v430_v35 = vadd.f32 %v429_v26, %v428_v29  ;;  %v398_v26 = vmul.f32 %v2368_v3, %v2368_v3  ;;  %v449_v29 = vsel %vm270_vm0, %v396_v7, 0.0  ;;  %v467_v7 = vsel %vm270_vm0, %v405_v63, 0.0 }
  0x7b   : > { %v432_v42 = vadd.f32 %v431_v30, %v430_v35  ;;  %v399_v30 = vmul.f32 %v2375_v10, %v2375_v10  ;;  %v451_v35 = vsel %vm270_vm0, %v397_v20, 0.0 }
  0x7d   : > { %v434_v48 = vadd.f32 %v433_v39, %v432_v42  ;;  %v400_v39 = vmul.f32 %v2382_v14, %v2382_v14  ;;  %v453_v42 = vsel %vm270_vm0, %v398_v26, 0.0 }
  0x7f   : > { %v436_v53 = vadd.f32 %v435_v47, %v434_v48  ;;  %v401_v47 = vmul.f32 %v2389_v18, %v2389_v18  ;;  %v455_v48 = vsel %vm270_vm0, %v399_v30, 0.0 }
  0x81   : > { %v438_v57 = vadd.f32 %v437_v51, %v436_v53  ;;  %v402_v51 = vmul.f32 %v2396_v23, %v2396_v23  ;;  %v457_v53 = vsel %vm270_vm0, %v400_v39, 0.0  ;;  %v2435_v39 = vld [vmem:[%s2785_s1] ss:$0 sm:$0xff] }
  0x83   : > { %v440_v62 = vadd.f32 %v439_v56, %v438_v57  ;;  %v403_v56 = vmul.f32 %v2403_v27, %v2403_v27  ;;  %v459_v57 = vsel %vm270_vm0, %v401_v47, 0.0 }
  0x85   : > { %v442_v15 = vadd.f32 %v441_v60, %v440_v62  ;;  %v461_v60 = vsel %vm270_vm0, %v402_v51, 0.0 }
  0x87   : > { %v444_v17 = vadd.f32 %v443_v6, %v442_v15  ;;  %v463_v6 = vsel %vm270_vm0, %v403_v56, 0.0 }
  0x89   : > { %v446_v24 = vadd.f32 %v445_v9, %v444_v17 }
  0x8b   : > { %v448_v19 = vadd.f32 %v447_v21, %v446_v24 }
  0x8d   : > { %v450_v38 = vadd.f32 %v449_v29, %v448_v19 }
  0x8f   : > { %v452_v44 = vadd.f32 %v451_v35, %v450_v38 }
  0x91   : > { %v454_v50 = vadd.f32 %v453_v42, %v452_v44 }
  0x93   : > { %v456_v54 = vadd.f32 %v455_v48, %v454_v50  ;;  %v2448_v50 = vld [vmem:[%s2785_s1 + $0x1] ss:$0 sm:$0xff] }
  0x95   : > { %v458_v59 = vadd.f32 %v457_v53, %v456_v54 }
  0x97   : > { %v460_v62 = vadd.f32 %v459_v57, %v458_v59 }
  0x99   : > { %v462_v15 = vadd.f32 %v461_v60, %v460_v62 }
  0x9b   : > { %v464_v1 = vadd.f32 %v463_v6, %v462_v15 }
  0x9d   : > { %v466_v9 = vadd.f32 %v465_v45, %v464_v1 }
  0x9f   : > { %v468_v17 = vadd.f32 %v467_v7, %v466_v9 }
  0xa1   : > { %v469_v20 = vrot.slane %v468_v17, 4 }
  0xa3   : > { %v470_v21 = vadd.f32 %v469_v20, %v468_v17 }
  0xa5   : > { %v471_v24 = vrot.slane %v470_v21, 2 }
  0xa7   : > { %v472_v26 = vadd.f32 %v471_v24, %v470_v21 }
  0xa9   : > { %v473_v29 = vrot.slane %v472_v26, 1 }
  0xab   : > { %v474_v19 = vadd.f32 %v473_v29, %v472_v26 }
  0xad   : > { %v475_v30 = vmul.f32 0.00390625, %v474_v19 }
  0xaf   : > { %v476_v35 = vadd.f32 1e-06, %v475_v30 }
  0xb1   : > { %1974 = vrsqrt.f32 %v476_v35 }
  0xbb   : > { %v2430_v38 = vpop.eup %1974 }
  0xbc   : > { %v478_v42 = vmul.f32 %v2430_v38, %v2208_v2  ;;  %v479_v44 = vmul.f32 %v2430_v38, %v2212_v4  ;;  %v480_v47 = vmul.f32 %v2430_v38, %v2216_v5  ;;  %v481_v48 = vmul.f32 %v2430_v38, %v2220_v11 }
  0xbd   : > { %v482_v51 = vmul.f32 %v2430_v38, %v2224_v12  ;;  %v483_v5 = vmul.f32 %v2430_v38, %v2234_v8  ;;  %v484_v11 = vmul.f32 %v2430_v38, %v2240_v13  ;;  %v485_v8 = vmul.f32 %v2430_v38, %v2249_v16 }
  0xbe   : > { %v515_v53 = vmul.f32 %v2435_v39, %v478_v42  ;;  %v516_v2 = vmul.f32 %v2435_v39, %v479_v44  ;;  %v517_v4 = vmul.f32 %v2435_v39, %v480_v47  ;;  %v518_v54 = vmul.f32 %v2435_v39, %v481_v48 }
  0xbf   : > { %v519_v59 = vmul.f32 %v2435_v39, %v482_v51  ;;  %v520_v60 = vmul.f32 %v2435_v39, %v483_v5  ;;  %v521_v62 = vmul.f32 %v2435_v39, %v484_v11  ;;  %v486_v63 = vmul.f32 %v2430_v38, %v2256_v33 }
  0xc0   : > { %v552_v56 = vadd.f32 %v2448_v50, %v515_v53  ;;  %v553_v57 = vadd.f32 %v2448_v50, %v516_v2  ;;  %v554_v12 = vadd.f32 %v2448_v50, %v517_v4  ;;  %v555_v41 = vadd.f32 %v2448_v50, %v518_v54 }
  0xc1   : > { %v556_v13 = vadd.f32 %v2448_v50, %v519_v59  ;;  %v557_v6 = vadd.f32 %v2448_v50, %v520_v60  ;;  %v522_v15 = vmul.f32 %v2435_v39, %v485_v8  ;;  %v487_v45 = vmul.f32 %v2430_v38, %v2263_v22 }
  0xc2   : > { %1774 = vmatprep.mubr.msk.f32.mxu0 %vm270_vm0, %v552_v56  ;;  %v558_v16 = vadd.f32 %v2448_v50, %v521_v62  ;;  %v523_v1 = vmul.f32 %v2435_v39, %v486_v63  ;;  %v488_v7 = vmul.f32 %v2430_v38, %v2270_v25  ;;  %v489_v17 = vmul.f32 %v2430_v38, %v2277_v28 }
  0xc3   : > { %1775 = vmatmul.mubr.msk.f32.vlgmr.msra.gmra.mrb[0].mxu0 %vm270_vm0, %v553_v57  ;;  %v559_v33 = vadd.f32 %v2448_v50, %v522_v15  ;;  %v524_v9 = vmul.f32 %v2435_v39, %v487_v45  ;;  %v490_v21 = vmul.f32 %v2430_v38, %v2284_v31  ;;  %v491_v26 = vmul.f32 %v2430_v38, %v2291_v34 }
  0xc4   : > { %1777 = vmatprep.mubr.msk.f32.mxu0 %vm270_vm0, %v554_v12  ;;  %v560_v22 = vadd.f32 %v2448_v50, %v523_v1  ;;  %v525_v20 = vmul.f32 %v2435_v39, %v488_v7  ;;  %v526_v24 = vmul.f32 %v2435_v39, %v489_v17  ;;  %v492_v19 = vmul.f32 %v2430_v38, %v2298_v37 }
  0xc5   : > { %v561_v25 = vadd.f32 %v2448_v50, %v524_v9  ;;  %v527_v29 = vmul.f32 %v2435_v39, %v490_v21  ;;  %v528_v30 = vmul.f32 %v2435_v39, %v491_v26  ;;  %v493_v35 = vmul.f32 %v2430_v38, %v2305_v40 }
  0xc6   : > { %v562_v28 = vadd.f32 %v2448_v50, %v525_v20  ;;  %v563_v31 = vadd.f32 %v2448_v50, %v526_v24  ;;  %v529_v42 = vmul.f32 %v2435_v39, %v492_v19  ;;  %v494_v44 = vmul.f32 %v2430_v38, %v2312_v43  ;;  %v941_v19 = vld [vmem:[%s2787_s3] sm:$0xff] }
  0xc7   : > { %1778 = vmatmul.mubr.msk.f32.gmra.mrb[2].mxu0 %vm270_vm0, %v555_v41  ;;  %v564_v34 = vadd.f32 %v2448_v50, %v527_v29  ;;  %v565_v37 = vadd.f32 %v2448_v50, %v528_v30  ;;  %v530_v47 = vmul.f32 %v2435_v39, %v493_v35  ;;  %v495_v48 = vmul.f32 %v2430_v38, %v2319_v46 }
  0xc8   : > { %1780 = vmatprep.mubr.msk.f32.mxu0 %vm270_vm0, %v556_v13  ;;  %v566_v40 = vadd.f32 %v2448_v50, %v529_v42  ;;  %v531_v51 = vmul.f32 %v2435_v39, %v494_v44  ;;  %v496_v53 = vmul.f32 %v2430_v38, %v2326_v49  ;;  %v497_v4 = vmul.f32 %v2430_v38, %v2333_v52 }
  0xc9   : > { %v567_v43 = vadd.f32 %v2448_v50, %v530_v47  ;;  %v532_v2 = vmul.f32 %v2435_v39, %v495_v48  ;;  %v498_v5 = vmul.f32 %v2430_v38, %v2340_v55  ;;  %v499_v56 = vmul.f32 %v2430_v38, %v2347_v58 }
  0xca   : > { %v568_v46 = vadd.f32 %v2448_v50, %v531_v51  ;;  %v533_v54 = vmul.f32 %v2435_v39, %v496_v53  ;;  %v534_v11 = vmul.f32 %v2435_v39, %v497_v4  ;;  %v500_v12 = vmul.f32 %v2430_v38, %v2354_v61  ;;  %v943_v51 = vld [vmem:[%s2787_s3 + $0x10] sm:$0xff]  ;;  %v944_v53 = vld [vmem:[%s2787_s3 + $0x18] sm:$0xff] }
  0xcb   : > { %1781 = vmatmul.mubr.msk.f32.gmra.mrb[4].mxu0 %vm270_vm0, %v557_v6  ;;  %v569_v49 = vadd.f32 %v2448_v50, %v532_v2  ;;  %v535_v57 = vmul.f32 %v2435_v39, %v498_v5  ;;  %v536_v59 = vmul.f32 %v2435_v39, %v499_v56  ;;  %v501_v41 = vmul.f32 %v2430_v38, %v2361_v0 }
  0xcc   : > { %1783 = vmatprep.mubr.msk.f32.mxu0 %vm270_vm0, %v558_v16  ;;  %v570_v52 = vadd.f32 %v2448_v50, %v533_v54  ;;  %v571_v55 = vadd.f32 %v2448_v50, %v534_v11  ;;  %v537_v60 = vmul.f32 %v2435_v39, %v500_v12  ;;  %v502_v8 = vmul.f32 %v2430_v38, %v2368_v3  ;;  %v1654_v54 = vld [vmem:[%s2787_s3 + $0x48] sm:$0xff] }
  0xcd   : > { %v572_v58 = vadd.f32 %v2448_v50, %v535_v57  ;;  %v573_v61 = vadd.f32 %v2448_v50, %v536_v59  ;;  %v538_v13 = vmul.f32 %v2435_v39, %v501_v41  ;;  %v503_v62 = vmul.f32 %v2430_v38, %v2375_v10  ;;  %v1656_v59 = vld [vmem:[%s2787_s3 + $0x58] sm:$0xff] }
  0xce   : > { %v574_v0 = vadd.f32 %v2448_v50, %v537_v60  ;;  %v539_v63 = vmul.f32 %v2435_v39, %v502_v8  ;;  %v504_v6 = vmul.f32 %v2430_v38, %v2382_v14  ;;  %v505_v45 = vmul.f32 %v2430_v38, %v2389_v18  ;;  %v1665_v8 = vld [vmem:[%s2787_s3 + $0x60] sm:$0xff] }
  0xcf   : > { %1784 = vmatmul.mubr.msk.f32.gmra.mrb[6].mxu0 %vm270_vm0, %v559_v33  ;;  %v575_v3 = vadd.f32 %v2448_v50, %v538_v13  ;;  %v540_v15 = vmul.f32 %v2435_v39, %v503_v62  ;;  %v506_v1 = vmul.f32 %v2430_v38, %v2396_v23  ;;  %v507_v33 = vmul.f32 %v2430_v38, %v2403_v27 }
  0xd0   : > { %1786 = vmatprep.mubr.msk.f32.mxu0 %vm270_vm0, %v560_v22  ;;  %v576_v10 = vadd.f32 %v2448_v50, %v539_v63  ;;  %v541_v16 = vmul.f32 %v2435_v39, %v504_v6  ;;  %v542_v7 = vmul.f32 %v2435_v39, %v505_v45  ;;  %v508_v17 = vmul.f32 %v2430_v38, %v2410_v32  ;;  %v1667_v45 = vld [vmem:[%s2787_s3 + $0x70] sm:$0xff] }
  0xd1   : > { %v577_v14 = vadd.f32 %v2448_v50, %v540_v15  ;;  %v543_v9 = vmul.f32 %v2435_v39, %v506_v1  ;;  %v544_v22 = vmul.f32 %v2435_v39, %v507_v33  ;;  %v509_v20 = vmul.f32 %v2430_v38, %v2417_v36  ;;  %v1633_v38 = vld [vmem:[%s2787_s3 + $0x20] sm:$0xff] }
  0xd2   : > { %v578_v18 = vadd.f32 %v2448_v50, %v541_v16  ;;  %v579_v23 = vadd.f32 %v2448_v50, %v542_v7  ;;  %v545_v21 = vmul.f32 %v2435_v39, %v508_v17  ;;  %v1922_v4 = vpack.c.bf16 %v944_v53, %v943_v51 }
  0xd3   : > { %1787 = vmatmul.mubr.msk.f32.gmra.mrb[8].mxu0 %vm270_vm0, %v561_v25  ;;  %v580_v27 = vadd.f32 %v2448_v50, %v543_v9  ;;  %v581_v25 = vadd.f32 %v2448_v50, %v544_v22  ;;  %v546_v32 = vmul.f32 %v2435_v39, %v509_v20  ;;  %v1634_v39 = vld [vmem:[%s2787_s3 + $0x28] sm:$0xff] }
  0xd4   : > { %1789 = vmatprep.mubr.msk.f32.mxu0 %vm270_vm0, %v562_v28  ;;  %v582_v24 = vadd.f32 %v2448_v50, %v545_v21  ;;  %v1910_v26 = vpack.c.bf16 %v1634_v39, %v1633_v38  ;;  %v1636_v28 = vld [vmem:[%s2787_s3 + $0x38] sm:$0xff] }
  0xd5   : > { %v583_v36 = vadd.f32 %v2448_v50, %v546_v32  ;;  %v1635_v50 = vld [vmem:[%s2787_s3 + $0x30] sm:$0xff] }
  0xd6   : > { %1911 = vmatprep.subr.bf16.mxu1 %v1910_v26  ;;  %v1914_v29 = vpack.c.bf16 %v1636_v28, %v1635_v50 }
  0xd7   : > { %1790 = vmatmul.mubr.msk.f32.gmra.mrb[10].mxu0 %vm270_vm0, %v563_v31  ;;  %1913 = vmatpush3.bf16.msra.mxu1 %v1910_v26  ;;  %v942_v31 = vld [vmem:[%s2787_s3 + $0x8] sm:$0xff] }
  0xd8   : > { %1792 = vmatprep.mubr.msk.f32.mxu0 %vm270_vm0, %v564_v34  ;;  %1915 = vmatprep.subr.bf16.mxu1 %v1914_v29  ;;  %v1918_v30 = vpack.c.bf16 %v942_v31, %v941_v19 }
  0xdb   : > { %1793 = vmatmul.mubr.msk.f32.gmra.mrb[12].mxu0 %vm270_vm0, %v565_v37  ;;  %1917 = vmatpush3.bf16.msra.mxu1 %v1914_v29 }
  0xdc   : > { %1795 = vmatprep.mubr.msk.f32.mxu0 %vm270_vm0, %v566_v40  ;;  %1919 = vmatprep.subr.bf16.mxu1 %v1918_v30 }
  0xdf   : > { %1796 = vmatmul.mubr.msk.f32.gmra.mrb[14].mxu0 %vm270_vm0, %v567_v43 }
  0xe0   : > { %1798 = vmatprep.mubr.msk.f32.mxu0 %vm270_vm0, %v568_v46  ;;  %v1653_v46 = vld [vmem:[%s2787_s3 + $0x40] sm:$0xff] }
  0xe1   : > { %v1926_v11 = vpack.c.bf16 %v1654_v54, %v1653_v46 }
  0xe3   : > { %1799 = vmatmul.mubr.msk.f32.gmra.mrb[16].mxu0 %vm270_vm0, %v569_v49 }
  0xe4   : > { %1801 = vmatprep.mubr.msk.f32.mxu0 %vm270_vm0, %v570_v52 }
  0xe7   : > { %1802 = vmatmul.mubr.msk.f32.gmra.mrb[18].mxu0 %vm270_vm0, %v571_v55  ;;  %v1655_v55 = vld [vmem:[%s2787_s3 + $0x50] sm:$0xff] }
  0xe8   : > { %1804 = vmatprep.mubr.msk.f32.mxu0 %vm270_vm0, %v572_v58  ;;  %v1930_v58 = vpack.c.bf16 %v1656_v59, %v1655_v55 }
  0xeb   : > { %1805 = vmatmul.mubr.msk.f32.gmra.mrb[20].mxu0 %vm270_vm0, %v573_v61  ;;  %v1666_v61 = vld [vmem:[%s2787_s3 + $0x68] sm:$0xff] }
  0xec   : > { %1807 = vmatprep.mubr.msk.f32.mxu0 %vm270_vm0, %v574_v0  ;;  %v1934_v62 = vpack.c.bf16 %v1666_v61, %v1665_v8 }
  0xef   : > { %1808 = vmatmul.mubr.msk.f32.gmra.mrb[22].mxu0 %vm270_vm0, %v575_v3 }
  0xf0   : > { %1810 = vmatprep.mubr.msk.f32.mxu0 %vm270_vm0, %v576_v10  ;;  %v1668_v10 = vld [vmem:[%s2787_s3 + $0x78] sm:$0xff] }
  0xf1   : > { %v1938_v1 = vpack.c.bf16 %v1668_v10, %v1667_v45 }
  0xf3   : > { %1811 = vmatmul.mubr.msk.f32.gmra.mrb[24].mxu0 %vm270_vm0, %v577_v14 }
  0xf4   : > { %1813 = vmatprep.mubr.msk.f32.mxu0 %vm270_vm0, %v578_v18 }
  0xf7   : > { %1814 = vmatmul.mubr.msk.f32.gmra.mrb[26].mxu0 %vm270_vm0, %v579_v23 }
  0xf8   : > { %1816 = vmatprep.mubr.msk.f32.mxu0 %vm270_vm0, %v580_v27 }
  0xfb   : > { %1817 = vmatmul.mubr.msk.f32.gmra.mrb[28].mxu0 %vm270_vm0, %v581_v25 }
  0xfc   : > { %1819 = vmatprep.mubr.msk.f32.mxu0 %vm270_vm0, %v582_v24 }
  0xff   : > { %1820 = vmatmul.mubr.msk.f32.gmra.mrb[30].mxu0 %vm270_vm0, %v583_v36 }
 0x196   : > { %v1776_v35 = vpop.f32.mrb[0].mxu0 }
 0x197   : > { %910 = vst.msk [vmem:[%s2625_s27 + $0x8] sm:$0xff] %vm270_vm0, %v1776_v35  ;;  %v750_v34 = vpop.f32.mrb[1].mxu0 }
 0x198   : > { %909 = vst.msk [vmem:[%s2625_s27] sm:$0xff] %vm270_vm0, %v750_v34 }
 0x19a   : > { %v2631_v42 = vpop.f32.mrb[2].mxu0 }
 0x19b   : > { %912 = vst.msk [vmem:[%s2625_s27 + $0x18] sm:$0xff] %vm270_vm0, %v2631_v42  ;;  %v760_v44 = vpop.f32.mrb[3].mxu0 }
 0x19c   : > { %911 = vst.msk [vmem:[%s2625_s27 + $0x10] sm:$0xff] %vm270_vm0, %v760_v44 }
 0x19e   : > { %v2638_v37 = vpop.f32.mrb[4].mxu0 }
 0x19f   : > { %914 = vst.msk [vmem:[%s2625_s27 + $0x28] sm:$0xff] %vm270_vm0, %v2638_v37  ;;  %v770_v47 = vpop.f32.mrb[5].mxu0 }
 0x1a0   : > { %913 = vst.msk [vmem:[%s2625_s27 + $0x20] sm:$0xff] %vm270_vm0, %v770_v47 }
 0x1a2   : > { %v2645_v48 = vpop.f32.mrb[6].mxu0 }
 0x1a3   : > { %916 = vst.msk [vmem:[%s2625_s27 + $0x38] sm:$0xff] %vm270_vm0, %v2645_v48  ;;  %v2650_v40 = vpop.f32.mrb[7].mxu0 }
 0x1a4   : > { %915 = vst.msk [vmem:[%s2625_s27 + $0x30] sm:$0xff] %vm270_vm0, %v2650_v40 }
 0x1a6   : > { %v1788_v43 = vpop.f32.mrb[8].mxu0 }
 0x1a7   : > { %918 = vst.msk [vmem:[%s2625_s27 + $0x48] sm:$0xff] %vm270_vm0, %v1788_v43  ;;  %v790_v2 = vpop.f32.mrb[9].mxu0 }
 0x1a8   : > { %917 = vst.msk [vmem:[%s2625_s27 + $0x40] sm:$0xff] %vm270_vm0, %v790_v2  ;;  %1830 = vmatprep.mubr.msk.f32.mxu1 %vm270_vm0, %v790_v2 }
 0x1a9   : > { %1831 = vmatmul.mubr.msk.f32.vlgmr.msra.gmra.mrb[0].mxu1 %vm270_vm0, %v1788_v43 }
 0x1aa   : > { %1921 = vmatpush3.bf16.msra.mxu1 %v1918_v30  ;;  %v1791_v5 = vpop.f32.mrb[10].mxu0 }
 0x1ab   : > { %920 = vst.msk [vmem:[%s2625_s27 + $0x58] sm:$0xff] %vm270_vm0, %v1791_v5  ;;  %v800_v49 = vpop.f32.mrb[11].mxu0  ;;  %1923 = vmatprep.subr.bf16.mxu1 %v1922_v4 }
 0x1ac   : > { %919 = vst.msk [vmem:[%s2625_s27 + $0x50] sm:$0xff] %vm270_vm0, %v800_v49  ;;  %1833 = vmatprep.mubr.msk.f32.mxu1 %vm270_vm0, %v800_v49 }
 0x1ad   : > { %1834 = vmatmul.mubr.msk.f32.gmra.mrb[2].mxu1 %vm270_vm0, %v1791_v5 }
 0x1ae   : > { %v1794_v56 = vpop.f32.mrb[12].mxu0  ;;  %1925 = vmatpush3.bf16.msra.mxu1 %v1922_v4 }
 0x1af   : > { %922 = vst.msk [vmem:[%s2625_s27 + $0x68] sm:$0xff] %vm270_vm0, %v1794_v56  ;;  %v810_v52 = vpop.f32.mrb[13].mxu0  ;;  %1927 = vmatprep.subr.bf16.mxu1 %v1926_v11 }
 0x1b0   : > { %921 = vst.msk [vmem:[%s2625_s27 + $0x60] sm:$0xff] %vm270_vm0, %v810_v52  ;;  %1836 = vmatprep.mubr.msk.f32.mxu1 %vm270_vm0, %v810_v52 }
 0x1b1   : > { %1837 = vmatmul.mubr.msk.f32.gmra.mrb[4].mxu1 %vm270_vm0, %v1794_v56 }
 0x1b2   : > { %v1797_v57 = vpop.f32.mrb[14].mxu0 }
 0x1b3   : > { %924 = vst.msk [vmem:[%s2625_s27 + $0x78] sm:$0xff] %vm270_vm0, %v1797_v57  ;;  %v820_v12 = vpop.f32.mrb[15].mxu0 }
 0x1b4   : > { %923 = vst.msk [vmem:[%s2625_s27 + $0x70] sm:$0xff] %vm270_vm0, %v820_v12  ;;  %1839 = vmatprep.mubr.msk.f32.mxu1 %vm270_vm0, %v820_v12 }
 0x1b5   : > { %1840 = vmatmul.mubr.msk.f32.gmra.mrb[6].mxu1 %vm270_vm0, %v1797_v57 }
 0x1b6   : > { %1850 = vmatprep.mubr.msk.f32.mxu1 %vm270_vm0, %v750_v34  ;;  %v1800_v41 = vpop.f32.mrb[16].mxu0 }
 0x1b7   : > { %926 = vst.msk [vmem:[%s2625_s27 + $0x88] sm:$0xff] %vm270_vm0, %v1800_v41  ;;  %v830_v60 = vpop.f32.mrb[17].mxu0 }
 0x1b8   : > { %925 = vst.msk [vmem:[%s2625_s27 + $0x80] sm:$0xff] %vm270_vm0, %v830_v60 }
 0x1b9   : > { %1851 = vmatmul.mubr.msk.f32.vlgmr.msra.gmra.mrb[0].mxu1 %vm270_vm0, %v1776_v35 }
 0x1ba   : > { %1929 = vmatpush3.bf16.msra.mxu1 %v1926_v11  ;;  %1853 = vmatprep.mubr.msk.f32.mxu1 %vm270_vm0, %v760_v44  ;;  %v1803_v13 = vpop.f32.mrb[18].mxu0 }
 0x1bb   : > { %1931 = vmatprep.subr.bf16.mxu1 %v1930_v58  ;;  %928 = vst.msk [vmem:[%s2625_s27 + $0x98] sm:$0xff] %vm270_vm0, %v1803_v13  ;;  %v840_v0 = vpop.f32.mrb[19].mxu0 }
 0x1bc   : > { %927 = vst.msk [vmem:[%s2625_s27 + $0x90] sm:$0xff] %vm270_vm0, %v840_v0 }
 0x1bd   : > { %1854 = vmatmul.mubr.msk.f32.gmra.mrb[2].mxu1 %vm270_vm0, %v2631_v42 }
 0x1be   : > { %1856 = vmatprep.mubr.msk.f32.mxu1 %vm270_vm0, %v770_v47  ;;  %1933 = vmatpush3.bf16.msra.mxu1 %v1930_v58  ;;  %v1806_v63 = vpop.f32.mrb[20].mxu0 }
 0x1bf   : > { %1935 = vmatprep.subr.bf16.mxu1 %v1934_v62  ;;  %930 = vst.msk [vmem:[%s2625_s27 + $0xa8] sm:$0xff] %vm270_vm0, %v1806_v63  ;;  %v850_v6 = vpop.f32.mrb[21].mxu0 }
 0x1c0   : > { %929 = vst.msk [vmem:[%s2625_s27 + $0xa0] sm:$0xff] %vm270_vm0, %v850_v6 }
 0x1c1   : > { %1857 = vmatmul.mubr.msk.f32.gmra.mrb[4].mxu1 %vm270_vm0, %v2638_v37 }
 0x1c2   : > { %1859 = vmatprep.mubr.msk.f32.mxu1 %vm270_vm0, %v2650_v40  ;;  %v1809_v3 = vpop.f32.mrb[22].mxu0 }
 0x1c3   : > { %932 = vst.msk [vmem:[%s2625_s27 + $0xb8] sm:$0xff] %vm270_vm0, %v1809_v3  ;;  %v860_v15 = vpop.f32.mrb[23].mxu0 }
 0x1c4   : > { %931 = vst.msk [vmem:[%s2625_s27 + $0xb0] sm:$0xff] %vm270_vm0, %v860_v15 }
 0x1c5   : > { %1860 = vmatmul.mubr.msk.f32.gmra.mrb[6].mxu1 %vm270_vm0, %v2645_v48 }
 0x1c6   : > { %1870 = vmatprep.mubr.msk.f32.mxu1 %vm270_vm0, %v830_v60  ;;  %v1812_v16 = vpop.f32.mrb[24].mxu0 }
 0x1c7   : > { %934 = vst.msk [vmem:[%s2625_s27 + $0xc8] sm:$0xff] %vm270_vm0, %v1812_v16  ;;  %v870_v14 = vpop.f32.mrb[25].mxu0 }
 0x1c8   : > { %933 = vst.msk [vmem:[%s2625_s27 + $0xc0] sm:$0xff] %vm270_vm0, %v870_v14 }
 0x1c9   : > { %1871 = vmatmul.mubr.msk.f32.vlgmr.msra.gmra.mrb[0].mxu1 %vm270_vm0, %v1800_v41 }
 0x1ca   : > { %1937 = vmatpush3.bf16.msra.mxu1 %v1934_v62  ;;  %1873 = vmatprep.mubr.msk.f32.mxu1 %vm270_vm0, %v840_v0  ;;  %v1815_v7 = vpop.f32.mrb[26].mxu0 }
 0x1cb   : > { %1939 = vmatprep.subr.bf16.mxu1 %v1938_v1  ;;  %936 = vst.msk [vmem:[%s2625_s27 + $0xd8] sm:$0xff] %vm270_vm0, %v1815_v7  ;;  %v880_v33 = vpop.f32.mrb[27].mxu0 }
 0x1cc   : > { %935 = vst.msk [vmem:[%s2625_s27 + $0xd0] sm:$0xff] %vm270_vm0, %v880_v33 }
 0x1cd   : > { %1874 = vmatmul.mubr.msk.f32.gmra.mrb[2].mxu1 %vm270_vm0, %v1803_v13 }
 0x1ce   : > { %1876 = vmatprep.mubr.msk.f32.mxu1 %vm270_vm0, %v850_v6  ;;  %1941 = vmatpush3.bf16.msra.mxu1 %v1938_v1  ;;  %v1818_v18 = vpop.f32.mrb[28].mxu0 }
 0x1cf   : > { %938 = vst.msk [vmem:[%s2625_s27 + $0xe8] sm:$0xff] %vm270_vm0, %v1818_v18  ;;  %v890_v9 = vpop.f32.mrb[29].mxu0 }
 0x1d0   : > { %937 = vst.msk [vmem:[%s2625_s27 + $0xe0] sm:$0xff] %vm270_vm0, %v890_v9 }
 0x1d1   : > { %1877 = vmatmul.mubr.msk.f32.gmra.mrb[4].mxu1 %vm270_vm0, %v1806_v63 }
 0x1d2   : > { %1879 = vmatprep.mubr.msk.f32.mxu1 %vm270_vm0, %v860_v15  ;;  %v1821_v17 = vpop.f32.mrb[30].mxu0 }
 0x1d3   : > { %940 = vst.msk [vmem:[%s2625_s27 + $0xf8] sm:$0xff] %vm270_vm0, %v1821_v17  ;;  %v900_v23 = vpop.f32.mrb[31].mxu0 }
 0x1d4   : > { %939 = vst.msk [vmem:[%s2625_s27 + $0xf0] sm:$0xff] %vm270_vm0, %v900_v23 }
 0x1d5   : > { %1880 = vmatmul.mubr.msk.f32.gmra.mrb[6].mxu1 %vm270_vm0, %v1809_v3 }
 0x1d6   : > { %1890 = vmatprep.mubr.msk.f32.mxu1 %vm270_vm0, %v870_v14 }
 0x1d9   : > { %1891 = vmatmul.mubr.msk.f32.vlgmr.msra.gmra.mrb[0].mxu1 %vm270_vm0, %v1812_v16 }
 0x1da   : > { %1893 = vmatprep.mubr.msk.f32.mxu1 %vm270_vm0, %v880_v33 }
 0x1dd   : > { %1894 = vmatmul.mubr.msk.f32.gmra.mrb[2].mxu1 %vm270_vm0, %v1815_v7 }
 0x1de   : > { %1896 = vmatprep.mubr.msk.f32.mxu1 %vm270_vm0, %v890_v9 }
 0x1e1   : > { %1897 = vmatmul.mubr.msk.f32.gmra.mrb[4].mxu1 %vm270_vm0, %v1818_v18 }
 0x1e2   : > { %1899 = vmatprep.mubr.msk.f32.mxu1 %vm270_vm0, %v900_v23 }
 0x1e5   : > { %1900 = vmatmul.mubr.msk.f32.gmra.mrb[6].mxu1 %vm270_vm0, %v1821_v17 }
 0x2ac   : > { %v1892_v22 = vpop.f32.mrb[0].mxu1 }
 0x2ad   : > { %1493 = vst.msk [vmem:[%s237_s28 + $0x8] sm:$0xff] %vm270_vm0, %v1892_v22  ;;  %v1445_v20 = vpop.f32.mrb[1].mxu1 }
 0x2ae   : > { %1492 = vst.msk [vmem:[%s237_s28] sm:$0xff] %vm270_vm0, %v1445_v20 }
 0x2b0   : > { %v1895_v27 = vpop.f32.mrb[2].mxu1 }
 0x2b1   : > { %1495 = vst.msk [vmem:[%s237_s28 + $0x18] sm:$0xff] %vm270_vm0, %v1895_v27  ;;  %v1455_v21 = vpop.f32.mrb[3].mxu1 }
 0x2b2   : > { %1494 = vst.msk [vmem:[%s237_s28 + $0x10] sm:$0xff] %vm270_vm0, %v1455_v21 }
 0x2b4   : > { %v1898_v25 = vpop.f32.mrb[4].mxu1 }
 0x2b5   : > { %1497 = vst.msk [vmem:[%s237_s28 + $0x28] sm:$0xff] %vm270_vm0, %v1898_v25  ;;  %v1465_v32 = vpop.f32.mrb[5].mxu1 }
 0x2b6   : > { %1496 = vst.msk [vmem:[%s237_s28 + $0x20] sm:$0xff] %vm270_vm0, %v1465_v32 }
 0x2b8   : > { %v1901_v24 = vpop.f32.mrb[6].mxu1 }
 0x2b9   : > { %1499 = vst.msk [vmem:[%s237_s28 + $0x38] sm:$0xff] %vm270_vm0, %v1901_v24  ;;  %v1475_v36 = vpop.f32.mrb[7].mxu1 }
 0x2ba   : > { %1498 = vst.msk [vmem:[%s237_s28 + $0x30] sm:$0xff] %vm270_vm0, %v1475_v36 }
 0x2bb PF: > { %s16_s18 = sadd.s32 1, %s1982_s18  }
 0x2bc   : > { %p13_p4 = scmp.ge.s32.totalorder %s16_s18, 4  }
 0x2be   :  { %15 = sbr.rel (!%p13_p4) target bundleno = 1 (0x1), region = 81 }

// kernel: spatial_transformer_forward.4
= control target key start
LH: loop header
LB: loop body
LE: loop exit
PB: predicated region body
PF: predicated region fallthrough
CT: control target
= control target key end

     0   :  { %s7845_s25 = smov 0   ;;  %s9644_s0 = inlined_call_operand.vmem [shape: f32[2,64,32], index: 0, kind: input, shape index: {}]   ;;  %s9645_s1 = inlined_call_operand.vmem [shape: f32[6,32], index: 1, kind: input, shape index: {}]   ;;  %s9646_s2 = inlined_call_operand.vmem [shape: f32[32,96], index: 2, kind: input, shape index: {}]   ;;  %s9647_s3 = inlined_call_operand.vmem [shape: f32[32,32], index: 3, kind: input, shape index: {}]   ;;  %s9648_s4 = inlined_call_operand.vmem [shape: f32[1,32], index: 4, kind: input, shape index: {}]   ;;  %s9649_s5 = inlined_call_operand.vmem [shape: f32[32,48], index: 5, kind: input, shape index: {}]   ;;  %s9650_s6 = inlined_call_operand.vmem [shape: f32[16,64], index: 6, kind: input, shape index: {}]   ;;  %s9651_s7 = inlined_call_operand.vmem [shape: f32[32,32], index: 7, kind: input, shape index: {}]   ;;  %s9652_s8 = inlined_call_operand.vmem [shape: f32[1,32], index: 8, kind: input, shape index: {}]   ;;  %s9653_s9 = inlined_call_operand.vmem [shape: f32[32,256], index: 9, kind: input, shape index: {}]   ;;  %s9654_s10 = inlined_call_operand.vmem [shape: f32[1,256], index: 10, kind: input, shape index: {}]   ;;  %s9655_s11 = inlined_call_operand.vmem [shape: f32[128,32], index: 11, kind: input, shape index: {}]   ;;  %s9656_s12 = inlined_call_operand.vmem [shape: f32[1,32], index: 12, kind: input, shape index: {}]   ;;  %s9657_s13 = inlined_call_operand.vmem [shape: f32[2,64,32], index: 13, kind: output, shape index: {}]  }
   0x1 LB: > { %s5505_s26 = sadd.s32 4294967295, %s7758_s25   ;;  %p5509_p0 = scmp.ge.s32.totalorder %s7758_s25, 1  ;;  %s7758_s25 = sphi %s7845_s25, %s23_s25  }
   0x2   : > { %p387_p1 = scmp.lt.s32.totalorder %s7758_s25, 3 }
   0x4   : > { %p388_p2 = pnand %p5509_p0, %p387_p1 }
   0x5   : > { %p431_p3 = scmp.lt.s32.totalorder (!%p388_p2), %s5505_s26, 1  ;;  %vm450_vm0 = vcmask (!%p388_p2), 261120   ;;  %v580_v56 = vld [vmem:[%s9646_s2] sm:$0xff] (!%p388_p2)  ;;  %v581_v57 = vld [vmem:[%s9646_s2 + $0x8] sm:$0xff] (!%p388_p2)  ;;  %v582_v59 = vld [vmem:[%s9646_s2 + $0x10] sm:$0xff] (!%p388_p2)  ;;  %vm737_vm1 = vcmask (!%p388_p2), 64512  }
   0x6   : > { %391 = sbr.rel (%p388_p2) target bundleno = 8189 (0x1ffd), region = 72  ;;  %v6687_v58 = vpack.c.bf16 (!%p388_p2), %v581_v57, %v580_v56  ;;  %v583_v60 = vld [vmem:[%s9646_s2 + $0x18] sm:$0xff] (!%p388_p2)  ;;  %s7760_s24 = smov (!%p388_p2), 96   ;;  %vm8002_vm2 = vmpackc.low (!%p388_p2), %vm737_vm1, %vm737_vm1  ;;  %vm883_vm3 = vcmask (!%p388_p2), 523264   ;;  %vm2483_vm4 = vcmask (!%p388_p2), 130048   ;;  %vm2492_vm5 = vcmask (!%p388_p2), 195584  }
   0x7   : > { %v6691_v61 = vpack.c.bf16 (!%p388_p2), %v583_v60, %v582_v59  ;;  %s7761_s28 = smov (!%p388_p2), 64   ;;  %s7762_s29 = smov (!%p388_p2), 88  }
   0x8   : > { %6688 = vmatprep.subr.bf16.mxu0 (!%p388_p2), %v6687_v58  ;;  %s7763_s14 = smov (!%p388_p2), 120   ;;  %s7764_s15 = smov (!%p388_p2), 56  }
   0x9   : > { %6690 = vmatpush3.bf16.msra.mxu0 (!%p388_p2), %v6687_v58  ;;  %s9663_s16 = smov (!%p388_p2), 80   ;;  %s7766_s17 = smov (!%p388_p2), 112  }
   0xa   : > { %6692 = vmatprep.subr.bf16.mxu0 (!%p388_p2), %v6691_v61  ;;  %s7767_s18 = smov (!%p388_p2), 48   ;;  %s9659_s19 = smov (!%p388_p2), 72  }
   0xb   : > { %s9661_s20 = smov (!%p388_p2), 104   ;;  %s7770_s21 = smov (!%p388_p2), 40  }
   0xc   : > { %s7771_s22 = smov (!%p388_p2), 8   ;;  %s7772_s23 = smov (!%p388_p2), 16  }
   0xd   : > { %s9674_s26 = smov (!%p431_p3, %s5505_s26), 1  ;;  %6694 = vmatpush3.bf16.msra.mxu0 %v6691_v61 }
   0xe   : > { %s9658_s27 = sshll.u32 %s9674_s26, 6 }
   0xf   : > { %s7861_s30 = scalar_lea.vmem %s9644_s0, %s9658_s27 }
  0x10   : > { %v441_v0 = vld [vmem:[%s7861_s30] sm:$0xff]  ;;  %v443_v1 = vld [vmem:[%s7861_s30 + $0x10] sm:$0xff]  ;;  %v442_v2 = vld [vmem:[%s7861_s30 + $0x8] sm:$0xff] }
  0x11   : > { %v451_v3 = vsel %vm450_vm0, %v441_v0, 0.0  ;;  %v457_v4 = vsel %vm450_vm0, %v443_v1, 0.0  ;;  %v444_v5 = vld [vmem:[%s7861_s30 + $0x18] sm:$0xff]  ;;  %v454_v6 = vsel %vm450_vm0, %v442_v2, 0.0  ;;  %v445_v8 = vld [vmem:[%s7861_s30 + $0x20] sm:$0xff]  ;;  %v446_v9 = vld [vmem:[%s7861_s30 + $0x28] sm:$0xff] }
  0x12   : > { %452 = vadd.xlane.f32.xlu0 %v451_v3  ;;  %458 = vadd.xlane.f32.xlu1 %v457_v4  ;;  %v460_v7 = vsel %vm450_vm0, %v444_v5, 0.0  ;;  %v463_v10 = vsel %vm450_vm0, %v445_v8, 0.0  ;;  %v466_v11 = vsel %vm450_vm0, %v446_v9, 0.0  ;;  %v447_v12 = vld [vmem:[%s7861_s30 + $0x30] sm:$0xff]  ;;  %v448_v13 = vld [vmem:[%s7861_s30 + $0x38] sm:$0xff] }
  0x13   : > { %v469_v14 = vsel %vm450_vm0, %v447_v12, 0.0  ;;  %v472_v15 = vsel %vm450_vm0, %v448_v13, 0.0 }
  0x16   : > { %455 = vadd.xlane.f32.xlu0 %v454_v6  ;;  %461 = vadd.xlane.f32.xlu1 %v460_v7 }
  0x1a   : > { %464 = vadd.xlane.f32.xlu0 %v463_v10  ;;  %467 = vadd.xlane.f32.xlu1 %v466_v11 }
  0x1e   : > { %470 = vadd.xlane.f32.xlu0 %v469_v14  ;;  %473 = vadd.xlane.f32.xlu1 %v472_v15 }
  0x9f   : > { %v453_v16 = vpop.xlane.xlu0 %452  ;;  %v459_v17 = vpop.xlane.xlu1 %458 }
  0xa0   : > { %v476_v18 = vmul.f32 0.03125, %v453_v16  ;;  %v478_v19 = vmul.f32 0.03125, %v459_v17  ;;  %v449_v16 = vld [vmem:[%s9645_s1] sm:$0x3f] }
  0xa2   : > { %v7879_v20 = vsub.f32 %v441_v0, %v476_v18  ;;  %v7881_v21 = vsub.f32 %v443_v1, %v478_v19  ;;  %v556_v0 = vlaneseq }
  0xa3   : > { %v456_v22 = vpop.xlane.xlu0 %455  ;;  %v462_v23 = vpop.xlane.xlu1 %461 }
  0xa4   : > { %v477_v24 = vmul.f32 0.03125, %v456_v22  ;;  %v479_v25 = vmul.f32 0.03125, %v462_v23  ;;  %v492_v26 = vmul.f32 %v7879_v20, %v7879_v20  ;;  %v494_v27 = vmul.f32 %v7881_v21, %v7881_v21 }
  0xa5   : > { %v7931_v6 = vshrl.u32 %v556_v0, 7 }
  0xa6   : > { %v7887_v28 = vsub.f32 %v442_v2, %v477_v24  ;;  %v7889_v29 = vsub.f32 %v444_v5, %v479_v25  ;;  %v500_v30 = vsel %vm450_vm0, %v492_v26, 0.0  ;;  %v506_v33 = vsel %vm450_vm0, %v494_v27, 0.0 }
  0xa7   : > { %501 = vadd.xlane.f32.xlu0 %v500_v30  ;;  %v465_v31 = vpop.xlane.xlu0 %464  ;;  %v468_v32 = vpop.xlane.xlu1 %467  ;;  %v570_v19 = vsub.s32 1, %v7931_v6 }
  0xa8   : > { %v480_v34 = vmul.f32 0.03125, %v465_v31  ;;  %v481_v35 = vmul.f32 0.03125, %v468_v32  ;;  %v493_v36 = vmul.f32 %v7887_v28, %v7887_v28  ;;  %v495_v37 = vmul.f32 %v7889_v29, %v7889_v29 }
  0xa9   : > { %v571_v32 = vrot.slane %v449_v16, %v570_v19 }
  0xaa   : > { %v7897_v38 = vsub.f32 %v445_v8, %v480_v34  ;;  %v7899_v39 = vsub.f32 %v446_v9, %v481_v35  ;;  %v503_v40 = vsel %vm450_vm0, %v493_v36, 0.0  ;;  %v509_v43 = vsel %vm450_vm0, %v495_v37, 0.0 }
  0xab   : > { %507 = vadd.xlane.f32.xlu0 %v506_v33  ;;  %504 = vadd.xlane.f32.xlu1 %v503_v40  ;;  %v471_v41 = vpop.xlane.xlu0 %470  ;;  %v474_v42 = vpop.xlane.xlu1 %473 }
  0xac   : > { %v482_v44 = vmul.f32 0.03125, %v471_v41  ;;  %v483_v45 = vmul.f32 0.03125, %v474_v42  ;;  %v496_v46 = vmul.f32 %v7897_v38, %v7897_v38  ;;  %v497_v47 = vmul.f32 %v7899_v39, %v7899_v39 }
  0xae   : > { %v7907_v48 = vsub.f32 %v447_v12, %v482_v44  ;;  %v7909_v49 = vsub.f32 %v448_v13, %v483_v45  ;;  %v512_v50 = vsel %vm450_vm0, %v496_v46, 0.0  ;;  %v515_v51 = vsel %vm450_vm0, %v497_v47, 0.0 }
  0xaf   : > { %510 = vadd.xlane.f32.xlu1 %v509_v43  ;;  %513 = vadd.xlane.f32.xlu0 %v512_v50  ;;  %v9665_v13 = vsub.s32 0, %v7931_v6 }
  0xb0   : > { %v498_v52 = vmul.f32 %v7907_v48, %v7907_v48  ;;  %v499_v53 = vmul.f32 %v7909_v49, %v7909_v49 }
  0xb1   : > { %v559_v24 = vrot.slane %v449_v16, %v9665_v13 }
  0xb2   : > { %v518_v54 = vsel %vm450_vm0, %v498_v52, 0.0  ;;  %v521_v55 = vsel %vm450_vm0, %v499_v53, 0.0 }
  0xb3   : > { %516 = vadd.xlane.f32.xlu1 %v515_v51  ;;  %519 = vadd.xlane.f32.xlu0 %v518_v54 }
  0xb7   : > { %522 = vadd.xlane.f32.xlu1 %v521_v55 }
 0x134   : > { %v502_v62 = vpop.xlane.xlu0 %501 }
 0x135   : > { %v524_v63 = vmul.f32 0.03125, %v502_v62 }
 0x137   : > { %v532_v1 = vadd.f32 1e-05, %v524_v63 }
 0x138   : > { %v505_v2 = vpop.xlane.xlu1 %504  ;;  %v508_v3 = vpop.xlane.xlu0 %507 }
 0x139   : > { %7422 = vrsqrt.f32 %v532_v1  ;;  %v525_v4 = vmul.f32 0.03125, %v505_v2  ;;  %v526_v5 = vmul.f32 0.03125, %v508_v3 }
 0x13b   : > { %v533_v7 = vadd.f32 1e-05, %v525_v4  ;;  %v534_v8 = vadd.f32 1e-05, %v526_v5 }
 0x13c   : > { %v511_v9 = vpop.xlane.xlu1 %510  ;;  %v514_v10 = vpop.xlane.xlu0 %513 }
 0x13d   : > { %7424 = vrsqrt.f32 %v533_v7  ;;  %v527_v11 = vmul.f32 0.03125, %v511_v9  ;;  %v528_v12 = vmul.f32 0.03125, %v514_v10 }
 0x13e   : > { %7426 = vrsqrt.f32 %v534_v8 }
 0x13f   : > { %v535_v14 = vadd.f32 1e-05, %v527_v11  ;;  %v536_v15 = vadd.f32 1e-05, %v528_v12 }
 0x140   : > { %v517_v17 = vpop.xlane.xlu1 %516  ;;  %v520_v18 = vpop.xlane.xlu0 %519 }
 0x141   : > { %7428 = vrsqrt.f32 %v535_v14  ;;  %v529_v22 = vmul.f32 0.03125, %v517_v17  ;;  %v530_v23 = vmul.f32 0.03125, %v520_v18 }
 0x142   : > { %7430 = vrsqrt.f32 %v536_v15 }
 0x143   : > { %v7423_v25 = vpop.eup %7422  ;;  %v537_v26 = vadd.f32 1e-05, %v529_v22  ;;  %v538_v27 = vadd.f32 1e-05, %v530_v23 }
 0x144   : > { %v523_v30 = vpop.xlane.xlu1 %522  ;;  %v548_v31 = vmul.f32 %v7423_v25, %v7879_v20 }
 0x145   : > { %7432 = vrsqrt.f32 %v537_v26  ;;  %v531_v33 = vmul.f32 0.03125, %v523_v30 }
 0x146   : > { %7434 = vrsqrt.f32 %v538_v27  ;;  %v560_v34 = vmul.f32 %v559_v24, %v548_v31 }
 0x147   : > { %v7425_v35 = vpop.eup %7424  ;;  %v539_v36 = vadd.f32 1e-05, %v531_v33 }
 0x148   : > { %v7427_v37 = vpop.eup %7426  ;;  %v572_v40 = vadd.f32 %v571_v32, %v560_v34  ;;  %v549_v41 = vmul.f32 %v7425_v35, %v7887_v28 }
 0x149   : > { %7436 = vrsqrt.f32 %v539_v36  ;;  %v550_v42 = vmul.f32 %v7427_v37, %v7881_v21 }
 0x14a   : > { %6107 = vmatprep.mubr.msk.f32.mxu0 %vm450_vm0, %v572_v40  ;;  %v561_v43 = vmul.f32 %v559_v24, %v549_v41 }
 0x14b   : > { %v7429_v20 = vpop.eup %7428  ;;  %v562_v44 = vmul.f32 %v559_v24, %v550_v42 }
 0x14c   : > { %v7431_v45 = vpop.eup %7430  ;;  %v573_v46 = vadd.f32 %v571_v32, %v561_v43  ;;  %v551_v47 = vmul.f32 %v7429_v20, %v7889_v29 }
 0x14d   : > { %v574_v50 = vadd.f32 %v571_v32, %v562_v44  ;;  %v552_v51 = vmul.f32 %v7431_v45, %v7897_v38 }
 0x14e   : > { %6108 = vmatmul.mubr.msk.f32.vlgmr.msra.gmra.mrb[0].mxu0 %vm450_vm0, %v573_v46  ;;  %v563_v52 = vmul.f32 %v559_v24, %v551_v47 }
 0x14f   : > { %v7433_v53 = vpop.eup %7432  ;;  %6110 = vmatprep.mubr.msk.f32.mxu0 %vm450_vm0, %v574_v50  ;;  %v564_v28 = vmul.f32 %v559_v24, %v552_v51 }
 0x150   : > { %v7435_v21 = vpop.eup %7434  ;;  %v575_v54 = vadd.f32 %v571_v32, %v563_v52  ;;  %v553_v55 = vmul.f32 %v7433_v53, %v7899_v39 }
 0x151   : > { %v576_v56 = vadd.f32 %v571_v32, %v564_v28  ;;  %v554_v57 = vmul.f32 %v7435_v21, %v7907_v48 }
 0x152   : > { %6111 = vmatmul.mubr.msk.f32.gmra.mrb[2].mxu0 %vm450_vm0, %v575_v54  ;;  %v565_v29 = vmul.f32 %v559_v24, %v553_v55 }
 0x153   : > { %v7437_v58 = vpop.eup %7436  ;;  %6113 = vmatprep.mubr.msk.f32.mxu0 %vm450_vm0, %v576_v56  ;;  %v566_v38 = vmul.f32 %v559_v24, %v554_v57 }
 0x154   : > { %v577_v59 = vadd.f32 %v571_v32, %v565_v29  ;;  %v555_v60 = vmul.f32 %v7437_v58, %v7909_v49 }
 0x155   : > { %v578_v61 = vadd.f32 %v571_v32, %v566_v38 }
 0x156   : > { %6114 = vmatmul.mubr.msk.f32.gmra.mrb[4].mxu0 %vm450_vm0, %v577_v59  ;;  %v567_v62 = vmul.f32 %v559_v24, %v555_v60 }
 0x157   : > { %6116 = vmatprep.mubr.msk.f32.mxu0 %vm450_vm0, %v578_v61 }
 0x158   : > { %v579_v39 = vadd.f32 %v571_v32, %v567_v62 }
 0x15a   : > { %6117 = vmatmul.mubr.msk.f32.gmra.mrb[6].mxu0 %vm450_vm0, %v579_v39 }
 0x221   : > { %v7958_v48 = vpop.f32.mrb[0].mxu0 }
 0x222   : > { %v7960_v63 = vpop.f32.mrb[1].mxu0 }
 0x223   : > { %6135 = vmatprep.mubr.msk.f32.mxu1 %vm737_vm1, %v7960_v63  ;;  %v7966_v49 = vpack.i.bf16 %v7958_v48, %v7960_v63 }
 0x225   : > { %7123 = vrot.lane.b32.xlu0 %v7966_v49, %s7760_s24  ;;  %v7970_v0 = vpop.f32.mrb[2].mxu0 }
 0x226   : > { %v7972_v1 = vpop.f32.mrb[3].mxu0 }
 0x227   : > { %v7976_v2 = vpack.i.bf16 %v7970_v0, %v7972_v1 }
 0x229   : > { %7128 = vrot.lane.b32.xlu1 %v7976_v2, %s7760_s24  ;;  %v7980_v3 = vpop.f32.mrb[4].mxu0 }
 0x22a   : > { %v7982_v4 = vpop.f32.mrb[5].mxu0 }
 0x22b   : > { %v7986_v5 = vpack.i.bf16 %v7980_v3, %v7982_v4 }
 0x22d   : > { %7133 = vrot.lane.b32.xlu1 %v7986_v5, %s7760_s24  ;;  %v7990_v7 = vpop.f32.mrb[6].mxu0 }
 0x22e   : > { %v7992_v8 = vpop.f32.mrb[7].mxu0 }
 0x22f   : > { %v7996_v9 = vpack.i.bf16 %v7990_v7, %v7992_v8 }
 0x231   : > { %7138 = vrot.lane.b32.xlu1 %v7996_v9, %s7760_s24 }
 0x297   : > { %v7124_v10 = vpop.permute.xlu0 %7123 }
 0x298   : > { %v7126_v11 = vunpack.i.h.bf16 %v7124_v10  ;;  %v7125_v12 = vunpack.i.l.bf16 %v7124_v10 }
 0x29a   : > { %v6695_v15 = vpack.c.bf16 %v7126_v11, %v7125_v12 }
 0x29b   : > { %v7129_v16 = vpop.permute.xlu1 %7128 }
 0x29c   : > { %v7131_v17 = vunpack.i.h.bf16 %v7129_v16  ;;  %v7130_v18 = vunpack.i.l.bf16 %v7129_v16  ;;  %6697 = vmatprep.subr.msk.bf16.mxu1 %vm8002_vm2, %v6695_v15 }
 0x29d   : > { %6700 = vmatpush3.bf16.xpose.msk.msra.mxu1 %vm8002_vm2, %v6695_v15 }
 0x29e   : > { %v6701_v22 = vpack.c.bf16 %v7131_v17, %v7130_v18 }
 0x29f   : > { %v7134_v23 = vpop.permute.xlu1 %7133 }
 0x2a0   : > { %v7136_v24 = vunpack.i.h.bf16 %v7134_v23  ;;  %v7135_v25 = vunpack.i.l.bf16 %v7134_v23  ;;  %6703 = vmatprep.subr.msk.bf16.mxu1 %vm8002_vm2, %v6701_v22 }
 0x2a2   : > { %v6707_v26 = vpack.c.bf16 %v7136_v24, %v7135_v25 }
 0x2a3   : > { %v7139_v27 = vpop.permute.xlu1 %7138 }
 0x2a4   : > { %v7141_v30 = vunpack.i.h.bf16 %v7139_v27  ;;  %v7140_v31 = vunpack.i.l.bf16 %v7139_v27 }
 0x2a5   : > { %6706 = vmatpush3.bf16.xpose.msk.msra.mxu1 %vm8002_vm2, %v6701_v22 }
 0x2a6   : > { %6709 = vmatprep.subr.msk.bf16.mxu1 %vm8002_vm2, %v6707_v26  ;;  %v6713_v32 = vpack.c.bf16 %v7141_v30, %v7140_v31 }
 0x2ad   : > { %6712 = vmatpush3.bf16.xpose.msk.msra.mxu1 %vm8002_vm2, %v6707_v26 }
 0x2ae   : > { %6715 = vmatprep.subr.msk.bf16.mxu1 %vm8002_vm2, %v6713_v32 }
 0x2b5   : > { %6718 = vmatpush3.bf16.xpose.msk.msra.mxu1 %vm8002_vm2, %v6713_v32 }
 0x2bc   : > { %6136 = vmatmul.mubr.msk.f32.vlgmr.msra.gmra.mrb[0].mxu1 %vm737_vm1, %v7958_v48 }
 0x2bd   : > { %6138 = vmatprep.mubr.msk.f32.mxu1 %vm737_vm1, %v7972_v1 }
 0x2c0   : > { %6139 = vmatmul.mubr.msk.f32.gmra.mrb[2].mxu1 %vm737_vm1, %v7970_v0 }
 0x2c1   : > { %6141 = vmatprep.mubr.msk.f32.mxu1 %vm737_vm1, %v7982_v4 }
 0x2c4   : > { %6142 = vmatmul.mubr.msk.f32.gmra.mrb[4].mxu1 %vm737_vm1, %v7980_v3 }
 0x2c5   : > { %6144 = vmatprep.mubr.msk.f32.mxu1 %vm737_vm1, %v7992_v8 }
 0x2c8   : > { %6145 = vmatmul.mubr.msk.f32.gmra.mrb[6].mxu1 %vm737_vm1, %v7990_v7 }
 0x38f   : > { %v6137_v33 = vpop.f32.mrb[0].mxu1 }
 0x390   : > { %v876_v34 = vmul.f32 0.35355338, %v6137_v33  ;;  %v836_v35 = vpop.f32.mrb[1].mxu1 }
 0x391   : > { %v875_v36 = vmul.f32 0.35355338, %v836_v35 }
 0x392   : > { %v887_v37 = vsel %vm883_vm3, %v876_v34, -inf }
 0x393   : > { %888 = vmax.xlane.f32.xlu1 %v887_v37  ;;  %v6140_v40 = vpop.f32.mrb[2].mxu1  ;;  %v884_v41 = vsel %vm883_vm3, %v875_v36, -inf }
 0x394   : > { %v878_v42 = vmul.f32 0.35355338, %v6140_v40  ;;  %885 = vmax.xlane.f32.xlu0 %v884_v41  ;;  %v846_v43 = vpop.f32.mrb[3].mxu1 }
 0x395   : > { %v877_v44 = vmul.f32 0.35355338, %v846_v43 }
 0x396   : > { %v893_v20 = vsel %vm883_vm3, %v878_v42, -inf }
 0x397   : > { %v6143_v45 = vpop.f32.mrb[4].mxu1  ;;  %v890_v53 = vsel %vm883_vm3, %v877_v44, -inf }
 0x398   : > { %v880_v46 = vmul.f32 0.35355338, %v6143_v45  ;;  %894 = vmax.xlane.f32.xlu0 %v893_v20  ;;  %v856_v47 = vpop.f32.mrb[5].mxu1 }
 0x399   : > { %v879_v51 = vmul.f32 0.35355338, %v856_v47 }
 0x39a   : > { %v899_v50 = vsel %vm883_vm3, %v880_v46, -inf }
 0x39b   : > { %900 = vmax.xlane.f32.xlu1 %v899_v50  ;;  %v6146_v52 = vpop.f32.mrb[6].mxu1  ;;  %v896_v56 = vsel %vm883_vm3, %v879_v51, -inf }
 0x39c   : > { %v8041_v28 = vmul.f32 0.35355338, %v6146_v52  ;;  %891 = vmax.xlane.f32.xlu0 %v890_v53  ;;  %v866_v21 = vpop.f32.mrb[7].mxu1 }
 0x39d   : > { %v8045_v55 = vmul.f32 0.35355338, %v866_v21 }
 0x39e   : > { %v905_v54 = vsel %vm883_vm3, %v8041_v28, -inf }
 0x39f   : > { %906 = vmax.xlane.f32.xlu1 %v905_v54  ;;  %v902_v57 = vsel %vm883_vm3, %v8045_v55, -inf }
 0x3a0   : > { %897 = vmax.xlane.f32.xlu0 %v896_v56 }
 0x3a4   : > { %903 = vmax.xlane.f32.xlu0 %v902_v57 }
 0x3b0   : > { %7148 = vrot.lane.b32.xlu1 %v7976_v2, %s7761_s28 }
 0x3b4   : > { %7153 = vrot.lane.b32.xlu1 %v7986_v5, %s7761_s28 }
 0x3b8   : > { %7158 = vrot.lane.b32.xlu1 %v7996_v9, %s7761_s28 }
 0x3ba   : > { %7143 = vrot.lane.b32.xlu0 %v7966_v49, %s7761_s28  ;;  %s7773_s28 = smov 24  }
 0x3bc   : > { %7168 = vrot.lane.b32.xlu1 %v7976_v2, %s7762_s29 }
 0x3be   : > { %7163 = vrot.lane.b32.xlu0 %v7966_v49, %s7762_s29 }
 0x420   : > { %v889_v29 = vpop.xlane.xlu1 %888 }
 0x421   : > { %v909_v58 = vsub.f32 %v876_v34, %v889_v29  ;;  %v886_v38 = vpop.xlane.xlu0 %885 }
 0x422   : > { %v908_v59 = vsub.f32 %v875_v36, %v886_v38 }
 0x423   : > { %v918_v60 = vmul.f32 1.442695, %v909_v58 }
 0x424   : > { %v916_v61 = vmul.f32 1.442695, %v908_v59 }
 0x425   : > { %7438 = vpow2.f32 %v918_v60  ;;  %v895_v62 = vpop.xlane.xlu0 %894 }
 0x426   : > { %7440 = vpow2.f32 %v916_v61  ;;  %v911_v39 = vsub.f32 %v878_v42, %v895_v62 }
 0x428   : > { %v922_v10 = vmul.f32 1.442695, %v911_v39  ;;  %v901_v11 = vpop.xlane.xlu1 %900 }
 0x429   : > { %v913_v12 = vsub.f32 %v880_v46, %v901_v11  ;;  %v892_v15 = vpop.xlane.xlu0 %891 }
 0x42a   : > { %7442 = vpow2.f32 %v922_v10  ;;  %v910_v16 = vsub.f32 %v877_v44, %v892_v15 }
 0x42b   : > { %v926_v17 = vmul.f32 1.442695, %v913_v12 }
 0x42c   : > { %v920_v18 = vmul.f32 1.442695, %v910_v16  ;;  %v907_v22 = vpop.xlane.xlu1 %906 }
 0x42d   : > { %v898_v23 = vpop.xlane.xlu0 %897  ;;  %v915_v62 = vsub.f32 %v8041_v28, %v907_v22 }
 0x42e   : > { %7444 = vpow2.f32 %v920_v18  ;;  %v912_v24 = vsub.f32 %v879_v51, %v898_v23 }
 0x42f   : > { %v8058_v25 = vpop.eup %7438  ;;  %7446 = vpow2.f32 %v926_v17  ;;  %v930_v39 = vmul.f32 1.442695, %v915_v62 }
 0x430   : > { %v8060_v26 = vpop.eup %7440  ;;  %v924_v27 = vmul.f32 1.442695, %v912_v24  ;;  %v7149_v30 = vpop.permute.xlu1 %7148  ;;  %v935_v31 = vsel %vm883_vm3, %v8058_v25, 0.0 }
 0x431   : > { %936 = vadd.xlane.f32.xlu1 %v935_v31  ;;  %v904_v32 = vpop.xlane.xlu0 %903  ;;  %v932_v33 = vsel %vm883_vm3, %v8060_v26, 0.0  ;;  %v7151_v40 = vunpack.i.h.bf16 %v7149_v30  ;;  %v7150_v41 = vunpack.i.l.bf16 %v7149_v30 }
 0x432   : > { %933 = vadd.xlane.f32.xlu0 %v932_v33  ;;  %7448 = vpow2.f32 %v924_v27  ;;  %v914_v10 = vsub.f32 %v8045_v55, %v904_v32 }
 0x433   : > { %v6723_v51 = vpack.c.bf16 %v7151_v40, %v7150_v41  ;;  %7450 = vpow2.f32 %v930_v39 }
 0x434   : > { %v8066_v34 = vpop.eup %7442  ;;  %v7154_v35 = vpop.permute.xlu1 %7153  ;;  %v928_v11 = vmul.f32 1.442695, %v914_v10 }
 0x435   : > { %v7144_v36 = vpop.permute.xlu0 %7143  ;;  %v941_v37 = vsel %vm883_vm3, %v8066_v34, 0.0  ;;  %v7156_v47 = vunpack.i.h.bf16 %v7154_v35  ;;  %v7155_v50 = vunpack.i.l.bf16 %v7154_v35 }
 0x436   : > { %v7146_v42 = vunpack.i.h.bf16 %v7144_v36  ;;  %v7145_v43 = vunpack.i.l.bf16 %v7144_v36  ;;  %942 = vadd.xlane.f32.xlu1 %v941_v37  ;;  %7452 = vpow2.f32 %v928_v11 }
 0x437   : > { %v6727_v57 = vpack.c.bf16 %v7156_v47, %v7155_v50 }
 0x438   : > { %v8070_v20 = vpop.eup %7444  ;;  %v6719_v44 = vpack.c.bf16 %v7146_v42, %v7145_v43  ;;  %v7159_v52 = vpop.permute.xlu1 %7158 }
 0x439   : > { %v938_v45 = vsel %vm883_vm3, %v8070_v20, 0.0  ;;  %v8074_v46 = vpop.eup %7446  ;;  %v7161_v54 = vunpack.i.h.bf16 %v7159_v52  ;;  %v7160_v56 = vunpack.i.l.bf16 %v7159_v52  ;;  %v7164_v29 = vpop.permute.xlu0 %7163 }
 0x43a   : > { %939 = vadd.xlane.f32.xlu0 %v938_v45  ;;  %6720 = vmatprep.subr.bf16.mxu0 %v6719_v44  ;;  %v947_v53 = vsel %vm883_vm3, %v8074_v46, 0.0  ;;  %v7166_v38 = vunpack.i.h.bf16 %v7164_v29  ;;  %v7165_v59 = vunpack.i.l.bf16 %v7164_v29 }
 0x43b   : > { %6722 = vmatpush3.bf16.msra.mxu0 %v6719_v44  ;;  %v6731_v60 = vpack.c.bf16 %v7161_v54, %v7160_v56 }
 0x43c   : > { %6724 = vmatprep.subr.bf16.mxu0 %v6723_v51  ;;  %v8078_v21 = vpop.eup %7448  ;;  %v6735_v61 = vpack.c.bf16 %v7166_v38, %v7165_v59  ;;  %v7169_v16 = vpop.permute.xlu1 %7168 }
 0x43d   : > { %v944_v58 = vsel %vm883_vm3, %v8078_v21, 0.0  ;;  %v8096_v28 = vpop.eup %7450  ;;  %v7171_v30 = vunpack.i.h.bf16 %v7169_v16  ;;  %v7170_v31 = vunpack.i.l.bf16 %v7169_v16 }
 0x43e   : > { %948 = vadd.xlane.f32.xlu0 %v947_v53  ;;  %v953_v55 = vsel %vm883_vm3, %v8096_v28, 0.0 }
 0x43f   : > { %6726 = vmatpush3.bf16.msra.mxu0 %v6723_v51  ;;  %v6741_v36 = vpack.c.bf16 %v7171_v30, %v7170_v31 }
 0x440   : > { %6728 = vmatprep.subr.bf16.mxu0 %v6727_v57  ;;  %v8102_v12 = vpop.eup %7452 }
 0x441   : > { %v950_v15 = vsel %vm883_vm3, %v8102_v12, 0.0 }
 0x442   : > { %945 = vadd.xlane.f32.xlu0 %v944_v58 }
 0x443   : > { %6730 = vmatpush3.bf16.msra.mxu0 %v6727_v57 }
 0x444   : > { %6732 = vmatprep.subr.bf16.mxu0 %v6731_v60 }
 0x447   : > { %7178 = vrot.lane.b32.xlu1 %v7996_v9, %s7762_s29  ;;  %6734 = vmatpush3.bf16.msra.mxu0 %v6731_v60 }
 0x448   : > { %6737 = vmatprep.subr.msk.bf16.mxu0 %vm8002_vm2, %v6735_v61 }
 0x458   : > { %7173 = vrot.lane.b32.xlu0 %v7986_v5, %s7762_s29 }
 0x45c   : > { %1125 = vrot.lane.b32.xlu0 %v7960_v63, %s7763_s14 }
 0x460   : > { %1129 = vrot.lane.b32.xlu0 %v7972_v1, %s7763_s14 }
 0x464   : > { %1133 = vrot.lane.b32.xlu0 %v7982_v4, %s7763_s14 }
 0x468   : > { %1137 = vrot.lane.b32.xlu0 %v7992_v8, %s7763_s14 }
 0x46b   : > { %954 = vadd.xlane.f32.xlu1 %v953_v55 }
 0x46f   : > { %951 = vadd.xlane.f32.xlu1 %v950_v15 }
 0x480   : > { %1127 = vrot.lane.b32.xlu1 %v7958_v48, %s7763_s14 }
 0x484   : > { %1131 = vrot.lane.b32.xlu1 %v7970_v0, %s7763_s14 }
 0x488   : > { %1135 = vrot.lane.b32.xlu1 %v7980_v3, %s7763_s14 }
 0x48c   : > { %1139 = vrot.lane.b32.xlu1 %v7990_v7, %s7763_s14 }
 0x4be   : > { %v937_v17 = vpop.xlane.xlu1 %936 }
 0x4bf   : > { %7454 = vrcp.f32 %v937_v17  ;;  %v934_v18 = vpop.xlane.xlu0 %933 }
 0x4c0   : > { %7456 = vrcp.f32 %v934_v18 }
 0x4c3   : > { %v943_v22 = vpop.xlane.xlu1 %942 }
 0x4c4   : > { %7458 = vrcp.f32 %v943_v22 }
 0x4c7   : > { %v940_v23 = vpop.xlane.xlu0 %939  ;;  %v7179_v47 = vpop.permute.xlu1 %7178 }
 0x4c8   : > { %7460 = vrcp.f32 %v940_v23  ;;  %v7181_v52 = vunpack.i.h.bf16 %v7179_v47 }
 0x4c9   : > { %v7455_v24 = vpop.eup %7454 }
 0x4ca   : > { %v7457_v27 = vpop.eup %7456  ;;  %v965_v35 = vmul.f32 %v7455_v24, %v8058_v25 }
 0x4cb   : > { %v949_v32 = vpop.xlane.xlu0 %948  ;;  %v964_v33 = vmul.f32 %v7457_v27, %v8060_v26 }
 0x4cc   : > { %7462 = vrcp.f32 %v949_v32 }
 0x4cd   : > { %6163 = vmatprep.mubr.msk.f32.mxu0 %vm883_vm3, %v964_v33 }
 0x4ce   : > { %6164 = vmatmul.mubr.msk.f32.vlgmr.msra.gmra.mrb[8].mxu0 %vm883_vm3, %v965_v35  ;;  %v7459_v40 = vpop.eup %7458 }
 0x4cf   : > { %6740 = vmatpush3.bf16.xpose.msk.msra.mxu0 %vm8002_vm2, %v6735_v61  ;;  %v946_v37 = vpop.xlane.xlu0 %945  ;;  %v967_v44 = vmul.f32 %v7459_v40, %v8066_v34 }
 0x4d0   : > { %7464 = vrcp.f32 %v946_v37  ;;  %6743 = vmatprep.subr.msk.bf16.mxu0 %vm8002_vm2, %v6741_v36 }
 0x4d2   : > { %v7461_v41 = vpop.eup %7460 }
 0x4d3   : > { %v7174_v42 = vpop.permute.xlu0 %7173  ;;  %v966_v26 = vmul.f32 %v7461_v41, %v8070_v20  ;;  %v7180_v20 = vunpack.i.l.bf16 %v7179_v47 }
 0x4d4   : > { %v7176_v25 = vunpack.i.h.bf16 %v7174_v42  ;;  %v7175_v43 = vunpack.i.l.bf16 %v7174_v42 }
 0x4d5   : > { %6166 = vmatprep.mubr.msk.f32.mxu0 %vm883_vm3, %v966_v26  ;;  %v6753_v54 = vpack.c.bf16 %v7181_v52, %v7180_v20 }
 0x4d6   : > { %v6747_v45 = vpack.c.bf16 %v7176_v25, %v7175_v43  ;;  %6167 = vmatmul.mubr.msk.f32.gmra.mrb[10].mxu0 %vm883_vm3, %v967_v44  ;;  %v7463_v50 = vpop.eup %7462 }
 0x4d7   : > { %6746 = vmatpush3.bf16.xpose.msk.msra.mxu0 %vm8002_vm2, %v6741_v36  ;;  %v969_v34 = vmul.f32 %v7463_v50, %v8074_v46 }
 0x4d8   : > { %6749 = vmatprep.subr.msk.bf16.mxu0 %vm8002_vm2, %v6747_v45 }
 0x4da   : > { %v7465_v51 = vpop.eup %7464 }
 0x4db   : > { %v968_v53 = vmul.f32 %v7465_v51, %v8078_v21  ;;  %v1126_v21 = vpop.permute.xlu0 %1125 }
 0x4dd   : > { %6169 = vmatprep.mubr.msk.f32.mxu0 %vm883_vm3, %v968_v53 }
 0x4de   : > { %6170 = vmatmul.mubr.msk.f32.gmra.mrb[12].mxu0 %vm883_vm3, %v969_v34 }
 0x4df   : > { %6752 = vmatpush3.bf16.xpose.msk.msra.mxu0 %vm8002_vm2, %v6747_v45  ;;  %v1130_v60 = vpop.permute.xlu0 %1129 }
 0x4e0   : > { %6755 = vmatprep.subr.msk.bf16.mxu0 %vm8002_vm2, %v6753_v54 }
 0x4e3   : > { %v1134_v62 = vpop.permute.xlu0 %1133 }
 0x4e7   : > { %6758 = vmatpush3.bf16.xpose.msk.msra.mxu0 %vm8002_vm2, %v6753_v54  ;;  %v1138_v10 = vpop.permute.xlu0 %1137 }
 0x4f8   : > { %v955_v56 = vpop.xlane.xlu1 %954 }
 0x4f9   : > { %7466 = vrcp.f32 %v955_v56 }
 0x4fc   : > { %v952_v57 = vpop.xlane.xlu1 %951 }
 0x4fd   : > { %7468 = vrcp.f32 %v952_v57 }
 0x500   : > { %v1128_v58 = vpop.permute.xlu1 %1127 }
 0x503   : > { %v7467_v46 = vpop.eup %7466 }
 0x504   : > { %v971_v59 = vmul.f32 %v7467_v46, %v8096_v28  ;;  %v1132_v61 = vpop.permute.xlu1 %1131 }
 0x507   : > { %v7469_v29 = vpop.eup %7468 }
 0x508   : > { %v970_v38 = vmul.f32 %v7469_v29, %v8102_v12  ;;  %v1136_v39 = vpop.permute.xlu1 %1135 }
 0x50a   : > { %6172 = vmatprep.mubr.msk.f32.mxu0 %vm883_vm3, %v970_v38 }
 0x50b   : > { %6173 = vmatmul.mubr.msk.f32.gmra.mrb[14].mxu0 %vm883_vm3, %v971_v59 }
 0x50c   : > { %6191 = vmatprep.mubr.msk.f32.mxu0 %vm737_vm1, %v1126_v21  ;;  %v1140_v11 = vpop.permute.xlu1 %1139 }
 0x50f   : > { %6192 = vmatmul.mubr.msk.f32.vlgmr.msra.gmra.mrb[16].mxu0 %vm737_vm1, %v1128_v58 }
 0x510   : > { %6194 = vmatprep.mubr.msk.f32.mxu0 %vm737_vm1, %v1130_v60 }
 0x513   : > { %6195 = vmatmul.mubr.msk.f32.gmra.mrb[18].mxu0 %vm737_vm1, %v1132_v61 }
 0x514   : > { %6197 = vmatprep.mubr.msk.f32.mxu0 %vm737_vm1, %v1134_v62 }
 0x517   : > { %6198 = vmatmul.mubr.msk.f32.gmra.mrb[20].mxu0 %vm737_vm1, %v1136_v39 }
 0x518   : > { %6200 = vmatprep.mubr.msk.f32.mxu0 %vm737_vm1, %v1138_v10 }
 0x51b   : > { %6201 = vmatmul.mubr.msk.f32.gmra.mrb[22].mxu0 %vm737_vm1, %v1140_v11 }
 0x5a1   : > { %v8152_v28 = vpop.f32.mrb[8].mxu0 }
 0x5a2   : > { %v8154_v55 = vpop.f32.mrb[9].mxu0 }
 0x5a9   : > { %v8156_v12 = vpop.f32.mrb[10].mxu0 }
 0x5aa   : > { %v8158_v15 = vpop.f32.mrb[11].mxu0 }
 0x5b1   : > { %v8160_v16 = vpop.f32.mrb[12].mxu0 }
 0x5b2   : > { %v8162_v17 = vpop.f32.mrb[13].mxu0 }
 0x5de   : > { %v8164_v18 = vpop.f32.mrb[14].mxu0 }
 0x5df   : > { %v8166_v22 = vpop.f32.mrb[15].mxu0 }
 0x5e2   : > { %v6193_v23 = vpop.f32.mrb[16].mxu0 }
 0x5e3   : > { %v1295_v24 = vmul.f32 0.35355338, %v6193_v23  ;;  %v1255_v27 = vpop.f32.mrb[17].mxu0 }
 0x5e4   : > { %v1294_v30 = vmul.f32 0.35355338, %v1255_v27 }
 0x5e5   : > { %v1305_v31 = vsel %vm883_vm3, %v1295_v24, -inf }
 0x5e6   : > { %1306 = vmax.xlane.f32.xlu1 %v1305_v31  ;;  %v6196_v32 = vpop.f32.mrb[18].mxu0  ;;  %v1302_v33 = vsel %vm883_vm3, %v1294_v30, -inf }
 0x5e7   : > { %v1297_v35 = vmul.f32 0.35355338, %v6196_v32  ;;  %1303 = vmax.xlane.f32.xlu0 %v1302_v33  ;;  %v1265_v36 = vpop.f32.mrb[19].mxu0 }
 0x5e8   : > { %v1296_v40 = vmul.f32 0.35355338, %v1265_v36 }
 0x5e9   : > { %v1311_v37 = vsel %vm883_vm3, %v1297_v35, -inf }
 0x5ea   : > { %v6199_v41 = vpop.f32.mrb[20].mxu0  ;;  %v1308_v45 = vsel %vm883_vm3, %v1296_v40, -inf }
 0x5eb   : > { %v1299_v42 = vmul.f32 0.35355338, %v6199_v41  ;;  %1312 = vmax.xlane.f32.xlu0 %v1311_v37  ;;  %v1275_v26 = vpop.f32.mrb[21].mxu0 }
 0x5ec   : > { %v1298_v43 = vmul.f32 0.35355338, %v1275_v26 }
 0x5ed   : > { %v1317_v25 = vsel %vm883_vm3, %v1299_v42, -inf }
 0x5ee   : > { %1318 = vmax.xlane.f32.xlu1 %v1317_v25  ;;  %v6202_v44 = vpop.f32.mrb[22].mxu0  ;;  %v1314_v20 = vsel %vm883_vm3, %v1298_v43, -inf }
 0x5ef   : > { %v8173_v47 = vmul.f32 0.35355338, %v6202_v44  ;;  %1309 = vmax.xlane.f32.xlu0 %v1308_v45  ;;  %v1285_v50 = vpop.f32.mrb[23].mxu0 }
 0x5f0   : > { %v8177_v52 = vmul.f32 0.35355338, %v1285_v50 }
 0x5f1   : > { %v1323_v51 = vsel %vm883_vm3, %v8173_v47, -inf }
 0x5f2   : > { %1324 = vmax.xlane.f32.xlu1 %v1323_v51  ;;  %v1320_v53 = vsel %vm883_vm3, %v8177_v52, -inf }
 0x5f3   : > { %1315 = vmax.xlane.f32.xlu0 %v1314_v20 }
 0x5f7   : > { %1321 = vmax.xlane.f32.xlu0 %v1320_v53 }
 0x603   : > { %7188 = vrot.lane.b32.xlu1 %v7976_v2, %s7764_s15 }
 0x607   : > { %7193 = vrot.lane.b32.xlu1 %v7986_v5, %s7764_s15 }
 0x60b   : > { %7198 = vrot.lane.b32.xlu1 %v7996_v9, %s7764_s15 }
 0x60d   : > { %7183 = vrot.lane.b32.xlu0 %v7966_v49, %s7764_s15 }
 0x60f   : > { %7208 = vrot.lane.b32.xlu1 %v7976_v2, %s9663_s16 }
 0x611   : > { %7203 = vrot.lane.b32.xlu0 %v7966_v49, %s9663_s16 }
 0x673   : > { %v1307_v34 = vpop.xlane.xlu1 %1306 }
 0x674   : > { %v1327_v54 = vsub.f32 %v1295_v24, %v1307_v34  ;;  %v1304_v56 = vpop.xlane.xlu0 %1303 }
 0x675   : > { %v1326_v57 = vsub.f32 %v1294_v30, %v1304_v56 }
 0x676   : > { %v1336_v21 = vmul.f32 1.442695, %v1327_v54 }
 0x677   : > { %v1334_v46 = vmul.f32 1.442695, %v1326_v57 }
 0x678   : > { %7470 = vpow2.f32 %v1336_v21  ;;  %v1313_v29 = vpop.xlane.xlu0 %1312 }
 0x679   : > { %7472 = vpow2.f32 %v1334_v46  ;;  %v1329_v58 = vsub.f32 %v1297_v35, %v1313_v29 }
 0x67b   : > { %v1340_v38 = vmul.f32 1.442695, %v1329_v58  ;;  %v1319_v59 = vpop.xlane.xlu1 %1318 }
 0x67c   : > { %v1331_v60 = vsub.f32 %v1299_v42, %v1319_v59  ;;  %v1310_v61 = vpop.xlane.xlu0 %1309 }
 0x67d   : > { %7474 = vpow2.f32 %v1340_v38  ;;  %v1328_v62 = vsub.f32 %v1296_v40, %v1310_v61 }
 0x67e   : > { %v1344_v39 = vmul.f32 1.442695, %v1331_v60 }
 0x67f   : > { %v1338_v10 = vmul.f32 1.442695, %v1328_v62  ;;  %v1325_v11 = vpop.xlane.xlu1 %1324 }
 0x680   : > { %v1316_v23 = vpop.xlane.xlu0 %1315 }
 0x681   : > { %7476 = vpow2.f32 %v1338_v10  ;;  %v1330_v24 = vsub.f32 %v1298_v43, %v1316_v23  ;;  %v1333_v10 = vsub.f32 %v8173_v47, %v1325_v11 }
 0x682   : > { %v8190_v27 = vpop.eup %7470  ;;  %7478 = vpow2.f32 %v1344_v39 }
 0x683   : > { %v8192_v30 = vpop.eup %7472  ;;  %v1342_v31 = vmul.f32 1.442695, %v1330_v24  ;;  %v7189_v32 = vpop.permute.xlu1 %7188  ;;  %v1353_v33 = vsel %vm883_vm3, %v8190_v27, 0.0  ;;  %v1348_v23 = vmul.f32 1.442695, %v1333_v10 }
 0x684   : > { %1354 = vadd.xlane.f32.xlu1 %v1353_v33  ;;  %v1322_v35 = vpop.xlane.xlu0 %1321  ;;  %v1350_v36 = vsel %vm883_vm3, %v8192_v30, 0.0  ;;  %v7191_v26 = vunpack.i.h.bf16 %v7189_v32  ;;  %v7190_v25 = vunpack.i.l.bf16 %v7189_v32 }
 0x685   : > { %1351 = vadd.xlane.f32.xlu0 %v1350_v36  ;;  %7480 = vpow2.f32 %v1342_v31  ;;  %v1332_v24 = vsub.f32 %v8177_v52, %v1322_v35 }
 0x686   : > { %v6763_v54 = vpack.c.bf16 %v7191_v26, %v7190_v25  ;;  %7482 = vpow2.f32 %v1348_v23 }
 0x687   : > { %v8198_v37 = vpop.eup %7474  ;;  %v7194_v40 = vpop.permute.xlu1 %7193  ;;  %v1346_v31 = vmul.f32 1.442695, %v1332_v24 }
 0x688   : > { %v7184_v41 = vpop.permute.xlu0 %7183  ;;  %v1359_v42 = vsel %vm883_vm3, %v8198_v37, 0.0  ;;  %v7196_v53 = vunpack.i.h.bf16 %v7194_v40  ;;  %v7195_v34 = vunpack.i.l.bf16 %v7194_v40 }
 0x689   : > { %v7186_v43 = vunpack.i.h.bf16 %v7184_v41  ;;  %v7185_v44 = vunpack.i.l.bf16 %v7184_v41  ;;  %1360 = vadd.xlane.f32.xlu1 %v1359_v42  ;;  %7484 = vpow2.f32 %v1346_v31 }
 0x68a   : > { %v6767_v58 = vpack.c.bf16 %v7196_v53, %v7195_v34 }
 0x68b   : > { %v8202_v45 = vpop.eup %7476  ;;  %v6759_v50 = vpack.c.bf16 %v7186_v43, %v7185_v44  ;;  %v7199_v56 = vpop.permute.xlu1 %7198 }
 0x68c   : > { %v1356_v51 = vsel %vm883_vm3, %v8202_v45, 0.0  ;;  %v8206_v20 = vpop.eup %7478  ;;  %v7201_v46 = vunpack.i.h.bf16 %v7199_v56  ;;  %v7200_v29 = vunpack.i.l.bf16 %v7199_v56  ;;  %v7204_v38 = vpop.permute.xlu0 %7203 }
 0x68d   : > { %1357 = vadd.xlane.f32.xlu0 %v1356_v51  ;;  %6760 = vmatprep.subr.bf16.mxu1 %v6759_v50  ;;  %v1365_v57 = vsel %vm883_vm3, %v8206_v20, 0.0  ;;  %v7206_v60 = vunpack.i.h.bf16 %v7204_v38  ;;  %v7205_v61 = vunpack.i.l.bf16 %v7204_v38 }
 0x68e   : > { %6762 = vmatpush3.bf16.msra.mxu1 %v6759_v50  ;;  %v6771_v62 = vpack.c.bf16 %v7201_v46, %v7200_v29 }
 0x68f   : > { %6764 = vmatprep.subr.bf16.mxu1 %v6763_v54  ;;  %v8210_v21 = vpop.eup %7480  ;;  %v6775_v39 = vpack.c.bf16 %v7206_v60, %v7205_v61  ;;  %v7209_v33 = vpop.permute.xlu1 %7208 }
 0x690   : > { %v1362_v59 = vsel %vm883_vm3, %v8210_v21, 0.0  ;;  %v8228_v47 = vpop.eup %7482  ;;  %v7211_v25 = vunpack.i.h.bf16 %v7209_v33  ;;  %v7210_v43 = vunpack.i.l.bf16 %v7209_v33 }
 0x691   : > { %1366 = vadd.xlane.f32.xlu0 %v1365_v57  ;;  %v1371_v52 = vsel %vm883_vm3, %v8228_v47, 0.0 }
 0x692   : > { %6766 = vmatpush3.bf16.msra.mxu1 %v6763_v54  ;;  %v6781_v53 = vpack.c.bf16 %v7211_v25, %v7210_v43 }
 0x693   : > { %6768 = vmatprep.subr.bf16.mxu1 %v6767_v58  ;;  %v8234_v11 = vpop.eup %7484 }
 0x694   : > { %v1368_v32 = vsel %vm883_vm3, %v8234_v11, 0.0 }
 0x695   : > { %1363 = vadd.xlane.f32.xlu0 %v1362_v59 }
 0x696   : > { %6770 = vmatpush3.bf16.msra.mxu1 %v6767_v58 }
 0x697   : > { %6772 = vmatprep.subr.bf16.mxu1 %v6771_v62 }
 0x69a   : > { %7218 = vrot.lane.b32.xlu1 %v7996_v9, %s9663_s16  ;;  %6774 = vmatpush3.bf16.msra.mxu1 %v6771_v62 }
 0x69b   : > { %6777 = vmatprep.subr.msk.bf16.mxu1 %vm8002_vm2, %v6775_v39 }
 0x6ab   : > { %7213 = vrot.lane.b32.xlu0 %v7986_v5, %s9663_s16 }
 0x6af   : > { %1543 = vrot.lane.b32.xlu0 %v7960_v63, %s7766_s17 }
 0x6b3   : > { %1547 = vrot.lane.b32.xlu0 %v7972_v1, %s7766_s17 }
 0x6b7   : > { %1551 = vrot.lane.b32.xlu0 %v7982_v4, %s7766_s17 }
 0x6bb   : > { %1555 = vrot.lane.b32.xlu0 %v7992_v8, %s7766_s17 }
 0x6be   : > { %1372 = vadd.xlane.f32.xlu1 %v1371_v52 }
 0x6c2   : > { %1369 = vadd.xlane.f32.xlu1 %v1368_v32 }
 0x6d3   : > { %1545 = vrot.lane.b32.xlu1 %v7958_v48, %s7766_s17 }
 0x6d7   : > { %1549 = vrot.lane.b32.xlu1 %v7970_v0, %s7766_s17 }
 0x6db   : > { %1553 = vrot.lane.b32.xlu1 %v7980_v3, %s7766_s17 }
 0x6df   : > { %1557 = vrot.lane.b32.xlu1 %v7990_v7, %s7766_s17 }
 0x711   : > { %v1355_v35 = vpop.xlane.xlu1 %1354 }
 0x712   : > { %7486 = vrcp.f32 %v1355_v35  ;;  %v1352_v36 = vpop.xlane.xlu0 %1351 }
 0x713   : > { %7488 = vrcp.f32 %v1352_v36 }
 0x716   : > { %v1361_v40 = vpop.xlane.xlu1 %1360 }
 0x717   : > { %7490 = vrcp.f32 %v1361_v40 }
 0x71a   : > { %v1358_v41 = vpop.xlane.xlu0 %1357  ;;  %v7219_v38 = vpop.permute.xlu1 %7218 }
 0x71b   : > { %7492 = vrcp.f32 %v1358_v41  ;;  %v7221_v61 = vunpack.i.h.bf16 %v7219_v38 }
 0x71c   : > { %v7487_v42 = vpop.eup %7486 }
 0x71d   : > { %v7489_v26 = vpop.eup %7488  ;;  %v1383_v51 = vmul.f32 %v7487_v42, %v8190_v27 }
 0x71e   : > { %v1367_v44 = vpop.xlane.xlu0 %1366  ;;  %v1382_v50 = vmul.f32 %v7489_v26, %v8192_v30 }
 0x71f   : > { %7494 = vrcp.f32 %v1367_v44 }
 0x720   : > { %6219 = vmatprep.mubr.msk.f32.mxu1 %vm883_vm3, %v1382_v50 }
 0x721   : > { %6220 = vmatmul.mubr.msk.f32.vlgmr.msra.gmra.mrb[8].mxu1 %vm883_vm3, %v1383_v51  ;;  %v7491_v54 = vpop.eup %7490 }
 0x722   : > { %6780 = vmatpush3.bf16.xpose.msk.msra.mxu1 %vm8002_vm2, %v6775_v39  ;;  %v1364_v34 = vpop.xlane.xlu0 %1363  ;;  %v1385_v29 = vmul.f32 %v7491_v54, %v8198_v37 }
 0x723   : > { %7496 = vrcp.f32 %v1364_v34  ;;  %6783 = vmatprep.subr.msk.bf16.mxu1 %vm8002_vm2, %v6781_v53 }
 0x725   : > { %v7493_v56 = vpop.eup %7492 }
 0x726   : > { %v7214_v57 = vpop.permute.xlu0 %7213  ;;  %v1384_v30 = vmul.f32 %v7493_v56, %v8202_v45  ;;  %v7220_v45 = vunpack.i.l.bf16 %v7219_v38 }
 0x727   : > { %v7216_v27 = vunpack.i.h.bf16 %v7214_v57  ;;  %v7215_v46 = vunpack.i.l.bf16 %v7214_v57 }
 0x728   : > { %6222 = vmatprep.mubr.msk.f32.mxu1 %vm883_vm3, %v1384_v30  ;;  %v6793_v39 = vpack.c.bf16 %v7221_v61, %v7220_v45 }
 0x729   : > { %v6787_v58 = vpack.c.bf16 %v7216_v27, %v7215_v46  ;;  %6223 = vmatmul.mubr.msk.f32.gmra.mrb[10].mxu1 %vm883_vm3, %v1385_v29  ;;  %v7495_v59 = vpop.eup %7494 }
 0x72a   : > { %6786 = vmatpush3.bf16.xpose.msk.msra.mxu1 %vm8002_vm2, %v6781_v53  ;;  %v1387_v37 = vmul.f32 %v7495_v59, %v8206_v20 }
 0x72b   : > { %6789 = vmatprep.subr.msk.bf16.mxu1 %vm8002_vm2, %v6787_v58 }
 0x72d   : > { %v7497_v60 = vpop.eup %7496 }
 0x72e   : > { %v1386_v62 = vmul.f32 %v7497_v60, %v8210_v21  ;;  %v1544_v21 = vpop.permute.xlu0 %1543 }
 0x730   : > { %6225 = vmatprep.mubr.msk.f32.mxu1 %vm883_vm3, %v1386_v62 }
 0x731   : > { %6226 = vmatmul.mubr.msk.f32.gmra.mrb[12].mxu1 %vm883_vm3, %v1387_v37 }
 0x732   : > { %6792 = vmatpush3.bf16.xpose.msk.msra.mxu1 %vm8002_vm2, %v6787_v58  ;;  %v1548_v33 = vpop.permute.xlu0 %1547 }
 0x733   : > { %6795 = vmatprep.subr.msk.bf16.mxu1 %vm8002_vm2, %v6793_v39 }
 0x736   : > { %v1552_v36 = vpop.permute.xlu0 %1551 }
 0x73a   : > { %6798 = vmatpush3.bf16.xpose.msk.msra.mxu1 %vm8002_vm2, %v6793_v39 }
 0x74b   : > { %v1373_v10 = vpop.xlane.xlu1 %1372 }
 0x74c   : > { %7498 = vrcp.f32 %v1373_v10 }
 0x74f   : > { %v1370_v23 = vpop.xlane.xlu1 %1369 }
 0x750   : > { %7500 = vrcp.f32 %v1370_v23 }
 0x753   : > { %v1546_v31 = vpop.permute.xlu1 %1545 }
 0x756   : > { %v7499_v20 = vpop.eup %7498 }
 0x757   : > { %v1389_v32 = vmul.f32 %v7499_v20, %v8228_v47  ;;  %v1550_v35 = vpop.permute.xlu1 %1549 }
 0x75a   : > { %v7501_v24 = vpop.eup %7500 }
 0x75b   : > { %v1388_v52 = vmul.f32 %v7501_v24, %v8234_v11  ;;  %v1554_v40 = vpop.permute.xlu1 %1553  ;;  %v1556_v11 = vpop.permute.xlu0 %1555 }
 0x75d   : > { %6228 = vmatprep.mubr.msk.f32.mxu1 %vm883_vm3, %v1388_v52 }
 0x75e   : > { %6229 = vmatmul.mubr.msk.f32.gmra.mrb[14].mxu1 %vm883_vm3, %v1389_v32 }
 0x75f   : > { %6247 = vmatprep.mubr.msk.f32.mxu1 %vm737_vm1, %v1544_v21  ;;  %v1558_v47 = vpop.permute.xlu1 %1557 }
 0x762   : > { %6248 = vmatmul.mubr.msk.f32.vlgmr.msra.gmra.mrb[16].mxu1 %vm737_vm1, %v1546_v31 }
 0x763   : > { %6250 = vmatprep.mubr.msk.f32.mxu1 %vm737_vm1, %v1548_v33 }
 0x766   : > { %6251 = vmatmul.mubr.msk.f32.gmra.mrb[18].mxu1 %vm737_vm1, %v1550_v35 }
 0x767   : > { %6253 = vmatprep.mubr.msk.f32.mxu1 %vm737_vm1, %v1552_v36 }
 0x76a   : > { %6254 = vmatmul.mubr.msk.f32.gmra.mrb[20].mxu1 %vm737_vm1, %v1554_v40 }
 0x76b   : > { %6256 = vmatprep.mubr.msk.f32.mxu1 %vm737_vm1, %v1556_v11 }
 0x76e   : > { %6257 = vmatmul.mubr.msk.f32.gmra.mrb[22].mxu1 %vm737_vm1, %v1558_v47 }
 0x7f4   : > { %v8284_v41 = vpop.f32.mrb[8].mxu1 }
 0x7f5   : > { %v8286_v42 = vpop.f32.mrb[9].mxu1 }
 0x7fc   : > { %v8288_v26 = vpop.f32.mrb[10].mxu1 }
 0x7fd   : > { %v8290_v25 = vpop.f32.mrb[11].mxu1 }
 0x804   : > { %v8292_v43 = vpop.f32.mrb[12].mxu1 }
 0x805   : > { %v8294_v44 = vpop.f32.mrb[13].mxu1 }
 0x831   : > { %v8296_v50 = vpop.f32.mrb[14].mxu1 }
 0x832   : > { %v8298_v51 = vpop.f32.mrb[15].mxu1 }
 0x835   : > { %v6249_v53 = vpop.f32.mrb[16].mxu1 }
 0x836   : > { %v1713_v34 = vmul.f32 0.35355338, %v6249_v53  ;;  %v1673_v54 = vpop.f32.mrb[17].mxu1 }
 0x837   : > { %v1712_v56 = vmul.f32 0.35355338, %v1673_v54 }
 0x838   : > { %v1723_v57 = vsel %vm883_vm3, %v1713_v34, -inf }
 0x839   : > { %1724 = vmax.xlane.f32.xlu1 %v1723_v57  ;;  %v6252_v30 = vpop.f32.mrb[18].mxu1  ;;  %v1720_v27 = vsel %vm883_vm3, %v1712_v56, -inf }
 0x83a   : > { %v1715_v46 = vmul.f32 0.35355338, %v6252_v30  ;;  %1721 = vmax.xlane.f32.xlu0 %v1720_v27  ;;  %v1683_v29 = vpop.f32.mrb[19].mxu1 }
 0x83b   : > { %v1714_v38 = vmul.f32 0.35355338, %v1683_v29 }
 0x83c   : > { %v1729_v58 = vsel %vm883_vm3, %v1715_v46, -inf }
 0x83d   : > { %v6255_v59 = vpop.f32.mrb[20].mxu1  ;;  %v1726_v39 = vsel %vm883_vm3, %v1714_v38, -inf }
 0x83e   : > { %v1717_v60 = vmul.f32 0.35355338, %v6255_v59  ;;  %1730 = vmax.xlane.f32.xlu0 %v1729_v58  ;;  %v1693_v61 = vpop.f32.mrb[21].mxu1 }
 0x83f   : > { %v1716_v62 = vmul.f32 0.35355338, %v1693_v61 }
 0x840   : > { %v1735_v45 = vsel %vm883_vm3, %v1717_v60, -inf }
 0x841   : > { %1736 = vmax.xlane.f32.xlu1 %v1735_v45  ;;  %v6258_v37 = vpop.f32.mrb[22].mxu1  ;;  %v1732_v24 = vsel %vm883_vm3, %v1716_v62, -inf }
 0x842   : > { %v8305_v10 = vmul.f32 0.35355338, %v6258_v37  ;;  %1727 = vmax.xlane.f32.xlu0 %v1726_v39  ;;  %v1703_v23 = vpop.f32.mrb[23].mxu1 }
 0x843   : > { %v8309_v20 = vmul.f32 0.35355338, %v1703_v23 }
 0x844   : > { %v1741_v21 = vsel %vm883_vm3, %v8305_v10, -inf }
 0x845   : > { %1742 = vmax.xlane.f32.xlu1 %v1741_v21  ;;  %v1738_v31 = vsel %vm883_vm3, %v8309_v20, -inf }
 0x846   : > { %1733 = vmax.xlane.f32.xlu0 %v1732_v24 }
 0x84a   : > { %1739 = vmax.xlane.f32.xlu0 %v1738_v31 }
 0x856   : > { %7228 = vrot.lane.b32.xlu1 %v7976_v2, %s7767_s18 }
 0x85a   : > { %7233 = vrot.lane.b32.xlu1 %v7986_v5, %s7767_s18 }
 0x85e   : > { %7238 = vrot.lane.b32.xlu1 %v7996_v9, %s7767_s18 }
 0x860   : > { %7223 = vrot.lane.b32.xlu0 %v7966_v49, %s7767_s18 }
 0x862   : > { %7248 = vrot.lane.b32.xlu1 %v7976_v2, %s9659_s19 }
 0x864   : > { %7243 = vrot.lane.b32.xlu0 %v7966_v49, %s9659_s19 }
 0x8c6   : > { %v1725_v52 = vpop.xlane.xlu1 %1724 }
 0x8c7   : > { %v1745_v32 = vsub.f32 %v1713_v34, %v1725_v52  ;;  %v1722_v33 = vpop.xlane.xlu0 %1721 }
 0x8c8   : > { %v1744_v35 = vsub.f32 %v1712_v56, %v1722_v33 }
 0x8c9   : > { %v1754_v36 = vmul.f32 1.442695, %v1745_v32 }
 0x8ca   : > { %v1752_v40 = vmul.f32 1.442695, %v1744_v35 }
 0x8cb   : > { %7502 = vpow2.f32 %v1754_v36  ;;  %v1731_v11 = vpop.xlane.xlu0 %1730 }
 0x8cc   : > { %7504 = vpow2.f32 %v1752_v40  ;;  %v1747_v47 = vsub.f32 %v1715_v46, %v1731_v11 }
 0x8ce   : > { %v1758_v53 = vmul.f32 1.442695, %v1747_v47  ;;  %v1737_v54 = vpop.xlane.xlu1 %1736 }
 0x8cf   : > { %v1749_v57 = vsub.f32 %v1717_v60, %v1737_v54  ;;  %v1728_v30 = vpop.xlane.xlu0 %1727 }
 0x8d0   : > { %7506 = vpow2.f32 %v1758_v53  ;;  %v1746_v27 = vsub.f32 %v1714_v38, %v1728_v30 }
 0x8d1   : > { %v1762_v29 = vmul.f32 1.442695, %v1749_v57 }
 0x8d2   : > { %v1756_v58 = vmul.f32 1.442695, %v1746_v27  ;;  %v1743_v59 = vpop.xlane.xlu1 %1742 }
 0x8d3   : > { %v1734_v61 = vpop.xlane.xlu0 %1733 }
 0x8d4   : > { %7508 = vpow2.f32 %v1756_v58  ;;  %v1748_v34 = vsub.f32 %v1716_v62, %v1734_v61 }
 0x8d5   : > { %v8322_v45 = vpop.eup %7502  ;;  %7510 = vpow2.f32 %v1762_v29 }
 0x8d6   : > { %v8324_v56 = vpop.eup %7504  ;;  %v1760_v37 = vmul.f32 1.442695, %v1748_v34  ;;  %v7229_v39 = vpop.permute.xlu1 %7228  ;;  %v1771_v46 = vsel %vm883_vm3, %v8322_v45, 0.0 }
 0x8d7   : > { %1772 = vadd.xlane.f32.xlu1 %v1771_v46  ;;  %v1740_v60 = vpop.xlane.xlu0 %1739  ;;  %v1768_v38 = vsel %vm883_vm3, %v8324_v56, 0.0  ;;  %v7231_v31 = vunpack.i.h.bf16 %v7229_v39  ;;  %v7230_v52 = vunpack.i.l.bf16 %v7229_v39 }
 0x8d8   : > { %1769 = vadd.xlane.f32.xlu0 %v1768_v38  ;;  %7512 = vpow2.f32 %v1760_v37 }
 0x8d9   : > { %v6803_v54 = vpack.c.bf16 %v7231_v31, %v7230_v52  ;;  %v1750_v31 = vsub.f32 %v8309_v20, %v1740_v60 }
 0x8da   : > { %v8330_v23 = vpop.eup %7506  ;;  %v7234_v62 = vpop.permute.xlu1 %7233 }
 0x8db   : > { %v7224_v21 = vpop.permute.xlu0 %7223  ;;  %v1777_v24 = vsel %vm883_vm3, %v8330_v23, 0.0  ;;  %v7236_v47 = vunpack.i.h.bf16 %v7234_v62  ;;  %v7235_v53 = vunpack.i.l.bf16 %v7234_v62  ;;  %v1764_v52 = vmul.f32 1.442695, %v1750_v31 }
 0x8dc   : > { %v7226_v32 = vunpack.i.h.bf16 %v7224_v21  ;;  %v7225_v33 = vunpack.i.l.bf16 %v7224_v21  ;;  %1778 = vadd.xlane.f32.xlu1 %v1777_v24  ;;  %v1751_v21 = vsub.f32 %v8305_v10, %v1743_v59 }
 0x8dd   : > { %v6807_v61 = vpack.c.bf16 %v7236_v47, %v7235_v53 }
 0x8de   : > { %v8334_v35 = vpop.eup %7508  ;;  %v6799_v36 = vpack.c.bf16 %v7226_v32, %v7225_v33  ;;  %v7239_v57 = vpop.permute.xlu1 %7238  ;;  %v1766_v24 = vmul.f32 1.442695, %v1751_v21 }
 0x8df   : > { %v1774_v40 = vsel %vm883_vm3, %v8334_v35, 0.0  ;;  %v8338_v11 = vpop.eup %7510  ;;  %v7241_v29 = vunpack.i.h.bf16 %v7239_v57  ;;  %v7240_v58 = vunpack.i.l.bf16 %v7239_v57  ;;  %v7244_v34 = vpop.permute.xlu0 %7243 }
 0x8e0   : > { %1775 = vadd.xlane.f32.xlu0 %v1774_v40  ;;  %6800 = vmatprep.subr.bf16.mxu0 %v6799_v36  ;;  %v1783_v30 = vsel %vm883_vm3, %v8338_v11, 0.0  ;;  %v7246_v39 = vunpack.i.h.bf16 %v7244_v34  ;;  %v7245_v46 = vunpack.i.l.bf16 %v7244_v34  ;;  %7514 = vpow2.f32 %v1766_v24 }
 0x8e1   : > { %6802 = vmatpush3.bf16.msra.mxu0 %v6799_v36  ;;  %v6811_v38 = vpack.c.bf16 %v7241_v29, %v7240_v58  ;;  %7516 = vpow2.f32 %v1764_v52 }
 0x8e2   : > { %6804 = vmatprep.subr.bf16.mxu0 %v6803_v54  ;;  %v8342_v27 = vpop.eup %7512  ;;  %v6815_v62 = vpack.c.bf16 %v7246_v39, %v7245_v46 }
 0x8e3   : > { %v1780_v37 = vsel %vm883_vm3, %v8342_v27, 0.0 }
 0x8e4   : > { %1784 = vadd.xlane.f32.xlu0 %v1783_v30 }
 0x8e5   : > { %6806 = vmatpush3.bf16.msra.mxu0 %v6803_v54 }
 0x8e6   : > { %6808 = vmatprep.subr.bf16.mxu0 %v6807_v61 }
 0x8e8   : > { %1781 = vadd.xlane.f32.xlu0 %v1780_v37 }
 0x8e9   : > { %6810 = vmatpush3.bf16.msra.mxu0 %v6807_v61 }
 0x8ea   : > { %6812 = vmatprep.subr.bf16.mxu0 %v6811_v38  ;;  %v8360_v10 = vpop.eup %7514 }
 0x8eb   : > { %v1789_v20 = vsel %vm883_vm3, %v8360_v10, 0.0  ;;  %v8366_v59 = vpop.eup %7516 }
 0x8ed   : > { %7258 = vrot.lane.b32.xlu1 %v7996_v9, %s9659_s19  ;;  %6814 = vmatpush3.bf16.msra.mxu0 %v6811_v38 }
 0x8ee   : > { %6817 = vmatprep.subr.msk.bf16.mxu0 %vm8002_vm2, %v6815_v62 }
 0x8fe   : > { %7253 = vrot.lane.b32.xlu0 %v7986_v5, %s9659_s19  ;;  %s9672_s19 = sshll.u32 %s9674_s26, 6 }
 0x8ff   : > { %s440_s18 = scalar_lea.vmem %s9657_s13, %s9672_s19 }
 0x902   : > { %1961 = vrot.lane.b32.xlu0 %v7960_v63, %s9661_s20  ;;  %v1786_v63 = vsel %vm883_vm3, %v8366_v59, 0.0 }
 0x906   : > { %1965 = vrot.lane.b32.xlu0 %v7972_v1, %s9661_s20  ;;  %v7249_v1 = vpop.permute.xlu1 %7248 }
 0x907   : > { %v7251_v36 = vunpack.i.h.bf16 %v7249_v1  ;;  %v7250_v40 = vunpack.i.l.bf16 %v7249_v1 }
 0x90a   : > { %1969 = vrot.lane.b32.xlu0 %v7982_v4, %s9661_s20 }
 0x90e   : > { %1973 = vrot.lane.b32.xlu0 %v7992_v8, %s9661_s20 }
 0x911   : > { %1790 = vadd.xlane.f32.xlu1 %v1789_v20 }
 0x915   : > { %1787 = vadd.xlane.f32.xlu1 %v1786_v63 }
 0x926   : > { %1963 = vrot.lane.b32.xlu1 %v7958_v48, %s9661_s20 }
 0x92a   : > { %1967 = vrot.lane.b32.xlu1 %v7970_v0, %s9661_s20 }
 0x92e   : > { %1971 = vrot.lane.b32.xlu1 %v7980_v3, %s9661_s20 }
 0x932   : > { %1975 = vrot.lane.b32.xlu1 %v7990_v7, %s9661_s20  ;;  %v6821_v7 = vpack.c.bf16 %v7251_v36, %v7250_v40 }
 0x964   : > { %v1773_v4 = vpop.xlane.xlu1 %1772 }
 0x965   : > { %7518 = vrcp.f32 %v1773_v4  ;;  %v1770_v8 = vpop.xlane.xlu0 %1769 }
 0x966   : > { %7520 = vrcp.f32 %v1770_v8 }
 0x969   : > { %v1779_v60 = vpop.xlane.xlu1 %1778 }
 0x96a   : > { %7522 = vrcp.f32 %v1779_v60 }
 0x96d   : > { %v1776_v32 = vpop.xlane.xlu0 %1775  ;;  %v7259_v34 = vpop.permute.xlu1 %7258 }
 0x96e   : > { %7524 = vrcp.f32 %v1776_v32  ;;  %v7261_v46 = vunpack.i.h.bf16 %v7259_v34 }
 0x96f   : > { %v7519_v33 = vpop.eup %7518 }
 0x970   : > { %v7521_v48 = vpop.eup %7520  ;;  %v1801_v3 = vmul.f32 %v7519_v33, %v8322_v45 }
 0x971   : > { %v1785_v0 = vpop.xlane.xlu0 %1784  ;;  %v1800_v47 = vmul.f32 %v7521_v48, %v8324_v56 }
 0x972   : > { %7526 = vrcp.f32 %v1785_v0 }
 0x973   : > { %6275 = vmatprep.mubr.msk.f32.mxu0 %vm883_vm3, %v1800_v47 }
 0x974   : > { %6276 = vmatmul.mubr.msk.f32.vlgmr.msra.gmra.mrb[24].mxu0 %vm883_vm3, %v1801_v3  ;;  %v7523_v54 = vpop.eup %7522 }
 0x975   : > { %6820 = vmatpush3.bf16.xpose.msk.msra.mxu0 %vm8002_vm2, %v6815_v62  ;;  %v1782_v53 = vpop.xlane.xlu0 %1781  ;;  %v1803_v58 = vmul.f32 %v7523_v54, %v8330_v23 }
 0x976   : > { %7528 = vrcp.f32 %v1782_v53  ;;  %6823 = vmatprep.subr.msk.bf16.mxu0 %vm8002_vm2, %v6821_v7 }
 0x978   : > { %v7525_v57 = vpop.eup %7524 }
 0x979   : > { %v7254_v30 = vpop.permute.xlu0 %7253  ;;  %v1802_v56 = vmul.f32 %v7525_v57, %v8334_v35  ;;  %v7260_v35 = vunpack.i.l.bf16 %v7259_v34 }
 0x97a   : > { %v7256_v45 = vunpack.i.h.bf16 %v7254_v30  ;;  %v7255_v29 = vunpack.i.l.bf16 %v7254_v30 }
 0x97b   : > { %6278 = vmatprep.mubr.msk.f32.mxu0 %vm883_vm3, %v1802_v56  ;;  %v6833_v62 = vpack.c.bf16 %v7261_v46, %v7260_v35 }
 0x97c   : > { %v6827_v61 = vpack.c.bf16 %v7256_v45, %v7255_v29  ;;  %6279 = vmatmul.mubr.msk.f32.gmra.mrb[26].mxu0 %vm883_vm3, %v1803_v58  ;;  %v7527_v37 = vpop.eup %7526 }
 0x97d   : > { %6826 = vmatpush3.bf16.xpose.msk.msra.mxu0 %vm8002_vm2, %v6821_v7  ;;  %v1805_v23 = vmul.f32 %v7527_v37, %v8338_v11 }
 0x97e   : > { %6829 = vmatprep.subr.msk.bf16.mxu0 %vm8002_vm2, %v6827_v61 }
 0x980   : > { %v7529_v39 = vpop.eup %7528 }
 0x981   : > { %v1804_v38 = vmul.f32 %v7529_v39, %v8342_v27  ;;  %v1962_v27 = vpop.permute.xlu0 %1961 }
 0x983   : > { %6281 = vmatprep.mubr.msk.f32.mxu0 %vm883_vm3, %v1804_v38 }
 0x984   : > { %6282 = vmatmul.mubr.msk.f32.gmra.mrb[28].mxu0 %vm883_vm3, %v1805_v23 }
 0x985   : > { %6832 = vmatpush3.bf16.xpose.msk.msra.mxu0 %vm8002_vm2, %v6827_v61  ;;  %v1966_v1 = vpop.permute.xlu0 %1965 }
 0x986   : > { %6835 = vmatprep.subr.msk.bf16.mxu0 %vm8002_vm2, %v6833_v62 }
 0x989   : > { %v1970_v8 = vpop.permute.xlu0 %1969 }
 0x98d   : > { %6838 = vmatpush3.bf16.xpose.msk.msra.mxu0 %vm8002_vm2, %v6833_v62 }
 0x99e   : > { %v1791_v21 = vpop.xlane.xlu1 %1790 }
 0x99f   : > { %7530 = vrcp.f32 %v1791_v21 }
 0x9a2   : > { %v1788_v24 = vpop.xlane.xlu1 %1787 }
 0x9a3   : > { %7532 = vrcp.f32 %v1788_v24 }
 0x9a6   : > { %v1964_v52 = vpop.permute.xlu1 %1963 }
 0x9a9   : > { %v7531_v11 = vpop.eup %7530 }
 0x9aa   : > { %v1807_v63 = vmul.f32 %v7531_v11, %v8360_v10  ;;  %v1968_v4 = vpop.permute.xlu1 %1967 }
 0x9ad   : > { %v7533_v31 = vpop.eup %7532 }
 0x9ae   : > { %v1806_v20 = vmul.f32 %v7533_v31, %v8366_v59  ;;  %v1972_v60 = vpop.permute.xlu1 %1971  ;;  %v1974_v59 = vpop.permute.xlu0 %1973 }
 0x9b0   : > { %6284 = vmatprep.mubr.msk.f32.mxu0 %vm883_vm3, %v1806_v20 }
 0x9b1   : > { %6285 = vmatmul.mubr.msk.f32.gmra.mrb[30].mxu0 %vm883_vm3, %v1807_v63 }
 0x9b2   : > { %6303 = vmatprep.mubr.msk.f32.mxu0 %vm737_vm1, %v1962_v27  ;;  %v1976_v10 = vpop.permute.xlu1 %1975 }
 0x9b5   : > { %6304 = vmatmul.mubr.msk.f32.vlgmr.msra.gmra.mrb[32].mxu0 %vm737_vm1, %v1964_v52 }
 0x9b6   : > { %6306 = vmatprep.mubr.msk.f32.mxu0 %vm737_vm1, %v1966_v1 }
 0x9b9   : > { %6307 = vmatmul.mubr.msk.f32.gmra.mrb[34].mxu0 %vm737_vm1, %v1968_v4 }
 0x9ba   : > { %6309 = vmatprep.mubr.msk.f32.mxu0 %vm737_vm1, %v1970_v8 }
 0x9bd   : > { %6310 = vmatmul.mubr.msk.f32.gmra.mrb[36].mxu0 %vm737_vm1, %v1972_v60 }
 0x9be   : > { %6312 = vmatprep.mubr.msk.f32.mxu0 %vm737_vm1, %v1974_v59 }
 0x9c1   : > { %6313 = vmatmul.mubr.msk.f32.gmra.mrb[38].mxu0 %vm737_vm1, %v1976_v10 }
 0xa47   : > { %v8416_v32 = vpop.f32.mrb[24].mxu0 }
 0xa48   : > { %v8418_v33 = vpop.f32.mrb[25].mxu0 }
 0xa4f   : > { %v8420_v48 = vpop.f32.mrb[26].mxu0 }
 0xa50   : > { %v8422_v36 = vpop.f32.mrb[27].mxu0 }
 0xa57   : > { %v8424_v40 = vpop.f32.mrb[28].mxu0 }
 0xa58   : > { %v8426_v0 = vpop.f32.mrb[29].mxu0 }
 0xa84   : > { %v8428_v47 = vpop.f32.mrb[30].mxu0 }
 0xa85   : > { %v8430_v3 = vpop.f32.mrb[31].mxu0 }
 0xa88   : > { %v6305_v7 = vpop.f32.mrb[32].mxu0 }
 0xa89   : > { %v2131_v53 = vmul.f32 0.35355338, %v6305_v7  ;;  %v2091_v54 = vpop.f32.mrb[33].mxu0 }
 0xa8a   : > { %v2130_v57 = vmul.f32 0.35355338, %v2091_v54 }
 0xa8b   : > { %v2141_v30 = vsel %vm883_vm3, %v2131_v53, -inf }
 0xa8c   : > { %2142 = vmax.xlane.f32.xlu1 %v2141_v30  ;;  %v6308_v56 = vpop.f32.mrb[34].mxu0  ;;  %v2138_v45 = vsel %vm883_vm3, %v2130_v57, -inf }
 0xa8d   : > { %v2133_v29 = vmul.f32 0.35355338, %v6308_v56  ;;  %2139 = vmax.xlane.f32.xlu0 %v2138_v45  ;;  %v2101_v58 = vpop.f32.mrb[35].mxu0 }
 0xa8e   : > { %v2132_v34 = vmul.f32 0.35355338, %v2101_v58 }
 0xa8f   : > { %v2147_v61 = vsel %vm883_vm3, %v2133_v29, -inf }
 0xa90   : > { %v6311_v37 = vpop.f32.mrb[36].mxu0  ;;  %v2144_v62 = vsel %vm883_vm3, %v2132_v34, -inf }
 0xa91   : > { %v2135_v39 = vmul.f32 0.35355338, %v6311_v37  ;;  %2148 = vmax.xlane.f32.xlu0 %v2147_v61  ;;  %v2111_v46 = vpop.f32.mrb[37].mxu0 }
 0xa92   : > { %v2134_v38 = vmul.f32 0.35355338, %v2111_v46 }
 0xa93   : > { %v2153_v35 = vsel %vm883_vm3, %v2135_v39, -inf }
 0xa94   : > { %2154 = vmax.xlane.f32.xlu1 %v2153_v35  ;;  %v6314_v23 = vpop.f32.mrb[38].mxu0  ;;  %v2150_v31 = vsel %vm883_vm3, %v2134_v38, -inf }
 0xa95   : > { %v8437_v21 = vmul.f32 0.35355338, %v6314_v23  ;;  %2145 = vmax.xlane.f32.xlu0 %v2144_v62  ;;  %v2121_v24 = vpop.f32.mrb[39].mxu0 }
 0xa96   : > { %v8441_v11 = vmul.f32 0.35355338, %v2121_v24 }
 0xa97   : > { %v2159_v27 = vsel %vm883_vm3, %v8437_v21, -inf }
 0xa98   : > { %2160 = vmax.xlane.f32.xlu1 %v2159_v27  ;;  %v2156_v52 = vsel %vm883_vm3, %v8441_v11, -inf }
 0xa99   : > { %2151 = vmax.xlane.f32.xlu0 %v2150_v31 }
 0xa9d   : > { %2157 = vmax.xlane.f32.xlu0 %v2156_v52 }
 0xaa9   : > { %7268 = vrot.lane.b32.xlu1 %v7976_v2, %s7770_s21 }
 0xab3   : > { %7263 = vrot.lane.b32.xlu0 %v7966_v49, %s7770_s21 }
 0xb19   : > { %v2143_v20 = vpop.xlane.xlu1 %2142 }
 0xb1a   : > { %v2163_v63 = vsub.f32 %v2131_v53, %v2143_v20  ;;  %v2140_v1 = vpop.xlane.xlu0 %2139 }
 0xb1b   : > { %v2162_v4 = vsub.f32 %v2130_v57, %v2140_v1 }
 0xb1c   : > { %v2172_v8 = vmul.f32 1.442695, %v2163_v63 }
 0xb1d   : > { %v2170_v60 = vmul.f32 1.442695, %v2162_v4 }
 0xb1e   : > { %7534 = vpow2.f32 %v2172_v8  ;;  %v2149_v59 = vpop.xlane.xlu0 %2148 }
 0xb1f   : > { %7536 = vpow2.f32 %v2170_v60  ;;  %v2165_v10 = vsub.f32 %v2133_v29, %v2149_v59 }
 0xb21   : > { %v2176_v7 = vmul.f32 1.442695, %v2165_v10  ;;  %v2155_v54 = vpop.xlane.xlu1 %2154 }
 0xb22   : > { %v2167_v30 = vsub.f32 %v2135_v39, %v2155_v54  ;;  %v2146_v56 = vpop.xlane.xlu0 %2145 }
 0xb23   : > { %7538 = vpow2.f32 %v2176_v7  ;;  %v2164_v45 = vsub.f32 %v2132_v34, %v2146_v56 }
 0xb24   : > { %v2180_v2 = vmul.f32 1.442695, %v2167_v30 }
 0xb25   : > { %v2174_v58 = vmul.f32 1.442695, %v2164_v45  ;;  %v2161_v61 = vpop.xlane.xlu1 %2160 }
 0xb26   : > { %v2152_v49 = vpop.xlane.xlu0 %2151  ;;  %v2169_v7 = vsub.f32 %v8437_v21, %v2161_v61 }
 0xb27   : > { %7540 = vpow2.f32 %v2174_v58  ;;  %v2166_v53 = vsub.f32 %v2134_v38, %v2152_v49 }
 0xb28   : > { %v8450_v37 = vpop.eup %7534  ;;  %7542 = vpow2.f32 %v2180_v2  ;;  %v2184_v30 = vmul.f32 1.442695, %v2169_v7 }
 0xb29   : > { %v8452_v57 = vpop.eup %7536  ;;  %v2178_v46 = vmul.f32 1.442695, %v2166_v53  ;;  %v2189_v29 = vsel %vm883_vm3, %v8450_v37, 0.0  ;;  %v7269_v35 = vpop.permute.xlu1 %7268 }
 0xb2a   : > { %2190 = vadd.xlane.f32.xlu1 %v2189_v29  ;;  %v2158_v39 = vpop.xlane.xlu0 %2157  ;;  %v2186_v34 = vsel %vm883_vm3, %v8452_v57, 0.0  ;;  %v7271_v24 = vunpack.i.h.bf16 %v7269_v35  ;;  %v7270_v27 = vunpack.i.l.bf16 %v7269_v35 }
 0xb2b   : > { %7544 = vpow2.f32 %v2178_v46  ;;  %2187 = vadd.xlane.f32.xlu0 %v2186_v34  ;;  %v2168_v54 = vsub.f32 %v8441_v11, %v2158_v39 }
 0xb2c   : > { %v6843_v8 = vpack.c.bf16 %v7271_v24, %v7270_v27  ;;  %7546 = vpow2.f32 %v2184_v30 }
 0xb2d   : > { %v8458_v23 = vpop.eup %7538  ;;  %v2182_v56 = vmul.f32 1.442695, %v2168_v54 }
 0xb2e   : > { %v7264_v38 = vpop.permute.xlu0 %7263  ;;  %v2195_v62 = vsel %vm883_vm3, %v8458_v23, 0.0 }
 0xb2f   : > { %v7266_v31 = vunpack.i.h.bf16 %v7264_v38  ;;  %v7265_v52 = vunpack.i.l.bf16 %v7264_v38  ;;  %2196 = vadd.xlane.f32.xlu1 %v2195_v62  ;;  %7548 = vpow2.f32 %v2182_v56 }
 0xb31   : > { %v8462_v20 = vpop.eup %7540  ;;  %v6839_v63 = vpack.c.bf16 %v7266_v31, %v7265_v52 }
 0xb32   : > { %v2192_v1 = vsel %vm883_vm3, %v8462_v20, 0.0  ;;  %v8466_v4 = vpop.eup %7542 }
 0xb33   : > { %2193 = vadd.xlane.f32.xlu0 %v2192_v1  ;;  %6840 = vmatprep.subr.bf16.mxu1 %v6839_v63  ;;  %v2201_v10 = vsel %vm883_vm3, %v8466_v4, 0.0  ;;  %v2501_v1 = vld [vmem:[%s9647_s3] sm:$0xff] }
 0xb34   : > { %6842 = vmatpush3.bf16.msra.mxu1 %v6839_v63 }
 0xb35   : > { %v8468_v60 = vpop.eup %7544  ;;  %6844 = vmatprep.subr.bf16.mxu1 %v6843_v8 }
 0xb36   : > { %v2198_v59 = vsel %vm883_vm3, %v8468_v60, 0.0  ;;  %v8480_v45 = vpop.eup %7546 }
 0xb37   : > { %2199 = vadd.xlane.f32.xlu1 %v2198_v59  ;;  %2202 = vadd.xlane.f32.xlu0 %v2201_v10  ;;  %v2207_v58 = vsel %vm883_vm3, %v8480_v45, 0.0  ;;  %v2504_v59 = vld [vmem:[%s9647_s3 + $0x18] sm:$0xff] }
 0xb38   : > { %6846 = vmatpush3.bf16.msra.mxu1 %v6843_v8  ;;  %v2503_v8 = vld [vmem:[%s9647_s3 + $0x10] sm:$0xff] }
 0xb39   : > { %v8482_v2 = vpop.eup %7548  ;;  %v6859_v10 = vpack.c.bf16 %v2504_v59, %v2503_v8 }
 0xb48   : > { %7278 = vrot.lane.b32.xlu1 %v7996_v9, %s7770_s21  ;;  %v2204_v9 = vsel %vm883_vm3, %v8482_v2, 0.0 }
 0xb4d   : > { %7273 = vrot.lane.b32.xlu0 %v7986_v5, %s7770_s21 }
 0xb6c   : > { %2208 = vadd.xlane.f32.xlu0 %v2207_v58  ;;  %2205 = vadd.xlane.f32.xlu1 %v2204_v9 }
 0xb7d   : > { %2389 = vrot.lane.b32.xlu1 %v8284_v41, %s7771_s22 }
 0xb81   : > { %2419 = vrot.lane.b32.xlu1 %v8418_v33, %s7772_s23 }
 0xb82   : > { %2387 = vrot.lane.b32.xlu0 %v8286_v42, %s7771_s22 }
 0xb85   : > { %2421 = vrot.lane.b32.xlu1 %v8416_v32, %s7772_s23 }
 0xb86   : > { %2391 = vrot.lane.b32.xlu0 %v8290_v25, %s7771_s22 }
 0xb89   : > { %2393 = vrot.lane.b32.xlu1 %v8288_v26, %s7771_s22 }
 0xb8a   : > { %2423 = vrot.lane.b32.xlu0 %v8422_v36, %s7772_s23 }
 0xb8d   : > { %2425 = vrot.lane.b32.xlu1 %v8420_v48, %s7772_s23 }
 0xb8e   : > { %2395 = vrot.lane.b32.xlu0 %v8294_v44, %s7771_s22 }
 0xb91   : > { %2397 = vrot.lane.b32.xlu1 %v8292_v43, %s7771_s22 }
 0xbb7   : > { %v2191_v41 = vpop.xlane.xlu1 %2190 }
 0xbb8   : > { %v2188_v5 = vpop.xlane.xlu0 %2187 }
 0xbb9   : > { %7550 = vrcp.f32 %v2188_v5 }
 0xbba   : > { %7552 = vrcp.f32 %v2191_v41 }
 0xbbc   : > { %v2197_v42 = vpop.xlane.xlu1 %2196 }
 0xbc0   : > { %v2194_v25 = vpop.xlane.xlu0 %2193 }
 0xbc1   : > { %7554 = vrcp.f32 %v2194_v25 }
 0xbc2   : > { %7556 = vrcp.f32 %v2197_v42 }
 0xbc3   : > { %v7551_v32 = vpop.eup %7550 }
 0xbc4   : > { %v2200_v33 = vpop.xlane.xlu1 %2199  ;;  %v2203_v26 = vpop.xlane.xlu0 %2202  ;;  %v2218_v21 = vmul.f32 %v7551_v32, %v8452_v57 }
 0xbc5   : > { %7558 = vrcp.f32 %v2200_v33  ;;  %v7553_v46 = vpop.eup %7552 }
 0xbc6   : > { %6331 = vmatprep.mubr.msk.f32.mxu1 %vm883_vm3, %v2218_v21  ;;  %7560 = vrcp.f32 %v2203_v26  ;;  %v2219_v29 = vmul.f32 %v7553_v46, %v8450_v37 }
 0xbc8   : > { %v7279_v48 = vpop.permute.xlu1 %7278  ;;  %v7274_v36 = vpop.permute.xlu0 %7273 }
 0xbc9   : > { %v7281_v44 = vunpack.i.h.bf16 %v7279_v48  ;;  %v7280_v11 = vunpack.i.l.bf16 %v7279_v48  ;;  %v7276_v61 = vunpack.i.h.bf16 %v7274_v36  ;;  %v7275_v43 = vunpack.i.l.bf16 %v7274_v36 }
 0xbcb   : > { %v6847_v49 = vpack.c.bf16 %v7276_v61, %v7275_v43  ;;  %v6851_v53 = vpack.c.bf16 %v7281_v44, %v7280_v11  ;;  %v7555_v57 = vpop.eup %7554 }
 0xbcc   : > { %v7557_v39 = vpop.eup %7556  ;;  %v2220_v34 = vmul.f32 %v7555_v57, %v8462_v20 }
 0xbcd   : > { %6848 = vmatprep.subr.bf16.mxu1 %v6847_v49  ;;  %v2221_v38 = vmul.f32 %v7557_v39, %v8458_v23 }
 0xbce   : > { %6850 = vmatpush3.bf16.msra.mxu1 %v6847_v49 }
 0xbcf   : > { %6852 = vmatprep.subr.bf16.mxu1 %v6851_v53  ;;  %v7559_v35 = vpop.eup %7558 }
 0xbd0   : > { %v7561_v62 = vpop.eup %7560  ;;  %v2222_v24 = vmul.f32 %v7559_v35, %v8468_v60 }
 0xbd1   : > { %v2223_v27 = vmul.f32 %v7561_v62, %v8466_v4  ;;  %v2502_v4 = vld [vmem:[%s9647_s3 + $0x8] sm:$0xff] }
 0xbd2   : > { %6854 = vmatpush3.bf16.msra.mxu1 %v6851_v53  ;;  %v6855_v60 = vpack.c.bf16 %v2502_v4, %v2501_v1 }
 0xbd4   : > { %6856 = vmatprep.subr.bf16.mxu1 %v6855_v60 }
 0xbd5   : > { %6332 = vmatmul.mubr.msk.f32.vlgmr.msra.gmra.mrb[24].mxu1 %vm883_vm3, %v2219_v29 }
 0xbd6   : > { %6334 = vmatprep.mubr.msk.f32.mxu1 %vm883_vm3, %v2220_v34  ;;  %6858 = vmatpush3.bf16.msra.mxu1 %v6855_v60 }
 0xbd7   : > { %6860 = vmatprep.subr.bf16.mxu1 %v6859_v10 }
 0xbd9   : > { %6335 = vmatmul.mubr.msk.f32.gmra.mrb[26].mxu1 %vm883_vm3, %v2221_v38 }
 0xbda   : > { %6337 = vmatprep.mubr.msk.f32.mxu1 %vm883_vm3, %v2222_v24  ;;  %6862 = vmatpush3.bf16.msra.mxu1 %v6859_v10 }
 0xbdd   : > { %6338 = vmatmul.mubr.msk.f32.gmra.mrb[28].mxu1 %vm883_vm3, %v2223_v27 }
 0xbf9   : > { %v2206_v37 = vpop.xlane.xlu1 %2205  ;;  %v2209_v31 = vpop.xlane.xlu0 %2208 }
 0xbfa   : > { %7562 = vrcp.f32 %v2206_v37 }
 0xbfb   : > { %7564 = vrcp.f32 %v2209_v31 }
 0xc04   : > { %v7563_v52 = vpop.eup %7562 }
 0xc05   : > { %v7565_v20 = vpop.eup %7564  ;;  %v2224_v63 = vmul.f32 %v7563_v52, %v8482_v2 }
 0xc06   : > { %v2225_v23 = vmul.f32 %v7565_v20, %v8480_v45 }
 0xc07   : > { %6340 = vmatprep.mubr.msk.f32.mxu1 %vm883_vm3, %v2224_v63 }
 0xc08   : > { %6341 = vmatmul.mubr.msk.f32.gmra.mrb[30].mxu1 %vm883_vm3, %v2225_v23 }
 0xca8   : > { %v6333_v7 = vpop.f32.mrb[24].mxu1 }
 0xca9   : > { %2453 = vrot.lane.b32.xlu1 %v6333_v7, %s7773_s28  ;;  %v2340_v54 = vpop.f32.mrb[25].mxu1 }
 0xcaa   : > { %2451 = vrot.lane.b32.xlu0 %v2340_v54, %s7773_s28  ;;  %v7742_v54 = vld [vmem:[%s7861_s30 + $0x8] sm:$0xff] }
 0xcac   : > { %v6336_v30 = vpop.f32.mrb[26].mxu1 }
 0xcad   : > { %2429 = vrot.lane.b32.xlu1 %v8424_v40, %s7772_s23  ;;  %v2350_v56 = vpop.f32.mrb[27].mxu1 }
 0xcae   : > { %2427 = vrot.lane.b32.xlu0 %v8426_v0, %s7772_s23 }
 0xcb0   : > { %v6339_v45 = vpop.f32.mrb[28].mxu1 }
 0xcb1   : > { %2457 = vrot.lane.b32.xlu1 %v6336_v30, %s7773_s28  ;;  %v2360_v2 = vpop.f32.mrb[29].mxu1 }
 0xcb2   : > { %2455 = vrot.lane.b32.xlu0 %v2350_v56, %s7773_s28  ;;  %v7743_v56 = vld [vmem:[%s7861_s30] sm:$0xff] }
 0xcb5   : > { %2401 = vrot.lane.b32.xlu1 %v8296_v50, %s7771_s22  ;;  %v2390_v50 = vpop.permute.xlu1 %2389 }
 0xcb6   : > { %2399 = vrot.lane.b32.xlu0 %v8298_v51, %s7771_s22  ;;  %v2388_v51 = vpop.permute.xlu0 %2387  ;;  %v2476_v26 = vsel %vm737_vm1, %v8152_v28, %v2390_v50 }
 0xcb9   : > { %2461 = vrot.lane.b32.xlu1 %v6339_v45, %s7773_s28  ;;  %v2420_v58 = vpop.permute.xlu1 %2419 }
 0xcba   : > { %2459 = vrot.lane.b32.xlu0 %v2360_v2, %s7773_s28  ;;  %v2392_v41 = vpop.permute.xlu0 %2391 }
 0xcbd   : > { %2433 = vrot.lane.b32.xlu1 %v8428_v47, %s7772_s23  ;;  %v2422_v9 = vpop.permute.xlu1 %2421  ;;  %v2475_v47 = vsel %vm737_vm1, %v8154_v55, %v2388_v51  ;;  %v2477_v55 = vsel %vm737_vm1, %v8158_v15, %v2392_v41  ;;  %v7744_v51 = vld [vmem:[%s7861_s30 + $0x10] sm:$0xff]  ;;  %v7745_v41 = vld [vmem:[%s7861_s30 + $0x18] sm:$0xff] }
 0xcbe   : > { %2431 = vrot.lane.b32.xlu0 %v8430_v3, %s7772_s23  ;;  %v2424_v25 = vpop.permute.xlu0 %2423  ;;  %v2484_v21 = vsel %vm2483_vm4, %v2475_v47, %v2420_v58  ;;  %v2485_v36 = vsel %vm2483_vm4, %v2476_v26, %v2422_v9 }
 0xcbf   : > { %v2486_v28 = vsel %vm2483_vm4, %v2477_v55, %v2424_v25 }
 0xcc1   : > { %v2394_v5 = vpop.permute.xlu1 %2393 }
 0xcc2   : > { %v2396_v33 = vpop.permute.xlu0 %2395  ;;  %v2478_v53 = vsel %vm737_vm1, %v8156_v12, %v2394_v5 }
 0xcc3   : > { %v2479_v15 = vsel %vm737_vm1, %v8162_v17, %v2396_v33 }
 0xcc5   : > { %v2426_v42 = vpop.permute.xlu1 %2425 }
 0xcc6   : > { %v2487_v57 = vsel %vm2483_vm4, %v2478_v53, %v2426_v42  ;;  %v7748_v53 = vld [vmem:[%s7861_s30 + $0x38] sm:$0xff] }
 0xcc9   : > { %v2398_v32 = vpop.permute.xlu1 %2397 }
 0xcca   : > { %v2480_v12 = vsel %vm737_vm1, %v8160_v16, %v2398_v32 }
 0xcdb   : > { %v6342_v40 = vpop.f32.mrb[30].mxu1 }
 0xcdc   : > { %2465 = vrot.lane.b32.xlu1 %v6342_v40, %s7773_s28  ;;  %v2370_v0 = vpop.f32.mrb[31].mxu1 }
 0xcdd   : > { %2463 = vrot.lane.b32.xlu0 %v2370_v0, %s7773_s28 }
 0xd1b   : > { %v2454_v3 = vpop.permute.xlu1 %2453 }
 0xd1c   : > { %v2452_v48 = vpop.permute.xlu0 %2451  ;;  %v2494_v11 = vsel %vm2492_vm5, %v2485_v36, %v2454_v3  ;;  %v7747_v36 = vld [vmem:[%s7861_s30 + $0x20] sm:$0xff] }
 0xd1d   : > { %v2493_v44 = vsel %vm2492_vm5, %v2484_v21, %v2452_v48  ;;  %v7746_v21 = vld [vmem:[%s7861_s30 + $0x28] sm:$0xff] }
 0xd1e   : > { %6351 = vmatprep.mubr.msk.f32.mxu1 %vm450_vm0, %v2493_v44 }
 0xd1f   : > { %v2430_v61 = vpop.permute.xlu1 %2429  ;;  %6352 = vmatmul.mubr.msk.f32.vlgmr.msra.gmra.mrb[32].mxu1 %vm450_vm0, %v2494_v11 }
 0xd20   : > { %v2428_v43 = vpop.permute.xlu0 %2427  ;;  %v2489_v27 = vsel %vm2483_vm4, %v2480_v12, %v2430_v61 }
 0xd21   : > { %v2488_v62 = vsel %vm2483_vm4, %v2479_v15, %v2428_v43 }
 0xd23   : > { %v2458_v49 = vpop.permute.xlu1 %2457 }
 0xd24   : > { %v2456_v46 = vpop.permute.xlu0 %2455  ;;  %v2496_v39 = vsel %vm2492_vm5, %v2487_v57, %v2458_v49  ;;  %v7749_v57 = vld [vmem:[%s7861_s30 + $0x30] sm:$0xff] }
 0xd25   : > { %v2495_v29 = vsel %vm2492_vm5, %v2486_v28, %v2456_v46 }
 0xd26   : > { %6354 = vmatprep.mubr.msk.f32.mxu1 %vm450_vm0, %v2495_v29 }
 0xd27   : > { %v2402_v34 = vpop.permute.xlu1 %2401  ;;  %6355 = vmatmul.mubr.msk.f32.gmra.mrb[34].mxu1 %vm450_vm0, %v2496_v39 }
 0xd28   : > { %v2400_v35 = vpop.permute.xlu0 %2399  ;;  %v2482_v63 = vsel %vm737_vm1, %v8164_v18, %v2402_v34 }
 0xd29   : > { %v2481_v17 = vsel %vm737_vm1, %v8166_v22, %v2400_v35  ;;  %v5618_v22 = vld [vmem:[%s9648_s4] ss:$0 sm:$0xff] }
 0xd2b   : > { %v2462_v38 = vpop.permute.xlu1 %2461 }
 0xd2c   : > { %v2460_v24 = vpop.permute.xlu0 %2459  ;;  %v2498_v31 = vsel %vm2492_vm5, %v2489_v27, %v2462_v38 }
 0xd2d   : > { %v2497_v37 = vsel %vm2492_vm5, %v2488_v62, %v2460_v24 }
 0xd2e   : > { %6357 = vmatprep.mubr.msk.f32.mxu1 %vm450_vm0, %v2497_v37 }
 0xd2f   : > { %6358 = vmatmul.mubr.msk.f32.gmra.mrb[36].mxu1 %vm450_vm0, %v2498_v31  ;;  %v2434_v52 = vpop.permute.xlu1 %2433 }
 0xd30   : > { %v2432_v20 = vpop.permute.xlu0 %2431  ;;  %v2491_v4 = vsel %vm2483_vm4, %v2482_v63, %v2434_v52 }
 0xd31   : > { %v2490_v23 = vsel %vm2483_vm4, %v2481_v17, %v2432_v20 }
 0xd4e   : > { %v2466_v16 = vpop.permute.xlu1 %2465 }
 0xd4f   : > { %v2464_v1 = vpop.permute.xlu0 %2463  ;;  %v2500_v60 = vsel %vm2492_vm5, %v2491_v4, %v2466_v16 }
 0xd50   : > { %v2499_v8 = vsel %vm2492_vm5, %v2490_v23, %v2464_v1 }
 0xd51   : > { %6360 = vmatprep.mubr.msk.f32.mxu1 %vm450_vm0, %v2499_v8 }
 0xd52   : > { %6361 = vmatmul.mubr.msk.f32.gmra.mrb[38].mxu1 %vm450_vm0, %v2500_v60 }
 0xdf2   : > { %v6353_v59 = vpop.f32.mrb[32].mxu1 }
 0xdf3   : > { %v2608_v18 = vadd.f32 %v6353_v59, %v5618_v22  ;;  %v2602_v10 = vpop.f32.mrb[33].mxu1 }
 0xdf4   : > { %v2603_v7 = vadd.f32 %v5618_v22, %v2602_v10 }
 0xdf5   : > { %v8600_v30 = vadd.f32 %v7742_v54, %v2608_v18 }
 0xdf6   : > { %v8603_v45 = vadd.f32 %v7743_v56, %v2603_v7 }
 0xdf7   : > { %v2652_v2 = vsel %vm450_vm0, %v8600_v30, 0.0 }
 0xdf8   : > { %2653 = vadd.xlane.f32.xlu1 %v2652_v2  ;;  %v2649_v40 = vsel %vm450_vm0, %v8603_v45, 0.0 }
 0xdf9   : > { %2650 = vadd.xlane.f32.xlu0 %v2649_v40 }
 0xdfa   : > { %v6356_v0 = vpop.f32.mrb[34].mxu1 }
 0xdfb   : > { %v2612_v50 = vpop.f32.mrb[35].mxu1  ;;  %v2618_v58 = vadd.f32 %v6356_v0, %v5618_v22 }
 0xdfc   : > { %v2613_v9 = vadd.f32 %v5618_v22, %v2612_v50 }
 0xdfd   : > { %v8613_v42 = vadd.f32 %v7745_v41, %v2618_v58  ;;  %v2777_v58 = vld [vmem:[%s9649_s5] sm:$0xff]  ;;  %v2779_v41 = vld [vmem:[%s9649_s5 + $0x10] sm:$0xff] }
 0xdfe   : > { %v8610_v5 = vadd.f32 %v7744_v51, %v2613_v9  ;;  %v2778_v9 = vld [vmem:[%s9649_s5 + $0x8] sm:$0xff] }
 0xdff   : > { %v2658_v26 = vsel %vm450_vm0, %v8613_v42, 0.0  ;;  %v6863_v51 = vpack.c.bf16 %v2778_v9, %v2777_v58 }
 0xe00   : > { %v2655_v25 = vsel %vm450_vm0, %v8610_v5, 0.0 }
 0xe01   : > { %2656 = vadd.xlane.f32.xlu0 %v2655_v25  ;;  %6864 = vmatprep.subr.bf16.mxu0 %v6863_v51  ;;  %v2780_v25 = vld [vmem:[%s9649_s5 + $0x18] sm:$0xff] }
 0xe02   : > { %v6359_v32 = vpop.f32.mrb[36].mxu1  ;;  %6866 = vmatpush3.bf16.msra.mxu0 %v6863_v51 }
 0xe03   : > { %v2628_v33 = vadd.f32 %v6359_v32, %v5618_v22  ;;  %v2622_v47 = vpop.f32.mrb[37].mxu1  ;;  %v6867_v32 = vpack.c.bf16 %v2780_v25, %v2779_v41 }
 0xe04   : > { %v2623_v3 = vadd.f32 %v5618_v22, %v2622_v47 }
 0xe05   : > { %v8620_v48 = vadd.f32 %v7746_v21, %v2628_v33  ;;  %2659 = vadd.xlane.f32.xlu0 %v2658_v26  ;;  %6868 = vmatprep.subr.bf16.mxu0 %v6867_v32 }
 0xe06   : > { %v8623_v44 = vadd.f32 %v7747_v36, %v2623_v3  ;;  %6870 = vmatpush3.bf16.msra.mxu0 %v6867_v32 }
 0xe07   : > { %v2664_v11 = vsel %vm450_vm0, %v8620_v48, 0.0 }
 0xe08   : > { %2665 = vadd.xlane.f32.xlu1 %v2664_v11  ;;  %v2661_v61 = vsel %vm450_vm0, %v8623_v44, 0.0 }
 0xe09   : > { %2662 = vadd.xlane.f32.xlu0 %v2661_v61 }
 0xe25   : > { %v6362_v43 = vpop.f32.mrb[38].mxu1 }
 0xe26   : > { %v2638_v55 = vadd.f32 %v6362_v43, %v5618_v22  ;;  %v2632_v49 = vpop.f32.mrb[39].mxu1 }
 0xe27   : > { %v2633_v28 = vadd.f32 %v5618_v22, %v2632_v49 }
 0xe28   : > { %v8630_v46 = vadd.f32 %v7748_v53, %v2638_v55 }
 0xe29   : > { %v8633_v29 = vadd.f32 %v7749_v57, %v2633_v28 }
 0xe2a   : > { %v2670_v39 = vsel %vm450_vm0, %v8630_v46, 0.0 }
 0xe2b   : > { %2671 = vadd.xlane.f32.xlu1 %v2670_v39  ;;  %v2667_v34 = vsel %vm450_vm0, %v8633_v29, 0.0 }
 0xe2c   : > { %2668 = vadd.xlane.f32.xlu0 %v2667_v34 }
 0xe85   : > { %v2654_v35 = vpop.xlane.xlu1 %2653 }
 0xe86   : > { %v2674_v15 = vmul.f32 0.03125, %v2654_v35  ;;  %v2651_v38 = vpop.xlane.xlu0 %2650 }
 0xe87   : > { %v2673_v12 = vmul.f32 0.03125, %v2651_v38 }
 0xe88   : > { %v8640_v62 = vsub.f32 %v8600_v30, %v2674_v15  ;;  %v2755_v15 = vsub.s32 2, %v7931_v6 }
 0xe89   : > { %v8643_v24 = vsub.f32 %v8603_v45, %v2673_v12 }
 0xe8a   : > { %v2690_v27 = vmul.f32 %v8640_v62, %v8640_v62 }
 0xe8b   : > { %v2689_v37 = vmul.f32 %v8643_v24, %v8643_v24 }
 0xe8c   : > { %v2700_v31 = vsel %vm450_vm0, %v2690_v27, 0.0 }
 0xe8d   : > { %2701 = vadd.xlane.f32.xlu1 %v2700_v31  ;;  %v2697_v52 = vsel %vm450_vm0, %v2689_v37, 0.0  ;;  %v2767_v37 = vsub.s32 3, %v7931_v6  ;;  %v7750_v31 = vld [vmem:[%s9645_s1] sm:$0x3f] }
 0xe8e   : > { %2698 = vadd.xlane.f32.xlu0 %v2697_v52  ;;  %v2657_v20 = vpop.xlane.xlu0 %2656  ;;  %v2756_v52 = vrot.slane %v7750_v31, %v2755_v15 }
 0xe8f   : > { %v2675_v17 = vmul.f32 0.03125, %v2657_v20 }
 0xe91   : > { %v8652_v16 = vsub.f32 %v8610_v5, %v2675_v17 }
 0xe92   : > { %v2660_v63 = vpop.xlane.xlu0 %2659 }
 0xe93   : > { %v2676_v23 = vmul.f32 0.03125, %v2660_v63  ;;  %v2691_v1 = vmul.f32 %v8652_v16, %v8652_v16 }
 0xe95   : > { %v8657_v4 = vsub.f32 %v8613_v42, %v2676_v23  ;;  %v2666_v8 = vpop.xlane.xlu1 %2665  ;;  %v2703_v60 = vsel %vm450_vm0, %v2691_v1, 0.0 }
 0xe96   : > { %v2678_v22 = vmul.f32 0.03125, %v2666_v8  ;;  %2704 = vadd.xlane.f32.xlu0 %v2703_v60  ;;  %v2663_v59 = vpop.xlane.xlu0 %2662 }
 0xe97   : > { %v2677_v18 = vmul.f32 0.03125, %v2663_v59  ;;  %v2692_v10 = vmul.f32 %v8657_v4, %v8657_v4  ;;  %v2768_v59 = vrot.slane %v7750_v31, %v2767_v37  ;;  %v2910_v37 = vld [vmem:[%s9650_s6] sm:$0xff]  ;;  %v2911_v31 = vld [vmem:[%s9650_s6 + $0x8] sm:$0xff] }
 0xe98   : > { %v8663_v7 = vsub.f32 %v8620_v48, %v2678_v22 }
 0xe99   : > { %v8666_v54 = vsub.f32 %v8623_v44, %v2677_v18  ;;  %v2706_v56 = vsel %vm450_vm0, %v2692_v10, 0.0 }
 0xe9a   : > { %2707 = vadd.xlane.f32.xlu1 %v2706_v56  ;;  %v2694_v2 = vmul.f32 %v8663_v7, %v8663_v7 }
 0xe9b   : > { %v2693_v40 = vmul.f32 %v8666_v54, %v8666_v54 }
 0xe9c   : > { %v2712_v0 = vsel %vm450_vm0, %v2694_v2, 0.0 }
 0xe9d   : > { %v2709_v50 = vsel %vm450_vm0, %v2693_v40, 0.0 }
 0xe9e   : > { %2713 = vadd.xlane.f32.xlu1 %v2712_v0  ;;  %2710 = vadd.xlane.f32.xlu0 %v2709_v50 }
 0xeb8   : > { %v2672_v33 = vpop.xlane.xlu1 %2671 }
 0xeb9   : > { %v2680_v47 = vmul.f32 0.03125, %v2672_v33  ;;  %v2669_v3 = vpop.xlane.xlu0 %2668 }
 0xeba   : > { %v2679_v26 = vmul.f32 0.03125, %v2669_v3 }
 0xebb   : > { %v8688_v21 = vsub.f32 %v8630_v46, %v2680_v47 }
 0xebc   : > { %v8691_v36 = vsub.f32 %v8633_v29, %v2679_v26 }
 0xebd   : > { %v2696_v11 = vmul.f32 %v8688_v21, %v8688_v21 }
 0xebe   : > { %v2695_v61 = vmul.f32 %v8691_v36, %v8691_v36 }
 0xebf   : > { %v2718_v43 = vsel %vm450_vm0, %v2696_v11, 0.0 }
 0xec0   : > { %2719 = vadd.xlane.f32.xlu1 %v2718_v43  ;;  %v2715_v55 = vsel %vm450_vm0, %v2695_v61, 0.0 }
 0xec1   : > { %2716 = vadd.xlane.f32.xlu0 %v2715_v55 }
 0xf1a   : > { %v2702_v49 = vpop.xlane.xlu1 %2701 }
 0xf1b   : > { %v2722_v28 = vmul.f32 0.03125, %v2702_v49  ;;  %v2699_v53 = vpop.xlane.xlu0 %2698 }
 0xf1c   : > { %v2721_v57 = vmul.f32 0.03125, %v2699_v53 }
 0xf1d   : > { %v2730_v39 = vadd.f32 1e-05, %v2722_v28 }
 0xf1e   : > { %v2729_v34 = vadd.f32 1e-05, %v2721_v57 }
 0xf1f   : > { %7566 = vrsqrt.f32 %v2730_v39 }
 0xf20   : > { %7568 = vrsqrt.f32 %v2729_v34 }
 0xf23   : > { %v2705_v35 = vpop.xlane.xlu0 %2704 }
 0xf24   : > { %v2723_v38 = vmul.f32 0.03125, %v2705_v35 }
 0xf26   : > { %v2731_v12 = vadd.f32 1e-05, %v2723_v38 }
 0xf27   : > { %v2708_v27 = vpop.xlane.xlu1 %2707 }
 0xf28   : > { %7570 = vrsqrt.f32 %v2731_v12  ;;  %v2724_v20 = vmul.f32 0.03125, %v2708_v27 }
 0xf29   : > { %v7567_v17 = vpop.eup %7566 }
 0xf2a   : > { %v7569_v63 = vpop.eup %7568  ;;  %v2746_v23 = vmul.f32 %v7567_v17, %v8640_v62  ;;  %v2732_v1 = vadd.f32 1e-05, %v2724_v20  ;;  %v6871_v20 = vpack.c.bf16 %v2911_v31, %v2910_v37 }
 0xf2b   : > { %v2714_v8 = vpop.xlane.xlu1 %2713  ;;  %v2711_v60 = vpop.xlane.xlu0 %2710  ;;  %v2745_v22 = vmul.f32 %v7569_v63, %v8643_v24 }
 0xf2c   : > { %v2758_v18 = vmul.f32 %v2756_v52, %v2746_v23  ;;  %7572 = vrsqrt.f32 %v2732_v1  ;;  %v2726_v10 = vmul.f32 0.03125, %v2714_v8  ;;  %v2725_v56 = vmul.f32 0.03125, %v2711_v60  ;;  %6872 = vmatprep.subr.bf16.mxu1 %v6871_v20 }
 0xf2d   : > { %v2757_v2 = vmul.f32 %v2756_v52, %v2745_v22  ;;  %6874 = vmatpush3.bf16.msra.mxu1 %v6871_v20 }
 0xf2e   : > { %v2734_v40 = vadd.f32 1e-05, %v2726_v10  ;;  %v2733_v0 = vadd.f32 1e-05, %v2725_v56  ;;  %v2770_v58 = vadd.f32 %v2768_v59, %v2758_v18 }
 0xf2f   : > { %v2769_v50 = vadd.f32 %v2768_v59, %v2757_v2 }
 0xf30   : > { %7574 = vrsqrt.f32 %v2734_v40 }
 0xf31   : > { %7576 = vrsqrt.f32 %v2733_v0  ;;  %6371 = vmatprep.mubr.msk.f32.mxu0 %vm450_vm0, %v2769_v50 }
 0xf32   : > { %v7571_v62 = vpop.eup %7570  ;;  %6372 = vmatmul.mubr.msk.f32.vlgmr.msra.gmra.mrb[40].mxu0 %vm450_vm0, %v2770_v58 }
 0xf33   : > { %v2747_v9 = vmul.f32 %v7571_v62, %v8652_v16 }
 0xf35   : > { %v2759_v24 = vmul.f32 %v2756_v52, %v2747_v9 }
 0xf36   : > { %v7573_v51 = vpop.eup %7572 }
 0xf37   : > { %v2771_v41 = vadd.f32 %v2768_v59, %v2759_v24  ;;  %v2748_v25 = vmul.f32 %v7573_v51, %v8657_v4 }
 0xf39   : > { %6374 = vmatprep.mubr.msk.f32.mxu0 %vm450_vm0, %v2771_v41  ;;  %v2760_v32 = vmul.f32 %v2756_v52, %v2748_v25 }
 0xf3a   : > { %v7575_v33 = vpop.eup %7574 }
 0xf3b   : > { %v7577_v47 = vpop.eup %7576  ;;  %v2772_v3 = vadd.f32 %v2768_v59, %v2760_v32  ;;  %v2750_v26 = vmul.f32 %v7575_v33, %v8663_v7 }
 0xf3c   : > { %v2749_v11 = vmul.f32 %v7577_v47, %v8666_v54 }
 0xf3d   : > { %6375 = vmatmul.mubr.msk.f32.gmra.mrb[42].mxu0 %vm450_vm0, %v2772_v3  ;;  %v2762_v61 = vmul.f32 %v2756_v52, %v2750_v26 }
 0xf3e   : > { %v2761_v43 = vmul.f32 %v2756_v52, %v2749_v11 }
 0xf3f   : > { %v2774_v16 = vadd.f32 %v2768_v59, %v2762_v61 }
 0xf40   : > { %v2773_v55 = vadd.f32 %v2768_v59, %v2761_v43 }
 0xf42   : > { %6377 = vmatprep.mubr.msk.f32.mxu0 %vm450_vm0, %v2773_v55 }
 0xf43   : > { %6378 = vmatmul.mubr.msk.f32.gmra.mrb[44].mxu0 %vm450_vm0, %v2774_v16 }
 0xf4d   : > { %v2720_v4 = vpop.xlane.xlu1 %2719 }
 0xf4e   : > { %v2728_v49 = vmul.f32 0.03125, %v2720_v4  ;;  %v2717_v28 = vpop.xlane.xlu0 %2716 }
 0xf4f   : > { %v2727_v53 = vmul.f32 0.03125, %v2717_v28 }
 0xf50   : > { %v2736_v57 = vadd.f32 1e-05, %v2728_v49 }
 0xf51   : > { %v2735_v39 = vadd.f32 1e-05, %v2727_v53 }
 0xf52   : > { %7578 = vrsqrt.f32 %v2736_v57 }
 0xf53   : > { %7580 = vrsqrt.f32 %v2735_v39 }
 0xf5c   : > { %v7579_v7 = vpop.eup %7578 }
 0xf5d   : > { %v7581_v54 = vpop.eup %7580  ;;  %v2752_v34 = vmul.f32 %v7579_v7, %v8688_v21 }
 0xf5e   : > { %v2751_v35 = vmul.f32 %v7581_v54, %v8691_v36 }
 0xf5f   : > { %v2764_v15 = vmul.f32 %v2756_v52, %v2752_v34 }
 0xf60   : > { %v2763_v38 = vmul.f32 %v2756_v52, %v2751_v35 }
 0xf61   : > { %v2776_v27 = vadd.f32 %v2768_v59, %v2764_v15 }
 0xf62   : > { %v2775_v12 = vadd.f32 %v2768_v59, %v2763_v38 }
 0xf64   : > { %6380 = vmatprep.mubr.msk.f32.mxu0 %vm450_vm0, %v2775_v12 }
 0xf65   : > { %6381 = vmatmul.mubr.msk.f32.gmra.mrb[46].mxu0 %vm450_vm0, %v2776_v27 }
0x1005   : > { %v8726_v21 = vpop.f32.mrb[40].mxu0 }
0x1006   : > { %2922 = vrot.lane.b32.xlu1 %v8726_v21, %s7760_s24  ;;  %v8730_v36 = vpop.f32.mrb[41].mxu0 }
0x1007   : > { %2920 = vrot.lane.b32.xlu0 %v8730_v36, %s7760_s24  ;;  %6415 = vmatprep.mubr.msk.f32.mxu0 %vm737_vm1, %v8730_v36 }
0x1010   : > { %v8736_v52 = vpop.f32.mrb[42].mxu0 }
0x1011   : > { %v8738_v17 = vpop.f32.mrb[43].mxu0 }
0x1012   : > { %2924 = vrot.lane.b32.xlu1 %v8738_v17, %s7760_s24 }
0x1016   : > { %v8742_v63 = vpop.f32.mrb[44].mxu0  ;;  %2926 = vrot.lane.b32.xlu1 %v8736_v52, %s7760_s24 }
0x1017   : > { %v8746_v23 = vpop.f32.mrb[45].mxu0 }
0x1018   : > { %2928 = vrot.lane.b32.xlu0 %v8746_v23, %s7760_s24 }
0x101a   : > { %2930 = vrot.lane.b32.xlu1 %v8742_v63, %s7760_s24 }
0x1038   : > { %v8752_v1 = vpop.f32.mrb[46].mxu0 }
0x1039   : > { %2934 = vrot.lane.b32.xlu1 %v8752_v1, %s7760_s24  ;;  %v8756_v8 = vpop.f32.mrb[47].mxu0 }
0x103a   : > { %2932 = vrot.lane.b32.xlu0 %v8756_v8, %s7760_s24 }
0x1078   : > { %v2923_v22 = vpop.permute.xlu1 %2922 }
0x1079   : > { %v2921_v60 = vpop.permute.xlu0 %2920 }
0x107a   : > { %6387 = vmatprep.mubr.msk.f32.mxu1 %vm2483_vm4, %v2921_v60 }
0x107b   : > { %6388 = vmatmul.mubr.msk.f32.vlgmr.msra.gmra.mrb[40].mxu1 %vm2483_vm4, %v2923_v22 }
0x1084   : > { %v2925_v59 = vpop.permute.xlu1 %2924 }
0x1085   : > { %6390 = vmatprep.mubr.msk.f32.mxu1 %vm2483_vm4, %v2925_v59 }
0x1088   : > { %v2927_v18 = vpop.permute.xlu1 %2926 }
0x1089   : > { %6391 = vmatmul.mubr.msk.f32.gmra.mrb[42].mxu1 %vm2483_vm4, %v2927_v18 }
0x108a   : > { %v2929_v10 = vpop.permute.xlu0 %2928 }
0x108b   : > { %6393 = vmatprep.mubr.msk.f32.mxu1 %vm2483_vm4, %v2929_v10 }
0x108c   : > { %v2931_v56 = vpop.permute.xlu1 %2930 }
0x108d   : > { %6394 = vmatmul.mubr.msk.f32.gmra.mrb[44].mxu1 %vm2483_vm4, %v2931_v56 }
0x10ab   : > { %v2935_v40 = vpop.permute.xlu1 %2934 }
0x10ac   : > { %v2933_v2 = vpop.permute.xlu0 %2932 }
0x10ad   : > { %6396 = vmatprep.mubr.msk.f32.mxu1 %vm2483_vm4, %v2933_v2 }
0x10ae   : > { %6397 = vmatmul.mubr.msk.f32.gmra.mrb[46].mxu1 %vm2483_vm4, %v2935_v40 }
0x114e   : > { %v6389_v0 = vpop.f32.mrb[40].mxu1 }
0x114f   : > { %v3018_v50 = vpop.f32.mrb[41].mxu1 }
0x1150   : > { %v6875_v58 = vpack.c.bf16 %v6389_v0, %v3018_v50  ;;  %v8768_v62 = vpack.i.bf16 %v6389_v0, %v3018_v50 }
0x1152   : > { %6877 = vmatprep.subr.msk.bf16.mxu0 %vm8002_vm2, %v6875_v58 }
0x1153   : > { %6880 = vmatpush3.bf16.xpose.msk.msra.mxu0 %vm8002_vm2, %v6875_v58 }
0x115c   : > { %v6392_v9 = vpop.f32.mrb[42].mxu1 }
0x115d   : > { %v3028_v24 = vpop.f32.mrb[43].mxu1 }
0x115e   : > { %v6881_v51 = vpack.c.bf16 %v6392_v9, %v3028_v24  ;;  %v8774_v41 = vpack.i.bf16 %v6392_v9, %v3028_v24 }
0x1160   : > { %v6395_v25 = vpop.f32.mrb[44].mxu1  ;;  %6883 = vmatprep.subr.msk.bf16.mxu0 %vm8002_vm2, %v6881_v51 }
0x1161   : > { %v3038_v32 = vpop.f32.mrb[45].mxu1  ;;  %6886 = vmatpush3.bf16.xpose.msk.msra.mxu0 %vm8002_vm2, %v6881_v51 }
0x1162   : > { %v6887_v33 = vpack.c.bf16 %v6395_v25, %v3038_v32  ;;  %v8780_v47 = vpack.i.bf16 %v6395_v25, %v3038_v32 }
0x1164   : > { %6889 = vmatprep.subr.msk.bf16.mxu0 %vm8002_vm2, %v6887_v33 }
0x1169   : > { %6892 = vmatpush3.bf16.xpose.msk.msra.mxu0 %vm8002_vm2, %v6887_v33 }
0x1181   : > { %v6398_v3 = vpop.f32.mrb[46].mxu1 }
0x1182   : > { %v3048_v26 = vpop.f32.mrb[47].mxu1 }
0x1183   : > { %v6893_v11 = vpack.c.bf16 %v6398_v3, %v3048_v26  ;;  %v8786_v61 = vpack.i.bf16 %v6398_v3, %v3048_v26 }
0x1185   : > { %6895 = vmatprep.subr.msk.bf16.mxu0 %vm8002_vm2, %v6893_v11 }
0x1186   : > { %6898 = vmatpush3.bf16.xpose.msk.msra.mxu0 %vm8002_vm2, %v6893_v11 }
0x118d   : > { %6416 = vmatmul.mubr.msk.f32.vlgmr.msra.gmra.mrb[48].mxu0 %vm737_vm1, %v8726_v21 }
0x118e   : > { %6418 = vmatprep.mubr.msk.f32.mxu0 %vm737_vm1, %v8738_v17 }
0x1191   : > { %6419 = vmatmul.mubr.msk.f32.gmra.mrb[50].mxu0 %vm737_vm1, %v8736_v52 }
0x1192   : > { %6421 = vmatprep.mubr.msk.f32.mxu0 %vm737_vm1, %v8746_v23 }
0x1195   : > { %6422 = vmatmul.mubr.msk.f32.gmra.mrb[52].mxu0 %vm737_vm1, %v8742_v63 }
0x1196   : > { %6424 = vmatprep.mubr.msk.f32.mxu0 %vm737_vm1, %v8756_v8 }
0x1199   : > { %6425 = vmatmul.mubr.msk.f32.gmra.mrb[54].mxu0 %vm737_vm1, %v8752_v1 }
0x1260   : > { %v6417_v43 = vpop.f32.mrb[48].mxu0 }
0x1261   : > { %v3203_v16 = vmul.f32 0.35355338, %v6417_v43  ;;  %v3163_v55 = vpop.f32.mrb[49].mxu0 }
0x1262   : > { %v3202_v4 = vmul.f32 0.35355338, %v3163_v55 }
0x1263   : > { %v3213_v49 = vsel %vm883_vm3, %v3203_v16, -inf }
0x1264   : > { %3214 = vmax.xlane.f32.xlu1 %v3213_v49  ;;  %v6420_v28 = vpop.f32.mrb[50].mxu0  ;;  %v3210_v53 = vsel %vm883_vm3, %v3202_v4, -inf }
0x1265   : > { %v3205_v57 = vmul.f32 0.35355338, %v6420_v28  ;;  %3211 = vmax.xlane.f32.xlu0 %v3210_v53  ;;  %v3173_v39 = vpop.f32.mrb[51].mxu0 }
0x1266   : > { %v3204_v54 = vmul.f32 0.35355338, %v3173_v39 }
0x1267   : > { %v3219_v7 = vsel %vm883_vm3, %v3205_v57, -inf }
0x1268   : > { %v6423_v34 = vpop.f32.mrb[52].mxu0  ;;  %v3216_v37 = vsel %vm883_vm3, %v3204_v54, -inf }
0x1269   : > { %v3207_v35 = vmul.f32 0.35355338, %v6423_v34  ;;  %3220 = vmax.xlane.f32.xlu0 %v3219_v7  ;;  %v3183_v15 = vpop.f32.mrb[53].mxu0 }
0x126a   : > { %v3206_v12 = vmul.f32 0.35355338, %v3183_v15 }
0x126b   : > { %v3225_v38 = vsel %vm883_vm3, %v3207_v35, -inf }
0x126c   : > { %3226 = vmax.xlane.f32.xlu1 %v3225_v38  ;;  %v6426_v27 = vpop.f32.mrb[54].mxu0  ;;  %v3222_v59 = vsel %vm883_vm3, %v3206_v12, -inf }
0x126d   : > { %v8811_v31 = vmul.f32 0.35355338, %v6426_v27  ;;  %3217 = vmax.xlane.f32.xlu0 %v3216_v37  ;;  %v3193_v20 = vpop.f32.mrb[55].mxu0 }
0x126e   : > { %v8815_v22 = vmul.f32 0.35355338, %v3193_v20 }
0x126f   : > { %v3231_v60 = vsel %vm883_vm3, %v8811_v31, -inf }
0x1270   : > { %3232 = vmax.xlane.f32.xlu1 %v3231_v60  ;;  %v3228_v18 = vsel %vm883_vm3, %v8815_v22, -inf }
0x1271   : > { %3223 = vmax.xlane.f32.xlu0 %v3222_v59 }
0x1275   : > { %3229 = vmax.xlane.f32.xlu0 %v3228_v18 }
0x1281   : > { %7288 = vrot.lane.b32.xlu1 %v8774_v41, %s7760_s24 }
0x1285   : > { %7293 = vrot.lane.b32.xlu1 %v8780_v47, %s7760_s24 }
0x1289   : > { %7298 = vrot.lane.b32.xlu1 %v8786_v61, %s7760_s24 }
0x128b   : > { %7283 = vrot.lane.b32.xlu0 %v8768_v62, %s7760_s24  ;;  %s9668_s24 = smov 80  }
0x128d   : > { %7308 = vrot.lane.b32.xlu1 %v8774_v41, %s7763_s14 }
0x128f   : > { %7303 = vrot.lane.b32.xlu0 %v8768_v62, %s7763_s14 }
0x12f1   : > { %v3215_v10 = vpop.xlane.xlu1 %3214 }
0x12f2   : > { %v3235_v56 = vsub.f32 %v3203_v16, %v3215_v10  ;;  %v3212_v2 = vpop.xlane.xlu0 %3211 }
0x12f3   : > { %v3234_v40 = vsub.f32 %v3202_v4, %v3212_v2 }
0x12f4   : > { %v3244_v0 = vmul.f32 1.442695, %v3235_v56 }
0x12f5   : > { %v3242_v50 = vmul.f32 1.442695, %v3234_v40 }
0x12f6   : > { %7582 = vpow2.f32 %v3244_v0  ;;  %v3221_v58 = vpop.xlane.xlu0 %3220 }
0x12f7   : > { %7584 = vpow2.f32 %v3242_v50  ;;  %v3237_v9 = vsub.f32 %v3205_v57, %v3221_v58 }
0x12f9   : > { %v3248_v24 = vmul.f32 1.442695, %v3237_v9  ;;  %v3227_v51 = vpop.xlane.xlu1 %3226 }
0x12fa   : > { %v3239_v25 = vsub.f32 %v3207_v35, %v3227_v51  ;;  %v3218_v32 = vpop.xlane.xlu0 %3217 }
0x12fb   : > { %7586 = vpow2.f32 %v3248_v24  ;;  %v3236_v33 = vsub.f32 %v3204_v54, %v3218_v32 }
0x12fc   : > { %v3252_v3 = vmul.f32 1.442695, %v3239_v25 }
0x12fd   : > { %v3246_v26 = vmul.f32 1.442695, %v3236_v33  ;;  %v3233_v11 = vpop.xlane.xlu1 %3232 }
0x12fe   : > { %v3224_v43 = vpop.xlane.xlu0 %3223 }
0x12ff   : > { %7588 = vpow2.f32 %v3246_v26  ;;  %v3238_v16 = vsub.f32 %v3206_v12, %v3224_v43  ;;  %v3241_v26 = vsub.f32 %v8811_v31, %v3233_v11 }
0x1300   : > { %v8832_v55 = vpop.eup %7582  ;;  %7590 = vpow2.f32 %v3252_v3 }
0x1301   : > { %v8834_v4 = vpop.eup %7584  ;;  %v3250_v49 = vmul.f32 1.442695, %v3238_v16  ;;  %v7289_v28 = vpop.permute.xlu1 %7288  ;;  %v3261_v53 = vsel %vm883_vm3, %v8832_v55, 0.0  ;;  %v3256_v43 = vmul.f32 1.442695, %v3241_v26 }
0x1302   : > { %3262 = vadd.xlane.f32.xlu1 %v3261_v53  ;;  %v3230_v57 = vpop.xlane.xlu0 %3229  ;;  %v3258_v39 = vsel %vm883_vm3, %v8834_v4, 0.0  ;;  %v7291_v15 = vunpack.i.h.bf16 %v7289_v28  ;;  %v7290_v38 = vunpack.i.l.bf16 %v7289_v28 }
0x1303   : > { %3259 = vadd.xlane.f32.xlu0 %v3258_v39  ;;  %7592 = vpow2.f32 %v3250_v49  ;;  %v3240_v16 = vsub.f32 %v8815_v22, %v3230_v57 }
0x1304   : > { %v6903_v56 = vpack.c.bf16 %v7291_v15, %v7290_v38  ;;  %7594 = vpow2.f32 %v3256_v43 }
0x1305   : > { %v8840_v7 = vpop.eup %7586  ;;  %v7294_v54 = vpop.permute.xlu1 %7293  ;;  %v3254_v49 = vmul.f32 1.442695, %v3240_v16 }
0x1306   : > { %v7284_v34 = vpop.permute.xlu0 %7283  ;;  %v3267_v35 = vsel %vm883_vm3, %v8840_v7, 0.0  ;;  %v7296_v18 = vunpack.i.h.bf16 %v7294_v54  ;;  %v7295_v10 = vunpack.i.l.bf16 %v7294_v54 }
0x1307   : > { %v7286_v12 = vunpack.i.h.bf16 %v7284_v34  ;;  %v7285_v27 = vunpack.i.l.bf16 %v7284_v34  ;;  %3268 = vadd.xlane.f32.xlu1 %v3267_v35  ;;  %7596 = vpow2.f32 %v3254_v49 }
0x1308   : > { %v6907_v9 = vpack.c.bf16 %v7296_v18, %v7295_v10 }
0x1309   : > { %v8844_v37 = vpop.eup %7588  ;;  %v6899_v20 = vpack.c.bf16 %v7286_v12, %v7285_v27  ;;  %v7299_v2 = vpop.permute.xlu1 %7298 }
0x130a   : > { %v3264_v60 = vsel %vm883_vm3, %v8844_v37, 0.0  ;;  %v8848_v59 = vpop.eup %7590  ;;  %v7301_v50 = vunpack.i.h.bf16 %v7299_v2  ;;  %v7300_v58 = vunpack.i.l.bf16 %v7299_v2  ;;  %v7304_v24 = vpop.permute.xlu0 %7303 }
0x130b   : > { %3265 = vadd.xlane.f32.xlu0 %v3264_v60  ;;  %6900 = vmatprep.subr.bf16.mxu1 %v6899_v20  ;;  %v3273_v40 = vsel %vm883_vm3, %v8848_v59, 0.0  ;;  %v7306_v25 = vunpack.i.h.bf16 %v7304_v24  ;;  %v7305_v32 = vunpack.i.l.bf16 %v7304_v24 }
0x130c   : > { %6902 = vmatpush3.bf16.msra.mxu1 %v6899_v20  ;;  %v6911_v33 = vpack.c.bf16 %v7301_v50, %v7300_v58 }
0x130d   : > { %6904 = vmatprep.subr.bf16.mxu1 %v6903_v56  ;;  %v8852_v0 = vpop.eup %7592  ;;  %v6915_v3 = vpack.c.bf16 %v7306_v25, %v7305_v32  ;;  %v7309_v53 = vpop.permute.xlu1 %7308 }
0x130e   : > { %v3270_v51 = vsel %vm883_vm3, %v8852_v0, 0.0  ;;  %v8870_v28 = vpop.eup %7594  ;;  %v7311_v38 = vunpack.i.h.bf16 %v7309_v53  ;;  %v7310_v12 = vunpack.i.l.bf16 %v7309_v53 }
0x130f   : > { %3274 = vadd.xlane.f32.xlu0 %v3273_v40  ;;  %v3279_v31 = vsel %vm883_vm3, %v8870_v28, 0.0 }
0x1310   : > { %6906 = vmatpush3.bf16.msra.mxu1 %v6903_v56  ;;  %v6921_v18 = vpack.c.bf16 %v7311_v38, %v7310_v12 }
0x1311   : > { %6908 = vmatprep.subr.bf16.mxu1 %v6907_v9  ;;  %v8876_v22 = vpop.eup %7596 }
0x1312   : > { %v3276_v11 = vsel %vm883_vm3, %v8876_v22, 0.0 }
0x1313   : > { %3271 = vadd.xlane.f32.xlu0 %v3270_v51 }
0x1314   : > { %6910 = vmatpush3.bf16.msra.mxu1 %v6907_v9 }
0x1315   : > { %6912 = vmatprep.subr.bf16.mxu1 %v6911_v33 }
0x1318   : > { %7318 = vrot.lane.b32.xlu1 %v8786_v61, %s7763_s14  ;;  %6914 = vmatpush3.bf16.msra.mxu1 %v6911_v33 }
0x1319   : > { %6917 = vmatprep.subr.msk.bf16.mxu1 %vm8002_vm2, %v6915_v3 }
0x1329   : > { %7313 = vrot.lane.b32.xlu0 %v8780_v47, %s7763_s14 }
0x132d   : > { %3451 = vrot.lane.b32.xlu0 %v8730_v36, %s7763_s14 }
0x1331   : > { %3455 = vrot.lane.b32.xlu0 %v8738_v17, %s7763_s14 }
0x1335   : > { %3459 = vrot.lane.b32.xlu0 %v8746_v23, %s7763_s14 }
0x1339   : > { %3463 = vrot.lane.b32.xlu0 %v8756_v8, %s7763_s14 }
0x133c   : > { %3280 = vadd.xlane.f32.xlu1 %v3279_v31 }
0x1340   : > { %3277 = vadd.xlane.f32.xlu1 %v3276_v11 }
0x1351   : > { %3453 = vrot.lane.b32.xlu1 %v8726_v21, %s7763_s14 }
0x1355   : > { %3457 = vrot.lane.b32.xlu1 %v8736_v52, %s7763_s14 }
0x1359   : > { %3461 = vrot.lane.b32.xlu1 %v8742_v63, %s7763_s14 }
0x135d   : > { %3465 = vrot.lane.b32.xlu1 %v8752_v1, %s7763_s14  ;;  %s9670_s14 = smov 72  }
0x138f   : > { %v3263_v57 = vpop.xlane.xlu1 %3262 }
0x1390   : > { %7598 = vrcp.f32 %v3263_v57  ;;  %v3260_v39 = vpop.xlane.xlu0 %3259 }
0x1391   : > { %7600 = vrcp.f32 %v3260_v39 }
0x1394   : > { %v3269_v54 = vpop.xlane.xlu1 %3268 }
0x1395   : > { %7602 = vrcp.f32 %v3269_v54 }
0x1398   : > { %v3266_v34 = vpop.xlane.xlu0 %3265  ;;  %v7319_v24 = vpop.permute.xlu1 %7318 }
0x1399   : > { %7604 = vrcp.f32 %v3266_v34  ;;  %v7321_v32 = vunpack.i.h.bf16 %v7319_v24 }
0x139a   : > { %v7599_v35 = vpop.eup %7598 }
0x139b   : > { %v7601_v15 = vpop.eup %7600  ;;  %v3291_v60 = vmul.f32 %v7599_v35, %v8832_v55 }
0x139c   : > { %v3275_v27 = vpop.xlane.xlu0 %3274  ;;  %v3290_v20 = vmul.f32 %v7601_v15, %v8834_v4 }
0x139d   : > { %7606 = vrcp.f32 %v3275_v27 }
0x139e   : > { %6443 = vmatprep.mubr.msk.f32.mxu1 %vm883_vm3, %v3290_v20 }
0x139f   : > { %6444 = vmatmul.mubr.msk.f32.vlgmr.msra.gmra.mrb[48].mxu1 %vm883_vm3, %v3291_v60  ;;  %v7603_v56 = vpop.eup %7602 }
0x13a0   : > { %6920 = vmatpush3.bf16.xpose.msk.msra.mxu1 %vm8002_vm2, %v6915_v3  ;;  %v3272_v10 = vpop.xlane.xlu0 %3271  ;;  %v3293_v58 = vmul.f32 %v7603_v56, %v8840_v7 }
0x13a1   : > { %7608 = vrcp.f32 %v3272_v10  ;;  %6923 = vmatprep.subr.msk.bf16.mxu1 %vm8002_vm2, %v6921_v18 }
0x13a3   : > { %v7605_v2 = vpop.eup %7604 }
0x13a4   : > { %v7314_v40 = vpop.permute.xlu0 %7313  ;;  %v3292_v4 = vmul.f32 %v7605_v2, %v8844_v37  ;;  %v7320_v37 = vunpack.i.l.bf16 %v7319_v24 }
0x13a5   : > { %v7316_v55 = vunpack.i.h.bf16 %v7314_v40  ;;  %v7315_v50 = vunpack.i.l.bf16 %v7314_v40 }
0x13a6   : > { %6446 = vmatprep.mubr.msk.f32.mxu1 %vm883_vm3, %v3292_v4  ;;  %v6933_v3 = vpack.c.bf16 %v7321_v32, %v7320_v37 }
0x13a7   : > { %v6927_v9 = vpack.c.bf16 %v7316_v55, %v7315_v50  ;;  %6447 = vmatmul.mubr.msk.f32.gmra.mrb[50].mxu1 %vm883_vm3, %v3293_v58  ;;  %v7607_v51 = vpop.eup %7606 }
0x13a8   : > { %6926 = vmatpush3.bf16.xpose.msk.msra.mxu1 %vm8002_vm2, %v6921_v18  ;;  %v3295_v7 = vmul.f32 %v7607_v51, %v8848_v59 }
0x13a9   : > { %6929 = vmatprep.subr.msk.bf16.mxu1 %vm8002_vm2, %v6927_v9 }
0x13ab   : > { %v7609_v25 = vpop.eup %7608 }
0x13ac   : > { %v3294_v33 = vmul.f32 %v7609_v25, %v8852_v0  ;;  %v3452_v0 = vpop.permute.xlu0 %3451 }
0x13ae   : > { %6449 = vmatprep.mubr.msk.f32.mxu1 %vm883_vm3, %v3294_v33 }
0x13af   : > { %6450 = vmatmul.mubr.msk.f32.gmra.mrb[52].mxu1 %vm883_vm3, %v3295_v7 }
0x13b0   : > { %6932 = vmatpush3.bf16.xpose.msk.msra.mxu1 %vm8002_vm2, %v6927_v9  ;;  %v3456_v53 = vpop.permute.xlu0 %3455 }
0x13b1   : > { %6935 = vmatprep.subr.msk.bf16.mxu1 %vm8002_vm2, %v6933_v3 }
0x13b4   : > { %v3460_v39 = vpop.permute.xlu0 %3459 }
0x13b8   : > { %6938 = vmatpush3.bf16.xpose.msk.msra.mxu1 %vm8002_vm2, %v6933_v3 }
0x13c9   : > { %v3281_v26 = vpop.xlane.xlu1 %3280 }
0x13ca   : > { %7610 = vrcp.f32 %v3281_v26 }
0x13cd   : > { %v3278_v43 = vpop.xlane.xlu1 %3277 }
0x13ce   : > { %7612 = vrcp.f32 %v3278_v43 }
0x13d1   : > { %v3454_v49 = vpop.permute.xlu1 %3453 }
0x13d4   : > { %v7611_v59 = vpop.eup %7610 }
0x13d5   : > { %v3297_v11 = vmul.f32 %v7611_v59, %v8870_v28  ;;  %v3458_v57 = vpop.permute.xlu1 %3457 }
0x13d8   : > { %v7613_v16 = vpop.eup %7612 }
0x13d9   : > { %v3296_v31 = vmul.f32 %v7613_v16, %v8876_v22  ;;  %v3462_v54 = vpop.permute.xlu1 %3461  ;;  %v3464_v22 = vpop.permute.xlu0 %3463 }
0x13db   : > { %6452 = vmatprep.mubr.msk.f32.mxu1 %vm883_vm3, %v3296_v31 }
0x13dc   : > { %6453 = vmatmul.mubr.msk.f32.gmra.mrb[54].mxu1 %vm883_vm3, %v3297_v11 }
0x13dd   : > { %6471 = vmatprep.mubr.msk.f32.mxu1 %vm737_vm1, %v3452_v0  ;;  %v3466_v28 = vpop.permute.xlu1 %3465 }
0x13e0   : > { %6472 = vmatmul.mubr.msk.f32.vlgmr.msra.gmra.mrb[56].mxu1 %vm737_vm1, %v3454_v49 }
0x13e1   : > { %6474 = vmatprep.mubr.msk.f32.mxu1 %vm737_vm1, %v3456_v53 }
0x13e4   : > { %6475 = vmatmul.mubr.msk.f32.gmra.mrb[58].mxu1 %vm737_vm1, %v3458_v57 }
0x13e5   : > { %6477 = vmatprep.mubr.msk.f32.mxu1 %vm737_vm1, %v3460_v39 }
0x13e8   : > { %6478 = vmatmul.mubr.msk.f32.gmra.mrb[60].mxu1 %vm737_vm1, %v3462_v54 }
0x13e9   : > { %6480 = vmatprep.mubr.msk.f32.mxu1 %vm737_vm1, %v3464_v22 }
0x13ec   : > { %6481 = vmatmul.mubr.msk.f32.gmra.mrb[62].mxu1 %vm737_vm1, %v3466_v28 }
0x1472   : > { %v8926_v34 = vpop.f32.mrb[48].mxu1 }
0x1473   : > { %v8928_v35 = vpop.f32.mrb[49].mxu1 }
0x147a   : > { %v8930_v15 = vpop.f32.mrb[50].mxu1 }
0x147b   : > { %v8932_v38 = vpop.f32.mrb[51].mxu1 }
0x1482   : > { %v8934_v12 = vpop.f32.mrb[52].mxu1 }
0x1483   : > { %v8936_v27 = vpop.f32.mrb[53].mxu1 }
0x14af   : > { %v8938_v20 = vpop.f32.mrb[54].mxu1 }
0x14b0   : > { %v8940_v60 = vpop.f32.mrb[55].mxu1 }
0x14b3   : > { %v6473_v18 = vpop.f32.mrb[56].mxu1 }
0x14b4   : > { %v3621_v10 = vmul.f32 0.35355338, %v6473_v18  ;;  %v3581_v56 = vpop.f32.mrb[57].mxu1 }
0x14b5   : > { %v3620_v2 = vmul.f32 0.35355338, %v3581_v56 }
0x14b6   : > { %v3631_v40 = vsel %vm883_vm3, %v3621_v10, -inf }
0x14b7   : > { %3632 = vmax.xlane.f32.xlu1 %v3631_v40  ;;  %v6476_v4 = vpop.f32.mrb[58].mxu1  ;;  %v3628_v55 = vsel %vm883_vm3, %v3620_v2, -inf }
0x14b8   : > { %v3623_v50 = vmul.f32 0.35355338, %v6476_v4  ;;  %3629 = vmax.xlane.f32.xlu0 %v3628_v55  ;;  %v3591_v58 = vpop.f32.mrb[59].mxu1 }
0x14b9   : > { %v3622_v24 = vmul.f32 0.35355338, %v3591_v58 }
0x14ba   : > { %v3637_v9 = vsel %vm883_vm3, %v3623_v50, -inf }
0x14bb   : > { %v6479_v51 = vpop.f32.mrb[60].mxu1  ;;  %v3634_v3 = vsel %vm883_vm3, %v3622_v24, -inf }
0x14bc   : > { %v3625_v25 = vmul.f32 0.35355338, %v6479_v51  ;;  %3638 = vmax.xlane.f32.xlu0 %v3637_v9  ;;  %v3601_v32 = vpop.f32.mrb[61].mxu1 }
0x14bd   : > { %v3624_v33 = vmul.f32 0.35355338, %v3601_v32 }
0x14be   : > { %v3643_v37 = vsel %vm883_vm3, %v3625_v25, -inf }
0x14bf   : > { %3644 = vmax.xlane.f32.xlu1 %v3643_v37  ;;  %v6482_v7 = vpop.f32.mrb[62].mxu1  ;;  %v3640_v16 = vsel %vm883_vm3, %v3624_v33, -inf }
0x14c0   : > { %v8947_v26 = vmul.f32 0.35355338, %v6482_v7  ;;  %3635 = vmax.xlane.f32.xlu0 %v3634_v3  ;;  %v3611_v43 = vpop.f32.mrb[63].mxu1 }
0x14c1   : > { %v8951_v59 = vmul.f32 0.35355338, %v3611_v43 }
0x14c2   : > { %v3649_v0 = vsel %vm883_vm3, %v8947_v26, -inf }
0x14c3   : > { %3650 = vmax.xlane.f32.xlu1 %v3649_v0  ;;  %v3646_v49 = vsel %vm883_vm3, %v8951_v59, -inf }
0x14c4   : > { %3641 = vmax.xlane.f32.xlu0 %v3640_v16 }
0x14c8   : > { %3647 = vmax.xlane.f32.xlu0 %v3646_v49 }
0x14d4   : > { %7328 = vrot.lane.b32.xlu1 %v8774_v41, %s7762_s29 }
0x14d8   : > { %7333 = vrot.lane.b32.xlu1 %v8780_v47, %s7762_s29 }
0x14dc   : > { %7338 = vrot.lane.b32.xlu1 %v8786_v61, %s7762_s29 }
0x14de   : > { %7323 = vrot.lane.b32.xlu0 %v8768_v62, %s7762_s29  ;;  %s9669_s29 = smov 104  }
0x14e0   : > { %7348 = vrot.lane.b32.xlu1 %v8774_v41, %s7766_s17 }
0x14e2   : > { %7343 = vrot.lane.b32.xlu0 %v8768_v62, %s7766_s17 }
0x1544   : > { %v3633_v31 = vpop.xlane.xlu1 %3632 }
0x1545   : > { %v3653_v11 = vsub.f32 %v3621_v10, %v3633_v31  ;;  %v3630_v53 = vpop.xlane.xlu0 %3629 }
0x1546   : > { %v3652_v57 = vsub.f32 %v3620_v2, %v3630_v53 }
0x1547   : > { %v3662_v39 = vmul.f32 1.442695, %v3653_v11 }
0x1548   : > { %v3660_v54 = vmul.f32 1.442695, %v3652_v57 }
0x1549   : > { %7614 = vpow2.f32 %v3662_v39  ;;  %v3639_v22 = vpop.xlane.xlu0 %3638 }
0x154a   : > { %7616 = vpow2.f32 %v3660_v54  ;;  %v3655_v28 = vsub.f32 %v3623_v50, %v3639_v22 }
0x154c   : > { %v3666_v18 = vmul.f32 1.442695, %v3655_v28  ;;  %v3645_v56 = vpop.xlane.xlu1 %3644 }
0x154d   : > { %v3657_v40 = vsub.f32 %v3625_v25, %v3645_v56  ;;  %v3636_v4 = vpop.xlane.xlu0 %3635 }
0x154e   : > { %7618 = vpow2.f32 %v3666_v18  ;;  %v3654_v55 = vsub.f32 %v3622_v24, %v3636_v4 }
0x154f   : > { %v3670_v58 = vmul.f32 1.442695, %v3657_v40 }
0x1550   : > { %v3664_v9 = vmul.f32 1.442695, %v3654_v55  ;;  %v3651_v51 = vpop.xlane.xlu1 %3650 }
0x1551   : > { %v3642_v32 = vpop.xlane.xlu0 %3641 }
0x1552   : > { %7620 = vpow2.f32 %v3664_v9  ;;  %v3656_v10 = vsub.f32 %v3624_v33, %v3642_v32 }
0x1553   : > { %v8968_v37 = vpop.eup %7614  ;;  %7622 = vpow2.f32 %v3670_v58 }
0x1554   : > { %v8970_v2 = vpop.eup %7616  ;;  %v3668_v7 = vmul.f32 1.442695, %v3656_v10  ;;  %v7329_v3 = vpop.permute.xlu1 %7328  ;;  %v3679_v50 = vsel %vm883_vm3, %v8968_v37, 0.0 }
0x1555   : > { %3680 = vadd.xlane.f32.xlu1 %v3679_v50  ;;  %v3648_v25 = vpop.xlane.xlu0 %3647  ;;  %v3676_v24 = vsel %vm883_vm3, %v8970_v2, 0.0  ;;  %v7331_v49 = vunpack.i.h.bf16 %v7329_v3  ;;  %v7330_v31 = vunpack.i.l.bf16 %v7329_v3 }
0x1556   : > { %3677 = vadd.xlane.f32.xlu0 %v3676_v24  ;;  %7624 = vpow2.f32 %v3668_v7 }
0x1557   : > { %v6943_v56 = vpack.c.bf16 %v7331_v49, %v7330_v31  ;;  %v3658_v49 = vsub.f32 %v8951_v59, %v3648_v25 }
0x1558   : > { %v8976_v43 = vpop.eup %7618  ;;  %v7334_v33 = vpop.permute.xlu1 %7333 }
0x1559   : > { %v7324_v0 = vpop.permute.xlu0 %7323  ;;  %v3685_v16 = vsel %vm883_vm3, %v8976_v43, 0.0  ;;  %v7336_v28 = vunpack.i.h.bf16 %v7334_v33  ;;  %v7335_v18 = vunpack.i.l.bf16 %v7334_v33  ;;  %v3672_v31 = vmul.f32 1.442695, %v3658_v49 }
0x155a   : > { %v7326_v11 = vunpack.i.h.bf16 %v7324_v0  ;;  %v7325_v53 = vunpack.i.l.bf16 %v7324_v0  ;;  %3686 = vadd.xlane.f32.xlu1 %v3685_v16  ;;  %v3659_v0 = vsub.f32 %v8947_v26, %v3651_v51 }
0x155b   : > { %v6947_v32 = vpack.c.bf16 %v7336_v28, %v7335_v18 }
0x155c   : > { %v8980_v57 = vpop.eup %7620  ;;  %v6939_v39 = vpack.c.bf16 %v7326_v11, %v7325_v53  ;;  %v7339_v40 = vpop.permute.xlu1 %7338  ;;  %v3674_v16 = vmul.f32 1.442695, %v3659_v0 }
0x155d   : > { %v3682_v54 = vsel %vm883_vm3, %v8980_v57, 0.0  ;;  %v8984_v22 = vpop.eup %7622  ;;  %v7341_v58 = vunpack.i.h.bf16 %v7339_v40  ;;  %v7340_v9 = vunpack.i.l.bf16 %v7339_v40  ;;  %v7344_v10 = vpop.permute.xlu0 %7343 }
0x155e   : > { %3683 = vadd.xlane.f32.xlu0 %v3682_v54  ;;  %6940 = vmatprep.subr.bf16.mxu0 %v6939_v39  ;;  %v3691_v4 = vsel %vm883_vm3, %v8984_v22, 0.0  ;;  %v7346_v3 = vunpack.i.h.bf16 %v7344_v10  ;;  %v7345_v50 = vunpack.i.l.bf16 %v7344_v10  ;;  %7626 = vpow2.f32 %v3674_v16 }
0x155f   : > { %6942 = vmatpush3.bf16.msra.mxu0 %v6939_v39  ;;  %v6951_v24 = vpack.c.bf16 %v7341_v58, %v7340_v9  ;;  %7628 = vpow2.f32 %v3672_v31 }
0x1560   : > { %6944 = vmatprep.subr.bf16.mxu0 %v6943_v56  ;;  %v8988_v55 = vpop.eup %7624  ;;  %v6955_v33 = vpack.c.bf16 %v7346_v3, %v7345_v50  ;;  %v7349_v25 = vpop.permute.xlu1 %7348 }
0x1561   : > { %v3688_v7 = vsel %vm883_vm3, %v8988_v55, 0.0  ;;  %v7351_v40 = vunpack.i.h.bf16 %v7349_v25 }
0x1562   : > { %3692 = vadd.xlane.f32.xlu0 %v3691_v4  ;;  %v7350_v4 = vunpack.i.l.bf16 %v7349_v25 }
0x1563   : > { %6946 = vmatpush3.bf16.msra.mxu0 %v6943_v56 }
0x1564   : > { %6948 = vmatprep.subr.bf16.mxu0 %v6947_v32  ;;  %v6961_v10 = vpack.c.bf16 %v7351_v40, %v7350_v4 }
0x1566   : > { %3689 = vadd.xlane.f32.xlu0 %v3688_v7 }
0x1567   : > { %6950 = vmatpush3.bf16.msra.mxu0 %v6947_v32 }
0x1568   : > { %6952 = vmatprep.subr.bf16.mxu0 %v6951_v24  ;;  %v9006_v11 = vpop.eup %7626 }
0x1569   : > { %v3697_v26 = vsel %vm883_vm3, %v9006_v11, 0.0  ;;  %v9012_v59 = vpop.eup %7628 }
0x156a   : > { %v3694_v51 = vsel %vm883_vm3, %v9012_v59, 0.0 }
0x156b   : > { %7358 = vrot.lane.b32.xlu1 %v8786_v61, %s7766_s17  ;;  %6954 = vmatpush3.bf16.msra.mxu0 %v6951_v24 }
0x156c   : > { %6957 = vmatprep.subr.msk.bf16.mxu0 %vm8002_vm2, %v6955_v33 }
0x157c   : > { %7353 = vrot.lane.b32.xlu0 %v8780_v47, %s7766_s17 }
0x1580   : > { %3869 = vrot.lane.b32.xlu0 %v8730_v36, %s7766_s17 }
0x1584   : > { %3873 = vrot.lane.b32.xlu0 %v8738_v17, %s7766_s17 }
0x1588   : > { %3877 = vrot.lane.b32.xlu0 %v8746_v23, %s7766_s17 }
0x158c   : > { %3881 = vrot.lane.b32.xlu0 %v8756_v8, %s7766_s17 }
0x158f   : > { %3698 = vadd.xlane.f32.xlu1 %v3697_v26 }
0x1593   : > { %3695 = vadd.xlane.f32.xlu1 %v3694_v51 }
0x15a4   : > { %3871 = vrot.lane.b32.xlu1 %v8726_v21, %s7766_s17 }
0x15a8   : > { %3875 = vrot.lane.b32.xlu1 %v8736_v52, %s7766_s17 }
0x15ac   : > { %3879 = vrot.lane.b32.xlu1 %v8742_v63, %s7766_s17 }
0x15b0   : > { %3883 = vrot.lane.b32.xlu1 %v8752_v1, %s7766_s17 }
0x15e2   : > { %v3681_v53 = vpop.xlane.xlu1 %3680 }
0x15e3   : > { %7630 = vrcp.f32 %v3681_v53  ;;  %v3678_v39 = vpop.xlane.xlu0 %3677 }
0x15e4   : > { %7632 = vrcp.f32 %v3678_v39 }
0x15e7   : > { %v3687_v54 = vpop.xlane.xlu1 %3686 }
0x15e8   : > { %7634 = vrcp.f32 %v3687_v54 }
0x15eb   : > { %v3684_v28 = vpop.xlane.xlu0 %3683 }
0x15ec   : > { %7636 = vrcp.f32 %v3684_v28 }
0x15ed   : > { %v7631_v18 = vpop.eup %7630 }
0x15ee   : > { %v7633_v56 = vpop.eup %7632  ;;  %v3709_v32 = vmul.f32 %v7631_v18, %v8968_v37 }
0x15ef   : > { %v3693_v58 = vpop.xlane.xlu0 %3692  ;;  %v3708_v9 = vmul.f32 %v7633_v56, %v8970_v2 }
0x15f0   : > { %7638 = vrcp.f32 %v3693_v58 }
0x15f1   : > { %6499 = vmatprep.mubr.msk.f32.mxu0 %vm883_vm3, %v3708_v9 }
0x15f2   : > { %6500 = vmatmul.mubr.msk.f32.vlgmr.msra.gmra.mrb[56].mxu0 %vm883_vm3, %v3709_v32  ;;  %v7635_v3 = vpop.eup %7634 }
0x15f3   : > { %6960 = vmatpush3.bf16.xpose.msk.msra.mxu0 %vm8002_vm2, %v6955_v33  ;;  %v3690_v7 = vpop.xlane.xlu0 %3689  ;;  %v3711_v16 = vmul.f32 %v7635_v3, %v8976_v43  ;;  %v7359_v33 = vpop.permute.xlu1 %7358 }
0x15f4   : > { %7640 = vrcp.f32 %v3690_v7  ;;  %6963 = vmatprep.subr.msk.bf16.mxu0 %vm8002_vm2, %v6961_v10  ;;  %v7361_v51 = vunpack.i.h.bf16 %v7359_v33 }
0x15f6   : > { %v7637_v50 = vpop.eup %7636 }
0x15f7   : > { %v7354_v24 = vpop.permute.xlu0 %7353  ;;  %v3710_v2 = vmul.f32 %v7637_v50, %v8980_v57  ;;  %v7360_v57 = vunpack.i.l.bf16 %v7359_v33 }
0x15f8   : > { %v7356_v37 = vunpack.i.h.bf16 %v7354_v24  ;;  %v7355_v0 = vunpack.i.l.bf16 %v7354_v24 }
0x15f9   : > { %6502 = vmatprep.mubr.msk.f32.mxu0 %vm883_vm3, %v3710_v2  ;;  %v6973_v53 = vpack.c.bf16 %v7361_v51, %v7360_v57 }
0x15fa   : > { %v6967_v49 = vpack.c.bf16 %v7356_v37, %v7355_v0  ;;  %6503 = vmatmul.mubr.msk.f32.gmra.mrb[58].mxu0 %vm883_vm3, %v3711_v16  ;;  %v7639_v31 = vpop.eup %7638 }
0x15fb   : > { %6966 = vmatpush3.bf16.xpose.msk.msra.mxu0 %vm8002_vm2, %v6961_v10  ;;  %v3713_v43 = vmul.f32 %v7639_v31, %v8984_v22 }
0x15fc   : > { %6969 = vmatprep.subr.msk.bf16.mxu0 %vm8002_vm2, %v6967_v49 }
0x15fe   : > { %v7641_v26 = vpop.eup %7640 }
0x15ff   : > { %v3712_v25 = vmul.f32 %v7641_v26, %v8988_v55  ;;  %v3870_v55 = vpop.permute.xlu0 %3869 }
0x1601   : > { %6505 = vmatprep.mubr.msk.f32.mxu0 %vm883_vm3, %v3712_v25 }
0x1602   : > { %6506 = vmatmul.mubr.msk.f32.gmra.mrb[60].mxu0 %vm883_vm3, %v3713_v43 }
0x1603   : > { %6972 = vmatpush3.bf16.xpose.msk.msra.mxu0 %vm8002_vm2, %v6967_v49  ;;  %v3874_v4 = vpop.permute.xlu0 %3873 }
0x1604   : > { %6975 = vmatprep.subr.msk.bf16.mxu0 %vm8002_vm2, %v6973_v53 }
0x1607   : > { %v3878_v9 = vpop.permute.xlu0 %3877 }
0x160b   : > { %6978 = vmatpush3.bf16.xpose.msk.msra.mxu0 %vm8002_vm2, %v6973_v53 }
0x161c   : > { %v3699_v39 = vpop.xlane.xlu1 %3698 }
0x161d   : > { %7642 = vrcp.f32 %v3699_v39 }
0x1620   : > { %v3696_v54 = vpop.xlane.xlu1 %3695 }
0x1621   : > { %7644 = vrcp.f32 %v3696_v54 }
0x1624   : > { %v3872_v18 = vpop.permute.xlu1 %3871 }
0x1627   : > { %v7643_v22 = vpop.eup %7642 }
0x1628   : > { %v3715_v40 = vmul.f32 %v7643_v22, %v9006_v11  ;;  %v3876_v58 = vpop.permute.xlu1 %3875 }
0x162b   : > { %v7645_v28 = vpop.eup %7644 }
0x162c   : > { %v3714_v56 = vmul.f32 %v7645_v28, %v9012_v59  ;;  %v3880_v32 = vpop.permute.xlu1 %3879  ;;  %v3882_v59 = vpop.permute.xlu0 %3881 }
0x162e   : > { %6508 = vmatprep.mubr.msk.f32.mxu0 %vm883_vm3, %v3714_v56 }
0x162f   : > { %6509 = vmatmul.mubr.msk.f32.gmra.mrb[62].mxu0 %vm883_vm3, %v3715_v40 }
0x1630   : > { %6527 = vmatprep.mubr.msk.f32.mxu0 %vm737_vm1, %v3870_v55  ;;  %v3884_v11 = vpop.permute.xlu1 %3883 }
0x1633   : > { %6528 = vmatmul.mubr.msk.f32.vlgmr.msra.gmra.mrb[64].mxu0 %vm737_vm1, %v3872_v18 }
0x1634   : > { %6530 = vmatprep.mubr.msk.f32.mxu0 %vm737_vm1, %v3874_v4 }
0x1637   : > { %6531 = vmatmul.mubr.msk.f32.gmra.mrb[66].mxu0 %vm737_vm1, %v3876_v58 }
0x1638   : > { %6533 = vmatprep.mubr.msk.f32.mxu0 %vm737_vm1, %v3878_v9 }
0x163b   : > { %6534 = vmatmul.mubr.msk.f32.gmra.mrb[68].mxu0 %vm737_vm1, %v3880_v32 }
0x163c   : > { %6536 = vmatprep.mubr.msk.f32.mxu0 %vm737_vm1, %v3882_v59 }
0x163f   : > { %6537 = vmatmul.mubr.msk.f32.gmra.mrb[70].mxu0 %vm737_vm1, %v3884_v11 }
0x16c5   : > { %v9062_v10 = vpop.f32.mrb[56].mxu0 }
0x16c6   : > { %v9064_v7 = vpop.f32.mrb[57].mxu0 }
0x16cd   : > { %v9066_v3 = vpop.f32.mrb[58].mxu0 }
0x16ce   : > { %v9068_v50 = vpop.f32.mrb[59].mxu0 }
0x16d5   : > { %v9070_v24 = vpop.f32.mrb[60].mxu0 }
0x16d6   : > { %v9072_v2 = vpop.f32.mrb[61].mxu0 }
0x1702   : > { %v9074_v37 = vpop.f32.mrb[62].mxu0 }
0x1703   : > { %v9076_v0 = vpop.f32.mrb[63].mxu0 }
0x1706   : > { %v6529_v16 = vpop.f32.mrb[64].mxu0 }
0x1707   : > { %v4039_v49 = vmul.f32 0.35355338, %v6529_v16  ;;  %v3999_v33 = vpop.f32.mrb[65].mxu0 }
0x1708   : > { %v4038_v31 = vmul.f32 0.35355338, %v3999_v33 }
0x1709   : > { %v4049_v26 = vsel %vm883_vm3, %v4039_v49, -inf }
0x170a   : > { %4050 = vmax.xlane.f32.xlu1 %v4049_v26  ;;  %v6532_v51 = vpop.f32.mrb[66].mxu0  ;;  %v4046_v57 = vsel %vm883_vm3, %v4038_v31, -inf }
0x170b   : > { %v4041_v25 = vmul.f32 0.35355338, %v6532_v51  ;;  %4047 = vmax.xlane.f32.xlu0 %v4046_v57  ;;  %v4009_v43 = vpop.f32.mrb[67].mxu0 }
0x170c   : > { %v4040_v39 = vmul.f32 0.35355338, %v4009_v43 }
0x170d   : > { %v4055_v53 = vsel %vm883_vm3, %v4041_v25, -inf }
0x170e   : > { %v6535_v54 = vpop.f32.mrb[68].mxu0  ;;  %v4052_v40 = vsel %vm883_vm3, %v4040_v39, -inf }
0x170f   : > { %v4043_v55 = vmul.f32 0.35355338, %v6535_v54  ;;  %4056 = vmax.xlane.f32.xlu0 %v4055_v53  ;;  %v4019_v22 = vpop.f32.mrb[69].mxu0 }
0x1710   : > { %v4042_v18 = vmul.f32 0.35355338, %v4019_v22 }
0x1711   : > { %v4061_v28 = vsel %vm883_vm3, %v4043_v55, -inf }
0x1712   : > { %4062 = vmax.xlane.f32.xlu1 %v4061_v28  ;;  %v6538_v56 = vpop.f32.mrb[70].mxu0  ;;  %v4058_v59 = vsel %vm883_vm3, %v4042_v18, -inf }
0x1713   : > { %v9083_v4 = vmul.f32 0.35355338, %v6538_v56  ;;  %4053 = vmax.xlane.f32.xlu0 %v4052_v40  ;;  %v4029_v58 = vpop.f32.mrb[71].mxu0 }
0x1714   : > { %v9087_v32 = vmul.f32 0.35355338, %v4029_v58 }
0x1715   : > { %v4067_v9 = vsel %vm883_vm3, %v9083_v4, -inf }
0x1716   : > { %4068 = vmax.xlane.f32.xlu1 %v4067_v9  ;;  %v4064_v11 = vsel %vm883_vm3, %v9087_v32, -inf }
0x1717   : > { %4059 = vmax.xlane.f32.xlu0 %v4058_v59 }
0x171b   : > { %4065 = vmax.xlane.f32.xlu0 %v4064_v11 }
0x1727   : > { %7368 = vrot.lane.b32.xlu1 %v8774_v41, %s9668_s24 }
0x172b   : > { %7373 = vrot.lane.b32.xlu1 %v8780_v47, %s9668_s24 }
0x172f   : > { %7378 = vrot.lane.b32.xlu1 %v8786_v61, %s9668_s24 }
0x1731   : > { %7363 = vrot.lane.b32.xlu0 %v8768_v62, %s9668_s24 }
0x1733   : > { %7388 = vrot.lane.b32.xlu1 %v8774_v41, %s9669_s29 }
0x1735   : > { %7383 = vrot.lane.b32.xlu0 %v8768_v62, %s9669_s29 }
0x1797   : > { %v4051_v16 = vpop.xlane.xlu1 %4050 }
0x1798   : > { %v4071_v33 = vsub.f32 %v4039_v49, %v4051_v16  ;;  %v4048_v26 = vpop.xlane.xlu0 %4047 }
0x1799   : > { %v4070_v51 = vsub.f32 %v4038_v31, %v4048_v26 }
0x179a   : > { %v4080_v57 = vmul.f32 1.442695, %v4071_v33 }
0x179b   : > { %v4078_v43 = vmul.f32 1.442695, %v4070_v51 }
0x179c   : > { %7646 = vpow2.f32 %v4080_v57  ;;  %v4057_v53 = vpop.xlane.xlu0 %4056 }
0x179d   : > { %7648 = vpow2.f32 %v4078_v43  ;;  %v4073_v54 = vsub.f32 %v4041_v25, %v4057_v53 }
0x179f   : > { %v4084_v22 = vmul.f32 1.442695, %v4073_v54  ;;  %v4063_v28 = vpop.xlane.xlu1 %4062 }
0x17a0   : > { %v4075_v56 = vsub.f32 %v4043_v55, %v4063_v28  ;;  %v4054_v40 = vpop.xlane.xlu0 %4053 }
0x17a1   : > { %7650 = vpow2.f32 %v4084_v22  ;;  %v4072_v58 = vsub.f32 %v4040_v39, %v4054_v40 }
0x17a2   : > { %v4088_v9 = vmul.f32 1.442695, %v4075_v56 }
0x17a3   : > { %v4082_v59 = vmul.f32 1.442695, %v4072_v58  ;;  %v4069_v11 = vpop.xlane.xlu1 %4068 }
0x17a4   : > { %v4060_v13 = vpop.xlane.xlu0 %4059 }
0x17a5   : > { %7652 = vpow2.f32 %v4082_v59  ;;  %v4074_v49 = vsub.f32 %v4042_v18, %v4060_v13 }
0x17a6   : > { %v9104_v16 = vpop.eup %7646  ;;  %7654 = vpow2.f32 %v4088_v9 }
0x17a7   : > { %v9106_v31 = vpop.eup %7648  ;;  %v4086_v33 = vmul.f32 1.442695, %v4074_v49  ;;  %v7369_v26 = vpop.permute.xlu1 %7368  ;;  %v4097_v25 = vsel %vm883_vm3, %v9104_v16, 0.0 }
0x17a8   : > { %4098 = vadd.xlane.f32.xlu1 %v4097_v25  ;;  %v4066_v55 = vpop.xlane.xlu0 %4065  ;;  %v4094_v39 = vsel %vm883_vm3, %v9106_v31, 0.0  ;;  %v7371_v43 = vunpack.i.h.bf16 %v7369_v26  ;;  %v7370_v53 = vunpack.i.l.bf16 %v7369_v26 }
0x17a9   : > { %4095 = vadd.xlane.f32.xlu0 %v4094_v39  ;;  %7656 = vpow2.f32 %v4086_v33 }
0x17aa   : > { %v6983_v9 = vpack.c.bf16 %v7371_v43, %v7370_v53 }
0x17ab   : > { %v9112_v51 = vpop.eup %7650  ;;  %v7374_v13 = vpop.permute.xlu1 %7373 }
0x17ac   : > { %v7364_v18 = vpop.permute.xlu0 %7363  ;;  %v4103_v57 = vsel %vm883_vm3, %v9112_v51, 0.0  ;;  %v7376_v59 = vunpack.i.h.bf16 %v7374_v13  ;;  %v7375_v49 = vunpack.i.l.bf16 %v7374_v13 }
0x17ad   : > { %v7366_v54 = vunpack.i.h.bf16 %v7364_v18  ;;  %v7365_v22 = vunpack.i.l.bf16 %v7364_v18  ;;  %4104 = vadd.xlane.f32.xlu1 %v4103_v57 }
0x17ae   : > { %v6987_v39 = vpack.c.bf16 %v7376_v59, %v7375_v49  ;;  %v4076_v59 = vsub.f32 %v9087_v32, %v4066_v55 }
0x17af   : > { %v9116_v28 = vpop.eup %7652  ;;  %v6979_v56 = vpack.c.bf16 %v7366_v54, %v7365_v22  ;;  %v7379_v33 = vpop.permute.xlu1 %7378 }
0x17b0   : > { %v4100_v40 = vsel %vm883_vm3, %v9116_v28, 0.0  ;;  %v9120_v58 = vpop.eup %7654  ;;  %v7381_v18 = vunpack.i.h.bf16 %v7379_v33  ;;  %v7380_v57 = vunpack.i.l.bf16 %v7379_v33  ;;  %v7384_v54 = vpop.permute.xlu0 %7383  ;;  %v4090_v49 = vmul.f32 1.442695, %v4076_v59 }
0x17b1   : > { %4101 = vadd.xlane.f32.xlu0 %v4100_v40  ;;  %6980 = vmatprep.subr.bf16.mxu1 %v6979_v56  ;;  %v4109_v26 = vsel %vm883_vm3, %v9120_v58, 0.0  ;;  %v7386_v53 = vunpack.i.h.bf16 %v7384_v54  ;;  %v7385_v22 = vunpack.i.l.bf16 %v7384_v54  ;;  %v4077_v40 = vsub.f32 %v9083_v4, %v4069_v11 }
0x17b2   : > { %6982 = vmatpush3.bf16.msra.mxu1 %v6979_v56  ;;  %v6991_v43 = vpack.c.bf16 %v7381_v18, %v7380_v57 }
0x17b3   : > { %6984 = vmatprep.subr.bf16.mxu1 %v6983_v9  ;;  %v9124_v25 = vpop.eup %7656  ;;  %v6995_v56 = vpack.c.bf16 %v7386_v53, %v7385_v22 }
0x17b4   : > { %v4106_v13 = vsel %vm883_vm3, %v9124_v25, 0.0 }
0x17b5   : > { %4110 = vadd.xlane.f32.xlu0 %v4109_v26 }
0x17b6   : > { %6986 = vmatpush3.bf16.msra.mxu1 %v6983_v9  ;;  %v4092_v9 = vmul.f32 1.442695, %v4077_v40 }
0x17b7   : > { %6988 = vmatprep.subr.bf16.mxu1 %v6987_v39 }
0x17b8   : > { %7658 = vpow2.f32 %v4092_v9 }
0x17b9   : > { %4107 = vadd.xlane.f32.xlu0 %v4106_v13  ;;  %7660 = vpow2.f32 %v4090_v49 }
0x17ba   : > { %6990 = vmatpush3.bf16.msra.mxu1 %v6987_v39 }
0x17bb   : > { %6992 = vmatprep.subr.bf16.mxu1 %v6991_v43 }
0x17be   : > { %7398 = vrot.lane.b32.xlu1 %v8786_v61, %s9669_s29  ;;  %6994 = vmatpush3.bf16.msra.mxu1 %v6991_v43 }
0x17bf   : > { %6997 = vmatprep.subr.msk.bf16.mxu1 %vm8002_vm2, %v6995_v56 }
0x17c2   : > { %v9142_v33 = vpop.eup %7658 }
0x17c3   : > { %v4115_v4 = vsel %vm883_vm3, %v9142_v33, 0.0  ;;  %v9148_v32 = vpop.eup %7660 }
0x17cf   : > { %7393 = vrot.lane.b32.xlu0 %v8780_v47, %s9669_s29 }
0x17d3   : > { %4287 = vrot.lane.b32.xlu0 %v8730_v36, %s9669_s29  ;;  %v4112_v36 = vsel %vm883_vm3, %v9148_v32, 0.0 }
0x17d7   : > { %4291 = vrot.lane.b32.xlu0 %v8738_v17, %s9669_s29  ;;  %v7389_v17 = vpop.permute.xlu1 %7388 }
0x17d8   : > { %v7391_v39 = vunpack.i.h.bf16 %v7389_v17  ;;  %v7390_v18 = vunpack.i.l.bf16 %v7389_v17 }
0x17db   : > { %4295 = vrot.lane.b32.xlu0 %v8746_v23, %s9669_s29 }
0x17df   : > { %4299 = vrot.lane.b32.xlu0 %v8756_v8, %s9669_s29 }
0x17e2   : > { %4116 = vadd.xlane.f32.xlu1 %v4115_v4 }
0x17e6   : > { %4113 = vadd.xlane.f32.xlu1 %v4112_v36 }
0x17f7   : > { %4289 = vrot.lane.b32.xlu1 %v8726_v21, %s9669_s29 }
0x17fb   : > { %4293 = vrot.lane.b32.xlu1 %v8736_v52, %s9669_s29 }
0x17ff   : > { %4297 = vrot.lane.b32.xlu1 %v8742_v63, %s9669_s29 }
0x1803   : > { %4301 = vrot.lane.b32.xlu1 %v8752_v1, %s9669_s29  ;;  %v7001_v1 = vpack.c.bf16 %v7391_v39, %v7390_v18 }
0x1835   : > { %v4099_v23 = vpop.xlane.xlu1 %4098 }
0x1836   : > { %7662 = vrcp.f32 %v4099_v23  ;;  %v4096_v8 = vpop.xlane.xlu0 %4095 }
0x1837   : > { %7664 = vrcp.f32 %v4096_v8 }
0x183a   : > { %v4105_v11 = vpop.xlane.xlu1 %4104 }
0x183b   : > { %7666 = vrcp.f32 %v4105_v11 }
0x183e   : > { %v4102_v55 = vpop.xlane.xlu0 %4101 }
0x183f   : > { %7668 = vrcp.f32 %v4102_v55 }
0x1840   : > { %v7663_v26 = vpop.eup %7662 }
0x1841   : > { %v7665_v21 = vpop.eup %7664  ;;  %v4127_v63 = vmul.f32 %v7663_v26, %v9104_v16 }
0x1842   : > { %v4111_v52 = vpop.xlane.xlu0 %4110  ;;  %v4126_v57 = vmul.f32 %v7665_v21, %v9106_v31 }
0x1843   : > { %7670 = vrcp.f32 %v4111_v52 }
0x1844   : > { %6555 = vmatprep.mubr.msk.f32.mxu1 %vm883_vm3, %v4126_v57 }
0x1845   : > { %6556 = vmatmul.mubr.msk.f32.vlgmr.msra.gmra.mrb[64].mxu1 %vm883_vm3, %v4127_v63  ;;  %v7667_v13 = vpop.eup %7666 }
0x1846   : > { %7000 = vmatpush3.bf16.xpose.msk.msra.mxu1 %vm8002_vm2, %v6995_v56  ;;  %v4108_v54 = vpop.xlane.xlu0 %4107  ;;  %v4129_v40 = vmul.f32 %v7667_v13, %v9112_v51  ;;  %v7399_v56 = vpop.permute.xlu1 %7398 }
0x1847   : > { %7672 = vrcp.f32 %v4108_v54  ;;  %7003 = vmatprep.subr.msk.bf16.mxu1 %vm8002_vm2, %v7001_v1  ;;  %v7401_v4 = vunpack.i.h.bf16 %v7399_v56 }
0x1849   : > { %v7669_v43 = vpop.eup %7668 }
0x184a   : > { %v7394_v53 = vpop.permute.xlu0 %7393  ;;  %v4128_v31 = vmul.f32 %v7669_v43, %v9116_v28  ;;  %v7400_v28 = vunpack.i.l.bf16 %v7399_v56 }
0x184b   : > { %v7396_v16 = vunpack.i.h.bf16 %v7394_v53  ;;  %v7395_v22 = vunpack.i.l.bf16 %v7394_v53 }
0x184c   : > { %6558 = vmatprep.mubr.msk.f32.mxu1 %vm883_vm3, %v4128_v31  ;;  %v7013_v17 = vpack.c.bf16 %v7401_v4, %v7400_v28 }
0x184d   : > { %v7007_v9 = vpack.c.bf16 %v7396_v16, %v7395_v22  ;;  %6559 = vmatmul.mubr.msk.f32.gmra.mrb[66].mxu1 %vm883_vm3, %v4129_v40  ;;  %v7671_v59 = vpop.eup %7670 }
0x184e   : > { %7006 = vmatpush3.bf16.xpose.msk.msra.mxu1 %vm8002_vm2, %v7001_v1  ;;  %v4131_v51 = vmul.f32 %v7671_v59, %v9120_v58 }
0x184f   : > { %7009 = vmatprep.subr.msk.bf16.mxu1 %vm8002_vm2, %v7007_v9 }
0x1851   : > { %v7673_v49 = vpop.eup %7672 }
0x1852   : > { %v4130_v36 = vmul.f32 %v7673_v49, %v9124_v25  ;;  %v4288_v25 = vpop.permute.xlu0 %4287 }
0x1854   : > { %6561 = vmatprep.mubr.msk.f32.mxu1 %vm883_vm3, %v4130_v36 }
0x1855   : > { %6562 = vmatmul.mubr.msk.f32.gmra.mrb[68].mxu1 %vm883_vm3, %v4131_v51 }
0x1856   : > { %7012 = vmatpush3.bf16.xpose.msk.msra.mxu1 %vm8002_vm2, %v7007_v9  ;;  %v4292_v39 = vpop.permute.xlu0 %4291 }
0x1857   : > { %7015 = vmatprep.subr.msk.bf16.mxu1 %vm8002_vm2, %v7013_v17 }
0x185a   : > { %v4296_v18 = vpop.permute.xlu0 %4295 }
0x185e   : > { %7018 = vmatpush3.bf16.xpose.msk.msra.mxu1 %vm8002_vm2, %v7013_v17 }
0x186f   : > { %v4117_v23 = vpop.xlane.xlu1 %4116 }
0x1870   : > { %7674 = vrcp.f32 %v4117_v23 }
0x1873   : > { %v4114_v8 = vpop.xlane.xlu1 %4113 }
0x1874   : > { %7676 = vrcp.f32 %v4114_v8 }
0x1877   : > { %v4290_v55 = vpop.permute.xlu1 %4289 }
0x187a   : > { %v7675_v58 = vpop.eup %7674 }
0x187b   : > { %v4133_v21 = vmul.f32 %v7675_v58, %v9142_v33  ;;  %v4294_v14 = vpop.permute.xlu1 %4293 }
0x187e   : > { %v7677_v11 = vpop.eup %7676 }
0x187f   : > { %v4132_v26 = vmul.f32 %v7677_v11, %v9148_v32  ;;  %v4298_v52 = vpop.permute.xlu1 %4297  ;;  %v4300_v32 = vpop.permute.xlu0 %4299 }
0x1881   : > { %6564 = vmatprep.mubr.msk.f32.mxu1 %vm883_vm3, %v4132_v26 }
0x1882   : > { %6565 = vmatmul.mubr.msk.f32.gmra.mrb[70].mxu1 %vm883_vm3, %v4133_v21 }
0x1883   : > { %6583 = vmatprep.mubr.msk.f32.mxu1 %vm737_vm1, %v4288_v25  ;;  %v4302_v33 = vpop.permute.xlu1 %4301 }
0x1886   : > { %6584 = vmatmul.mubr.msk.f32.vlgmr.msra.gmra.mrb[72].mxu1 %vm737_vm1, %v4290_v55 }
0x1887   : > { %6586 = vmatprep.mubr.msk.f32.mxu1 %vm737_vm1, %v4292_v39 }
0x188a   : > { %6587 = vmatmul.mubr.msk.f32.gmra.mrb[74].mxu1 %vm737_vm1, %v4294_v14 }
0x188b   : > { %6589 = vmatprep.mubr.msk.f32.mxu1 %vm737_vm1, %v4296_v18 }
0x188e   : > { %6590 = vmatmul.mubr.msk.f32.gmra.mrb[76].mxu1 %vm737_vm1, %v4298_v52 }
0x188f   : > { %6592 = vmatprep.mubr.msk.f32.mxu1 %vm737_vm1, %v4300_v32 }
0x1892   : > { %6593 = vmatmul.mubr.msk.f32.gmra.mrb[78].mxu1 %vm737_vm1, %v4302_v33 }
0x1918   : > { %v9198_v57 = vpop.f32.mrb[64].mxu1 }
0x1919   : > { %v9200_v63 = vpop.f32.mrb[65].mxu1 }
0x1920   : > { %v9202_v1 = vpop.f32.mrb[66].mxu1 }
0x1921   : > { %v9204_v54 = vpop.f32.mrb[67].mxu1 }
0x1928   : > { %v9206_v13 = vpop.f32.mrb[68].mxu1 }
0x1929   : > { %v9208_v43 = vpop.f32.mrb[69].mxu1 }
0x1955   : > { %v9210_v53 = vpop.f32.mrb[70].mxu1 }
0x1956   : > { %v9212_v31 = vpop.f32.mrb[71].mxu1 }
0x1959   : > { %v6585_v16 = vpop.f32.mrb[72].mxu1 }
0x195a   : > { %v4457_v22 = vmul.f32 0.35355338, %v6585_v16  ;;  %v4417_v40 = vpop.f32.mrb[73].mxu1 }
0x195b   : > { %v4456_v9 = vmul.f32 0.35355338, %v4417_v40 }
0x195c   : > { %v4467_v56 = vsel %vm883_vm3, %v4457_v22, -inf }
0x195d   : > { %4468 = vmax.xlane.f32.xlu1 %v4467_v56  ;;  %v6588_v59 = vpop.f32.mrb[74].mxu1  ;;  %v4464_v49 = vsel %vm883_vm3, %v4456_v9, -inf }
0x195e   : > { %v4459_v4 = vmul.f32 0.35355338, %v6588_v59  ;;  %4465 = vmax.xlane.f32.xlu0 %v4464_v49  ;;  %v4427_v28 = vpop.f32.mrb[75].mxu1 }
0x195f   : > { %v4458_v51 = vmul.f32 0.35355338, %v4427_v28 }
0x1960   : > { %v4473_v36 = vsel %vm883_vm3, %v4459_v4, -inf }
0x1961   : > { %v6591_v17 = vpop.f32.mrb[76].mxu1  ;;  %v4470_v55 = vsel %vm883_vm3, %v4458_v51, -inf }
0x1962   : > { %v4461_v23 = vmul.f32 0.35355338, %v6591_v17  ;;  %4474 = vmax.xlane.f32.xlu0 %v4473_v36  ;;  %v4437_v8 = vpop.f32.mrb[77].mxu1 }
0x1963   : > { %v4460_v58 = vmul.f32 0.35355338, %v4437_v8 }
0x1964   : > { %v4479_v25 = vsel %vm883_vm3, %v4461_v23, -inf }
0x1965   : > { %4480 = vmax.xlane.f32.xlu1 %v4479_v25  ;;  %v6594_v11 = vpop.f32.mrb[78].mxu1  ;;  %v4476_v18 = vsel %vm883_vm3, %v4460_v58, -inf }
0x1966   : > { %v9219_v26 = vmul.f32 0.35355338, %v6594_v11  ;;  %4471 = vmax.xlane.f32.xlu0 %v4470_v55  ;;  %v4447_v21 = vpop.f32.mrb[79].mxu1 }
0x1967   : > { %v9223_v14 = vmul.f32 0.35355338, %v4447_v21 }
0x1968   : > { %v4485_v39 = vsel %vm883_vm3, %v9219_v26, -inf }
0x1969   : > { %4486 = vmax.xlane.f32.xlu1 %v4485_v39  ;;  %v4482_v52 = vsel %vm883_vm3, %v9223_v14, -inf }
0x196a   : > { %4477 = vmax.xlane.f32.xlu0 %v4476_v18 }
0x196e   : > { %4483 = vmax.xlane.f32.xlu0 %v4482_v52 }
0x197a   : > { %7408 = vrot.lane.b32.xlu1 %v8774_v41, %s9670_s14 }
0x1984   : > { %7403 = vrot.lane.b32.xlu0 %v8768_v62, %s9670_s14 }
0x19ea   : > { %v4469_v32 = vpop.xlane.xlu1 %4468 }
0x19eb   : > { %v4489_v33 = vsub.f32 %v4457_v22, %v4469_v32  ;;  %v4466_v16 = vpop.xlane.xlu0 %4465 }
0x19ec   : > { %v4488_v40 = vsub.f32 %v4456_v9, %v4466_v16 }
0x19ed   : > { %v4498_v56 = vmul.f32 1.442695, %v4489_v33 }
0x19ee   : > { %v4496_v59 = vmul.f32 1.442695, %v4488_v40 }
0x19ef   : > { %7678 = vpow2.f32 %v4498_v56  ;;  %v4475_v49 = vpop.xlane.xlu0 %4474 }
0x19f0   : > { %7680 = vpow2.f32 %v4496_v59  ;;  %v4491_v28 = vsub.f32 %v4459_v4, %v4475_v49 }
0x19f2   : > { %v4502_v36 = vmul.f32 1.442695, %v4491_v28  ;;  %v4481_v17 = vpop.xlane.xlu1 %4480 }
0x19f3   : > { %v4493_v8 = vsub.f32 %v4461_v23, %v4481_v17  ;;  %v4472_v25 = vpop.xlane.xlu0 %4471 }
0x19f4   : > { %7682 = vpow2.f32 %v4502_v36  ;;  %v4490_v11 = vsub.f32 %v4458_v51, %v4472_v25 }
0x19f5   : > { %v4506_v41 = vmul.f32 1.442695, %v4493_v8 }
0x19f6   : > { %v4500_v55 = vmul.f32 1.442695, %v4490_v11  ;;  %v4487_v21 = vpop.xlane.xlu1 %4486 }
0x19f7   : > { %v4478_v62 = vpop.xlane.xlu0 %4477 }
0x19f8   : > { %7684 = vpow2.f32 %v4500_v55  ;;  %v4492_v22 = vsub.f32 %v4460_v58, %v4478_v62  ;;  %v4495_v55 = vsub.f32 %v9219_v26, %v4487_v21 }
0x19f9   : > { %v9232_v39 = vpop.eup %7678  ;;  %7686 = vpow2.f32 %v4506_v41 }
0x19fa   : > { %v9234_v9 = vpop.eup %7680  ;;  %v4504_v18 = vmul.f32 1.442695, %v4492_v22  ;;  %v4515_v4 = vsel %vm883_vm3, %v9232_v39, 0.0  ;;  %v7409_v52 = vpop.permute.xlu1 %7408  ;;  %v4510_v22 = vmul.f32 1.442695, %v4495_v55 }
0x19fb   : > { %4516 = vadd.xlane.f32.xlu1 %v4515_v4  ;;  %v4484_v23 = vpop.xlane.xlu0 %4483  ;;  %v4512_v51 = vsel %vm883_vm3, %v9234_v9, 0.0  ;;  %v7411_v16 = vunpack.i.h.bf16 %v7409_v52  ;;  %v7410_v40 = vunpack.i.l.bf16 %v7409_v52 }
0x19fc   : > { %7688 = vpow2.f32 %v4504_v18  ;;  %4513 = vadd.xlane.f32.xlu0 %v4512_v51  ;;  %v4494_v62 = vsub.f32 %v9223_v14, %v4484_v23 }
0x19fd   : > { %v7023_v8 = vpack.c.bf16 %v7411_v16, %v7410_v40  ;;  %7690 = vpow2.f32 %v4510_v22  ;;  %v4827_v22 = vld [vmem:[%s9651_s7 + $0x10] sm:$0xff] }
0x19fe   : > { %v9240_v32 = vpop.eup %7682  ;;  %v4508_v18 = vmul.f32 1.442695, %v4494_v62 }
0x19ff   : > { %v7404_v58 = vpop.permute.xlu0 %7403  ;;  %v4521_v33 = vsel %vm883_vm3, %v9240_v32, 0.0 }
0x1a00   : > { %v7406_v56 = vunpack.i.h.bf16 %v7404_v58  ;;  %v7405_v59 = vunpack.i.l.bf16 %v7404_v58  ;;  %4522 = vadd.xlane.f32.xlu1 %v4521_v33  ;;  %7692 = vpow2.f32 %v4508_v18 }
0x1a02   : > { %v9244_v49 = vpop.eup %7684  ;;  %v7019_v28 = vpack.c.bf16 %v7406_v56, %v7405_v59 }
0x1a03   : > { %v4518_v36 = vsel %vm883_vm3, %v9244_v49, 0.0  ;;  %v9248_v17 = vpop.eup %7686 }
0x1a04   : > { %4519 = vadd.xlane.f32.xlu0 %v4518_v36  ;;  %7020 = vmatprep.subr.bf16.mxu0 %v7019_v28  ;;  %v4527_v41 = vsel %vm883_vm3, %v9248_v17, 0.0 }
0x1a05   : > { %7022 = vmatpush3.bf16.msra.mxu0 %v7019_v28 }
0x1a06   : > { %v9250_v25 = vpop.eup %7688  ;;  %7024 = vmatprep.subr.bf16.mxu0 %v7023_v8 }
0x1a07   : > { %v4524_v11 = vsel %vm883_vm3, %v9250_v25, 0.0  ;;  %v9262_v4 = vpop.eup %7690 }
0x1a08   : > { %4525 = vadd.xlane.f32.xlu1 %v4524_v11  ;;  %4528 = vadd.xlane.f32.xlu0 %v4527_v41  ;;  %v4533_v52 = vsel %vm883_vm3, %v9262_v4, 0.0 }
0x1a09   : > { %7026 = vmatpush3.bf16.msra.mxu0 %v7023_v8 }
0x1a0a   : > { %v9264_v51 = vpop.eup %7692 }
0x1a19   : > { %7418 = vrot.lane.b32.xlu1 %v8786_v61, %s9670_s14  ;;  %v4530_v61 = vsel %vm883_vm3, %v9264_v51, 0.0 }
0x1a1e   : > { %7413 = vrot.lane.b32.xlu0 %v8780_v47, %s9670_s14 }
0x1a3d   : > { %4534 = vadd.xlane.f32.xlu0 %v4533_v52  ;;  %4531 = vadd.xlane.f32.xlu1 %v4530_v61 }
0x1a4e   : > { %4715 = vrot.lane.b32.xlu1 %v9062_v10, %s7771_s22 }
0x1a52   : > { %4745 = vrot.lane.b32.xlu1 %v9200_v63, %s7772_s23 }
0x1a53   : > { %4713 = vrot.lane.b32.xlu0 %v9064_v7, %s7771_s22 }
0x1a56   : > { %4747 = vrot.lane.b32.xlu1 %v9198_v57, %s7772_s23 }
0x1a57   : > { %4717 = vrot.lane.b32.xlu0 %v9068_v50, %s7771_s22 }
0x1a5a   : > { %4719 = vrot.lane.b32.xlu1 %v9066_v3, %s7771_s22 }
0x1a5b   : > { %4749 = vrot.lane.b32.xlu0 %v9204_v54, %s7772_s23 }
0x1a5e   : > { %4751 = vrot.lane.b32.xlu1 %v9202_v1, %s7772_s23 }
0x1a5f   : > { %4721 = vrot.lane.b32.xlu0 %v9072_v2, %s7771_s22 }
0x1a62   : > { %4723 = vrot.lane.b32.xlu1 %v9070_v24, %s7771_s22 }
0x1a88   : > { %v4517_v10 = vpop.xlane.xlu1 %4516 }
0x1a89   : > { %v4514_v47 = vpop.xlane.xlu0 %4513 }
0x1a8a   : > { %7694 = vrcp.f32 %v4514_v47 }
0x1a8b   : > { %7696 = vrcp.f32 %v4517_v10 }
0x1a8d   : > { %v4523_v7 = vpop.xlane.xlu1 %4522 }
0x1a91   : > { %v4520_v50 = vpop.xlane.xlu0 %4519 }
0x1a92   : > { %7698 = vrcp.f32 %v4520_v50 }
0x1a93   : > { %7700 = vrcp.f32 %v4523_v7 }
0x1a94   : > { %v7695_v57 = vpop.eup %7694 }
0x1a95   : > { %v4526_v63 = vpop.xlane.xlu1 %4525  ;;  %v4529_v3 = vpop.xlane.xlu0 %4528  ;;  %v4544_v26 = vmul.f32 %v7695_v57, %v9234_v9 }
0x1a96   : > { %7702 = vrcp.f32 %v4526_v63  ;;  %v7697_v33 = vpop.eup %7696 }
0x1a97   : > { %6611 = vmatprep.mubr.msk.f32.mxu0 %vm883_vm3, %v4544_v26  ;;  %7704 = vrcp.f32 %v4529_v3  ;;  %v4545_v16 = vmul.f32 %v7697_v33, %v9232_v39 }
0x1a99   : > { %v7419_v1 = vpop.permute.xlu1 %7418  ;;  %v7414_v54 = vpop.permute.xlu0 %7413 }
0x1a9a   : > { %v7421_v2 = vunpack.i.h.bf16 %v7419_v1  ;;  %v7420_v14 = vunpack.i.l.bf16 %v7419_v1  ;;  %v7416_v21 = vunpack.i.h.bf16 %v7414_v54  ;;  %v7415_v24 = vunpack.i.l.bf16 %v7414_v54 }
0x1a9c   : > { %v7027_v23 = vpack.c.bf16 %v7416_v21, %v7415_v24  ;;  %v7031_v58 = vpack.c.bf16 %v7421_v2, %v7420_v14  ;;  %v7699_v9 = vpop.eup %7698 }
0x1a9d   : > { %v7701_v40 = vpop.eup %7700  ;;  %v4546_v56 = vmul.f32 %v7699_v9, %v9244_v49 }
0x1a9e   : > { %7028 = vmatprep.subr.bf16.mxu0 %v7027_v23  ;;  %v4547_v28 = vmul.f32 %v7701_v40, %v9240_v32 }
0x1a9f   : > { %7030 = vmatpush3.bf16.msra.mxu0 %v7027_v23 }
0x1aa0   : > { %7032 = vmatprep.subr.bf16.mxu0 %v7031_v58  ;;  %v7703_v59 = vpop.eup %7702 }
0x1aa1   : > { %v7705_v36 = vpop.eup %7704  ;;  %v4548_v8 = vmul.f32 %v7703_v59, %v9250_v25  ;;  %v4826_v25 = vld [vmem:[%s9651_s7 + $0x8] sm:$0xff] }
0x1aa2   : > { %v4549_v11 = vmul.f32 %v7705_v36, %v9248_v17  ;;  %v4825_v17 = vld [vmem:[%s9651_s7] sm:$0xff] }
0x1aa3   : > { %7034 = vmatpush3.bf16.msra.mxu0 %v7031_v58  ;;  %v7035_v18 = vpack.c.bf16 %v4826_v25, %v4825_v17 }
0x1aa5   : > { %7036 = vmatprep.subr.bf16.mxu0 %v7035_v18 }
0x1aa6   : > { %6612 = vmatmul.mubr.msk.f32.vlgmr.msra.gmra.mrb[72].mxu0 %vm883_vm3, %v4545_v16 }
0x1aa7   : > { %6614 = vmatprep.mubr.msk.f32.mxu0 %vm883_vm3, %v4546_v56  ;;  %7038 = vmatpush3.bf16.msra.mxu0 %v7035_v18 }
0x1aaa   : > { %6615 = vmatmul.mubr.msk.f32.gmra.mrb[74].mxu0 %vm883_vm3, %v4547_v28 }
0x1aab   : > { %6617 = vmatprep.mubr.msk.f32.mxu0 %vm883_vm3, %v4548_v8 }
0x1aae   : > { %6618 = vmatmul.mubr.msk.f32.gmra.mrb[76].mxu0 %vm883_vm3, %v4549_v11 }
0x1aca   : > { %v4532_v39 = vpop.xlane.xlu1 %4531  ;;  %v4535_v49 = vpop.xlane.xlu0 %4534 }
0x1acb   : > { %7706 = vrcp.f32 %v4532_v39 }
0x1acc   : > { %7708 = vrcp.f32 %v4535_v49 }
0x1ad5   : > { %v7707_v41 = vpop.eup %7706 }
0x1ad6   : > { %v7709_v55 = vpop.eup %7708  ;;  %v4550_v62 = vmul.f32 %v7707_v41, %v9264_v51 }
0x1ad7   : > { %v4551_v32 = vmul.f32 %v7709_v55, %v9262_v4  ;;  %v4828_v4 = vld [vmem:[%s9651_s7 + $0x18] sm:$0xff] }
0x1ad8   : > { %6620 = vmatprep.mubr.msk.f32.mxu0 %vm883_vm3, %v4550_v62  ;;  %v7039_v51 = vpack.c.bf16 %v4828_v4, %v4827_v22 }
0x1ad9   : > { %6621 = vmatmul.mubr.msk.f32.gmra.mrb[78].mxu0 %vm883_vm3, %v4551_v32 }
0x1ada   : > { %7040 = vmatprep.subr.bf16.mxu0 %v7039_v51 }
0x1adb   : > { %7042 = vmatpush3.bf16.msra.mxu0 %v7039_v51 }
0x1b79   : > { %v6613_v52 = vpop.f32.mrb[72].mxu0 }
0x1b7a   : > { %4779 = vrot.lane.b32.xlu1 %v6613_v52, %s7773_s28  ;;  %v4666_v61 = vpop.f32.mrb[73].mxu0 }
0x1b7b   : > { %4777 = vrot.lane.b32.xlu0 %v4666_v61, %s7773_s28 }
0x1b7d   : > { %v6616_v47 = vpop.f32.mrb[74].mxu0 }
0x1b7e   : > { %4755 = vrot.lane.b32.xlu1 %v9206_v13, %s7772_s23  ;;  %v4676_v10 = vpop.f32.mrb[75].mxu0 }
0x1b7f   : > { %4753 = vrot.lane.b32.xlu0 %v9208_v43, %s7772_s23 }
0x1b81   : > { %v6619_v7 = vpop.f32.mrb[76].mxu0 }
0x1b82   : > { %4783 = vrot.lane.b32.xlu1 %v6616_v47, %s7773_s28  ;;  %v4686_v50 = vpop.f32.mrb[77].mxu0 }
0x1b83   : > { %4781 = vrot.lane.b32.xlu0 %v4676_v10, %s7773_s28 }
0x1b86   : > { %4727 = vrot.lane.b32.xlu1 %v9074_v37, %s7771_s22  ;;  %v4716_v37 = vpop.permute.xlu1 %4715 }
0x1b87   : > { %4725 = vrot.lane.b32.xlu0 %v9076_v0, %s7771_s22  ;;  %v4714_v0 = vpop.permute.xlu0 %4713  ;;  %v4802_v21 = vsel %vm737_vm1, %v8926_v34, %v4716_v37 }
0x1b8a   : > { %4787 = vrot.lane.b32.xlu1 %v6619_v7, %s7773_s28  ;;  %v4746_v57 = vpop.permute.xlu1 %4745 }
0x1b8b   : > { %4785 = vrot.lane.b32.xlu0 %v4686_v50, %s7773_s28  ;;  %v4718_v26 = vpop.permute.xlu0 %4717 }
0x1b8e   : > { %4759 = vrot.lane.b32.xlu1 %v9210_v53, %s7772_s23  ;;  %v4748_v63 = vpop.permute.xlu1 %4747  ;;  %v4801_v53 = vsel %vm737_vm1, %v8928_v35, %v4714_v0  ;;  %v4803_v35 = vsel %vm737_vm1, %v8932_v38, %v4718_v26 }
0x1b8f   : > { %4757 = vrot.lane.b32.xlu0 %v9212_v31, %s7772_s23  ;;  %v4750_v54 = vpop.permute.xlu0 %4749  ;;  %v4809_v24 = vsel %vm2483_vm4, %v4801_v53, %v4746_v57  ;;  %v4810_v58 = vsel %vm2483_vm4, %v4802_v21, %v4748_v63 }
0x1b90   : > { %v4811_v34 = vsel %vm2483_vm4, %v4803_v35, %v4750_v54 }
0x1b92   : > { %v4720_v3 = vpop.permute.xlu1 %4719 }
0x1b93   : > { %v4722_v14 = vpop.permute.xlu0 %4721  ;;  %v4804_v59 = vsel %vm737_vm1, %v8930_v15, %v4720_v3 }
0x1b94   : > { %v4805_v38 = vsel %vm737_vm1, %v8936_v27, %v4722_v14 }
0x1b96   : > { %v4752_v1 = vpop.permute.xlu1 %4751 }
0x1b97   : > { %v4812_v36 = vsel %vm2483_vm4, %v4804_v59, %v4752_v1 }
0x1b9a   : > { %v4724_v2 = vpop.permute.xlu1 %4723 }
0x1b9b   : > { %v4806_v15 = vsel %vm737_vm1, %v8934_v12, %v4724_v2 }
0x1bac   : > { %v6622_v13 = vpop.f32.mrb[78].mxu0 }
0x1bad   : > { %4791 = vrot.lane.b32.xlu1 %v6622_v13, %s7773_s28  ;;  %v4696_v43 = vpop.f32.mrb[79].mxu0 }
0x1bae   : > { %4789 = vrot.lane.b32.xlu0 %v4696_v43, %s7773_s28 }
0x1bec   : > { %v4780_v31 = vpop.permute.xlu1 %4779 }
0x1bed   : > { %v4778_v23 = vpop.permute.xlu0 %4777  ;;  %v4818_v9 = vsel %vm2492_vm5, %v4810_v58, %v4780_v31 }
0x1bee   : > { %v4817_v33 = vsel %vm2492_vm5, %v4809_v24, %v4778_v23 }
0x1bef   : > { %6631 = vmatprep.mubr.msk.f32.mxu0 %vm450_vm0, %v4817_v33 }
0x1bf0   : > { %v4756_v16 = vpop.permute.xlu1 %4755  ;;  %6632 = vmatmul.mubr.msk.f32.vlgmr.msra.gmra.mrb[80].mxu0 %vm450_vm0, %v4818_v9 }
0x1bf1   : > { %v4754_v40 = vpop.permute.xlu0 %4753  ;;  %v4814_v32 = vsel %vm2483_vm4, %v4806_v15, %v4756_v16 }
0x1bf2   : > { %v4813_v55 = vsel %vm2483_vm4, %v4805_v38, %v4754_v40 }
0x1bf4   : > { %v4784_v56 = vpop.permute.xlu1 %4783 }
0x1bf5   : > { %v4782_v28 = vpop.permute.xlu0 %4781  ;;  %v4820_v11 = vsel %vm2492_vm5, %v4812_v36, %v4784_v56 }
0x1bf6   : > { %v4819_v8 = vsel %vm2492_vm5, %v4811_v34, %v4782_v28 }
0x1bf7   : > { %6634 = vmatprep.mubr.msk.f32.mxu0 %vm450_vm0, %v4819_v8 }
0x1bf8   : > { %v4728_v39 = vpop.permute.xlu1 %4727  ;;  %6635 = vmatmul.mubr.msk.f32.gmra.mrb[82].mxu0 %vm450_vm0, %v4820_v11 }
0x1bf9   : > { %v4726_v49 = vpop.permute.xlu0 %4725  ;;  %v4808_v12 = vsel %vm737_vm1, %v8938_v20, %v4728_v39 }
0x1bfa   : > { %v4807_v27 = vsel %vm737_vm1, %v8940_v60, %v4726_v49  ;;  %v5739_v60 = vld [vmem:[%s9652_s8] ss:$0 sm:$0xff] }
0x1bfc   : > { %v4788_v41 = vpop.permute.xlu1 %4787 }
0x1bfd   : > { %v4786_v62 = vpop.permute.xlu0 %4785  ;;  %v4822_v25 = vsel %vm2492_vm5, %v4814_v32, %v4788_v41 }
0x1bfe   : > { %v4821_v17 = vsel %vm2492_vm5, %v4813_v55, %v4786_v62 }
0x1bff   : > { %6637 = vmatprep.mubr.msk.f32.mxu0 %vm450_vm0, %v4821_v17 }
0x1c00   : > { %6638 = vmatmul.mubr.msk.f32.gmra.mrb[84].mxu0 %vm450_vm0, %v4822_v25  ;;  %v4760_v22 = vpop.permute.xlu1 %4759 }
0x1c01   : > { %v4758_v18 = vpop.permute.xlu0 %4757  ;;  %v4816_v61 = vsel %vm2483_vm4, %v4808_v12, %v4760_v22 }
0x1c02   : > { %v4815_v51 = vsel %vm2483_vm4, %v4807_v27, %v4758_v18 }
0x1c1f   : > { %v4792_v4 = vpop.permute.xlu1 %4791 }
0x1c20   : > { %v4790_v52 = vpop.permute.xlu0 %4789  ;;  %v4824_v10 = vsel %vm2492_vm5, %v4816_v61, %v4792_v4 }
0x1c21   : > { %v4823_v47 = vsel %vm2492_vm5, %v4815_v51, %v4790_v52 }
0x1c22   : > { %6640 = vmatprep.mubr.msk.f32.mxu0 %vm450_vm0, %v4823_v47 }
0x1c23   : > { %6641 = vmatmul.mubr.msk.f32.gmra.mrb[86].mxu0 %vm450_vm0, %v4824_v10 }
0x1cc3   : > { %v6633_v7 = vpop.f32.mrb[80].mxu0 }
0x1cc4   : > { %v4932_v50 = vadd.f32 %v6633_v7, %v5739_v60  ;;  %v4926_v20 = vpop.f32.mrb[81].mxu0  ;;  %v5102_v7 = vld [vmem:[%s9653_s9 + $0x8] sm:$0xff] }
0x1cc5   : > { %v4927_v13 = vadd.f32 %v5739_v60, %v4926_v20 }
0x1cc6   : > { %v9382_v43 = vadd.f32 %v4932_v50, %v8600_v30  ;;  %v5104_v50 = vld [vmem:[%s9653_s9 + $0x18] sm:$0xff] }
0x1cc7   : > { %v9385_v37 = vadd.f32 %v4927_v13, %v8603_v45  ;;  %v7043_v20 = vpack.c.bf16 %v5104_v50, %v5102_v7  ;;  %v5101_v13 = vld [vmem:[%s9653_s9] sm:$0xff] }
0x1cc8   : > { %v4976_v57 = vsel %vm450_vm0, %v9382_v43, 0.0 }
0x1cc9   : > { %4977 = vadd.xlane.f32.xlu1 %v4976_v57  ;;  %v4973_v63 = vsel %vm450_vm0, %v9385_v37, 0.0  ;;  %v5103_v57 = vld [vmem:[%s9653_s9 + $0x10] sm:$0xff]  ;;  %7044 = vmatprep.subr.bf16.mxu1 %v7043_v20 }
0x1cca   : > { %4974 = vadd.xlane.f32.xlu0 %v4973_v63  ;;  %v7045_v63 = vpack.c.bf16 %v5103_v57, %v5101_v13 }
0x1ccb   : > { %v6636_v0 = vpop.f32.mrb[82].mxu0 }
0x1ccc   : > { %v4936_v3 = vpop.f32.mrb[83].mxu0  ;;  %v4942_v26 = vadd.f32 %v6636_v0, %v5739_v60  ;;  %7046 = vmatpush1.bf16.msra.mxu1 %v7045_v63  ;;  %v5106_v0 = vld [vmem:[%s9653_s9 + $0x28] sm:$0xff] }
0x1ccd   : > { %v4937_v1 = vadd.f32 %v5739_v60, %v4936_v3  ;;  %v5108_v3 = vld [vmem:[%s9653_s9 + $0x38] sm:$0xff] }
0x1cce   : > { %v9395_v30 = vadd.f32 %v4942_v26, %v8613_v42  ;;  %v7047_v26 = vpack.c.bf16 %v5108_v3, %v5106_v0 }
0x1ccf   : > { %v9392_v54 = vadd.f32 %v4937_v1, %v8610_v5  ;;  %v5105_v1 = vld [vmem:[%s9653_s9 + $0x20] sm:$0xff] }
0x1cd0   : > { %v4982_v21 = vsel %vm450_vm0, %v9395_v30, 0.0  ;;  %7048 = vmatprep.subr.bf16.mxu1 %v7047_v26 }
0x1cd1   : > { %v4979_v45 = vsel %vm450_vm0, %v9392_v54, 0.0 }
0x1cd2   : > { %4980 = vadd.xlane.f32.xlu0 %v4979_v45  ;;  %v5107_v45 = vld [vmem:[%s9653_s9 + $0x30] sm:$0xff] }
0x1cd3   : > { %v6639_v2 = vpop.f32.mrb[84].mxu0 }
0x1cd4   : > { %v4952_v14 = vadd.f32 %v6639_v2, %v5739_v60  ;;  %v4946_v53 = vpop.f32.mrb[85].mxu0  ;;  %v7049_v2 = vpack.c.bf16 %v5107_v45, %v5105_v1 }
0x1cd5   : > { %v4947_v31 = vadd.f32 %v5739_v60, %v4946_v53 }
0x1cd6   : > { %v9402_v24 = vadd.f32 %v4952_v14, %v8620_v48  ;;  %4983 = vadd.xlane.f32.xlu0 %v4982_v21  ;;  %7050 = vmatpush1.bf16.msra.mxu1 %v7049_v2  ;;  %v7774_v14 = vmov 0.0  }
0x1cd7   : > { %v9405_v5 = vadd.f32 %v4947_v31, %v8623_v44  ;;  %5209 = vmatprep.mubr.f32.mxu1 %v7774_v14 }
0x1cd8   : > { %v4988_v42 = vsel %vm450_vm0, %v9402_v24, 0.0 }
0x1cd9   : > { %4989 = vadd.xlane.f32.xlu1 %v4988_v42  ;;  %v4985_v23 = vsel %vm450_vm0, %v9405_v5, 0.0 }
0x1cda   : > { %4986 = vadd.xlane.f32.xlu0 %v4985_v23 }
0x1cf6   : > { %v6642_v58 = vpop.f32.mrb[86].mxu0 }
0x1cf7   : > { %v4962_v33 = vadd.f32 %v6642_v58, %v5739_v60  ;;  %v4956_v9 = vpop.f32.mrb[87].mxu0 }
0x1cf8   : > { %v4957_v16 = vadd.f32 %v5739_v60, %v4956_v9 }
0x1cf9   : > { %v9412_v40 = vadd.f32 %v4962_v33, %v8630_v46 }
0x1cfa   : > { %v9415_v48 = vadd.f32 %v4957_v16, %v8633_v29 }
0x1cfb   : > { %v4994_v44 = vsel %vm450_vm0, %v9412_v40, 0.0 }
0x1cfc   : > { %4995 = vadd.xlane.f32.xlu1 %v4994_v44  ;;  %v4991_v35 = vsel %vm450_vm0, %v9415_v48, 0.0 }
0x1cfd   : > { %4992 = vadd.xlane.f32.xlu0 %v4991_v35  ;;  %v5306_v35 = vld [vmem:[%s9655_s11] sm:$0xff] }
0x1d56   : > { %v4978_v56 = vpop.xlane.xlu1 %4977 }
0x1d57   : > { %v4998_v34 = vmul.f32 0.03125, %v4978_v56  ;;  %v4975_v59 = vpop.xlane.xlu0 %4974  ;;  %v5307_v56 = vld [vmem:[%s9655_s11 + $0x8] sm:$0xff] }
0x1d58   : > { %v4997_v28 = vmul.f32 0.03125, %v4975_v59  ;;  %v7051_v59 = vpack.c.bf16 %v5307_v56, %v5306_v35 }
0x1d59   : > { %v9422_v36 = vsub.f32 %v9382_v43, %v4998_v34  ;;  %v5308_v34 = vld [vmem:[%s9655_s11 + $0x10] sm:$0xff] }
0x1d5a   : > { %v9425_v46 = vsub.f32 %v9385_v37, %v4997_v28  ;;  %v5309_v28 = vld [vmem:[%s9655_s11 + $0x18] sm:$0xff]  ;;  %7052 = vmatprep.subr.bf16.mxu0 %v7051_v59  ;;  %7083 = vmatprep.subr.bf16.mxu1 %v7051_v59 }
0x1d5b   : > { %v5014_v29 = vmul.f32 %v9422_v36, %v9422_v36  ;;  %7054 = vmatpush3.bf16.msra.mxu0 %v7051_v59 }
0x1d5c   : > { %v5013_v8 = vmul.f32 %v9425_v46, %v9425_v46 }
0x1d5d   : > { %v5024_v11 = vsel %vm450_vm0, %v5014_v29, 0.0  ;;  %v7055_v29 = vpack.c.bf16 %v5309_v28, %v5308_v34 }
0x1d5e   : > { %5025 = vadd.xlane.f32.xlu1 %v5024_v11  ;;  %v5021_v39 = vsel %vm450_vm0, %v5013_v8, 0.0 }
0x1d5f   : > { %5022 = vadd.xlane.f32.xlu0 %v5021_v39  ;;  %v4981_v49 = vpop.xlane.xlu0 %4980  ;;  %7056 = vmatprep.subr.bf16.mxu0 %v7055_v29 }
0x1d60   : > { %v4999_v38 = vmul.f32 0.03125, %v4981_v49  ;;  %7058 = vmatpush3.bf16.msra.mxu0 %v7055_v29 }
0x1d62   : > { %v9434_v41 = vsub.f32 %v9392_v54, %v4999_v38 }
0x1d63   : > { %v4984_v15 = vpop.xlane.xlu0 %4983 }
0x1d64   : > { %v5000_v55 = vmul.f32 0.03125, %v4984_v15  ;;  %v5015_v62 = vmul.f32 %v9434_v41, %v9434_v41 }
0x1d66   : > { %v9439_v32 = vsub.f32 %v9395_v30, %v5000_v55  ;;  %v4990_v17 = vpop.xlane.xlu1 %4989  ;;  %v5027_v25 = vsel %vm450_vm0, %v5015_v62, 0.0 }
0x1d67   : > { %v5002_v22 = vmul.f32 0.03125, %v4990_v17  ;;  %5028 = vadd.xlane.f32.xlu0 %v5027_v25  ;;  %v4987_v18 = vpop.xlane.xlu0 %4986  ;;  %v5079_v17 = vsub.s32 4, %v7931_v6 }
0x1d68   : > { %v5001_v27 = vmul.f32 0.03125, %v4987_v18  ;;  %v5016_v4 = vmul.f32 %v9439_v32, %v9439_v32 }
0x1d69   : > { %v9445_v12 = vsub.f32 %v9402_v24, %v5002_v22  ;;  %v5091_v22 = vsub.s32 5, %v7931_v6 }
0x1d6a   : > { %v9448_v51 = vsub.f32 %v9405_v5, %v5001_v27  ;;  %v5030_v52 = vsel %vm450_vm0, %v5016_v4, 0.0 }
0x1d6b   : > { %5031 = vadd.xlane.f32.xlu1 %v5030_v52  ;;  %v5018_v61 = vmul.f32 %v9445_v12, %v9445_v12  ;;  %v7751_v52 = vld [vmem:[%s9645_s1] sm:$0x3f] }
0x1d6c   : > { %v5017_v47 = vmul.f32 %v9448_v51, %v9448_v51 }
0x1d6d   : > { %v5036_v10 = vsel %vm450_vm0, %v5018_v61, 0.0  ;;  %v9511_v61 = vrot.slane %v7751_v52, %v5079_v17 }
0x1d6e   : > { %v5033_v60 = vsel %vm450_vm0, %v5017_v47, 0.0 }
0x1d6f   : > { %5037 = vadd.xlane.f32.xlu1 %v5036_v10  ;;  %5034 = vadd.xlane.f32.xlu0 %v5033_v60  ;;  %v9513_v60 = vrot.slane %v7751_v52, %v5091_v22  ;;  %v5315_v52 = vld [vmem:[%s9655_s11 + $0x48] sm:$0xff] }
0x1d89   : > { %v4996_v53 = vpop.xlane.xlu1 %4995 }
0x1d8a   : > { %v5004_v31 = vmul.f32 0.03125, %v4996_v53  ;;  %v4993_v21 = vpop.xlane.xlu0 %4992 }
0x1d8b   : > { %v5003_v42 = vmul.f32 0.03125, %v4993_v21 }
0x1d8c   : > { %v9483_v23 = vsub.f32 %v9412_v40, %v5004_v31 }
0x1d8d   : > { %v9486_v58 = vsub.f32 %v9415_v48, %v5003_v42 }
0x1d8e   : > { %v5020_v33 = vmul.f32 %v9483_v23, %v9483_v23 }
0x1d8f   : > { %v5019_v9 = vmul.f32 %v9486_v58, %v9486_v58 }
0x1d90   : > { %v5042_v16 = vsel %vm450_vm0, %v5020_v33, 0.0 }
0x1d91   : > { %5043 = vadd.xlane.f32.xlu1 %v5042_v16  ;;  %v5039_v44 = vsel %vm450_vm0, %v5019_v9, 0.0 }
0x1d92   : > { %5040 = vadd.xlane.f32.xlu0 %v5039_v44 }
0x1deb   : > { %v5026_v8 = vpop.xlane.xlu1 %5025 }
0x1dec   : > { %v5046_v11 = vmul.f32 0.03125, %v5026_v8  ;;  %v5023_v39 = vpop.xlane.xlu0 %5022 }
0x1ded   : > { %v5045_v49 = vmul.f32 0.03125, %v5023_v39 }
0x1dee   : > { %v5054_v38 = vadd.f32 1e-05, %v5046_v11 }
0x1def   : > { %v5053_v15 = vadd.f32 1e-05, %v5045_v49 }
0x1df0   : > { %7710 = vrsqrt.f32 %v5054_v38 }
0x1df1   : > { %7712 = vrsqrt.f32 %v5053_v15 }
0x1df4   : > { %v5029_v55 = vpop.xlane.xlu0 %5028 }
0x1df5   : > { %v5047_v62 = vmul.f32 0.03125, %v5029_v55 }
0x1df7   : > { %v5055_v25 = vadd.f32 1e-05, %v5047_v62 }
0x1df8   : > { %v5032_v18 = vpop.xlane.xlu1 %5031 }
0x1df9   : > { %7714 = vrsqrt.f32 %v5055_v25  ;;  %v5048_v27 = vmul.f32 0.03125, %v5032_v18  ;;  %v5313_v18 = vld [vmem:[%s9655_s11 + $0x38] sm:$0xff] }
0x1dfa   : > { %v7711_v4 = vpop.eup %7710 }
0x1dfb   : > { %v7713_v47 = vpop.eup %7712  ;;  %v5056_v10 = vadd.f32 1e-05, %v5048_v27  ;;  %v5070_v13 = vmul.f32 %v7711_v4, %v9422_v36  ;;  %v5314_v4 = vld [vmem:[%s9655_s11 + $0x40] sm:$0xff] }
0x1dfc   : > { %v5069_v7 = vmul.f32 %v7713_v47, %v9425_v46  ;;  %v5038_v50 = vpop.xlane.xlu1 %5037  ;;  %v5035_v20 = vpop.xlane.xlu0 %5034  ;;  %v5316_v47 = vld [vmem:[%s9655_s11 + $0x50] sm:$0xff] }
0x1dfd   : > { %7716 = vrsqrt.f32 %v5056_v10  ;;  %v5050_v57 = vmul.f32 0.03125, %v5038_v50  ;;  %v5049_v63 = vmul.f32 0.03125, %v5035_v20  ;;  %v5082_v45 = vmul.f32 %v9511_v61, %v5070_v13  ;;  %v5317_v10 = vld [vmem:[%s9655_s11 + $0x58] sm:$0xff]  ;;  %v5319_v50 = vld [vmem:[%s9655_s11 + $0x68] sm:$0xff]  ;;  %v5320_v13 = vld [vmem:[%s9655_s11 + $0x70] sm:$0xff] }
0x1dfe   : > { %v5081_v0 = vmul.f32 %v9511_v61, %v5069_v7  ;;  %v5318_v7 = vld [vmem:[%s9655_s11 + $0x60] sm:$0xff] }
0x1dff   : > { %v5058_v3 = vadd.f32 1e-05, %v5050_v57  ;;  %v5057_v26 = vadd.f32 1e-05, %v5049_v63  ;;  %v5094_v36 = vadd.f32 %v9513_v60, %v5082_v45  ;;  %v7075_v20 = vpack.c.bf16 %v5319_v50, %v5318_v7  ;;  %v5321_v57 = vld [vmem:[%s9655_s11 + $0x78] sm:$0xff] }
0x1e00   : > { %v5093_v1 = vadd.f32 %v9513_v60, %v5081_v0  ;;  %v7079_v63 = vpack.c.bf16 %v5321_v57, %v5320_v13  ;;  %v5109_v0 = vld [vmem:[%s9654_s10] sm:$0x3] }
0x1e01   : > { %7718 = vrsqrt.f32 %v5058_v3  ;;  %v9595_v3 = vrot.slane %v5109_v0, %v570_v19 }
0x1e02   : > { %7720 = vrsqrt.f32 %v5057_v26  ;;  %5748 = vmatmul.mubr.msk.f32.vlgmr.msra.gmra.mrb[80].mxu1 %vm450_vm0, %v5093_v1 }
0x1e03   : > { %v7715_v46 = vpop.eup %7714  ;;  %5215 = vmatprep.mubr.f32.mxu1 %v7774_v14  ;;  %7091 = vmatpush3.bf16.msra.mxu1 %v7051_v59 }
0x1e04   : > { %v5071_v2 = vmul.f32 %v7715_v46, %v9434_v41  ;;  %7084 = vmatprep.subr.bf16.mxu1 %v7055_v29 }
0x1e06   : > { %5749 = vmatmul.mubr.msk.f32.gmra.mrb[82].mxu1 %vm450_vm0, %v5094_v36  ;;  %v5083_v53 = vmul.f32 %v9511_v61, %v5071_v2 }
0x1e07   : > { %v7717_v31 = vpop.eup %7716  ;;  %5221 = vmatprep.mubr.f32.mxu1 %v7774_v14  ;;  %7092 = vmatpush3.bf16.msra.mxu1 %v7055_v29 }
0x1e08   : > { %v5095_v21 = vadd.f32 %v9513_v60, %v5083_v53  ;;  %v5072_v42 = vmul.f32 %v7717_v31, %v9439_v32 }
0x1e0a   : > { %5750 = vmatmul.mubr.msk.f32.gmra.mrb[84].mxu1 %vm450_vm0, %v5095_v21  ;;  %v5084_v33 = vmul.f32 %v9511_v61, %v5072_v42 }
0x1e0b   : > { %v7719_v9 = vpop.eup %7718  ;;  %5227 = vmatprep.mubr.f32.mxu1 %v7774_v14 }
0x1e0c   : > { %v7721_v41 = vpop.eup %7720  ;;  %v5096_v16 = vadd.f32 %v9513_v60, %v5084_v33  ;;  %v5074_v35 = vmul.f32 %v7719_v9, %v9445_v12 }
0x1e0d   : > { %v5073_v44 = vmul.f32 %v7721_v41, %v9448_v51 }
0x1e0e   : > { %5751 = vmatmul.mubr.msk.f32.gmra.mrb[86].mxu1 %vm450_vm0, %v5096_v16  ;;  %v5086_v34 = vmul.f32 %v9511_v61, %v5074_v35 }
0x1e0f   : > { %5233 = vmatprep.mubr.f32.mxu1 %v7774_v14  ;;  %v5085_v32 = vmul.f32 %v9511_v61, %v5073_v44  ;;  %v9671_v44 = vsub.s32 0, %v7931_v6 }
0x1e10   : > { %v5098_v59 = vadd.f32 %v9513_v60, %v5086_v34 }
0x1e11   : > { %v5097_v56 = vadd.f32 %v9513_v60, %v5085_v32  ;;  %v9603_v35 = vrot.slane %v5109_v0, %v9671_v44 }
0x1e13   : > { %5752 = vmatmul.mubr.msk.f32.gmra.mrb[88].mxu1 %vm450_vm0, %v5097_v56 }
0x1e14   : > { %5239 = vmatprep.mubr.f32.mxu1 %v7774_v14 }
0x1e17   : > { %5753 = vmatmul.mubr.msk.f32.gmra.mrb[90].mxu1 %vm450_vm0, %v5098_v59 }
0x1e18   : > { %5245 = vmatprep.mubr.f32.mxu1 %v7774_v14 }
0x1e1e   : > { %v5044_v12 = vpop.xlane.xlu1 %5043 }
0x1e1f   : > { %v5052_v51 = vmul.f32 0.03125, %v5044_v12  ;;  %v5041_v28 = vpop.xlane.xlu0 %5040 }
0x1e20   : > { %v5051_v29 = vmul.f32 0.03125, %v5041_v28 }
0x1e21   : > { %v5060_v8 = vadd.f32 1e-05, %v5052_v51 }
0x1e22   : > { %v5059_v11 = vadd.f32 1e-05, %v5051_v29 }
0x1e23   : > { %7722 = vrsqrt.f32 %v5060_v8 }
0x1e24   : > { %7724 = vrsqrt.f32 %v5059_v11 }
0x1e2d   : > { %v7723_v39 = vpop.eup %7722 }
0x1e2e   : > { %v7725_v49 = vpop.eup %7724  ;;  %v5076_v15 = vmul.f32 %v7723_v39, %v9483_v23  ;;  %v5311_v23 = vld [vmem:[%s9655_s11 + $0x28] sm:$0xff] }
0x1e2f   : > { %v5075_v38 = vmul.f32 %v7725_v49, %v9486_v58  ;;  %v5310_v58 = vld [vmem:[%s9655_s11 + $0x20] sm:$0xff] }
0x1e30   : > { %v5088_v17 = vmul.f32 %v9511_v61, %v5076_v15  ;;  %v7059_v22 = vpack.c.bf16 %v5311_v23, %v5310_v58 }
0x1e31   : > { %v5087_v55 = vmul.f32 %v9511_v61, %v5075_v38  ;;  %v7067_v61 = vpack.c.bf16 %v5315_v52, %v5314_v4 }
0x1e32   : > { %v5100_v25 = vadd.f32 %v9513_v60, %v5088_v17  ;;  %7060 = vmatprep.subr.bf16.mxu0 %v7059_v22  ;;  %7085 = vmatprep.subr.bf16.mxu1 %v7059_v22 }
0x1e33   : > { %v5099_v62 = vadd.f32 %v9513_v60, %v5087_v55  ;;  %7062 = vmatpush3.bf16.msra.mxu0 %v7059_v22  ;;  %7093 = vmatpush3.bf16.msra.mxu1 %v7059_v22  ;;  %v7071_v60 = vpack.c.bf16 %v5317_v10, %v5316_v47 }
0x1e35   : > { %5754 = vmatmul.mubr.msk.f32.gmra.mrb[92].mxu1 %vm450_vm0, %v5099_v62 }
0x1e36   : > { %5251 = vmatprep.mubr.f32.mxu1 %v7774_v14  ;;  %v5312_v14 = vld [vmem:[%s9655_s11 + $0x30] sm:$0xff] }
0x1e37   : > { %v7063_v27 = vpack.c.bf16 %v5313_v18, %v5312_v14 }
0x1e39   : > { %5755 = vmatmul.mubr.msk.f32.gmra.mrb[94].mxu1 %vm450_vm0, %v5100_v25  ;;  %7064 = vmatprep.subr.bf16.mxu0 %v7063_v27 }
0x1e3a   : > { %7086 = vmatprep.subr.bf16.mxu1 %v7063_v27  ;;  %7066 = vmatpush3.bf16.msra.mxu0 %v7063_v27 }
0x1e3b   : > { %7094 = vmatpush3.bf16.msra.mxu1 %v7063_v27  ;;  %7068 = vmatprep.subr.bf16.mxu0 %v7067_v61 }
0x1e3c   : > { %7087 = vmatprep.subr.bf16.mxu1 %v7067_v61 }
0x1e3e   : > { %7070 = vmatpush3.bf16.msra.mxu0 %v7067_v61 }
0x1e3f   : > { %7095 = vmatpush3.bf16.msra.mxu1 %v7067_v61  ;;  %7072 = vmatprep.subr.bf16.mxu0 %v7071_v60 }
0x1e40   : > { %7088 = vmatprep.subr.bf16.mxu1 %v7071_v60 }
0x1e42   : > { %7074 = vmatpush3.bf16.msra.mxu0 %v7071_v60 }
0x1e43   : > { %7096 = vmatpush3.bf16.msra.mxu1 %v7071_v60  ;;  %7076 = vmatprep.subr.bf16.mxu0 %v7075_v20 }
0x1e44   : > { %7089 = vmatprep.subr.bf16.mxu1 %v7075_v20 }
0x1e46   : > { %7078 = vmatpush3.bf16.msra.mxu0 %v7075_v20 }
0x1e47   : > { %7097 = vmatpush3.bf16.msra.mxu1 %v7075_v20  ;;  %7080 = vmatprep.subr.bf16.mxu0 %v7079_v63 }
0x1e48   : > { %7090 = vmatprep.subr.bf16.mxu1 %v7079_v63 }
0x1e4a   : > { %7082 = vmatpush3.bf16.msra.mxu0 %v7079_v63 }
0x1e4b   : > { %7098 = vmatpush3.bf16.msra.mxu1 %v7079_v63 }
0x1ed5   : > { %v5211_v26 = vpop.f32.mrb[80].mxu1 }
0x1ed6   : > { %v5213_v1 = vpop.f32.mrb[81].mxu1  ;;  %v5212_v28 = vadd.f32 %v5211_v26, %v9603_v35 }
0x1ed7   : > { %v5214_v45 = vadd.f32 %v5213_v1, %v9595_v3 }
0x1ed9   : > { %v5266_v46 = vmul.f32 0.70710677, %v5214_v45  ;;  %v5217_v36 = vpop.f32.mrb[82].mxu1  ;;  %v5258_v34 = vmul.f32 0.5, %v5214_v45 }
0x1eda   : > { %v5219_v2 = vpop.f32.mrb[83].mxu1  ;;  %v5218_v62 = vadd.f32 %v5217_v36, %v9603_v35 }
0x1edb   : > { %7726 = verf.f32 %v5266_v46  ;;  %v5220_v53 = vadd.f32 %v5219_v2, %v9595_v3 }
0x1edd   : > { %v5267_v31 = vmul.f32 0.70710677, %v5220_v53  ;;  %v5223_v21 = vpop.f32.mrb[84].mxu1  ;;  %v5259_v39 = vmul.f32 0.5, %v5220_v53 }
0x1ede   : > { %v5225_v42 = vpop.f32.mrb[85].mxu1  ;;  %v5224_v27 = vadd.f32 %v5223_v21, %v9603_v35 }
0x1edf   : > { %7728 = verf.f32 %v5267_v31  ;;  %v5226_v33 = vadd.f32 %v5225_v42, %v9595_v3 }
0x1ee1   : > { %v5268_v9 = vmul.f32 0.70710677, %v5226_v33  ;;  %v5229_v41 = vpop.f32.mrb[86].mxu1  ;;  %v5260_v22 = vmul.f32 0.5, %v5226_v33 }
0x1ee2   : > { %v5231_v19 = vpop.f32.mrb[87].mxu1  ;;  %v5230_v60 = vadd.f32 %v5229_v41, %v9603_v35 }
0x1ee3   : > { %7730 = verf.f32 %v5268_v9  ;;  %v5232_v16 = vadd.f32 %v5231_v19, %v9595_v3 }
0x1ee5   : > { %v7727_v32 = vpop.eup %7726  ;;  %v5269_v56 = vmul.f32 0.70710677, %v5232_v16  ;;  %v5261_v61 = vmul.f32 0.5, %v5232_v16 }
0x1ee6   : > { %v5282_v59 = vadd.f32 1.0, %v7727_v32  ;;  %v5235_v12 = vpop.f32.mrb[88].mxu1 }
0x1ee7   : > { %7732 = verf.f32 %v5269_v56  ;;  %v5237_v51 = vpop.f32.mrb[89].mxu1  ;;  %v5236_v63 = vadd.f32 %v5235_v12, %v9603_v35 }
0x1ee8   : > { %v5290_v29 = vmul.f32 %v5282_v59, %v5258_v34  ;;  %v5238_v8 = vadd.f32 %v5237_v51, %v9595_v3 }
0x1ee9   : > { %v7729_v11 = vpop.eup %7728 }
0x1eea   : > { %v5283_v49 = vadd.f32 1.0, %v7729_v11  ;;  %v5270_v38 = vmul.f32 0.70710677, %v5238_v8  ;;  %v5241_v15 = vpop.f32.mrb[90].mxu1  ;;  %v5298_v6 = vmul.f32 %v5290_v29, %v5212_v28  ;;  %v5262_v13 = vmul.f32 0.5, %v5238_v8 }
0x1eeb   : > { %v5243_v55 = vpop.f32.mrb[91].mxu1  ;;  %v5242_v36 = vadd.f32 %v5241_v15, %v9603_v35 }
0x1eec   : > { %v5291_v17 = vmul.f32 %v5283_v49, %v5259_v39  ;;  %7734 = verf.f32 %v5270_v38  ;;  %v5244_v25 = vadd.f32 %v5243_v55, %v9595_v3  ;;  %6675 = vmatprep.mubr.f32.mxu0 %v5298_v6 }
0x1eed   : > { %v7731_v58 = vpop.eup %7730 }
0x1eee   : > { %v5299_v23 = vmul.f32 %v5291_v17, %v5218_v62  ;;  %v5284_v14 = vadd.f32 1.0, %v7731_v58  ;;  %v5271_v18 = vmul.f32 0.70710677, %v5244_v25  ;;  %v5263_v1 = vmul.f32 0.5, %v5244_v25 }
0x1ef0   : > { %v5292_v4 = vmul.f32 %v5284_v14, %v5260_v22  ;;  %7736 = verf.f32 %v5271_v18  ;;  %6676 = vmatmul.mubr.f32.vlgmr.msra.gmra.mrb[88].mxu0 %v5299_v23 }
0x1ef1   : > { %v7733_v52 = vpop.eup %7732 }
0x1ef2   : > { %v5285_v47 = vadd.f32 1.0, %v7733_v52  ;;  %v5300_v10 = vmul.f32 %v5292_v4, %v5224_v27 }
0x1ef4   : > { %v5293_v7 = vmul.f32 %v5285_v47, %v5261_v61  ;;  %6678 = vmatprep.mubr.f32.mxu0 %v5300_v10 }
0x1ef6   : > { %v7735_v50 = vpop.eup %7734  ;;  %v5301_v20 = vmul.f32 %v5293_v7, %v5230_v60 }
0x1ef7   : > { %v5286_v57 = vadd.f32 1.0, %v7735_v50 }
0x1ef8   : > { %6679 = vmatmul.mubr.f32.gmra.mrb[90].mxu0 %v5301_v20 }
0x1ef9   : > { %v5294_v0 = vmul.f32 %v5286_v57, %v5262_v13 }
0x1efa   : > { %v7737_v26 = vpop.eup %7736 }
0x1efb   : > { %v5287_v45 = vadd.f32 1.0, %v7737_v26  ;;  %v5302_v46 = vmul.f32 %v5294_v0, %v5236_v63 }
0x1efd   : > { %v5295_v2 = vmul.f32 %v5287_v45, %v5263_v1  ;;  %6681 = vmatprep.mubr.f32.mxu0 %v5302_v46 }
0x1eff   : > { %v5303_v53 = vmul.f32 %v5295_v2, %v5242_v36 }
0x1f01   : > { %6682 = vmatmul.mubr.f32.gmra.mrb[92].mxu0 %v5303_v53 }
0x1f08   : > { %v5247_v31 = vpop.f32.mrb[92].mxu1 }
0x1f09   : > { %v5249_v21 = vpop.f32.mrb[93].mxu1  ;;  %v5248_v34 = vadd.f32 %v5247_v31, %v9603_v35 }
0x1f0a   : > { %v5250_v42 = vadd.f32 %v5249_v21, %v9595_v3 }
0x1f0c   : > { %v5272_v33 = vmul.f32 0.70710677, %v5250_v42  ;;  %v5253_v9 = vpop.f32.mrb[94].mxu1  ;;  %v5264_v32 = vmul.f32 0.5, %v5250_v42 }
0x1f0d   : > { %v5255_v41 = vpop.f32.mrb[95].mxu1  ;;  %v5254_v8 = vadd.f32 %v5253_v9, %v9603_v35 }
0x1f0e   : > { %7738 = verf.f32 %v5272_v33  ;;  %v5256_v19 = vadd.f32 %v5255_v41, %v9595_v3  ;;  %v5756_v3 = vld [vmem:[%s9656_s12] ss:$0 sm:$0xff] }
0x1f10   : > { %v5273_v16 = vmul.f32 0.70710677, %v5256_v19  ;;  %v5265_v51 = vmul.f32 0.5, %v5256_v19 }
0x1f12   : > { %7740 = verf.f32 %v5273_v16 }
0x1f18   : > { %v7739_v44 = vpop.eup %7738 }
0x1f19   : > { %v5288_v56 = vadd.f32 1.0, %v7739_v44 }
0x1f1b   : > { %v5296_v59 = vmul.f32 %v5288_v56, %v5264_v32 }
0x1f1c   : > { %v7741_v12 = vpop.eup %7740 }
0x1f1d   : > { %v5289_v28 = vadd.f32 1.0, %v7741_v12  ;;  %v5304_v29 = vmul.f32 %v5296_v59, %v5248_v34 }
0x1f1f   : > { %v5297_v11 = vmul.f32 %v5289_v28, %v5265_v51  ;;  %6684 = vmatprep.mubr.f32.mxu1 %v5304_v29 }
0x1f21   : > { %v5305_v39 = vmul.f32 %v5297_v11, %v5254_v8 }
0x1f23   : > { %6685 = vmatmul.mubr.f32.vlgmr.msra.gmra.mrb[96].mxu1 %v5305_v39 }
0x1fc3   : > { %v6677_v49 = vpop.f32.mrb[88].mxu0 }
0x1fc4   : > { %v5401_v38 = vadd.f32 %v6677_v49, %v5756_v3  ;;  %v5395_v15 = vpop.f32.mrb[89].mxu0 }
0x1fc5   : > { %v5396_v6 = vadd.f32 %v5756_v3, %v5395_v15 }
0x1fc6   : > { %v5435_v55 = vadd.f32 %v5401_v38, %v9382_v43 }
0x1fc7   : > { %v5434_v35 = vadd.f32 %v5396_v6, %v9385_v37 }
0x1fc8   : > { %5443 = vst.msk [vmem:[%s440_s18 + $0x8] sm:$0xff] %vm450_vm0, %v5435_v55 }
0x1fc9   : > { %5442 = vst.msk [vmem:[%s440_s18] sm:$0xff] %vm450_vm0, %v5434_v35 }
0x1fcb   : > { %v6680_v62 = vpop.f32.mrb[90].mxu0 }
0x1fcc   : > { %v5411_v17 = vadd.f32 %v6680_v62, %v5756_v3  ;;  %v5405_v25 = vpop.f32.mrb[91].mxu0 }
0x1fcd   : > { %v5406_v58 = vadd.f32 %v5756_v3, %v5405_v25 }
0x1fce   : > { %v5437_v23 = vadd.f32 %v5411_v17, %v9395_v30 }
0x1fcf   : > { %v5436_v22 = vadd.f32 %v5406_v58, %v9392_v54 }
0x1fd0   : > { %5445 = vst.msk [vmem:[%s440_s18 + $0x18] sm:$0xff] %vm450_vm0, %v5437_v23 }
0x1fd1   : > { %5444 = vst.msk [vmem:[%s440_s18 + $0x10] sm:$0xff] %vm450_vm0, %v5436_v22 }
0x1fd4   : > { %v6683_v14 = vpop.f32.mrb[92].mxu0 }
0x1fd5   : > { %v5421_v43 = vadd.f32 %v6683_v14, %v5756_v3  ;;  %v5415_v18 = vpop.f32.mrb[93].mxu0 }
0x1fd6   : > { %v5416_v37 = vadd.f32 %v5756_v3, %v5415_v18 }
0x1fd7   : > { %v5439_v27 = vadd.f32 %v5421_v43, %v9402_v24 }
0x1fd8   : > { %v5438_v4 = vadd.f32 %v5416_v37, %v9405_v5 }
0x1fd9   : > { %5447 = vst.msk [vmem:[%s440_s18 + $0x28] sm:$0xff] %vm450_vm0, %v5439_v27 }
0x1fda   : > { %5446 = vst.msk [vmem:[%s440_s18 + $0x20] sm:$0xff] %vm450_vm0, %v5438_v4 }
0x1ff6   : > { %v6686_v52 = vpop.f32.mrb[96].mxu1 }
0x1ff7   : > { %v5431_v30 = vadd.f32 %v6686_v52, %v5756_v3  ;;  %v5425_v61 = vpop.f32.mrb[97].mxu1 }
0x1ff8   : > { %v5426_v54 = vadd.f32 %v5756_v3, %v5425_v61 }
0x1ff9   : > { %v5441_v47 = vadd.f32 %v5431_v30, %v9412_v40 }
0x1ffa   : > { %v5440_v10 = vadd.f32 %v5426_v54, %v9415_v48 }
0x1ffb   : > { %5449 = vst.msk [vmem:[%s440_s18 + $0x38] sm:$0xff] %vm450_vm0, %v5441_v47 }
0x1ffc   : > { %5448 = vst.msk [vmem:[%s440_s18 + $0x30] sm:$0xff] %vm450_vm0, %v5440_v10 }
0x1ffd PF: > { %s23_s25 = sadd.s32 1, %s7758_s25  }
0x1ffe   : > { %p20_p4 = scmp.ge.s32.totalorder %s23_s25, 4  }
0x2000   :  { %22 = sbr.rel (!%p20_p4) target bundleno = 1 (0x1), region = 102 }

</bundles_post_ra>
